<compile_context>
chip_gen: v6e
topology: v6e:2x2x1
jax: 0.10.0
libtpu: 0.0.40
codegen_flags: <defaults>
</compile_context>

<pallas_src>
import functools
import math

import jax
import jax.numpy as jnp
from jax import lax
from jax.experimental import pallas as pl
from jax.experimental.pallas import tpu as pltpu

_VMEM_LIMIT = 32 * 1024 * 1024  # explicit scoped-VMEM budget (safe on v5e/v6e/v7x)


# ----------------------------- tiling helpers -------------------------------

def _pick_tile(dim, preferred, align):
    """Largest tile <= preferred that divides `dim` and is a multiple of `align`;
    falls back to the full axis (which always satisfies the (8,128) rule)."""
    if dim <= preferred:
        return dim
    t = (preferred // align) * align
    while t >= align:
        if dim % t == 0:
            return t
        t -= align
    return dim


def _pick_head_block(num_heads, head_dim):
    """Smallest head-group size hblk such that hblk*head_dim is a multiple of
    128 (lane-dense blocks on the fused QKV layout) and hblk divides num_heads.
    Returns None if no such grouping exists."""
    base = 128 // math.gcd(head_dim, 128)
    hblk = base
    while hblk <= num_heads:
        if num_heads % hblk == 0:
            return hblk
        hblk += base
    return None


# ------------------------------ linear (matmul) ------------------------------

def _linear_kernel(x_ref, w_ref, b_ref, o_ref, acc_ref):
    k = pl.program_id(2)

    @pl.when(k == 0)
    def _():
        acc_ref[...] = jnp.zeros_like(acc_ref)

    acc_ref[...] += jnp.dot(x_ref[...], w_ref[...],
                            preferred_element_type=jnp.float32)

    @pl.when(k == pl.num_programs(2) - 1)
    def _():
        o_ref[...] = (acc_ref[...] + b_ref[...].astype(jnp.float32)
                      ).astype(o_ref.dtype)


def linear(x2d, w, b, *, tm=256, tn=256, tk=512):
    """x2d: (M, K); w: (Nout, K) [nn.Linear]; b: (Nout,) -> (M, Nout)."""
    M, K = x2d.shape
    Nout = w.shape[0]
    wt = w.T                       # (K, Nout)
    b2 = b.reshape(1, Nout)

    bm = _pick_tile(M, tm, 8)
    bn = _pick_tile(Nout, tn, 128)
    bk = _pick_tile(K, tk, 128)
    grid = (M // bm, Nout // bn, K // bk)

    itemsize = x2d.dtype.itemsize
    cost = pl.CostEstimate(
        flops=2 * M * K * Nout,
        transcendentals=0,
        bytes_accessed=(M * K + K * Nout + M * Nout) * itemsize)

    return pl.pallas_call(
        _linear_kernel,
        out_shape=jax.ShapeDtypeStruct((M, Nout), x2d.dtype),
        grid=grid,
        in_specs=[
            pl.BlockSpec((bm, bk), lambda i, j, k: (i, k)),
            pl.BlockSpec((bk, bn), lambda i, j, k: (k, j)),
            pl.BlockSpec((1, bn), lambda i, j, k: (0, j)),
        ],
        out_specs=pl.BlockSpec((bm, bn), lambda i, j, k: (i, j)),
        scratch_shapes=[pltpu.VMEM((bm, bn), jnp.float32)],
        compiler_params=pltpu.CompilerParams(
            dimension_semantics=("parallel", "parallel", "arbitrary"),
            vmem_limit_bytes=_VMEM_LIMIT),
        cost_estimate=cost,
    )(x2d, wt, b2)


# ---------------- flash attention on the fused (B, N, 3C) QKV ----------------

def _flash_qkv_kernel(q_ref, k_ref, v_ref, o_ref, m_sc, l_sc, acc_sc,
                      *, scale, hblk, head_dim):
    ki = pl.program_id(3)

    @pl.when(ki == 0)
    def _():
        m_sc[...] = jnp.full_like(m_sc, -jnp.inf)
        l_sc[...] = jnp.zeros_like(l_sc)
        acc_sc[...] = jnp.zeros_like(acc_sc)

    # Fold 1/sqrt(d) into q once per step: bq*W multiplies instead of bq*bkv.
    qs = q_ref[0] * jnp.array(scale, dtype=q_ref.dtype)   # (bq,  hblk*d)
    kb = k_ref[0]                                          # (bkv, hblk*d)
    vb = v_ref[0]                                          # (bkv, hblk*d)

    for h in range(hblk):                    # static unroll over the head group
        lo, hi = h * head_dim, (h + 1) * head_dim
        qh = qs[:, lo:hi]                                  # (bq,  d)
        kh = kb[:, lo:hi]                                  # (bkv, d)
        vh = vb[:, lo:hi]                                  # (bkv, d)

        # Contract over d directly (no explicit k.T).
        s = lax.dot_general(qh, kh, (((1,), (1,)), ((), ())),
                            preferred_element_type=jnp.float32)   # (bq, bkv)

        m_prev = m_sc[h]                                   # (bq, 1)
        m_new = jnp.maximum(m_prev, jnp.max(s, axis=-1, keepdims=True))
        alpha = jnp.exp(m_prev - m_new)
        p = jnp.exp(s - m_new)

        l_sc[h] = alpha * l_sc[h] + jnp.sum(p, axis=-1, keepdims=True)
        # Keep the PV matmul inputs in the model dtype (no f32 upcast of V).
        acc_sc[h] = alpha * acc_sc[h] + jnp.dot(
            p.astype(vh.dtype), vh, preferred_element_type=jnp.float32)
        m_sc[h] = m_new

    @pl.when(ki == pl.num_programs(3) - 1)
    def _():
        for h in range(hblk):
            l = l_sc[h]
            inv = pl.reciprocal(l, approx=True)    # EUP slot (cheap)
            inv = inv * (2.0 - l * inv)            # one Newton step -> ~f32 exact
            o_ref[0, :, h * head_dim:(h + 1) * head_dim] = (
                acc_sc[h] * inv).astype(o_ref.dtype)


def flash_attention_qkv(qkv, num_heads, head_dim, *, tq=256, tkv=512):
    """qkv: (B, N, 3C) with columns [q | k | v], each head-major (torch layout).
    Returns the attention output head-concatenated: (B, N, C)."""
    B, N, threeC = qkv.shape
    C = threeC // 3
    assert C == num_heads * head_dim

    hblk = _pick_head_block(num_heads, head_dim)
    if hblk is None:
        # TODO(synk): general fallback (materialize (B,H,N,d) q/k/v) for head
        # configs where no head group yields a 128-lane-aligned column block.
        raise NotImplementedError("num_heads/head_dim not 128-lane tileable")
    G = num_heads // hblk
    W = hblk * head_dim                       # lane-dense block width (%128 == 0)

    bq = _pick_tile(N, tq, 8)
    bkv = _pick_tile(N, tkv, 128)
    grid = (B, G, N // bq, N // bkv)
    scale = 1.0 / math.sqrt(head_dim)

    itemsize = qkv.dtype.itemsize
    cost = pl.CostEstimate(
        flops=4 * B * num_heads * N * N * head_dim,
        transcendentals=B * num_heads * N * N,
        bytes_accessed=(3 * B * N * C + B * N * C) * itemsize)

    kernel = functools.partial(_flash_qkv_kernel, scale=scale, hblk=hblk,
                               head_dim=head_dim)
    return pl.pallas_call(
        kernel,
        out_shape=jax.ShapeDtypeStruct((B, N, C), qkv.dtype),
        grid=grid,
        in_specs=[
            # q columns:  blocks [0, G) of the 3C axis (head group g)
            pl.BlockSpec((1, bq, W), lambda b, g, qi, ki: (b, qi, g)),
            # k columns:  blocks [G, 2G)
            pl.BlockSpec((1, bkv, W), lambda b, g, qi, ki: (b, ki, G + g)),
            # v columns:  blocks [2G, 3G)
            pl.BlockSpec((1, bkv, W), lambda b, g, qi, ki: (b, ki, 2 * G + g)),
        ],
        out_specs=pl.BlockSpec((1, bq, W), lambda b, g, qi, ki: (b, qi, g)),
        scratch_shapes=[
            pltpu.VMEM((hblk, bq, 1), jnp.float32),         # running max
            pltpu.VMEM((hblk, bq, 1), jnp.float32),         # running sum
            pltpu.VMEM((hblk, bq, head_dim), jnp.float32),  # running output acc
        ],
        compiler_params=pltpu.CompilerParams(
            dimension_semantics=("parallel", "parallel", "parallel", "arbitrary"),
            vmem_limit_bytes=_VMEM_LIMIT),
        cost_estimate=cost,
    )(qkv, qkv, qkv)


# ------------------------------ full forward ---------------------------------

def attention_forward(x, qkv_w, qkv_b, proj_w, proj_b, num_heads,
                      *, tm=256, tn=256, tk=512, tq=256, tkv=512):
    """Pallas equivalent of Attention.forward. x: (B, N, C)."""
    B, N, C = x.shape
    assert C % num_heads == 0
    head_dim = C // num_heads

    # 1) Fused QKV projection (tiled MXU matmul with K-accumulation).
    qkv = linear(x.reshape(B * N, C), qkv_w, qkv_b, tm=tm, tn=tn, tk=tk)
    qkv = qkv.reshape(B, N, 3 * C)          # free reshape, no HBM round trip

    # 2) Flash attention reading q/k/v straight out of the fused QKV layout
    #    (no (2,0,3,1,4) transpose); output lands directly in (B, N, C).
    attn = flash_attention_qkv(qkv, num_heads, head_dim, tq=tq, tkv=tkv)

    # 3) Output projection: plain lane-dense matmul over the merged heads.
    out = linear(attn.reshape(B * N, C), proj_w, proj_b, tm=tm, tn=tn, tk=tk)
    return out.reshape(B, N, C)


# --------------------------- reference (pure JAX) ----------------------------

def attention_reference(x, qkv_w, qkv_b, proj_w, proj_b, num_heads):
    B, N, C = x.shape
    hd = C // num_heads
    qkv = x @ qkv_w.T + qkv_b
    qkv = qkv.reshape(B, N, 3, num_heads, hd).transpose(2, 0, 3, 1, 4)
    q, k, v = qkv[0], qkv[1], qkv[2]
    s = jnp.einsum("bhqd,bhkd->bhqk", q, k) / math.sqrt(hd)
    p = jax.nn.softmax(s, axis=-1)
    o = jnp.einsum("bhqk,bhkd->bhqd", p, v)
    o = o.transpose(0, 2, 1, 3).reshape(B, N, C)
    return o @ proj_w.T + proj_b


# --------------------------------- main ---------------------------------------

if __name__ == "__main__":
    # Small but multi-tile shapes (exercise K-accumulation, KV streaming, head
    # groups and the online softmax): B=2, seq=256, heads=8, head_dim=32 -> C=256.
    B, N, num_heads, head_dim = 2, 256, 8, 32
    C = num_heads * head_dim

    key = jax.random.PRNGKey(0)
    kx, kqw, kqb, kpw, kpb = jax.random.split(key, 5)

    x = jax.random.normal(kx, (B, N, C), dtype=jnp.float32)
    qkv_w = jax.random.normal(kqw, (3 * C, C), dtype=jnp.float32) * 0.05
    qkv_b = jax.random.normal(kqb, (3 * C,), dtype=jnp.float32) * 0.05
    proj_w = jax.random.normal(kpw, (C, C), dtype=jnp.float32) * 0.05
    proj_b = jax.random.normal(kpb, (C,), dtype=jnp.float32) * 0.05

    fwd = jax.jit(functools.partial(
        attention_forward, num_heads=num_heads,
        tm=128, tn=128, tk=128, tq=128, tkv=128))   # small tiles -> multi-step grids

    out = jax.block_until_ready(fwd(x, qkv_w, qkv_b, proj_w, proj_b))

    ref = attention_reference(x, qkv_w, qkv_b, proj_w, proj_b, num_heads)
    assert out.shape == (B, N, C)
    assert jnp.allclose(out, ref, atol=1e-3, rtol=1e-3), "mismatch vs reference"

    print("KERNEL_OK")
</pallas_src>

<mosaic_0001>
module attributes {stable_mosaic.version = 11 : i64} {
  func.func @_flash_qkv_kernel(%arg0: i32, %arg1: i32, %arg2: i32, %arg3: i32, %arg4: memref<1x128x128xf32, #tpu.memory_space<vmem>>, %arg5: memref<1x128x128xf32, #tpu.memory_space<vmem>>, %arg6: memref<1x128x128xf32, #tpu.memory_space<vmem>>, %arg7: memref<1x128x128xf32, #tpu.memory_space<vmem>>, %arg8: memref<4x128x1xf32, #tpu.memory_space<vmem>>, %arg9: memref<4x128x1xf32, #tpu.memory_space<vmem>>, %arg10: memref<4x128x32xf32, #tpu.memory_space<vmem>>) attributes {dimension_semantics = [#tpu.dimension_semantics<parallel>, #tpu.dimension_semantics<parallel>, #tpu.dimension_semantics<parallel>, #tpu.dimension_semantics<arbitrary>], iteration_bounds = array<i64: 2, 2, 2, 2>, scalar_prefetch = 0 : i64, scratch_operands = 3 : i64, tpu.core_type = #tpu.core_type<tc>, window_params = [{transform_indices = @transform_0, window_bounds = array<i64: 1, 128, 128>}, {transform_indices = @transform_1, window_bounds = array<i64: 1, 128, 128>}, {transform_indices = @transform_2, window_bounds = array<i64: 1, 128, 128>}, {transform_indices = @transform_3, window_bounds = array<i64: 1, 128, 128>}]} {
    %c0_i32 = arith.constant 0 : i32
    %0 = arith.cmpi eq, %arg3, %c0_i32 : i32
    %1 = arith.extui %0 : i1 to i32
    %c0_i32_0 = arith.constant 0 : i32
    %2 = arith.cmpi ne, %1, %c0_i32_0 : i32
    scf.if %2 {
      %cst_95 = arith.constant 0xFF800000 : f32
      %154 = vector.broadcast %cst_95 : f32 to vector<4x128x1xf32>
      %c0_96 = arith.constant 0 : index
      %c0_97 = arith.constant 0 : index
      %c0_98 = arith.constant 0 : index
      %155 = vector.load %arg8[%c0_96, %c0_97, %c0_98] : memref<4x128x1xf32, #tpu.memory_space<vmem>>, vector<4x128x1xf32>
      tpu.vector_store %arg8[%c0_96, %c0_97, %c0_98], %154 {strides = array<i32>} : memref<4x128x1xf32, #tpu.memory_space<vmem>>, vector<4x128x1xf32>,
      %cst_99 = arith.constant 0.000000e+00 : f32
      %156 = vector.broadcast %cst_99 : f32 to vector<4x128x1xf32>
      %c0_100 = arith.constant 0 : index
      %c0_101 = arith.constant 0 : index
      %c0_102 = arith.constant 0 : index
      %157 = vector.load %arg9[%c0_100, %c0_101, %c0_102] : memref<4x128x1xf32, #tpu.memory_space<vmem>>, vector<4x128x1xf32>
      tpu.vector_store %arg9[%c0_100, %c0_101, %c0_102], %156 {strides = array<i32>} : memref<4x128x1xf32, #tpu.memory_space<vmem>>, vector<4x128x1xf32>,
      %cst_103 = arith.constant 0.000000e+00 : f32
      %158 = vector.broadcast %cst_103 : f32 to vector<4x128x32xf32>
      %c0_104 = arith.constant 0 : index
      %c0_105 = arith.constant 0 : index
      %c0_106 = arith.constant 0 : index
      %159 = vector.load %arg10[%c0_104, %c0_105, %c0_106] : memref<4x128x32xf32, #tpu.memory_space<vmem>>, vector<4x128x32xf32>
      tpu.vector_store %arg10[%c0_104, %c0_105, %c0_106], %158 {strides = array<i32>} : memref<4x128x32xf32, #tpu.memory_space<vmem>>, vector<4x128x32xf32>,
    } else {
    }
    %c0 = arith.constant 0 : index
    %c0_1 = arith.constant 0 : index
    %c0_2 = arith.constant 0 : index
    %3 = vector.load %arg4[%c0, %c0_1, %c0_2] : memref<1x128x128xf32, #tpu.memory_space<vmem>>, vector<1x128x128xf32>
    %4 = vector.shape_cast %3 : vector<1x128x128xf32> to vector<128x128xf32>
    %cst = arith.constant 0.176776692 : f32
    %5 = vector.broadcast %cst : f32 to vector<128x128xf32>
    %6 = arith.mulf %4, %5 : vector<128x128xf32>
    %c0_3 = arith.constant 0 : index
    %c0_4 = arith.constant 0 : index
    %c0_5 = arith.constant 0 : index
    %7 = vector.load %arg5[%c0_3, %c0_4, %c0_5] : memref<1x128x128xf32, #tpu.memory_space<vmem>>, vector<1x128x128xf32>
    %8 = vector.shape_cast %7 : vector<1x128x128xf32> to vector<128x128xf32>
    %c0_6 = arith.constant 0 : index
    %c0_7 = arith.constant 0 : index
    %c0_8 = arith.constant 0 : index
    %9 = vector.load %arg6[%c0_6, %c0_7, %c0_8] : memref<1x128x128xf32, #tpu.memory_space<vmem>>, vector<1x128x128xf32>
    %10 = vector.shape_cast %9 : vector<1x128x128xf32> to vector<128x128xf32>
    %11 = vector.extract_strided_slice %6 {offsets = [0, 0], sizes = [128, 32], strides = [1, 1]} : vector<128x128xf32> to vector<128x32xf32>
    %12 = vector.extract_strided_slice %8 {offsets = [0, 0], sizes = [128, 32], strides = [1, 1]} : vector<128x128xf32> to vector<128x32xf32>
    %13 = vector.extract_strided_slice %10 {offsets = [0, 0], sizes = [128, 32], strides = [1, 1]} : vector<128x128xf32> to vector<128x32xf32>
    %cst_9 = arith.constant dense<0.000000e+00> : vector<128x128xf32>
    %14 = tpu.matmul %11, %12, %cst_9 {dimension_numbers = #tpu.dot_dimension_numbers<[1], [1], [0], [0], [0, 0, 1, 0], [], []>} : vector<128x32xf32>, vector<128x32xf32>, vector<128x128xf32> -> vector<128x128xf32>
    %c0_10 = arith.constant 0 : index
    %c0_11 = arith.constant 0 : index
    %c0_12 = arith.constant 0 : index
    %15 = vector.load %arg8[%c0_10, %c0_11, %c0_12] : memref<4x128x1xf32, #tpu.memory_space<vmem>>, vector<1x128x1xf32>
    %16 = vector.shape_cast %15 : vector<1x128x1xf32> to vector<128x1xf32>
    %cst_13 = arith.constant dense<0xFF800000> : vector<128xf32>
    %17 = vector.multi_reduction <maximumf>, %14, %cst_13 [1] : vector<128x128xf32> to vector<128xf32>
    %18 = vector.shape_cast %17 : vector<128xf32> to vector<128x1xf32>
    %19 = arith.maximumf %16, %18 : vector<128x1xf32>
    %20 = arith.subf %16, %19 : vector<128x1xf32>
    %21 = math.exp %20 : vector<128x1xf32>
    %22 = vector.broadcast %19 : vector<128x1xf32> to vector<128x128xf32>
    %23 = arith.subf %14, %22 : vector<128x128xf32>
    %24 = math.exp %23 : vector<128x128xf32>
    %c0_14 = arith.constant 0 : index
    %c0_15 = arith.constant 0 : index
    %c0_16 = arith.constant 0 : index
    %25 = vector.load %arg9[%c0_14, %c0_15, %c0_16] : memref<4x128x1xf32, #tpu.memory_space<vmem>>, vector<1x128x1xf32>
    %26 = vector.shape_cast %25 : vector<1x128x1xf32> to vector<128x1xf32>
    %27 = arith.mulf %21, %26 : vector<128x1xf32>
    %cst_17 = arith.constant dense<0.000000e+00> : vector<128xf32>
    %28 = vector.multi_reduction <add>, %24, %cst_17 [1] : vector<128x128xf32> to vector<128xf32>
    %29 = vector.shape_cast %28 : vector<128xf32> to vector<128x1xf32>
    %30 = arith.addf %27, %29 : vector<128x1xf32>
    %c0_18 = arith.constant 0 : index
    %c0_19 = arith.constant 0 : index
    %c0_20 = arith.constant 0 : index
    %31 = vector.load %arg9[%c0_18, %c0_19, %c0_20] : memref<4x128x1xf32, #tpu.memory_space<vmem>>, vector<1x128x1xf32>
    %32 = vector.shape_cast %31 : vector<1x128x1xf32> to vector<128x1xf32>
    %33 = vector.shape_cast %30 : vector<128x1xf32> to vector<1x128x1xf32>
    tpu.vector_store %arg9[%c0_18, %c0_19, %c0_20], %33 {strides = array<i32>} : memref<4x128x1xf32, #tpu.memory_space<vmem>>, vector<1x128x1xf32>,
    %c0_21 = arith.constant 0 : index
    %c0_22 = arith.constant 0 : index
    %c0_23 = arith.constant 0 : index
    %34 = vector.load %arg10[%c0_21, %c0_22, %c0_23] : memref<4x128x32xf32, #tpu.memory_space<vmem>>, vector<1x128x32xf32>
    %35 = vector.shape_cast %34 : vector<1x128x32xf32> to vector<128x32xf32>
    %36 = vector.broadcast %21 : vector<128x1xf32> to vector<128x32xf32>
    %37 = arith.mulf %36, %35 : vector<128x32xf32>
    %cst_24 = arith.constant dense<0.000000e+00> : vector<128x32xf32>
    %38 = tpu.matmul %24, %13, %cst_24 {dimension_numbers = #tpu.dot_dimension_numbers<[1], [0], [0], [1], [0, 0, 1, 1], [], []>} : vector<128x128xf32>, vector<128x32xf32>, vector<128x32xf32> -> vector<128x32xf32>
    %39 = arith.addf %37, %38 : vector<128x32xf32>
    %c0_25 = arith.constant 0 : index
    %c0_26 = arith.constant 0 : index
    %c0_27 = arith.constant 0 : index
    %40 = vector.load %arg10[%c0_25, %c0_26, %c0_27] : memref<4x128x32xf32, #tpu.memory_space<vmem>>, vector<1x128x32xf32>
    %41 = vector.shape_cast %40 : vector<1x128x32xf32> to vector<128x32xf32>
    %42 = vector.shape_cast %39 : vector<128x32xf32> to vector<1x128x32xf32>
    tpu.vector_store %arg10[%c0_25, %c0_26, %c0_27], %42 {strides = array<i32>} : memref<4x128x32xf32, #tpu.memory_space<vmem>>, vector<1x128x32xf32>,
    %c0_28 = arith.constant 0 : index
    %c0_29 = arith.constant 0 : index
    %c0_30 = arith.constant 0 : index
    %43 = vector.load %arg8[%c0_28, %c0_29, %c0_30] : memref<4x128x1xf32, #tpu.memory_space<vmem>>, vector<1x128x1xf32>
    %44 = vector.shape_cast %43 : vector<1x128x1xf32> to vector<128x1xf32>
    %45 = vector.shape_cast %19 : vector<128x1xf32> to vector<1x128x1xf32>
    tpu.vector_store %arg8[%c0_28, %c0_29, %c0_30], %45 {strides = array<i32>} : memref<4x128x1xf32, #tpu.memory_space<vmem>>, vector<1x128x1xf32>,
    %46 = vector.extract_strided_slice %6 {offsets = [0, 32], sizes = [128, 32], strides = [1, 1]} : vector<128x128xf32> to vector<128x32xf32>
    %47 = vector.extract_strided_slice %8 {offsets = [0, 32], sizes = [128, 32], strides = [1, 1]} : vector<128x128xf32> to vector<128x32xf32>
    %48 = vector.extract_strided_slice %10 {offsets = [0, 32], sizes = [128, 32], strides = [1, 1]} : vector<128x128xf32> to vector<128x32xf32>
    %cst_31 = arith.constant dense<0.000000e+00> : vector<128x128xf32>
    %49 = tpu.matmul %46, %47, %cst_31 {dimension_numbers = #tpu.dot_dimension_numbers<[1], [1], [0], [0], [0, 0, 1, 0], [], []>} : vector<128x32xf32>, vector<128x32xf32>, vector<128x128xf32> -> vector<128x128xf32>
    %c1 = arith.constant 1 : index
    %c0_32 = arith.constant 0 : index
    %c0_33 = arith.constant 0 : index
    %50 = vector.load %arg8[%c1, %c0_32, %c0_33] : memref<4x128x1xf32, #tpu.memory_space<vmem>>, vector<1x128x1xf32>
    %51 = vector.shape_cast %50 : vector<1x128x1xf32> to vector<128x1xf32>
    %cst_34 = arith.constant dense<0xFF800000> : vector<128xf32>
    %52 = vector.multi_reduction <maximumf>, %49, %cst_34 [1] : vector<128x128xf32> to vector<128xf32>
    %53 = vector.shape_cast %52 : vector<128xf32> to vector<128x1xf32>
    %54 = arith.maximumf %51, %53 : vector<128x1xf32>
    %55 = arith.subf %51, %54 : vector<128x1xf32>
    %56 = math.exp %55 : vector<128x1xf32>
    %57 = vector.broadcast %54 : vector<128x1xf32> to vector<128x128xf32>
    %58 = arith.subf %49, %57 : vector<128x128xf32>
    %59 = math.exp %58 : vector<128x128xf32>
    %c1_35 = arith.constant 1 : index
    %c0_36 = arith.constant 0 : index
    %c0_37 = arith.constant 0 : index
    %60 = vector.load %arg9[%c1_35, %c0_36, %c0_37] : memref<4x128x1xf32, #tpu.memory_space<vmem>>, vector<1x128x1xf32>
    %61 = vector.shape_cast %60 : vector<1x128x1xf32> to vector<128x1xf32>
    %62 = arith.mulf %56, %61 : vector<128x1xf32>
    %cst_38 = arith.constant dense<0.000000e+00> : vector<128xf32>
    %63 = vector.multi_reduction <add>, %59, %cst_38 [1] : vector<128x128xf32> to vector<128xf32>
    %64 = vector.shape_cast %63 : vector<128xf32> to vector<128x1xf32>
    %65 = arith.addf %62, %64 : vector<128x1xf32>
    %c1_39 = arith.constant 1 : index
    %c0_40 = arith.constant 0 : index
    %c0_41 = arith.constant 0 : index
    %66 = vector.load %arg9[%c1_39, %c0_40, %c0_41] : memref<4x128x1xf32, #tpu.memory_space<vmem>>, vector<1x128x1xf32>
    %67 = vector.shape_cast %66 : vector<1x128x1xf32> to vector<128x1xf32>
    %68 = vector.shape_cast %65 : vector<128x1xf32> to vector<1x128x1xf32>
    tpu.vector_store %arg9[%c1_39, %c0_40, %c0_41], %68 {strides = array<i32>} : memref<4x128x1xf32, #tpu.memory_space<vmem>>, vector<1x128x1xf32>,
    %c1_42 = arith.constant 1 : index
    %c0_43 = arith.constant 0 : index
    %c0_44 = arith.constant 0 : index
    %69 = vector.load %arg10[%c1_42, %c0_43, %c0_44] : memref<4x128x32xf32, #tpu.memory_space<vmem>>, vector<1x128x32xf32>
    %70 = vector.shape_cast %69 : vector<1x128x32xf32> to vector<128x32xf32>
    %71 = vector.broadcast %56 : vector<128x1xf32> to vector<128x32xf32>
    %72 = arith.mulf %71, %70 : vector<128x32xf32>
    %cst_45 = arith.constant dense<0.000000e+00> : vector<128x32xf32>
    %73 = tpu.matmul %59, %48, %cst_45 {dimension_numbers = #tpu.dot_dimension_numbers<[1], [0], [0], [1], [0, 0, 1, 1], [], []>} : vector<128x128xf32>, vector<128x32xf32>, vector<128x32xf32> -> vector<128x32xf32>
    %74 = arith.addf %72, %73 : vector<128x32xf32>
    %c1_46 = arith.constant 1 : index
    %c0_47 = arith.constant 0 : index
    %c0_48 = arith.constant 0 : index
    %75 = vector.load %arg10[%c1_46, %c0_47, %c0_48] : memref<4x128x32xf32, #tpu.memory_space<vmem>>, vector<1x128x32xf32>
    %76 = vector.shape_cast %75 : vector<1x128x32xf32> to vector<128x32xf32>
    %77 = vector.shape_cast %74 : vector<128x32xf32> to vector<1x128x32xf32>
    tpu.vector_store %arg10[%c1_46, %c0_47, %c0_48], %77 {strides = array<i32>} : memref<4x128x32xf32, #tpu.memory_space<vmem>>, vector<1x128x32xf32>,
    %c1_49 = arith.constant 1 : index
    %c0_50 = arith.constant 0 : index
    %c0_51 = arith.constant 0 : index
    %78 = vector.load %arg8[%c1_49, %c0_50, %c0_51] : memref<4x128x1xf32, #tpu.memory_space<vmem>>, vector<1x128x1xf32>
    %79 = vector.shape_cast %78 : vector<1x128x1xf32> to vector<128x1xf32>
    %80 = vector.shape_cast %54 : vector<128x1xf32> to vector<1x128x1xf32>
    tpu.vector_store %arg8[%c1_49, %c0_50, %c0_51], %80 {strides = array<i32>} : memref<4x128x1xf32, #tpu.memory_space<vmem>>, vector<1x128x1xf32>,
    %81 = vector.extract_strided_slice %6 {offsets = [0, 64], sizes = [128, 32], strides = [1, 1]} : vector<128x128xf32> to vector<128x32xf32>
    %82 = vector.extract_strided_slice %8 {offsets = [0, 64], sizes = [128, 32], strides = [1, 1]} : vector<128x128xf32> to vector<128x32xf32>
    %83 = vector.extract_strided_slice %10 {offsets = [0, 64], sizes = [128, 32], strides = [1, 1]} : vector<128x128xf32> to vector<128x32xf32>
    %cst_52 = arith.constant dense<0.000000e+00> : vector<128x128xf32>
    %84 = tpu.matmul %81, %82, %cst_52 {dimension_numbers = #tpu.dot_dimension_numbers<[1], [1], [0], [0], [0, 0, 1, 0], [], []>} : vector<128x32xf32>, vector<128x32xf32>, vector<128x128xf32> -> vector<128x128xf32>
    %c2 = arith.constant 2 : index
    %c0_53 = arith.constant 0 : index
    %c0_54 = arith.constant 0 : index
    %85 = vector.load %arg8[%c2, %c0_53, %c0_54] : memref<4x128x1xf32, #tpu.memory_space<vmem>>, vector<1x128x1xf32>
    %86 = vector.shape_cast %85 : vector<1x128x1xf32> to vector<128x1xf32>
    %cst_55 = arith.constant dense<0xFF800000> : vector<128xf32>
    %87 = vector.multi_reduction <maximumf>, %84, %cst_55 [1] : vector<128x128xf32> to vector<128xf32>
    %88 = vector.shape_cast %87 : vector<128xf32> to vector<128x1xf32>
    %89 = arith.maximumf %86, %88 : vector<128x1xf32>
    %90 = arith.subf %86, %89 : vector<128x1xf32>
    %91 = math.exp %90 : vector<128x1xf32>
    %92 = vector.broadcast %89 : vector<128x1xf32> to vector<128x128xf32>
    %93 = arith.subf %84, %92 : vector<128x128xf32>
    %94 = math.exp %93 : vector<128x128xf32>
    %c2_56 = arith.constant 2 : index
    %c0_57 = arith.constant 0 : index
    %c0_58 = arith.constant 0 : index
    %95 = vector.load %arg9[%c2_56, %c0_57, %c0_58] : memref<4x128x1xf32, #tpu.memory_space<vmem>>, vector<1x128x1xf32>
    %96 = vector.shape_cast %95 : vector<1x128x1xf32> to vector<128x1xf32>
    %97 = arith.mulf %91, %96 : vector<128x1xf32>
    %cst_59 = arith.constant dense<0.000000e+00> : vector<128xf32>
    %98 = vector.multi_reduction <add>, %94, %cst_59 [1] : vector<128x128xf32> to vector<128xf32>
    %99 = vector.shape_cast %98 : vector<128xf32> to vector<128x1xf32>
    %100 = arith.addf %97, %99 : vector<128x1xf32>
    %c2_60 = arith.constant 2 : index
    %c0_61 = arith.constant 0 : index
    %c0_62 = arith.constant 0 : index
    %101 = vector.load %arg9[%c2_60, %c0_61, %c0_62] : memref<4x128x1xf32, #tpu.memory_space<vmem>>, vector<1x128x1xf32>
    %102 = vector.shape_cast %101 : vector<1x128x1xf32> to vector<128x1xf32>
    %103 = vector.shape_cast %100 : vector<128x1xf32> to vector<1x128x1xf32>
    tpu.vector_store %arg9[%c2_60, %c0_61, %c0_62], %103 {strides = array<i32>} : memref<4x128x1xf32, #tpu.memory_space<vmem>>, vector<1x128x1xf32>,
    %c2_63 = arith.constant 2 : index
    %c0_64 = arith.constant 0 : index
    %c0_65 = arith.constant 0 : index
    %104 = vector.load %arg10[%c2_63, %c0_64, %c0_65] : memref<4x128x32xf32, #tpu.memory_space<vmem>>, vector<1x128x32xf32>
    %105 = vector.shape_cast %104 : vector<1x128x32xf32> to vector<128x32xf32>
    %106 = vector.broadcast %91 : vector<128x1xf32> to vector<128x32xf32>
    %107 = arith.mulf %106, %105 : vector<128x32xf32>
    %cst_66 = arith.constant dense<0.000000e+00> : vector<128x32xf32>
    %108 = tpu.matmul %94, %83, %cst_66 {dimension_numbers = #tpu.dot_dimension_numbers<[1], [0], [0], [1], [0, 0, 1, 1], [], []>} : vector<128x128xf32>, vector<128x32xf32>, vector<128x32xf32> -> vector<128x32xf32>
    %109 = arith.addf %107, %108 : vector<128x32xf32>
    %c2_67 = arith.constant 2 : index
    %c0_68 = arith.constant 0 : index
    %c0_69 = arith.constant 0 : index
    %110 = vector.load %arg10[%c2_67, %c0_68, %c0_69] : memref<4x128x32xf32, #tpu.memory_space<vmem>>, vector<1x128x32xf32>
    %111 = vector.shape_cast %110 : vector<1x128x32xf32> to vector<128x32xf32>
    %112 = vector.shape_cast %109 : vector<128x32xf32> to vector<1x128x32xf32>
    tpu.vector_store %arg10[%c2_67, %c0_68, %c0_69], %112 {strides = array<i32>} : memref<4x128x32xf32, #tpu.memory_space<vmem>>, vector<1x128x32xf32>,
    %c2_70 = arith.constant 2 : index
    %c0_71 = arith.constant 0 : index
    %c0_72 = arith.constant 0 : index
    %113 = vector.load %arg8[%c2_70, %c0_71, %c0_72] : memref<4x128x1xf32, #tpu.memory_space<vmem>>, vector<1x128x1xf32>
    %114 = vector.shape_cast %113 : vector<1x128x1xf32> to vector<128x1xf32>
    %115 = vector.shape_cast %89 : vector<128x1xf32> to vector<1x128x1xf32>
    tpu.vector_store %arg8[%c2_70, %c0_71, %c0_72], %115 {strides = array<i32>} : memref<4x128x1xf32, #tpu.memory_space<vmem>>, vector<1x128x1xf32>,
    %116 = vector.extract_strided_slice %6 {offsets = [0, 96], sizes = [128, 32], strides = [1, 1]} : vector<128x128xf32> to vector<128x32xf32>
    %117 = vector.extract_strided_slice %8 {offsets = [0, 96], sizes = [128, 32], strides = [1, 1]} : vector<128x128xf32> to vector<128x32xf32>
    %118 = vector.extract_strided_slice %10 {offsets = [0, 96], sizes = [128, 32], strides = [1, 1]} : vector<128x128xf32> to vector<128x32xf32>
    %cst_73 = arith.constant dense<0.000000e+00> : vector<128x128xf32>
    %119 = tpu.matmul %116, %117, %cst_73 {dimension_numbers = #tpu.dot_dimension_numbers<[1], [1], [0], [0], [0, 0, 1, 0], [], []>} : vector<128x32xf32>, vector<128x32xf32>, vector<128x128xf32> -> vector<128x128xf32>
    %c3 = arith.constant 3 : index
    %c0_74 = arith.constant 0 : index
    %c0_75 = arith.constant 0 : index
    %120 = vector.load %arg8[%c3, %c0_74, %c0_75] : memref<4x128x1xf32, #tpu.memory_space<vmem>>, vector<1x128x1xf32>
    %121 = vector.shape_cast %120 : vector<1x128x1xf32> to vector<128x1xf32>
    %cst_76 = arith.constant dense<0xFF800000> : vector<128xf32>
    %122 = vector.multi_reduction <maximumf>, %119, %cst_76 [1] : vector<128x128xf32> to vector<128xf32>
    %123 = vector.shape_cast %122 : vector<128xf32> to vector<128x1xf32>
    %124 = arith.maximumf %121, %123 : vector<128x1xf32>
    %125 = arith.subf %121, %124 : vector<128x1xf32>
    %126 = math.exp %125 : vector<128x1xf32>
    %127 = vector.broadcast %124 : vector<128x1xf32> to vector<128x128xf32>
    %128 = arith.subf %119, %127 : vector<128x128xf32>
    %129 = math.exp %128 : vector<128x128xf32>
    %c3_77 = arith.constant 3 : index
    %c0_78 = arith.constant 0 : index
    %c0_79 = arith.constant 0 : index
    %130 = vector.load %arg9[%c3_77, %c0_78, %c0_79] : memref<4x128x1xf32, #tpu.memory_space<vmem>>, vector<1x128x1xf32>
    %131 = vector.shape_cast %130 : vector<1x128x1xf32> to vector<128x1xf32>
    %132 = arith.mulf %126, %131 : vector<128x1xf32>
    %cst_80 = arith.constant dense<0.000000e+00> : vector<128xf32>
    %133 = vector.multi_reduction <add>, %129, %cst_80 [1] : vector<128x128xf32> to vector<128xf32>
    %134 = vector.shape_cast %133 : vector<128xf32> to vector<128x1xf32>
    %135 = arith.addf %132, %134 : vector<128x1xf32>
    %c3_81 = arith.constant 3 : index
    %c0_82 = arith.constant 0 : index
    %c0_83 = arith.constant 0 : index
    %136 = vector.load %arg9[%c3_81, %c0_82, %c0_83] : memref<4x128x1xf32, #tpu.memory_space<vmem>>, vector<1x128x1xf32>
    %137 = vector.shape_cast %136 : vector<1x128x1xf32> to vector<128x1xf32>
    %138 = vector.shape_cast %135 : vector<128x1xf32> to vector<1x128x1xf32>
    tpu.vector_store %arg9[%c3_81, %c0_82, %c0_83], %138 {strides = array<i32>} : memref<4x128x1xf32, #tpu.memory_space<vmem>>, vector<1x128x1xf32>,
    %c3_84 = arith.constant 3 : index
    %c0_85 = arith.constant 0 : index
    %c0_86 = arith.constant 0 : index
    %139 = vector.load %arg10[%c3_84, %c0_85, %c0_86] : memref<4x128x32xf32, #tpu.memory_space<vmem>>, vector<1x128x32xf32>
    %140 = vector.shape_cast %139 : vector<1x128x32xf32> to vector<128x32xf32>
    %141 = vector.broadcast %126 : vector<128x1xf32> to vector<128x32xf32>
    %142 = arith.mulf %141, %140 : vector<128x32xf32>
    %cst_87 = arith.constant dense<0.000000e+00> : vector<128x32xf32>
    %143 = tpu.matmul %129, %118, %cst_87 {dimension_numbers = #tpu.dot_dimension_numbers<[1], [0], [0], [1], [0, 0, 1, 1], [], []>} : vector<128x128xf32>, vector<128x32xf32>, vector<128x32xf32> -> vector<128x32xf32>
    %144 = arith.addf %142, %143 : vector<128x32xf32>
    %c3_88 = arith.constant 3 : index
    %c0_89 = arith.constant 0 : index
    %c0_90 = arith.constant 0 : index
    %145 = vector.load %arg10[%c3_88, %c0_89, %c0_90] : memref<4x128x32xf32, #tpu.memory_space<vmem>>, vector<1x128x32xf32>
    %146 = vector.shape_cast %145 : vector<1x128x32xf32> to vector<128x32xf32>
    %147 = vector.shape_cast %144 : vector<128x32xf32> to vector<1x128x32xf32>
    tpu.vector_store %arg10[%c3_88, %c0_89, %c0_90], %147 {strides = array<i32>} : memref<4x128x32xf32, #tpu.memory_space<vmem>>, vector<1x128x32xf32>,
    %c3_91 = arith.constant 3 : index
    %c0_92 = arith.constant 0 : index
    %c0_93 = arith.constant 0 : index
    %148 = vector.load %arg8[%c3_91, %c0_92, %c0_93] : memref<4x128x1xf32, #tpu.memory_space<vmem>>, vector<1x128x1xf32>
    %149 = vector.shape_cast %148 : vector<1x128x1xf32> to vector<128x1xf32>
    %150 = vector.shape_cast %124 : vector<128x1xf32> to vector<1x128x1xf32>
    tpu.vector_store %arg8[%c3_91, %c0_92, %c0_93], %150 {strides = array<i32>} : memref<4x128x1xf32, #tpu.memory_space<vmem>>, vector<1x128x1xf32>,
    %c1_i32 = arith.constant 1 : i32
    %151 = arith.cmpi eq, %arg3, %c1_i32 : i32
    %152 = arith.extui %151 : i1 to i32
    %c0_i32_94 = arith.constant 0 : i32
    %153 = arith.cmpi ne, %152, %c0_i32_94 : i32
    scf.if %153 {
      %c0_95 = arith.constant 0 : index
      %c0_96 = arith.constant 0 : index
      %c0_97 = arith.constant 0 : index
      %154 = vector.load %arg9[%c0_95, %c0_96, %c0_97] : memref<4x128x1xf32, #tpu.memory_space<vmem>>, vector<1x128x1xf32>
      %155 = vector.shape_cast %154 : vector<1x128x1xf32> to vector<128x1xf32>
      %156 = tpu.reciprocal %155 {approx = true} : vector<128x1xf32> -> vector<128x1xf32>
      %157 = arith.mulf %155, %156 : vector<128x1xf32>
      %cst_98 = arith.constant 2.000000e+00 : f32
      %158 = vector.broadcast %cst_98 : f32 to vector<128x1xf32>
      %159 = arith.subf %158, %157 : vector<128x1xf32>
      %160 = arith.mulf %156, %159 : vector<128x1xf32>
      %c0_99 = arith.constant 0 : index
      %c0_100 = arith.constant 0 : index
      %c0_101 = arith.constant 0 : index
      %161 = vector.load %arg10[%c0_99, %c0_100, %c0_101] : memref<4x128x32xf32, #tpu.memory_space<vmem>>, vector<1x128x32xf32>
      %162 = vector.shape_cast %161 : vector<1x128x32xf32> to vector<128x32xf32>
      %163 = vector.broadcast %160 : vector<128x1xf32> to vector<128x32xf32>
      %164 = arith.mulf %162, %163 : vector<128x32xf32>
      %c0_102 = arith.constant 0 : index
      %c0_103 = arith.constant 0 : index
      %c0_104 = arith.constant 0 : index
      %165 = vector.load %arg7[%c0_102, %c0_103, %c0_104] : memref<1x128x128xf32, #tpu.memory_space<vmem>>, vector<1x128x32xf32>
      %166 = vector.shape_cast %165 : vector<1x128x32xf32> to vector<128x32xf32>
      %167 = vector.shape_cast %164 : vector<128x32xf32> to vector<1x128x32xf32>
      tpu.vector_store %arg7[%c0_102, %c0_103, %c0_104], %167 {strides = array<i32>} : memref<1x128x128xf32, #tpu.memory_space<vmem>>, vector<1x128x32xf32>,
      %c1_105 = arith.constant 1 : index
      %c0_106 = arith.constant 0 : index
      %c0_107 = arith.constant 0 : index
      %168 = vector.load %arg9[%c1_105, %c0_106, %c0_107] : memref<4x128x1xf32, #tpu.memory_space<vmem>>, vector<1x128x1xf32>
      %169 = vector.shape_cast %168 : vector<1x128x1xf32> to vector<128x1xf32>
      %170 = tpu.reciprocal %169 {approx = true} : vector<128x1xf32> -> vector<128x1xf32>
      %171 = arith.mulf %169, %170 : vector<128x1xf32>
      %cst_108 = arith.constant 2.000000e+00 : f32
      %172 = vector.broadcast %cst_108 : f32 to vector<128x1xf32>
      %173 = arith.subf %172, %171 : vector<128x1xf32>
      %174 = arith.mulf %170, %173 : vector<128x1xf32>
      %c1_109 = arith.constant 1 : index
      %c0_110 = arith.constant 0 : index
      %c0_111 = arith.constant 0 : index
      %175 = vector.load %arg10[%c1_109, %c0_110, %c0_111] : memref<4x128x32xf32, #tpu.memory_space<vmem>>, vector<1x128x32xf32>
      %176 = vector.shape_cast %175 : vector<1x128x32xf32> to vector<128x32xf32>
      %177 = vector.broadcast %174 : vector<128x1xf32> to vector<128x32xf32>
      %178 = arith.mulf %176, %177 : vector<128x32xf32>
      %c0_112 = arith.constant 0 : index
      %c0_113 = arith.constant 0 : index
      %c32 = arith.constant 32 : index
      %179 = vector.load %arg7[%c0_112, %c0_113, %c32] : memref<1x128x128xf32, #tpu.memory_space<vmem>>, vector<1x128x32xf32>
      %180 = vector.shape_cast %179 : vector<1x128x32xf32> to vector<128x32xf32>
      %181 = vector.shape_cast %178 : vector<128x32xf32> to vector<1x128x32xf32>
      tpu.vector_store %arg7[%c0_112, %c0_113, %c32], %181 {strides = array<i32>} : memref<1x128x128xf32, #tpu.memory_space<vmem>>, vector<1x128x32xf32>,
      %c2_114 = arith.constant 2 : index
      %c0_115 = arith.constant 0 : index
      %c0_116 = arith.constant 0 : index
      %182 = vector.load %arg9[%c2_114, %c0_115, %c0_116] : memref<4x128x1xf32, #tpu.memory_space<vmem>>, vector<1x128x1xf32>
      %183 = vector.shape_cast %182 : vector<1x128x1xf32> to vector<128x1xf32>
      %184 = tpu.reciprocal %183 {approx = true} : vector<128x1xf32> -> vector<128x1xf32>
      %185 = arith.mulf %183, %184 : vector<128x1xf32>
      %cst_117 = arith.constant 2.000000e+00 : f32
      %186 = vector.broadcast %cst_117 : f32 to vector<128x1xf32>
      %187 = arith.subf %186, %185 : vector<128x1xf32>
      %188 = arith.mulf %184, %187 : vector<128x1xf32>
      %c2_118 = arith.constant 2 : index
      %c0_119 = arith.constant 0 : index
      %c0_120 = arith.constant 0 : index
      %189 = vector.load %arg10[%c2_118, %c0_119, %c0_120] : memref<4x128x32xf32, #tpu.memory_space<vmem>>, vector<1x128x32xf32>
      %190 = vector.shape_cast %189 : vector<1x128x32xf32> to vector<128x32xf32>
      %191 = vector.broadcast %188 : vector<128x1xf32> to vector<128x32xf32>
      %192 = arith.mulf %190, %191 : vector<128x32xf32>
      %c0_121 = arith.constant 0 : index
      %c0_122 = arith.constant 0 : index
      %c64 = arith.constant 64 : index
      %193 = vector.load %arg7[%c0_121, %c0_122, %c64] : memref<1x128x128xf32, #tpu.memory_space<vmem>>, vector<1x128x32xf32>
      %194 = vector.shape_cast %193 : vector<1x128x32xf32> to vector<128x32xf32>
      %195 = vector.shape_cast %192 : vector<128x32xf32> to vector<1x128x32xf32>
      tpu.vector_store %arg7[%c0_121, %c0_122, %c64], %195 {strides = array<i32>} : memref<1x128x128xf32, #tpu.memory_space<vmem>>, vector<1x128x32xf32>,
      %c3_123 = arith.constant 3 : index
      %c0_124 = arith.constant 0 : index
      %c0_125 = arith.constant 0 : index
      %196 = vector.load %arg9[%c3_123, %c0_124, %c0_125] : memref<4x128x1xf32, #tpu.memory_space<vmem>>, vector<1x128x1xf32>
      %197 = vector.shape_cast %196 : vector<1x128x1xf32> to vector<128x1xf32>
      %198 = tpu.reciprocal %197 {approx = true} : vector<128x1xf32> -> vector<128x1xf32>
      %199 = arith.mulf %197, %198 : vector<128x1xf32>
      %cst_126 = arith.constant 2.000000e+00 : f32
      %200 = vector.broadcast %cst_126 : f32 to vector<128x1xf32>
      %201 = arith.subf %200, %199 : vector<128x1xf32>
      %202 = arith.mulf %198, %201 : vector<128x1xf32>
      %c3_127 = arith.constant 3 : index
      %c0_128 = arith.constant 0 : index
      %c0_129 = arith.constant 0 : index
      %203 = vector.load %arg10[%c3_127, %c0_128, %c0_129] : memref<4x128x32xf32, #tpu.memory_space<vmem>>, vector<1x128x32xf32>
      %204 = vector.shape_cast %203 : vector<1x128x32xf32> to vector<128x32xf32>
      %205 = vector.broadcast %202 : vector<128x1xf32> to vector<128x32xf32>
      %206 = arith.mulf %204, %205 : vector<128x32xf32>
      %c0_130 = arith.constant 0 : index
      %c0_131 = arith.constant 0 : index
      %c96 = arith.constant 96 : index
      %207 = vector.load %arg7[%c0_130, %c0_131, %c96] : memref<1x128x128xf32, #tpu.memory_space<vmem>>, vector<1x128x32xf32>
      %208 = vector.shape_cast %207 : vector<1x128x32xf32> to vector<128x32xf32>
      %209 = vector.shape_cast %206 : vector<128x32xf32> to vector<1x128x32xf32>
      tpu.vector_store %arg7[%c0_130, %c0_131, %c96], %209 {strides = array<i32>} : memref<1x128x128xf32, #tpu.memory_space<vmem>>, vector<1x128x32xf32>,
    } else {
    }
    return
  }
  func.func @transform_0(%arg0: i32, %arg1: i32, %arg2: i32, %arg3: i32) -> (i32, i32, i32) {
    %c0_i32 = arith.constant 0 : i32
    return %arg0, %arg2, %arg1 : i32, i32, i32
  }
  func.func @transform_1(%arg0: i32, %arg1: i32, %arg2: i32, %arg3: i32) -> (i32, i32, i32) {
    %c2_i32 = arith.constant 2 : i32
    %0 = arith.addi %c2_i32, %arg1 : i32
    %c0_i32 = arith.constant 0 : i32
    return %arg0, %arg3, %0 : i32, i32, i32
  }
  func.func @transform_2(%arg0: i32, %arg1: i32, %arg2: i32, %arg3: i32) -> (i32, i32, i32) {
    %c4_i32 = arith.constant 4 : i32
    %0 = arith.addi %c4_i32, %arg1 : i32
    %c0_i32 = arith.constant 0 : i32
    return %arg0, %arg3, %0 : i32, i32, i32
  }
  func.func @transform_3(%arg0: i32, %arg1: i32, %arg2: i32, %arg3: i32) -> (i32, i32, i32) {
    %c0_i32 = arith.constant 0 : i32
    return %arg0, %arg2, %arg1 : i32, i32, i32
  }
}

module attributes {stable_mosaic.version = 11 : i64} {
  func.func @_linear_kernel(%arg0: i32, %arg1: i32, %arg2: i32, %arg3: memref<128x128xf32, #tpu.memory_space<vmem>>, %arg4: memref<128x128xf32, #tpu.memory_space<vmem>>, %arg5: memref<1x128xf32, #tpu.memory_space<vmem>>, %arg6: memref<128x128xf32, #tpu.memory_space<vmem>>, %arg7: memref<128x128xf32, #tpu.memory_space<vmem>>) attributes {dimension_semantics = [#tpu.dimension_semantics<parallel>, #tpu.dimension_semantics<parallel>, #tpu.dimension_semantics<arbitrary>], iteration_bounds = array<i64: 4, 6, 2>, scalar_prefetch = 0 : i64, scratch_operands = 1 : i64, tpu.core_type = #tpu.core_type<tc>, window_params = [{transform_indices = @transform_0, window_bounds = array<i64: 128, 128>}, {transform_indices = @transform_1, window_bounds = array<i64: 128, 128>}, {transform_indices = @transform_2, window_bounds = array<i64: 1, 128>}, {transform_indices = @transform_3, window_bounds = array<i64: 128, 128>}]} {
    %c0_i32 = arith.constant 0 : i32
    %0 = arith.cmpi eq, %arg2, %c0_i32 : i32
    %1 = arith.extui %0 : i1 to i32
    %c0_i32_0 = arith.constant 0 : i32
    %2 = arith.cmpi ne, %1, %c0_i32_0 : i32
    scf.if %2 {
      %cst_9 = arith.constant 0.000000e+00 : f32
      %12 = vector.broadcast %cst_9 : f32 to vector<128x128xf32>
      %c0_10 = arith.constant 0 : index
      %c0_11 = arith.constant 0 : index
      %13 = vector.load %arg7[%c0_10, %c0_11] : memref<128x128xf32, #tpu.memory_space<vmem>>, vector<128x128xf32>
      tpu.vector_store %arg7[%c0_10, %c0_11], %12 {strides = array<i32>} : memref<128x128xf32, #tpu.memory_space<vmem>>, vector<128x128xf32>,
    } else {
    }
    %c0 = arith.constant 0 : index
    %c0_1 = arith.constant 0 : index
    %3 = vector.load %arg7[%c0, %c0_1] : memref<128x128xf32, #tpu.memory_space<vmem>>, vector<128x128xf32>
    %c0_2 = arith.constant 0 : index
    %c0_3 = arith.constant 0 : index
    %4 = vector.load %arg3[%c0_2, %c0_3] : memref<128x128xf32, #tpu.memory_space<vmem>>, vector<128x128xf32>
    %c0_4 = arith.constant 0 : index
    %c0_5 = arith.constant 0 : index
    %5 = vector.load %arg4[%c0_4, %c0_5] : memref<128x128xf32, #tpu.memory_space<vmem>>, vector<128x128xf32>
    %cst = arith.constant dense<0.000000e+00> : vector<128x128xf32>
    %6 = tpu.matmul %4, %5, %cst {dimension_numbers = #tpu.dot_dimension_numbers<[1], [0], [0], [1], [0, 0, 1, 1], [], []>} : vector<128x128xf32>, vector<128x128xf32>, vector<128x128xf32> -> vector<128x128xf32>
    %7 = arith.addf %3, %6 : vector<128x128xf32>
    %c0_6 = arith.constant 0 : index
    %c0_7 = arith.constant 0 : index
    %8 = vector.load %arg7[%c0_6, %c0_7] : memref<128x128xf32, #tpu.memory_space<vmem>>, vector<128x128xf32>
    tpu.vector_store %arg7[%c0_6, %c0_7], %7 {strides = array<i32>} : memref<128x128xf32, #tpu.memory_space<vmem>>, vector<128x128xf32>,
    %c1_i32 = arith.constant 1 : i32
    %9 = arith.cmpi eq, %arg2, %c1_i32 : i32
    %10 = arith.extui %9 : i1 to i32
    %c0_i32_8 = arith.constant 0 : i32
    %11 = arith.cmpi ne, %10, %c0_i32_8 : i32
    scf.if %11 {
      %c0_9 = arith.constant 0 : index
      %c0_10 = arith.constant 0 : index
      %12 = vector.load %arg7[%c0_9, %c0_10] : memref<128x128xf32, #tpu.memory_space<vmem>>, vector<128x128xf32>
      %c0_11 = arith.constant 0 : index
      %c0_12 = arith.constant 0 : index
      %13 = vector.load %arg5[%c0_11, %c0_12] : memref<1x128xf32, #tpu.memory_space<vmem>>, vector<1x128xf32>
      %14 = vector.broadcast %13 : vector<1x128xf32> to vector<128x128xf32>
      %15 = arith.addf %12, %14 : vector<128x128xf32>
      %c0_13 = arith.constant 0 : index
      %c0_14 = arith.constant 0 : index
      %16 = vector.load %arg6[%c0_13, %c0_14] : memref<128x128xf32, #tpu.memory_space<vmem>>, vector<128x128xf32>
      tpu.vector_store %arg6[%c0_13, %c0_14], %15 {strides = array<i32>} : memref<128x128xf32, #tpu.memory_space<vmem>>, vector<128x128xf32>,
    } else {
    }
    return
  }
  func.func @transform_0(%arg0: i32, %arg1: i32, %arg2: i32) -> (i32, i32) {
    %c0_i32 = arith.constant 0 : i32
    return %arg0, %arg2 : i32, i32
  }
  func.func @transform_1(%arg0: i32, %arg1: i32, %arg2: i32) -> (i32, i32) {
    %c0_i32 = arith.constant 0 : i32
    return %arg2, %arg1 : i32, i32
  }
  func.func @transform_2(%arg0: i32, %arg1: i32, %arg2: i32) -> (i32, i32) {
    %c0_i32 = arith.constant 0 : i32
    %c0_i32_0 = arith.constant 0 : i32
    return %c0_i32, %arg1 : i32, i32
  }
  func.func @transform_3(%arg0: i32, %arg1: i32, %arg2: i32) -> (i32, i32) {
    %c0_i32 = arith.constant 0 : i32
    return %arg0, %arg1 : i32, i32
  }
}

module attributes {stable_mosaic.version = 11 : i64} {
  func.func @_linear_kernel(%arg0: i32, %arg1: i32, %arg2: i32, %arg3: memref<128x128xf32, #tpu.memory_space<vmem>>, %arg4: memref<128x128xf32, #tpu.memory_space<vmem>>, %arg5: memref<1x128xf32, #tpu.memory_space<vmem>>, %arg6: memref<128x128xf32, #tpu.memory_space<vmem>>, %arg7: memref<128x128xf32, #tpu.memory_space<vmem>>) attributes {dimension_semantics = [#tpu.dimension_semantics<parallel>, #tpu.dimension_semantics<parallel>, #tpu.dimension_semantics<arbitrary>], iteration_bounds = array<i64: 4, 2, 2>, scalar_prefetch = 0 : i64, scratch_operands = 1 : i64, tpu.core_type = #tpu.core_type<tc>, window_params = [{transform_indices = @transform_0, window_bounds = array<i64: 128, 128>}, {transform_indices = @transform_1, window_bounds = array<i64: 128, 128>}, {transform_indices = @transform_2, window_bounds = array<i64: 1, 128>}, {transform_indices = @transform_3, window_bounds = array<i64: 128, 128>}]} {
    %c0_i32 = arith.constant 0 : i32
    %0 = arith.cmpi eq, %arg2, %c0_i32 : i32
    %1 = arith.extui %0 : i1 to i32
    %c0_i32_0 = arith.constant 0 : i32
    %2 = arith.cmpi ne, %1, %c0_i32_0 : i32
    scf.if %2 {
      %cst_9 = arith.constant 0.000000e+00 : f32
      %12 = vector.broadcast %cst_9 : f32 to vector<128x128xf32>
      %c0_10 = arith.constant 0 : index
      %c0_11 = arith.constant 0 : index
      %13 = vector.load %arg7[%c0_10, %c0_11] : memref<128x128xf32, #tpu.memory_space<vmem>>, vector<128x128xf32>
      tpu.vector_store %arg7[%c0_10, %c0_11], %12 {strides = array<i32>} : memref<128x128xf32, #tpu.memory_space<vmem>>, vector<128x128xf32>,
    } else {
    }
    %c0 = arith.constant 0 : index
    %c0_1 = arith.constant 0 : index
    %3 = vector.load %arg7[%c0, %c0_1] : memref<128x128xf32, #tpu.memory_space<vmem>>, vector<128x128xf32>
    %c0_2 = arith.constant 0 : index
    %c0_3 = arith.constant 0 : index
    %4 = vector.load %arg3[%c0_2, %c0_3] : memref<128x128xf32, #tpu.memory_space<vmem>>, vector<128x128xf32>
    %c0_4 = arith.constant 0 : index
    %c0_5 = arith.constant 0 : index
    %5 = vector.load %arg4[%c0_4, %c0_5] : memref<128x128xf32, #tpu.memory_space<vmem>>, vector<128x128xf32>
    %cst = arith.constant dense<0.000000e+00> : vector<128x128xf32>
    %6 = tpu.matmul %4, %5, %cst {dimension_numbers = #tpu.dot_dimension_numbers<[1], [0], [0], [1], [0, 0, 1, 1], [], []>} : vector<128x128xf32>, vector<128x128xf32>, vector<128x128xf32> -> vector<128x128xf32>
    %7 = arith.addf %3, %6 : vector<128x128xf32>
    %c0_6 = arith.constant 0 : index
    %c0_7 = arith.constant 0 : index
    %8 = vector.load %arg7[%c0_6, %c0_7] : memref<128x128xf32, #tpu.memory_space<vmem>>, vector<128x128xf32>
    tpu.vector_store %arg7[%c0_6, %c0_7], %7 {strides = array<i32>} : memref<128x128xf32, #tpu.memory_space<vmem>>, vector<128x128xf32>,
    %c1_i32 = arith.constant 1 : i32
    %9 = arith.cmpi eq, %arg2, %c1_i32 : i32
    %10 = arith.extui %9 : i1 to i32
    %c0_i32_8 = arith.constant 0 : i32
    %11 = arith.cmpi ne, %10, %c0_i32_8 : i32
    scf.if %11 {
      %c0_9 = arith.constant 0 : index
      %c0_10 = arith.constant 0 : index
      %12 = vector.load %arg7[%c0_9, %c0_10] : memref<128x128xf32, #tpu.memory_space<vmem>>, vector<128x128xf32>
      %c0_11 = arith.constant 0 : index
      %c0_12 = arith.constant 0 : index
      %13 = vector.load %arg5[%c0_11, %c0_12] : memref<1x128xf32, #tpu.memory_space<vmem>>, vector<1x128xf32>
      %14 = vector.broadcast %13 : vector<1x128xf32> to vector<128x128xf32>
      %15 = arith.addf %12, %14 : vector<128x128xf32>
      %c0_13 = arith.constant 0 : index
      %c0_14 = arith.constant 0 : index
      %16 = vector.load %arg6[%c0_13, %c0_14] : memref<128x128xf32, #tpu.memory_space<vmem>>, vector<128x128xf32>
      tpu.vector_store %arg6[%c0_13, %c0_14], %15 {strides = array<i32>} : memref<128x128xf32, #tpu.memory_space<vmem>>, vector<128x128xf32>,
    } else {
    }
    return
  }
  func.func @transform_0(%arg0: i32, %arg1: i32, %arg2: i32) -> (i32, i32) {
    %c0_i32 = arith.constant 0 : i32
    return %arg0, %arg2 : i32, i32
  }
  func.func @transform_1(%arg0: i32, %arg1: i32, %arg2: i32) -> (i32, i32) {
    %c0_i32 = arith.constant 0 : i32
    return %arg2, %arg1 : i32, i32
  }
  func.func @transform_2(%arg0: i32, %arg1: i32, %arg2: i32) -> (i32, i32) {
    %c0_i32 = arith.constant 0 : i32
    %c0_i32_0 = arith.constant 0 : i32
    return %c0_i32, %arg1 : i32, i32
  }
  func.func @transform_3(%arg0: i32, %arg1: i32, %arg2: i32) -> (i32, i32) {
    %c0_i32 = arith.constant 0 : i32
    return %arg0, %arg1 : i32, i32
  }
}

</mosaic_0001>

<bundles_post_ra>
// kernel: attention_forward.3
= control target key start
LH: loop header
LB: loop body
LE: loop exit
PB: predicated region body
PF: predicated region fallthrough
CT: control target
= control target key end

     0   :  { %s1628_s0 = inlined_call_operand.vmem [shape: f32[512,256], index: 0, kind: input, shape index: {}]   ;;  %s1629_s1 = inlined_call_operand.vmem [shape: f32[256,768], index: 1, kind: input, shape index: {}]   ;;  %s1630_s2 = inlined_call_operand.vmem [shape: f32[1,768], index: 2, kind: input, shape index: {}]   ;;  %s1631_s3 = inlined_call_operand.vmem [shape: f32[512,768], index: 3, kind: output, shape index: {}]  }
   0x1   :  { %1634 = sst [smem:[#allocation9_spill]] %s1628_s0 }
   0x2   :  { %1635 = sst [smem:[#allocation10_spill]] %s1629_s1 }
   0x3   :  { %1636 = sst [smem:[#allocation11_spill]] %s1631_s3 }
   0x4   :  { %s1317_s12 = smov 0   ;;  %s1319_s13 = smov 0  }
   0x5   :  { %s1321_s14 = smov 0   ;;  %s1323_s15 = smov 0  }
   0x6   :  { %s1325_s16 = smov 0   ;;  %s1327_s17 = smov 0  }
   0x7   :  { %s1329_s18 = smov 0   ;;  %s1331_s19 = smov 0  }
   0x8   :  { %s1333_s20 = smov 0   ;;  %s1335_s21 = smov 0  }
   0x9   :  { %s1337_s22 = smov 0   ;;  %s1339_s23 = smov 0  }
   0xa   :  { %s1341_s24 = smov 0  }
   0xb LB: > { %1637 = sst [smem:[#allocation6_spill]] %s1278_s20  ;;  %s25_s26 = sadd.s32 1, %s1282_s21  ;;  %s1294_s24 = sphi %s1341_s24, %s13_s24   ;;  %s1290_s23 = sphi %s1339_s23, %s1663_s23   ;;  %s1286_s22 = sphi %s1337_s22, %s1662_s22   ;;  %s1282_s21 = sphi %s1335_s21, %s1661_s21   ;;  %s1278_s20 = sphi %s1333_s20, %s1660_s20   ;;  %s1274_s19 = sphi %s1331_s19, %s1659_s19   ;;  %s1270_s18 = sphi %s1329_s18, %s1658_s18   ;;  %s1266_s17 = sphi %s1327_s17, %s1657_s17   ;;  %s1262_s16 = sphi %s1325_s16, %s1656_s16   ;;  %s1258_s15 = sphi %s1323_s15, %s1655_s15   ;;  %s1254_s14 = sphi %s1321_s14, %s1654_s14   ;;  %s1250_s13 = sphi %s1319_s13, %s1653_s13   ;;  %s1246_s12 = sphi %s1317_s12, %s1652_s12  }
   0xc   : > { %p26_p0 = scmp.ge.s32.totalorder %s25_s26, 2  ;;  %s28_s27 = sadd.s32 1, %s1286_s22 }
   0xd   : > { %s32_s28 = sadd.s32 1, %s1290_s23  ;;  %s41_s29 = sadd.s32 1, %s1266_s17 }
   0xe   : > { %s1665_s26 = smov (%p26_p0, %s25_s26), 0  ;;  %s1667_s27 = smov (!%p26_p0, %s28_s27), %s1286_s22 }
   0xf   : > { %1638 = sst [smem:[#allocation7_spill]] %s1665_s26  ;;  %s37_s30 = ssub.s32 %s1282_s21, %s1665_s26 }
  0x10   : > { %p48_p1 = scmp.ne.s32.totalorder %s1266_s17, %s1262_s16  ;;  %p30_p2 = scmp.ge.s32.totalorder %s1667_s27, 6 }
  0x11   : > { %p49_p3 = scmp.eq.s32.totalorder %s1294_s24, 0  ;;  %s69_s4 = sadd.s32 1, %s1258_s15 }
  0x12   : > { %p76_p4 = scmp.ne.s32.totalorder %s1258_s15, %s1254_s14  ;;  %s1669_s27 = smov (%p30_p2, %s1667_s27), 0 }
  0x13   : > { %1639 = sst [smem:[#allocation8_spill]] %s1669_s27  ;;  %s1671_s28 = smov (!%p30_p2, %s32_s28), %s1290_s23 }
  0x14   : > { %p1401_p5 = por %p49_p3, %p48_p1  ;;  %s65_s6 = ssub.s32 %s1286_s22, %s1669_s27 }
  0x15   : > { %p34_p6 = scmp.ge.s32.totalorder %s1671_s28, 4  ;;  %s66_s7 = sor.u32 %s65_s6, %s37_s30 }
  0x16   : > { %p67_p7 = scmp.eq.s32.totalorder %s66_s7, 0  ;;  %p1407_p8 = por %p76_p4, %p49_p3 }
  0x17   : > { %s1673_s28 = smov (%p34_p6, %s1671_s28), 0  ;;  %s123_s11 = sadd.s32 1, %s1250_s13 }
  0x18   : > { %s1414_s9 = scalar_select %p67_p7, %s1258_s15, %s69_s4  }
  0x19   : > { %s36_s10 = ssub.s32 %s1290_s23, %s1673_s28  ;;  %p133_p11 = scmp.ne.s32.totalorder %s1250_s13, %s1246_s12 }
  0x1a   : > { %s38_s25 = sor.u32 %s37_s30, %s36_s10  ;;  %s120_s26 = sor.u32 %s65_s6, %s36_s10 }
  0x1b   : > { %p39_p9 = scmp.eq.s32.totalorder %s38_s25, 0  ;;  %p121_p10 = scmp.eq.s32.totalorder %s120_s26, 0 }
  0x1c   : > { %s1642_s27 = sadd.s32 4294967295, %s1294_s24   ;;  %p942_p0 = scmp.ge.s32.totalorder %s1294_s24, 48 }
  0x1d   : > { %p134_p12 = scmp.eq.s32.totalorder %s1642_s27, 47 }
  0x1e   : > { %s1424_s3 = scalar_select %p39_p9, %s1266_s17, %s41_s29  }
  0x1f   : > { %s1427_s7 = scalar_select %p121_p10, %s1250_s13, %s123_s11  }
  0x20   : > { %p1429_p13 = por %p134_p12, %p133_p11  ;;  %156 = sbr.rel (%p942_p0) target bundleno = 73 (0x49), region = 16 }
  0x25   : > { %159 = sbr.rel (!%p1401_p5) target bundleno = 55 (0x37), region = 20  ;;  %s161_s25 = sand.u32 (%p1401_p5), 1, %s1266_s17  }
  0x26   : > { %s964_s26 = sshll.u32 (%p1401_p5), %s1290_s23, 5  ;;  %s943_s27 = sshll.u32 (%p1401_p5), %s161_s25, 7 }
  0x27   : > { %s166_s29 = sadd.s32 (%p1401_p5), %s1282_s21, %s964_s26  ;;  %s1644_s0 = sld [smem:[#allocation9_spill]] (%p1401_p5) }
  0x28   : > { %s946_s30 = sshll.u32 (%p1401_p5), %s166_s29, 3  ;;  %s163_s5 = scalar_lea.vmem (%p1401_p5), [#allocation3], %s943_s27 }
  0x2d   : > { %s1442_s10 = scalar_lea.vmem %s1644_s0, %s946_s30 }
  0x2e   : > { %v227_v0 = vld [vmem:[%s1442_s10] sm:$0xff]  ;;  %v229_v1 = vld [vmem:[%s1442_s10 + $0x10] sm:$0xff] }
  0x2f   : > { %v231_v2 = vld [vmem:[%s1442_s10 + $0x20] sm:$0xff]  ;;  %228 = vst [vmem:[%s163_s5] sm:$0xff] %v227_v0  ;;  %230 = vst [vmem:[%s163_s5 + $0x8] sm:$0xff] %v229_v1  ;;  %v233_v3 = vld [vmem:[%s1442_s10 + $0x30] sm:$0xff] }
  0x30   : > { %232 = vst [vmem:[%s163_s5 + $0x10] sm:$0xff] %v231_v2  ;;  %v235_v4 = vld [vmem:[%s1442_s10 + $0x40] sm:$0xff]  ;;  %v237_v5 = vld [vmem:[%s1442_s10 + $0x50] sm:$0xff]  ;;  %234 = vst [vmem:[%s163_s5 + $0x18] sm:$0xff] %v233_v3 }
  0x31   : > { %236 = vst [vmem:[%s163_s5 + $0x20] sm:$0xff] %v235_v4  ;;  %238 = vst [vmem:[%s163_s5 + $0x28] sm:$0xff] %v237_v5  ;;  %v239_v6 = vld [vmem:[%s1442_s10 + $0x60] sm:$0xff]  ;;  %v241_v7 = vld [vmem:[%s1442_s10 + $0x70] sm:$0xff] }
  0x32   : > { %v243_v8 = vld [vmem:[%s1442_s10 + $0x80] sm:$0xff]  ;;  %240 = vst [vmem:[%s163_s5 + $0x30] sm:$0xff] %v239_v6  ;;  %242 = vst [vmem:[%s163_s5 + $0x38] sm:$0xff] %v241_v7  ;;  %v245_v9 = vld [vmem:[%s1442_s10 + $0x90] sm:$0xff] }
  0x33   : > { %244 = vst [vmem:[%s163_s5 + $0x40] sm:$0xff] %v243_v8  ;;  %v247_v10 = vld [vmem:[%s1442_s10 + $0xa0] sm:$0xff]  ;;  %v249_v11 = vld [vmem:[%s1442_s10 + $0xb0] sm:$0xff]  ;;  %246 = vst [vmem:[%s163_s5 + $0x48] sm:$0xff] %v245_v9 }
  0x34   : > { %248 = vst [vmem:[%s163_s5 + $0x50] sm:$0xff] %v247_v10  ;;  %250 = vst [vmem:[%s163_s5 + $0x58] sm:$0xff] %v249_v11  ;;  %v251_v12 = vld [vmem:[%s1442_s10 + $0xc0] sm:$0xff]  ;;  %v253_v13 = vld [vmem:[%s1442_s10 + $0xd0] sm:$0xff] }
  0x35   : > { %v255_v14 = vld [vmem:[%s1442_s10 + $0xe0] sm:$0xff]  ;;  %252 = vst [vmem:[%s163_s5 + $0x60] sm:$0xff] %v251_v12  ;;  %254 = vst [vmem:[%s163_s5 + $0x68] sm:$0xff] %v253_v13  ;;  %v257_v15 = vld [vmem:[%s1442_s10 + $0xf0] sm:$0xff] }
  0x36   : > { %256 = vst [vmem:[%s163_s5 + $0x70] sm:$0xff] %v255_v14  ;;  %258 = vst [vmem:[%s163_s5 + $0x78] sm:$0xff] %v257_v15 }
  0x37 PF: > { %264 = sbr.rel (!%p1407_p8) target bundleno = 73 (0x49), region = 58  ;;  %s266_s11 = sand.u32 (%p1407_p8), 1, %s1258_s15  }
  0x38   : > { %s1085_s25 = smul.u32 (%p1407_p8), 96, %s1282_s21  ;;  %s947_s26 = sshll.u32 (%p1407_p8), %s266_s11, 7 }
  0x39   : > { %s1645_s1 = sld [smem:[#allocation10_spill]] (%p1407_p8)  ;;  %s268_s8 = scalar_lea.vmem (%p1407_p8), [#allocation4], %s947_s26 }
  0x3a   : > { %s271_s27 = sadd.s32 (%p1407_p8), %s1286_s22, %s1085_s25 }
  0x3b   : > { %s950_s29 = sshll.u32 (%p1407_p8), %s271_s27, 3 }
  0x3f   : > { %s1468_s6 = scalar_lea.vmem %s1645_s1, %s950_s29 }
  0x40   : > { %v332_v16 = vld [vmem:[%s1468_s6] sm:$0xff]  ;;  %v334_v17 = vld [vmem:[%s1468_s6 + $0x30] sm:$0xff] }
  0x41   : > { %v336_v18 = vld [vmem:[%s1468_s6 + $0x60] sm:$0xff]  ;;  %333 = vst [vmem:[%s268_s8] sm:$0xff] %v332_v16  ;;  %335 = vst [vmem:[%s268_s8 + $0x8] sm:$0xff] %v334_v17  ;;  %v338_v19 = vld [vmem:[%s1468_s6 + $0x90] sm:$0xff] }
  0x42   : > { %337 = vst [vmem:[%s268_s8 + $0x10] sm:$0xff] %v336_v18  ;;  %v340_v20 = vld [vmem:[%s1468_s6 + $0xc0] sm:$0xff]  ;;  %v342_v21 = vld [vmem:[%s1468_s6 + $0xf0] sm:$0xff]  ;;  %339 = vst [vmem:[%s268_s8 + $0x18] sm:$0xff] %v338_v19 }
  0x43   : > { %341 = vst [vmem:[%s268_s8 + $0x20] sm:$0xff] %v340_v20  ;;  %343 = vst [vmem:[%s268_s8 + $0x28] sm:$0xff] %v342_v21  ;;  %v344_v22 = vld [vmem:[%s1468_s6 + $0x120] sm:$0xff]  ;;  %v346_v23 = vld [vmem:[%s1468_s6 + $0x150] sm:$0xff] }
  0x44   : > { %v348_v24 = vld [vmem:[%s1468_s6 + $0x180] sm:$0xff]  ;;  %345 = vst [vmem:[%s268_s8 + $0x30] sm:$0xff] %v344_v22  ;;  %347 = vst [vmem:[%s268_s8 + $0x38] sm:$0xff] %v346_v23  ;;  %v350_v25 = vld [vmem:[%s1468_s6 + $0x1b0] sm:$0xff] }
  0x45   : > { %349 = vst [vmem:[%s268_s8 + $0x40] sm:$0xff] %v348_v24  ;;  %v352_v26 = vld [vmem:[%s1468_s6 + $0x1e0] sm:$0xff]  ;;  %v354_v27 = vld [vmem:[%s1468_s6 + $0x210] sm:$0xff]  ;;  %351 = vst [vmem:[%s268_s8 + $0x48] sm:$0xff] %v350_v25 }
  0x46   : > { %353 = vst [vmem:[%s268_s8 + $0x50] sm:$0xff] %v352_v26  ;;  %355 = vst [vmem:[%s268_s8 + $0x58] sm:$0xff] %v354_v27  ;;  %v356_v28 = vld [vmem:[%s1468_s6 + $0x240] sm:$0xff]  ;;  %v358_v29 = vld [vmem:[%s1468_s6 + $0x270] sm:$0xff] }
  0x47   : > { %v360_v30 = vld [vmem:[%s1468_s6 + $0x2a0] sm:$0xff]  ;;  %357 = vst [vmem:[%s268_s8 + $0x60] sm:$0xff] %v356_v28  ;;  %359 = vst [vmem:[%s268_s8 + $0x68] sm:$0xff] %v358_v29  ;;  %v362_v31 = vld [vmem:[%s1468_s6 + $0x2d0] sm:$0xff] }
  0x48   : > { %361 = vst [vmem:[%s268_s8 + $0x70] sm:$0xff] %v360_v30  ;;  %363 = vst [vmem:[%s268_s8 + $0x78] sm:$0xff] %v362_v31 }
  0x49 PF: > { %p951_p1 = scmp.ge.s32.totalorder %s1294_s24, 1  ;;  %p374_p2 = scmp.lt.s32.totalorder %s1294_s24, 49 }
  0x4b   : > { %p375_p3 = pnand %p951_p1, %p374_p2 }
  0x4c   : > { %s381_s10 = sand.u32 (!%p375_p3), 1, %s1262_s16   ;;  %s388_s5 = sand.u32 (!%p375_p3), 1, %s1254_s14  }
  0x4d   : > { %378 = sbr.rel (%p375_p3) target bundleno = 371 (0x173), region = 100  ;;  %s952_s11 = sshll.u32 (!%p375_p3), %s381_s10, 7 }
  0x4e   : > { %s953_s25 = sshll.u32 (!%p375_p3), %s388_s5, 7  ;;  %s414_s26 = sand.u32 (!%p375_p3), 1, %s1246_s12  }
  0x4f   : > { %p419_p4 = scmp.lt.s32.totalorder (!%p375_p3), %s1274_s19, 5  ;;  %s954_s27 = sshll.u32 (!%p375_p3), %s414_s26, 7 }
  0x50   : > { %s1499_s8 = scalar_lea.vmem (!%p375_p3), [#allocation3], %s952_s11  ;;  %s1501_s0 = scalar_lea.vmem (!%p375_p3), [#allocation4], %s953_s25 }
  0x51   : > { %s1503_s1 = scalar_lea.vmem (!%p375_p3), [#allocation5], %s954_s27  ;;  %p955_p5 = scmp.ne.s32.totalorder (!%p375_p3), %s1270_s18, 0 }
  0x52   : > { %s1493_s29 = scalar_select %p419_p4, %s1274_s19, 5 }
  0x53   : > { %426 = sbr.rel (%p955_p5) target bundleno = 97 (0x61), region = 112 }
  0x54   : > { %s421_s6 = scalar_lea.vmem %s1630_s2, %s1493_s29 }
  0x58   : > { %v1296_v32 = vmov 0.0  }
  0x59   : > { %427 = vst [vmem:[#allocation2 + $0x30] sm:$0xff] %v1296_v32  ;;  %428 = vst [vmem:[#allocation2] sm:$0xff] %v1296_v32 }
  0x5a   : > { %429 = vst [vmem:[#allocation2 + $0x58] sm:$0xff] %v1296_v32  ;;  %430 = vst [vmem:[#allocation2 + $0x18] sm:$0xff] %v1296_v32 }
  0x5b   : > { %431 = vst [vmem:[#allocation2 + $0x50] sm:$0xff] %v1296_v32  ;;  %432 = vst [vmem:[#allocation2 + $0x68] sm:$0xff] %v1296_v32 }
  0x5c   : > { %433 = vst [vmem:[#allocation2 + $0x8] sm:$0xff] %v1296_v32  ;;  %434 = vst [vmem:[#allocation2 + $0x48] sm:$0xff] %v1296_v32 }
  0x5d   : > { %435 = vst [vmem:[#allocation2 + $0x40] sm:$0xff] %v1296_v32  ;;  %436 = vst [vmem:[#allocation2 + $0x20] sm:$0xff] %v1296_v32 }
  0x5e   : > { %437 = vst [vmem:[#allocation2 + $0x10] sm:$0xff] %v1296_v32  ;;  %438 = vst [vmem:[#allocation2 + $0x38] sm:$0xff] %v1296_v32 }
  0x5f   : > { %439 = vst [vmem:[#allocation2 + $0x60] sm:$0xff] %v1296_v32  ;;  %440 = vst [vmem:[#allocation2 + $0x70] sm:$0xff] %v1296_v32 }
  0x60   : > { %441 = vst [vmem:[#allocation2 + $0x78] sm:$0xff] %v1296_v32  ;;  %442 = vst [vmem:[#allocation2 + $0x28] sm:$0xff] %v1296_v32 }
  0x61 PF: > { %v490_v33 = vld [vmem:[%s1501_s0 + $0x78] sm:$0xff]  ;;  %v489_v34 = vld [vmem:[%s1501_s0 + $0x70] sm:$0xff]  ;;  %v488_v35 = vld [vmem:[%s1501_s0 + $0x68] sm:$0xff]  ;;  %p956_p6 = scmp.ne.s32.totalorder %s1270_s18, 1 }
  0x62   : > { %997 = vmatprep.subr.mxu0 %v490_v33  ;;  %1053 = vmatprep.subr.mxu1 %v490_v33  ;;  %v487_v36 = vld [vmem:[%s1501_s0 + $0x60] sm:$0xff]  ;;  %v486_v37 = vld [vmem:[%s1501_s0 + $0x58] sm:$0xff]  ;;  %v485_v38 = vld [vmem:[%s1501_s0 + $0x50] sm:$0xff] }
  0x63   : > { %998 = vmatpush3.msra.mxu0 %v490_v33  ;;  %1069 = vmatpush3.msra.mxu1 %v490_v33  ;;  %v484_v39 = vld [vmem:[%s1501_s0 + $0x48] sm:$0xff]  ;;  %v483_v40 = vld [vmem:[%s1501_s0 + $0x40] sm:$0xff]  ;;  %v482_v41 = vld [vmem:[%s1501_s0 + $0x38] sm:$0xff] }
  0x64   : > { %999 = vmatprep.subr.mxu0 %v489_v34  ;;  %1054 = vmatprep.subr.mxu1 %v489_v34  ;;  %v481_v42 = vld [vmem:[%s1501_s0 + $0x30] sm:$0xff]  ;;  %v480_v43 = vld [vmem:[%s1501_s0 + $0x28] sm:$0xff]  ;;  %v479_v44 = vld [vmem:[%s1501_s0 + $0x20] sm:$0xff] }
  0x65   : > { %1000 = vmatpush3.msra.mxu0 %v489_v34  ;;  %1070 = vmatpush3.msra.mxu1 %v489_v34  ;;  %v478_v45 = vld [vmem:[%s1501_s0 + $0x18] sm:$0xff]  ;;  %v477_v46 = vld [vmem:[%s1501_s0 + $0x10] sm:$0xff]  ;;  %v476_v47 = vld [vmem:[%s1501_s0 + $0x8] sm:$0xff] }
  0x66   : > { %1001 = vmatprep.subr.mxu0 %v488_v35  ;;  %1055 = vmatprep.subr.mxu1 %v488_v35  ;;  %v475_v48 = vld [vmem:[%s1501_s0] sm:$0xff]  ;;  %v460_v51 = vld [vmem:[%s1499_s8 + $0x8] sm:$0xff]  ;;  %v461_v53 = vld [vmem:[%s1499_s8 + $0x10] sm:$0xff] }
  0x67   : > { %1002 = vmatpush3.msra.mxu0 %v488_v35  ;;  %1071 = vmatpush3.msra.mxu1 %v488_v35  ;;  %v459_v49 = vld [vmem:[%s1499_s8] sm:$0xff]  ;;  %v468_v52 = vld [vmem:[%s1499_s8 + $0x48] sm:$0xff]  ;;  %v469_v54 = vld [vmem:[%s1499_s8 + $0x50] sm:$0xff] }
  0x68   : > { %1003 = vmatprep.subr.mxu0 %v487_v36  ;;  %1056 = vmatprep.subr.mxu1 %v487_v36  ;;  %v467_v50 = vld [vmem:[%s1499_s8 + $0x40] sm:$0xff]  ;;  %v462_v55 = vld [vmem:[%s1499_s8 + $0x18] sm:$0xff]  ;;  %v464_v59 = vld [vmem:[%s1499_s8 + $0x28] sm:$0xff] }
  0x69   : > { %1004 = vmatpush3.msra.mxu0 %v487_v36  ;;  %1072 = vmatpush3.msra.mxu1 %v487_v36  ;;  %v470_v56 = vld [vmem:[%s1499_s8 + $0x58] sm:$0xff]  ;;  %v463_v57 = vld [vmem:[%s1499_s8 + $0x20] sm:$0xff]  ;;  %v472_v60 = vld [vmem:[%s1499_s8 + $0x68] sm:$0xff] }
  0x6a   : > { %1005 = vmatprep.subr.mxu0 %v486_v37  ;;  %1057 = vmatprep.subr.mxu1 %v486_v37  ;;  %v471_v58 = vld [vmem:[%s1499_s8 + $0x60] sm:$0xff]  ;;  %v465_v61 = vld [vmem:[%s1499_s8 + $0x30] sm:$0xff]  ;;  %v466_v63 = vld [vmem:[%s1499_s8 + $0x38] sm:$0xff] }
  0x6b   : > { %1006 = vmatpush3.msra.mxu0 %v486_v37  ;;  %1073 = vmatpush3.msra.mxu1 %v486_v37  ;;  %v473_v62 = vld [vmem:[%s1499_s8 + $0x70] sm:$0xff]  ;;  %v474_v0 = vld [vmem:[%s1499_s8 + $0x78] sm:$0xff]  ;;  %v444_v1 = vld [vmem:[#allocation2] sm:$0xff] }
  0x6c   : > { %1007 = vmatprep.subr.mxu0 %v485_v38  ;;  %1058 = vmatprep.subr.mxu1 %v485_v38  ;;  %v452_v2 = vld [vmem:[#allocation2 + $0x20] sm:$0xff]  ;;  %v443_v5 = vld [vmem:[#allocation2 + $0x30] sm:$0xff]  ;;  %v446_v11 = vld [vmem:[#allocation2 + $0x18] sm:$0xff] }
  0x6d   : > { %1008 = vmatpush3.msra.mxu0 %v485_v38  ;;  %1074 = vmatpush3.msra.mxu1 %v485_v38  ;;  %v451_v6 = vld [vmem:[#allocation2 + $0x40] sm:$0xff]  ;;  %v454_v12 = vld [vmem:[#allocation2 + $0x38] sm:$0xff]  ;;  %v453_v18 = vld [vmem:[#allocation2 + $0x10] sm:$0xff] }
  0x6e   : > { %1009 = vmatprep.subr.mxu0 %v484_v39  ;;  %1059 = vmatprep.subr.mxu1 %v484_v39  ;;  %v445_v17 = vld [vmem:[#allocation2 + $0x58] sm:$0xff]  ;;  %v448_v23 = vld [vmem:[#allocation2 + $0x68] sm:$0xff]  ;;  %v456_v24 = vld [vmem:[#allocation2 + $0x70] sm:$0xff] }
  0x6f   : > { %1010 = vmatpush3.msra.mxu0 %v484_v39  ;;  %1075 = vmatpush3.msra.mxu1 %v484_v39  ;;  %v447_v29 = vld [vmem:[#allocation2 + $0x50] sm:$0xff]  ;;  %v455_v30 = vld [vmem:[#allocation2 + $0x60] sm:$0xff]  ;;  %v450_v35 = vld [vmem:[#allocation2 + $0x48] sm:$0xff] }
  0x70   : > { %1011 = vmatprep.subr.mxu0 %v483_v40  ;;  %1060 = vmatprep.subr.mxu1 %v483_v40  ;;  %v458_v36 = vld [vmem:[#allocation2 + $0x28] sm:$0xff] }
  0x71   : > { %1012 = vmatpush3.msra.mxu0 %v483_v40  ;;  %1076 = vmatpush3.msra.mxu1 %v483_v40 }
  0x72   : > { %1013 = vmatprep.subr.mxu0 %v482_v41  ;;  %1061 = vmatprep.subr.mxu1 %v482_v41 }
  0x73   : > { %1014 = vmatpush3.msra.mxu0 %v482_v41  ;;  %1077 = vmatpush3.msra.mxu1 %v482_v41  ;;  %v449_v41 = vld [vmem:[#allocation2 + $0x8] sm:$0xff] }
  0x74   : > { %1015 = vmatprep.subr.mxu0 %v481_v42  ;;  %1062 = vmatprep.subr.mxu1 %v481_v42 }
  0x75   : > { %1016 = vmatpush3.msra.mxu0 %v481_v42  ;;  %1078 = vmatpush3.msra.mxu1 %v481_v42  ;;  %v457_v42 = vld [vmem:[#allocation2 + $0x78] sm:$0xff] }
  0x76   : > { %1017 = vmatprep.subr.mxu0 %v480_v43  ;;  %1063 = vmatprep.subr.mxu1 %v480_v43 }
  0x77   : > { %1018 = vmatpush3.msra.mxu0 %v480_v43  ;;  %1079 = vmatpush3.msra.mxu1 %v480_v43 }
  0x78   : > { %1019 = vmatprep.subr.mxu0 %v479_v44  ;;  %1064 = vmatprep.subr.mxu1 %v479_v44 }
  0x79   : > { %1020 = vmatpush3.msra.mxu0 %v479_v44  ;;  %1080 = vmatpush3.msra.mxu1 %v479_v44 }
  0x7a   : > { %1021 = vmatprep.subr.mxu0 %v478_v45  ;;  %1065 = vmatprep.subr.mxu1 %v478_v45 }
  0x7b   : > { %1022 = vmatpush3.msra.mxu0 %v478_v45  ;;  %1081 = vmatpush3.msra.mxu1 %v478_v45 }
  0x7c   : > { %1023 = vmatprep.subr.mxu0 %v477_v46  ;;  %1066 = vmatprep.subr.mxu1 %v477_v46 }
  0x7d   : > { %1024 = vmatpush3.msra.mxu0 %v477_v46  ;;  %1082 = vmatpush3.msra.mxu1 %v477_v46 }
  0x7e   : > { %1025 = vmatprep.subr.mxu0 %v476_v47  ;;  %1067 = vmatprep.subr.mxu1 %v476_v47 }
  0x7f   : > { %1026 = vmatpush3.msra.mxu0 %v476_v47  ;;  %1083 = vmatpush3.msra.mxu1 %v476_v47 }
  0x80   : > { %1027 = vmatprep.subr.mxu0 %v475_v48  ;;  %1068 = vmatprep.subr.mxu1 %v475_v48 }
  0x81   : > { %1028 = vmatpush3.msra.mxu0 %v475_v48  ;;  %1084 = vmatpush3.msra.mxu1 %v475_v48 }
  0x82   : > { %1029 = vmatprep.mubr.f32.mxu0 %v459_v49  ;;  %1041 = vmatprep.mubr.f32.mxu1 %v467_v50 }
  0x83   : > { %1030 = vmatmul.mubr.f32.vlgmr.msra.gmra.mxu0 %v460_v51  ;;  %1042 = vmatmul.mubr.f32.vlgmr.msra.gmra.mxu1 %v468_v52 }
  0x84   : > { %1032 = vmatprep.mubr.f32.mxu0 %v461_v53  ;;  %1044 = vmatprep.mubr.f32.mxu1 %v469_v54 }
  0x87   : > { %1033 = vmatmul.mubr.f32.gmra.mxu0 %v462_v55  ;;  %1045 = vmatmul.mubr.f32.gmra.mxu1 %v470_v56 }
  0x88   : > { %1035 = vmatprep.mubr.f32.mxu0 %v463_v57  ;;  %1047 = vmatprep.mubr.f32.mxu1 %v471_v58 }
  0x8b   : > { %1036 = vmatmul.mubr.f32.gmra.mxu0 %v464_v59  ;;  %1048 = vmatmul.mubr.f32.gmra.mxu1 %v472_v60 }
  0x8c   : > { %1038 = vmatprep.mubr.f32.mxu0 %v465_v61  ;;  %1050 = vmatprep.mubr.f32.mxu1 %v473_v62 }
  0x8f   : > { %1039 = vmatmul.mubr.f32.gmra.mxu0 %v466_v63  ;;  %1051 = vmatmul.mubr.f32.gmra.mxu1 %v474_v0 }
 0x143   : > { %v1031_v3 = vpop.f32.mrf.mxu0  ;;  %v1043_v4 = vpop.f32.mrf.mxu1 }
 0x144   : > { %v637_v7 = vadd.f32 %v1031_v3, %v444_v1  ;;  %v645_v8 = vadd.f32 %v1043_v4, %v452_v2 }
 0x145   : > { %v557_v9 = vpop.f32.mrf.mxu0  ;;  %v597_v10 = vpop.f32.mrf.mxu1 }
 0x146   : > { %653 = vst [vmem:[#allocation2] sm:$0xff] %v637_v7  ;;  %661 = vst [vmem:[#allocation2 + $0x20] sm:$0xff] %v645_v8  ;;  %v636_v13 = vadd.f32 %v557_v9, %v443_v5  ;;  %v644_v14 = vadd.f32 %v597_v10, %v451_v6 }
 0x147   : > { %v1034_v15 = vpop.f32.mrf.mxu0  ;;  %v1046_v16 = vpop.f32.mrf.mxu1 }
 0x148   : > { %652 = vst [vmem:[#allocation2 + $0x30] sm:$0xff] %v636_v13  ;;  %660 = vst [vmem:[#allocation2 + $0x40] sm:$0xff] %v644_v14  ;;  %v639_v19 = vadd.f32 %v1034_v15, %v446_v11  ;;  %v647_v20 = vadd.f32 %v1046_v16, %v454_v12 }
 0x149   : > { %v567_v21 = vpop.f32.mrf.mxu0  ;;  %v607_v22 = vpop.f32.mrf.mxu1 }
 0x14a   : > { %655 = vst [vmem:[#allocation2 + $0x18] sm:$0xff] %v639_v19  ;;  %663 = vst [vmem:[#allocation2 + $0x38] sm:$0xff] %v647_v20  ;;  %v638_v25 = vadd.f32 %v567_v21, %v445_v17  ;;  %v646_v26 = vadd.f32 %v607_v22, %v453_v18 }
 0x14b   : > { %v1037_v27 = vpop.f32.mrf.mxu0  ;;  %v1049_v28 = vpop.f32.mrf.mxu1 }
 0x14c   : > { %654 = vst [vmem:[#allocation2 + $0x58] sm:$0xff] %v638_v25  ;;  %662 = vst [vmem:[#allocation2 + $0x10] sm:$0xff] %v646_v26  ;;  %v641_v31 = vadd.f32 %v1037_v27, %v448_v23  ;;  %v649_v32 = vadd.f32 %v1049_v28, %v456_v24 }
 0x14d   : > { %v577_v33 = vpop.f32.mrf.mxu0  ;;  %v617_v34 = vpop.f32.mrf.mxu1 }
 0x14e   : > { %657 = vst [vmem:[#allocation2 + $0x68] sm:$0xff] %v641_v31  ;;  %665 = vst [vmem:[#allocation2 + $0x70] sm:$0xff] %v649_v32  ;;  %v640_v37 = vadd.f32 %v577_v33, %v447_v29  ;;  %v648_v38 = vadd.f32 %v617_v34, %v455_v30 }
 0x14f   : > { %v1040_v39 = vpop.f32.mrf.mxu0  ;;  %v1052_v40 = vpop.f32.mrf.mxu1 }
 0x150   : > { %656 = vst [vmem:[#allocation2 + $0x50] sm:$0xff] %v640_v37  ;;  %664 = vst [vmem:[#allocation2 + $0x60] sm:$0xff] %v648_v38  ;;  %v643_v43 = vadd.f32 %v1040_v39, %v450_v35  ;;  %v651_v44 = vadd.f32 %v1052_v40, %v458_v36  ;;  %671 = sbr.rel (%p956_p6) target bundleno = 352 (0x160), region = 116 }
 0x151   : > { %v587_v45 = vpop.f32.mrf.mxu0  ;;  %v627_v46 = vpop.f32.mrf.mxu1 }
 0x152   : > { %659 = vst [vmem:[#allocation2 + $0x48] sm:$0xff] %v643_v43  ;;  %667 = vst [vmem:[#allocation2 + $0x28] sm:$0xff] %v651_v44  ;;  %v642_v47 = vadd.f32 %v587_v45, %v449_v41  ;;  %v650_v48 = vadd.f32 %v627_v46, %v457_v42 }
 0x154   : > { %658 = vst [vmem:[#allocation2 + $0x8] sm:$0xff] %v642_v47  ;;  %666 = vst [vmem:[#allocation2 + $0x78] sm:$0xff] %v650_v48 }
 0x155   : > { %v672_v49 = vld [vmem:[#allocation2 + $0x30] sm:$0xff]  ;;  %v957_v50 = vld [vmem:[%s421_s6] ss:$0 sm:$0xff]  ;;  %v674_v54 = vld [vmem:[#allocation2 + $0x58] sm:$0xff] }
 0x156   : > { %v673_v51 = vld [vmem:[#allocation2] sm:$0xff]  ;;  %v695_v52 = vadd.f32 %v957_v50, %v672_v49  ;;  %v675_v55 = vld [vmem:[#allocation2 + $0x18] sm:$0xff]  ;;  %v697_v57 = vadd.f32 %v957_v50, %v674_v54  ;;  %v677_v60 = vld [vmem:[#allocation2 + $0x68] sm:$0xff] }
 0x157   : > { %v696_v53 = vadd.f32 %v957_v50, %v673_v51  ;;  %v676_v56 = vld [vmem:[#allocation2 + $0x50] sm:$0xff]  ;;  %v698_v58 = vadd.f32 %v957_v50, %v675_v55  ;;  %v700_v63 = vadd.f32 %v957_v50, %v677_v60  ;;  %v680_v2 = vld [vmem:[#allocation2 + $0x40] sm:$0xff]  ;;  %v683_v8 = vld [vmem:[#allocation2 + $0x38] sm:$0xff] }
 0x158   : > { %v699_v59 = vadd.f32 %v957_v50, %v676_v56  ;;  %711 = vst [vmem:[%s1503_s1] sm:$0xff] %v695_v52  ;;  %v681_v3 = vld [vmem:[#allocation2 + $0x20] sm:$0xff]  ;;  %v682_v4 = vld [vmem:[#allocation2 + $0x10] sm:$0xff]  ;;  %713 = vst [vmem:[%s1503_s1 + $0x10] sm:$0xff] %v697_v57  ;;  %v703_v5 = vadd.f32 %v957_v50, %v680_v2  ;;  %v706_v11 = vadd.f32 %v957_v50, %v683_v8 }
 0x159   : > { %v679_v62 = vld [vmem:[#allocation2 + $0x48] sm:$0xff]  ;;  %712 = vst [vmem:[%s1503_s1 + $0x8] sm:$0xff] %v696_v53  ;;  %714 = vst [vmem:[%s1503_s1 + $0x18] sm:$0xff] %v698_v58  ;;  %v704_v6 = vadd.f32 %v957_v50, %v681_v3  ;;  %v705_v7 = vadd.f32 %v957_v50, %v682_v4  ;;  %v684_v9 = vld [vmem:[#allocation2 + $0x60] sm:$0xff] }
 0x15a   : > { %v702_v1 = vadd.f32 %v957_v50, %v679_v62  ;;  %715 = vst [vmem:[%s1503_s1 + $0x20] sm:$0xff] %v699_v59  ;;  %v685_v10 = vld [vmem:[#allocation2 + $0x70] sm:$0xff]  ;;  %716 = vst [vmem:[%s1503_s1 + $0x28] sm:$0xff] %v700_v63  ;;  %v707_v12 = vadd.f32 %v957_v50, %v684_v9  ;;  %v687_v15 = vld [vmem:[#allocation2 + $0x28] sm:$0xff] }
 0x15b   : > { %v678_v61 = vld [vmem:[#allocation2 + $0x8] sm:$0xff]  ;;  %v708_v13 = vadd.f32 %v957_v50, %v685_v10  ;;  %v686_v14 = vld [vmem:[#allocation2 + $0x78] sm:$0xff]  ;;  %719 = vst [vmem:[%s1503_s1 + $0x40] sm:$0xff] %v703_v5  ;;  %720 = vst [vmem:[%s1503_s1 + $0x48] sm:$0xff] %v704_v6  ;;  %v710_v17 = vadd.f32 %v957_v50, %v687_v15 }
 0x15c   : > { %v701_v0 = vadd.f32 %v957_v50, %v678_v61  ;;  %718 = vst [vmem:[%s1503_s1 + $0x38] sm:$0xff] %v702_v1  ;;  %721 = vst [vmem:[%s1503_s1 + $0x50] sm:$0xff] %v705_v7  ;;  %v709_v16 = vadd.f32 %v957_v50, %v686_v14 }
 0x15d   : > { %722 = vst [vmem:[%s1503_s1 + $0x58] sm:$0xff] %v706_v11  ;;  %723 = vst [vmem:[%s1503_s1 + $0x60] sm:$0xff] %v707_v12 }
 0x15e   : > { %717 = vst [vmem:[%s1503_s1 + $0x30] sm:$0xff] %v701_v0  ;;  %724 = vst [vmem:[%s1503_s1 + $0x68] sm:$0xff] %v708_v13 }
 0x15f   : > { %725 = vst [vmem:[%s1503_s1 + $0x70] sm:$0xff] %v709_v16  ;;  %726 = vst [vmem:[%s1503_s1 + $0x78] sm:$0xff] %v710_v17 }
 0x160 PF: > { %733 = sbr.rel (!%p1429_p13) target bundleno = 371 (0x173), region = 120  ;;  %s1646_s14 = sld [smem:[#allocation6_spill]] (%p1429_p13)  ;;  %v797_v18 = vld [vmem:[%s1503_s1] sm:$0xff] (%p1429_p13)  ;;  %v799_v19 = vld [vmem:[%s1503_s1 + $0x8] sm:$0xff] (%p1429_p13)  ;;  %v801_v20 = vld [vmem:[%s1503_s1 + $0x10] sm:$0xff] (%p1429_p13) }
 0x161   : > { %v803_v21 = vld [vmem:[%s1503_s1 + $0x18] sm:$0xff] (%p1429_p13)  ;;  %v805_v22 = vld [vmem:[%s1503_s1 + $0x20] sm:$0xff] (%p1429_p13)  ;;  %v807_v23 = vld [vmem:[%s1503_s1 + $0x28] sm:$0xff] (%p1429_p13)  ;;  %s1647_s11 = sld [smem:[#allocation11_spill]] (%p1429_p13) }
 0x162   : > { %v813_v26 = vld [vmem:[%s1503_s1 + $0x40] sm:$0xff] (%p1429_p13)  ;;  %v815_v27 = vld [vmem:[%s1503_s1 + $0x48] sm:$0xff] (%p1429_p13) }
 0x163   : > { %v811_v25 = vld [vmem:[%s1503_s1 + $0x38] sm:$0xff] (%p1429_p13)  ;;  %v817_v28 = vld [vmem:[%s1503_s1 + $0x50] sm:$0xff] (%p1429_p13) }
 0x164   : > { %v819_v29 = vld [vmem:[%s1503_s1 + $0x58] sm:$0xff] (%p1429_p13)  ;;  %v821_v30 = vld [vmem:[%s1503_s1 + $0x60] sm:$0xff] (%p1429_p13) }
 0x165   : > { %v809_v24 = vld [vmem:[%s1503_s1 + $0x30] sm:$0xff]  ;;  %v823_v31 = vld [vmem:[%s1503_s1 + $0x68] sm:$0xff] }
 0x166   : > { %s1086_s16 = smul.u32 96, %s1646_s14  ;;  %v825_v32 = vld [vmem:[%s1503_s1 + $0x70] sm:$0xff]  ;;  %v827_v33 = vld [vmem:[%s1503_s1 + $0x78] sm:$0xff] }
 0x168   : > { %s736_s18 = sadd.s32 %s1274_s19, %s1086_s16 }
 0x169   : > { %s961_s20 = sshll.u32 %s736_s18, 3 }
 0x16a   : > { %s738_s25 = scalar_lea.vmem %s1647_s11, %s961_s20 }
 0x16b   : > { %798 = vst [vmem:[%s738_s25] sm:$0xff] %v797_v18  ;;  %800 = vst [vmem:[%s738_s25 + $0x30] sm:$0xff] %v799_v19 }
 0x16c   : > { %802 = vst [vmem:[%s738_s25 + $0x60] sm:$0xff] %v801_v20  ;;  %804 = vst [vmem:[%s738_s25 + $0x90] sm:$0xff] %v803_v21 }
 0x16d   : > { %806 = vst [vmem:[%s738_s25 + $0xc0] sm:$0xff] %v805_v22  ;;  %808 = vst [vmem:[%s738_s25 + $0xf0] sm:$0xff] %v807_v23 }
 0x16e   : > { %810 = vst [vmem:[%s738_s25 + $0x120] sm:$0xff] %v809_v24  ;;  %812 = vst [vmem:[%s738_s25 + $0x150] sm:$0xff] %v811_v25 }
 0x16f   : > { %814 = vst [vmem:[%s738_s25 + $0x180] sm:$0xff] %v813_v26  ;;  %816 = vst [vmem:[%s738_s25 + $0x1b0] sm:$0xff] %v815_v27 }
 0x170   : > { %818 = vst [vmem:[%s738_s25 + $0x1e0] sm:$0xff] %v817_v28  ;;  %820 = vst [vmem:[%s738_s25 + $0x210] sm:$0xff] %v819_v29 }
 0x171   : > { %822 = vst [vmem:[%s738_s25 + $0x240] sm:$0xff] %v821_v30  ;;  %824 = vst [vmem:[%s738_s25 + $0x270] sm:$0xff] %v823_v31 }
 0x172   : > { %826 = vst [vmem:[%s738_s25 + $0x2a0] sm:$0xff] %v825_v32  ;;  %828 = vst [vmem:[%s738_s25 + $0x2d0] sm:$0xff] %v827_v33 }
 0x173 PF: > { %s13_s24 = sadd.s32 1, %s1294_s24   ;;  %s1649_s26 = sld [smem:[#allocation7_spill]] }
 0x174   : > { %p1584_p7 = scmp.ge.s32.totalorder %s13_s24, 50   ;;  %s1650_s1 = sld [smem:[#allocation8_spill]] }
 0x175   : > { %s1652_s12 = smov %s1250_s13  ;;  %s1653_s13 = smov %s1427_s7 }
 0x176   : > { %s1654_s14 = smov %s1258_s15  ;;  %s1655_s15 = smov %s1414_s9 }
 0x177   : > { %s1656_s16 = smov %s1266_s17  ;;  %s1657_s17 = smov %s1424_s3 }
 0x178   : > { %s1658_s18 = smov %s1282_s21  ;;  %s1659_s19 = smov %s1286_s22 }
 0x179   : > { %s1660_s20 = smov %s1290_s23  ;;  %s1661_s21 = smov %s1649_s26 }
 0x17a   : > { %s1662_s22 = smov %s1650_s1  ;;  %s1663_s23 = smov %s1673_s28 }
 0x17b   :  { %12 = sbr.rel (!%p1584_p7) target bundleno = 11 (0xb), region = 200 }

// kernel: attention_forward.5
= control target key start
LH: loop header
LB: loop body
LE: loop exit
PB: predicated region body
PF: predicated region fallthrough
CT: control target
= control target key end

     0   :  { %s1649_s0 = inlined_call_operand.vmem [shape: f32[512,256], index: 0, kind: input, shape index: {}]   ;;  %s1650_s1 = inlined_call_operand.vmem [shape: f32[256,256], index: 1, kind: input, shape index: {}]   ;;  %s1651_s2 = inlined_call_operand.vmem [shape: f32[1,256], index: 2, kind: input, shape index: {}]   ;;  %s1652_s3 = inlined_call_operand.hbm [shape: f32[512,256], index: 3, kind: output, shape index: {}]  }
   0x1   :  { %1657 = sst [smem:[#allocation13_spill]] %s1649_s0 }
   0x2   :  { %1658 = sst [smem:[#allocation14_spill]] %s1650_s1 }
   0x3   :  { %1659 = sst [smem:[#allocation15_spill]] %s1651_s2 }
   0x4   :  { %1660 = sst [smem:[#allocation16_spill]] %s1652_s3 }
   0x5   :  { %8 = vsyncpa [#allocation6], 0 }
   0x6   :  { %10 = vsyncpa [#allocation6 + $0x1], 0  ;;  %s1303_s12 = smov 0   ;;  %s1305_s13 = smov 0  }
   0x7   :  { %s1307_s14 = smov 0   ;;  %s1309_s15 = smov 0  }
   0x8   :  { %s1311_s16 = smov 0   ;;  %s1313_s17 = smov 0  }
   0x9   :  { %s1315_s18 = smov 0   ;;  %s1317_s19 = smov 0  }
   0xa   :  { %s1319_s20 = smov 0   ;;  %s1321_s21 = smov 0  }
   0xb   :  { %s1323_s22 = smov 0   ;;  %s1325_s23 = smov 0  }
   0xc   :  { %s1327_s24 = smov 0   ;;  %s1329_s25 = smov 0  }
   0xd LB: > { %1661 = sst [smem:[#allocation8_spill]] %s1252_s19  ;;  %s28_s28 = sadd.s32 1, %s1264_s22  ;;  %s1276_s25 = sphi %s1329_s25, %s16_s25   ;;  %s1272_s24 = sphi %s1327_s24, %s1696_s24   ;;  %s1268_s23 = sphi %s1325_s23, %s1695_s23   ;;  %s1264_s22 = sphi %s1323_s22, %s1694_s22   ;;  %s1260_s21 = sphi %s1321_s21, %s1693_s21   ;;  %s1256_s20 = sphi %s1319_s20, %s1692_s20   ;;  %s1252_s19 = sphi %s1317_s19, %s1691_s19   ;;  %s1248_s18 = sphi %s1315_s18, %s1690_s18   ;;  %s1244_s17 = sphi %s1313_s17, %s1689_s17   ;;  %s1240_s16 = sphi %s1311_s16, %s1688_s16   ;;  %s1236_s15 = sphi %s1309_s15, %s1687_s15   ;;  %s1232_s14 = sphi %s1307_s14, %s1686_s14   ;;  %s1228_s13 = sphi %s1305_s13, %s1685_s13   ;;  %s1224_s12 = sphi %s1303_s12, %s1684_s12  }
   0xe   : > { %1662 = sst [smem:[#allocation9_spill]] %s1260_s21  ;;  %s31_s29 = sadd.s32 1, %s1268_s23 }
   0xf   : > { %p29_p0 = scmp.ge.s32.totalorder %s28_s28, 2  ;;  %s35_s30 = sadd.s32 1, %s1272_s24 }
  0x10   : > { %s44_s4 = sadd.s32 1, %s1248_s18  ;;  %p51_p1 = scmp.ne.s32.totalorder %s1248_s18, %s1244_s17 }
  0x11   : > { %s1698_s28 = smov (%p29_p0, %s28_s28), 0  ;;  %s1700_s29 = smov (!%p29_p0, %s31_s29), %s1268_s23 }
  0x12   : > { %1663 = sst [smem:[#allocation10_spill]] %s1698_s28  ;;  %s40_s5 = ssub.s32 %s1264_s22, %s1698_s28 }
  0x13   : > { %p52_p2 = scmp.eq.s32.totalorder %s1276_s25, 0  ;;  %p33_p3 = scmp.ge.s32.totalorder %s1700_s29, 2 }
  0x14   : > { %s72_s6 = sadd.s32 1, %s1240_s16  ;;  %p79_p5 = scmp.ne.s32.totalorder %s1240_s16, %s1236_s15 }
  0x15   : > { %p1388_p4 = por %p52_p2, %p51_p1  ;;  %s1702_s29 = smov (%p33_p3, %s1700_s29), 0 }
  0x16   : > { %1665 = sst [smem:[#allocation11_spill]] %s1702_s29  ;;  %s1704_s30 = smov (!%p33_p3, %s35_s30), %s1272_s24 }
  0x17   : > { %s68_s8 = ssub.s32 %s1268_s23, %s1702_s29  ;;  %p1399_p6 = por %p79_p5, %p52_p2 }
  0x18   : > { %p37_p7 = scmp.ge.s32.totalorder %s1704_s30, 4  ;;  %s69_s10 = sor.u32 %s68_s8, %s40_s5 }
  0x19   : > { %p70_p8 = scmp.eq.s32.totalorder %s69_s10, 0  ;;  %s126_s11 = sadd.s32 1, %s1232_s14 }
  0x1a   : > { %s1706_s30 = smov (%p37_p7, %s1704_s30), 0  ;;  %p136_p9 = scmp.ne.s32.totalorder %s1232_s14, %s1228_s13 }
  0x1b   : > { %1667 = sst [smem:[#allocation12_spill]] %s1706_s30  ;;  %s39_s26 = ssub.s32 %s1272_s24, %s1706_s30 }
  0x1c   : > { %s1407_s27 = scalar_select %p70_p8, %s1240_s16, %s72_s6  }
  0x1d   : > { %s41_s28 = sor.u32 %s40_s5, %s39_s26  ;;  %s123_s29 = sor.u32 %s68_s8, %s39_s26 }
  0x1e   : > { %p42_p10 = scmp.eq.s32.totalorder %s41_s28, 0  ;;  %p124_p11 = scmp.eq.s32.totalorder %s123_s29, 0 }
  0x1f   : > { %s1668_s3 = sadd.s32 4294967295, %s1276_s25   ;;  %p142_p13 = scmp.ne.s32.totalorder %s1228_s13, %s1224_s12 }
  0x20   : > { %p137_p12 = scmp.eq.s32.totalorder %s1668_s3, 15  ;;  %s1670_s2 = sadd.s32 4294967294, %s1276_s25  }
  0x21   : > { %s1418_s21 = scalar_select %p42_p10, %s1248_s18, %s44_s4  }
  0x22   : > { %s1421_s19 = scalar_select %p124_p11, %s1232_s14, %s126_s11  }
  0x23   : > { %p1423_p0 = por %p137_p12, %p136_p9  ;;  %p143_p1 = scmp.eq.s32.totalorder %s1670_s2, 15 }
  0x24   : > { %p868_p3 = scmp.ge.s32.totalorder %s1276_s25, 16 }
  0x25   : > { %p1429_p2 = por %p143_p1, %p142_p13 }
  0x26   : > { %159 = sbr.rel (%p868_p3) target bundleno = 79 (0x4f), region = 16 }
  0x2b   : > { %162 = sbr.rel (!%p1388_p4) target bundleno = 61 (0x3d), region = 20  ;;  %s164_s3 = sand.u32 (%p1388_p4), 1, %s1248_s18  }
  0x2c   : > { %s890_s26 = sshll.u32 (%p1388_p4), %s1272_s24, 5  ;;  %s869_s28 = sshll.u32 (%p1388_p4), %s164_s3, 7 }
  0x2d   : > { %s169_s29 = sadd.s32 (%p1388_p4), %s1264_s22, %s890_s26  ;;  %s1672_s0 = sld [smem:[#allocation13_spill]] (%p1388_p4) }
  0x2e   : > { %s872_s4 = sshll.u32 (%p1388_p4), %s169_s29, 3  ;;  %s166_s7 = scalar_lea.vmem (%p1388_p4), [#allocation3], %s869_s28 }
  0x33   : > { %s1442_s8 = scalar_lea.vmem %s1672_s0, %s872_s4 }
  0x34   : > { %v230_v0 = vld [vmem:[%s1442_s8] sm:$0xff]  ;;  %v232_v1 = vld [vmem:[%s1442_s8 + $0x10] sm:$0xff] }
  0x35   : > { %v234_v2 = vld [vmem:[%s1442_s8 + $0x20] sm:$0xff]  ;;  %231 = vst [vmem:[%s166_s7] sm:$0xff] %v230_v0  ;;  %233 = vst [vmem:[%s166_s7 + $0x8] sm:$0xff] %v232_v1  ;;  %v236_v3 = vld [vmem:[%s1442_s8 + $0x30] sm:$0xff] }
  0x36   : > { %235 = vst [vmem:[%s166_s7 + $0x10] sm:$0xff] %v234_v2  ;;  %v238_v4 = vld [vmem:[%s1442_s8 + $0x40] sm:$0xff]  ;;  %v240_v5 = vld [vmem:[%s1442_s8 + $0x50] sm:$0xff]  ;;  %237 = vst [vmem:[%s166_s7 + $0x18] sm:$0xff] %v236_v3 }
  0x37   : > { %239 = vst [vmem:[%s166_s7 + $0x20] sm:$0xff] %v238_v4  ;;  %241 = vst [vmem:[%s166_s7 + $0x28] sm:$0xff] %v240_v5  ;;  %v242_v6 = vld [vmem:[%s1442_s8 + $0x60] sm:$0xff]  ;;  %v244_v7 = vld [vmem:[%s1442_s8 + $0x70] sm:$0xff] }
  0x38   : > { %v246_v8 = vld [vmem:[%s1442_s8 + $0x80] sm:$0xff]  ;;  %243 = vst [vmem:[%s166_s7 + $0x30] sm:$0xff] %v242_v6  ;;  %245 = vst [vmem:[%s166_s7 + $0x38] sm:$0xff] %v244_v7  ;;  %v248_v9 = vld [vmem:[%s1442_s8 + $0x90] sm:$0xff] }
  0x39   : > { %247 = vst [vmem:[%s166_s7 + $0x40] sm:$0xff] %v246_v8  ;;  %v250_v10 = vld [vmem:[%s1442_s8 + $0xa0] sm:$0xff]  ;;  %v252_v11 = vld [vmem:[%s1442_s8 + $0xb0] sm:$0xff]  ;;  %249 = vst [vmem:[%s166_s7 + $0x48] sm:$0xff] %v248_v9 }
  0x3a   : > { %251 = vst [vmem:[%s166_s7 + $0x50] sm:$0xff] %v250_v10  ;;  %253 = vst [vmem:[%s166_s7 + $0x58] sm:$0xff] %v252_v11  ;;  %v254_v12 = vld [vmem:[%s1442_s8 + $0xc0] sm:$0xff]  ;;  %v256_v13 = vld [vmem:[%s1442_s8 + $0xd0] sm:$0xff] }
  0x3b   : > { %v258_v14 = vld [vmem:[%s1442_s8 + $0xe0] sm:$0xff]  ;;  %255 = vst [vmem:[%s166_s7 + $0x60] sm:$0xff] %v254_v12  ;;  %257 = vst [vmem:[%s166_s7 + $0x68] sm:$0xff] %v256_v13  ;;  %v260_v15 = vld [vmem:[%s1442_s8 + $0xf0] sm:$0xff] }
  0x3c   : > { %259 = vst [vmem:[%s166_s7 + $0x70] sm:$0xff] %v258_v14  ;;  %261 = vst [vmem:[%s166_s7 + $0x78] sm:$0xff] %v260_v15 }
  0x3d PF: > { %267 = sbr.rel (!%p1399_p6) target bundleno = 79 (0x4f), region = 58  ;;  %s269_s11 = sand.u32 (%p1399_p6), 1, %s1240_s16  }
  0x3e   : > { %s891_s3 = sshll.u32 (%p1399_p6), %s1264_s22, 5  ;;  %s873_s26 = sshll.u32 (%p1399_p6), %s269_s11, 7 }
  0x3f   : > { %s274_s28 = sadd.s32 (%p1399_p6), %s1268_s23, %s891_s3  ;;  %s1673_s1 = sld [smem:[#allocation14_spill]] (%p1399_p6) }
  0x40   : > { %s876_s29 = sshll.u32 (%p1399_p6), %s274_s28, 3  ;;  %s271_s9 = scalar_lea.vmem (%p1399_p6), [#allocation4], %s873_s26 }
  0x45   : > { %s1468_s2 = scalar_lea.vmem %s1673_s1, %s876_s29 }
  0x46   : > { %v335_v16 = vld [vmem:[%s1468_s2] sm:$0xff]  ;;  %v337_v17 = vld [vmem:[%s1468_s2 + $0x10] sm:$0xff] }
  0x47   : > { %v339_v18 = vld [vmem:[%s1468_s2 + $0x20] sm:$0xff]  ;;  %336 = vst [vmem:[%s271_s9] sm:$0xff] %v335_v16  ;;  %338 = vst [vmem:[%s271_s9 + $0x8] sm:$0xff] %v337_v17  ;;  %v341_v19 = vld [vmem:[%s1468_s2 + $0x30] sm:$0xff] }
  0x48   : > { %340 = vst [vmem:[%s271_s9 + $0x10] sm:$0xff] %v339_v18  ;;  %v343_v20 = vld [vmem:[%s1468_s2 + $0x40] sm:$0xff]  ;;  %v345_v21 = vld [vmem:[%s1468_s2 + $0x50] sm:$0xff]  ;;  %342 = vst [vmem:[%s271_s9 + $0x18] sm:$0xff] %v341_v19 }
  0x49   : > { %344 = vst [vmem:[%s271_s9 + $0x20] sm:$0xff] %v343_v20  ;;  %346 = vst [vmem:[%s271_s9 + $0x28] sm:$0xff] %v345_v21  ;;  %v347_v22 = vld [vmem:[%s1468_s2 + $0x60] sm:$0xff]  ;;  %v349_v23 = vld [vmem:[%s1468_s2 + $0x70] sm:$0xff] }
  0x4a   : > { %v351_v24 = vld [vmem:[%s1468_s2 + $0x80] sm:$0xff]  ;;  %348 = vst [vmem:[%s271_s9 + $0x30] sm:$0xff] %v347_v22  ;;  %350 = vst [vmem:[%s271_s9 + $0x38] sm:$0xff] %v349_v23  ;;  %v353_v25 = vld [vmem:[%s1468_s2 + $0x90] sm:$0xff] }
  0x4b   : > { %352 = vst [vmem:[%s271_s9 + $0x40] sm:$0xff] %v351_v24  ;;  %v355_v26 = vld [vmem:[%s1468_s2 + $0xa0] sm:$0xff]  ;;  %v357_v27 = vld [vmem:[%s1468_s2 + $0xb0] sm:$0xff]  ;;  %354 = vst [vmem:[%s271_s9 + $0x48] sm:$0xff] %v353_v25 }
  0x4c   : > { %356 = vst [vmem:[%s271_s9 + $0x50] sm:$0xff] %v355_v26  ;;  %358 = vst [vmem:[%s271_s9 + $0x58] sm:$0xff] %v357_v27  ;;  %v359_v28 = vld [vmem:[%s1468_s2 + $0xc0] sm:$0xff]  ;;  %v361_v29 = vld [vmem:[%s1468_s2 + $0xd0] sm:$0xff] }
  0x4d   : > { %v363_v30 = vld [vmem:[%s1468_s2 + $0xe0] sm:$0xff]  ;;  %360 = vst [vmem:[%s271_s9 + $0x60] sm:$0xff] %v359_v28  ;;  %362 = vst [vmem:[%s271_s9 + $0x68] sm:$0xff] %v361_v29  ;;  %v365_v31 = vld [vmem:[%s1468_s2 + $0xf0] sm:$0xff] }
  0x4e   : > { %364 = vst [vmem:[%s271_s9 + $0x70] sm:$0xff] %v363_v30  ;;  %366 = vst [vmem:[%s271_s9 + $0x78] sm:$0xff] %v365_v31 }
  0x4f PF: > { %p877_p4 = scmp.ge.s32.totalorder %s1276_s25, 1  ;;  %p377_p5 = scmp.lt.s32.totalorder %s1276_s25, 17 }
  0x51   : > { %p378_p6 = pnand %p877_p4, %p377_p5 }
  0x52   : > { %s384_s8 = sand.u32 (!%p378_p6), 1, %s1244_s17   ;;  %s391_s7 = sand.u32 (!%p378_p6), 1, %s1236_s15  }
  0x53   : > { %381 = sbr.rel (%p378_p6) target bundleno = 397 (0x18d), region = 100  ;;  %s878_s11 = sshll.u32 (!%p378_p6), %s384_s8, 7 }
  0x54   : > { %s879_s3 = sshll.u32 (!%p378_p6), %s391_s7, 7  ;;  %s418_s26 = sand.u32 (!%p378_p6), 1, %s1228_s13  }
  0x55   : > { %p423_p7 = scmp.lt.s32.totalorder (!%p378_p6), %s1256_s20, 1  ;;  %s880_s28 = sshll.u32 (!%p378_p6), %s418_s26, 7 }
  0x56   : > { %s1674_s2 = sld [smem:[#allocation15_spill]] (!%p378_p6)  ;;  %s1501_s0 = scalar_lea.vmem (!%p378_p6), [#allocation3], %s878_s11 }
  0x57   : > { %s1503_s1 = scalar_lea.vmem (!%p378_p6), [#allocation4], %s879_s3  ;;  %s1505_s30 = scalar_lea.vmem (!%p378_p6), [#allocation5], %s880_s28 }
  0x58   : > { %s1495_s29 = scalar_select %p423_p7, %s1256_s20, 1 }
  0x59   : > { %s1675_s15 = sld [smem:[#allocation8_spill]] }
  0x5c   : > { %s425_s9 = scalar_lea.vmem %s1674_s2, %s1495_s29 }
  0x5f   : > { %p881_p8 = scmp.ne.s32.totalorder %s1675_s15, 0 }
  0x61   : > { %430 = sbr.rel (%p881_p8) target bundleno = 111 (0x6f), region = 112 }
  0x66   : > { %v1278_v32 = vmov 0.0  }
  0x67   : > { %431 = vst [vmem:[#allocation2 + $0x30] sm:$0xff] %v1278_v32  ;;  %432 = vst [vmem:[#allocation2] sm:$0xff] %v1278_v32 }
  0x68   : > { %433 = vst [vmem:[#allocation2 + $0x58] sm:$0xff] %v1278_v32  ;;  %434 = vst [vmem:[#allocation2 + $0x18] sm:$0xff] %v1278_v32 }
  0x69   : > { %435 = vst [vmem:[#allocation2 + $0x50] sm:$0xff] %v1278_v32  ;;  %436 = vst [vmem:[#allocation2 + $0x68] sm:$0xff] %v1278_v32 }
  0x6a   : > { %437 = vst [vmem:[#allocation2 + $0x8] sm:$0xff] %v1278_v32  ;;  %438 = vst [vmem:[#allocation2 + $0x48] sm:$0xff] %v1278_v32 }
  0x6b   : > { %439 = vst [vmem:[#allocation2 + $0x40] sm:$0xff] %v1278_v32  ;;  %440 = vst [vmem:[#allocation2 + $0x20] sm:$0xff] %v1278_v32 }
  0x6c   : > { %441 = vst [vmem:[#allocation2 + $0x10] sm:$0xff] %v1278_v32  ;;  %442 = vst [vmem:[#allocation2 + $0x38] sm:$0xff] %v1278_v32 }
  0x6d   : > { %443 = vst [vmem:[#allocation2 + $0x60] sm:$0xff] %v1278_v32  ;;  %444 = vst [vmem:[#allocation2 + $0x70] sm:$0xff] %v1278_v32 }
  0x6e   : > { %445 = vst [vmem:[#allocation2 + $0x78] sm:$0xff] %v1278_v32  ;;  %446 = vst [vmem:[#allocation2 + $0x28] sm:$0xff] %v1278_v32 }
  0x6f PF: > { %v494_v33 = vld [vmem:[%s1503_s1 + $0x78] sm:$0xff]  ;;  %v493_v34 = vld [vmem:[%s1503_s1 + $0x70] sm:$0xff]  ;;  %v492_v35 = vld [vmem:[%s1503_s1 + $0x68] sm:$0xff] }
  0x70   : > { %925 = vmatprep.subr.mxu0 %v494_v33  ;;  %981 = vmatprep.subr.mxu1 %v494_v33  ;;  %v491_v36 = vld [vmem:[%s1503_s1 + $0x60] sm:$0xff]  ;;  %v490_v37 = vld [vmem:[%s1503_s1 + $0x58] sm:$0xff]  ;;  %v489_v38 = vld [vmem:[%s1503_s1 + $0x50] sm:$0xff] }
  0x71   : > { %926 = vmatpush3.msra.mxu0 %v494_v33  ;;  %997 = vmatpush3.msra.mxu1 %v494_v33  ;;  %v488_v39 = vld [vmem:[%s1503_s1 + $0x48] sm:$0xff]  ;;  %v487_v40 = vld [vmem:[%s1503_s1 + $0x40] sm:$0xff]  ;;  %v486_v41 = vld [vmem:[%s1503_s1 + $0x38] sm:$0xff] }
  0x72   : > { %927 = vmatprep.subr.mxu0 %v493_v34  ;;  %982 = vmatprep.subr.mxu1 %v493_v34  ;;  %v485_v42 = vld [vmem:[%s1503_s1 + $0x30] sm:$0xff]  ;;  %v484_v43 = vld [vmem:[%s1503_s1 + $0x28] sm:$0xff]  ;;  %v483_v44 = vld [vmem:[%s1503_s1 + $0x20] sm:$0xff] }
  0x73   : > { %928 = vmatpush3.msra.mxu0 %v493_v34  ;;  %998 = vmatpush3.msra.mxu1 %v493_v34  ;;  %v482_v45 = vld [vmem:[%s1503_s1 + $0x18] sm:$0xff]  ;;  %v481_v46 = vld [vmem:[%s1503_s1 + $0x10] sm:$0xff]  ;;  %v480_v47 = vld [vmem:[%s1503_s1 + $0x8] sm:$0xff] }
  0x74   : > { %929 = vmatprep.subr.mxu0 %v492_v35  ;;  %983 = vmatprep.subr.mxu1 %v492_v35  ;;  %v479_v48 = vld [vmem:[%s1503_s1] sm:$0xff]  ;;  %v464_v51 = vld [vmem:[%s1501_s0 + $0x8] sm:$0xff]  ;;  %v465_v53 = vld [vmem:[%s1501_s0 + $0x10] sm:$0xff] }
  0x75   : > { %930 = vmatpush3.msra.mxu0 %v492_v35  ;;  %999 = vmatpush3.msra.mxu1 %v492_v35  ;;  %v463_v49 = vld [vmem:[%s1501_s0] sm:$0xff]  ;;  %v472_v52 = vld [vmem:[%s1501_s0 + $0x48] sm:$0xff]  ;;  %v473_v54 = vld [vmem:[%s1501_s0 + $0x50] sm:$0xff] }
  0x76   : > { %931 = vmatprep.subr.mxu0 %v491_v36  ;;  %984 = vmatprep.subr.mxu1 %v491_v36  ;;  %v471_v50 = vld [vmem:[%s1501_s0 + $0x40] sm:$0xff]  ;;  %v466_v55 = vld [vmem:[%s1501_s0 + $0x18] sm:$0xff]  ;;  %v468_v59 = vld [vmem:[%s1501_s0 + $0x28] sm:$0xff] }
  0x77   : > { %932 = vmatpush3.msra.mxu0 %v491_v36  ;;  %1000 = vmatpush3.msra.mxu1 %v491_v36  ;;  %v474_v56 = vld [vmem:[%s1501_s0 + $0x58] sm:$0xff]  ;;  %v467_v57 = vld [vmem:[%s1501_s0 + $0x20] sm:$0xff]  ;;  %v476_v60 = vld [vmem:[%s1501_s0 + $0x68] sm:$0xff] }
  0x78   : > { %933 = vmatprep.subr.mxu0 %v490_v37  ;;  %985 = vmatprep.subr.mxu1 %v490_v37  ;;  %v475_v58 = vld [vmem:[%s1501_s0 + $0x60] sm:$0xff]  ;;  %v469_v61 = vld [vmem:[%s1501_s0 + $0x30] sm:$0xff]  ;;  %v470_v63 = vld [vmem:[%s1501_s0 + $0x38] sm:$0xff] }
  0x79   : > { %934 = vmatpush3.msra.mxu0 %v490_v37  ;;  %1001 = vmatpush3.msra.mxu1 %v490_v37  ;;  %v477_v62 = vld [vmem:[%s1501_s0 + $0x70] sm:$0xff]  ;;  %v478_v0 = vld [vmem:[%s1501_s0 + $0x78] sm:$0xff]  ;;  %v448_v1 = vld [vmem:[#allocation2] sm:$0xff]  ;;  %s1676_s0 = sld [smem:[#allocation8_spill]] }
  0x7a   : > { %935 = vmatprep.subr.mxu0 %v489_v38  ;;  %986 = vmatprep.subr.mxu1 %v489_v38  ;;  %v456_v2 = vld [vmem:[#allocation2 + $0x20] sm:$0xff]  ;;  %v447_v5 = vld [vmem:[#allocation2 + $0x30] sm:$0xff]  ;;  %v450_v11 = vld [vmem:[#allocation2 + $0x18] sm:$0xff] }
  0x7b   : > { %936 = vmatpush3.msra.mxu0 %v489_v38  ;;  %1002 = vmatpush3.msra.mxu1 %v489_v38  ;;  %v455_v6 = vld [vmem:[#allocation2 + $0x40] sm:$0xff]  ;;  %v458_v12 = vld [vmem:[#allocation2 + $0x38] sm:$0xff]  ;;  %v457_v18 = vld [vmem:[#allocation2 + $0x10] sm:$0xff] }
  0x7c   : > { %937 = vmatprep.subr.mxu0 %v488_v39  ;;  %987 = vmatprep.subr.mxu1 %v488_v39  ;;  %v449_v17 = vld [vmem:[#allocation2 + $0x58] sm:$0xff]  ;;  %v452_v23 = vld [vmem:[#allocation2 + $0x68] sm:$0xff]  ;;  %v460_v24 = vld [vmem:[#allocation2 + $0x70] sm:$0xff] }
  0x7d   : > { %938 = vmatpush3.msra.mxu0 %v488_v39  ;;  %1003 = vmatpush3.msra.mxu1 %v488_v39  ;;  %v451_v29 = vld [vmem:[#allocation2 + $0x50] sm:$0xff]  ;;  %v459_v30 = vld [vmem:[#allocation2 + $0x60] sm:$0xff]  ;;  %v454_v35 = vld [vmem:[#allocation2 + $0x48] sm:$0xff] }
  0x7e   : > { %939 = vmatprep.subr.mxu0 %v487_v40  ;;  %988 = vmatprep.subr.mxu1 %v487_v40  ;;  %v462_v36 = vld [vmem:[#allocation2 + $0x28] sm:$0xff] }
  0x7f   : > { %940 = vmatpush3.msra.mxu0 %v487_v40  ;;  %1004 = vmatpush3.msra.mxu1 %v487_v40  ;;  %p882_p9 = scmp.ne.s32.totalorder %s1676_s0, 1 }
  0x80   : > { %941 = vmatprep.subr.mxu0 %v486_v41  ;;  %989 = vmatprep.subr.mxu1 %v486_v41 }
  0x81   : > { %942 = vmatpush3.msra.mxu0 %v486_v41  ;;  %1005 = vmatpush3.msra.mxu1 %v486_v41  ;;  %v453_v41 = vld [vmem:[#allocation2 + $0x8] sm:$0xff] }
  0x82   : > { %943 = vmatprep.subr.mxu0 %v485_v42  ;;  %990 = vmatprep.subr.mxu1 %v485_v42 }
  0x83   : > { %944 = vmatpush3.msra.mxu0 %v485_v42  ;;  %1006 = vmatpush3.msra.mxu1 %v485_v42  ;;  %v461_v42 = vld [vmem:[#allocation2 + $0x78] sm:$0xff] }
  0x84   : > { %945 = vmatprep.subr.mxu0 %v484_v43  ;;  %991 = vmatprep.subr.mxu1 %v484_v43 }
  0x85   : > { %946 = vmatpush3.msra.mxu0 %v484_v43  ;;  %1007 = vmatpush3.msra.mxu1 %v484_v43 }
  0x86   : > { %947 = vmatprep.subr.mxu0 %v483_v44  ;;  %992 = vmatprep.subr.mxu1 %v483_v44 }
  0x87   : > { %948 = vmatpush3.msra.mxu0 %v483_v44  ;;  %1008 = vmatpush3.msra.mxu1 %v483_v44 }
  0x88   : > { %949 = vmatprep.subr.mxu0 %v482_v45  ;;  %993 = vmatprep.subr.mxu1 %v482_v45 }
  0x89   : > { %950 = vmatpush3.msra.mxu0 %v482_v45  ;;  %1009 = vmatpush3.msra.mxu1 %v482_v45 }
  0x8a   : > { %951 = vmatprep.subr.mxu0 %v481_v46  ;;  %994 = vmatprep.subr.mxu1 %v481_v46 }
  0x8b   : > { %952 = vmatpush3.msra.mxu0 %v481_v46  ;;  %1010 = vmatpush3.msra.mxu1 %v481_v46 }
  0x8c   : > { %953 = vmatprep.subr.mxu0 %v480_v47  ;;  %995 = vmatprep.subr.mxu1 %v480_v47 }
  0x8d   : > { %954 = vmatpush3.msra.mxu0 %v480_v47  ;;  %1011 = vmatpush3.msra.mxu1 %v480_v47 }
  0x8e   : > { %955 = vmatprep.subr.mxu0 %v479_v48  ;;  %996 = vmatprep.subr.mxu1 %v479_v48 }
  0x8f   : > { %956 = vmatpush3.msra.mxu0 %v479_v48  ;;  %1012 = vmatpush3.msra.mxu1 %v479_v48 }
  0x90   : > { %957 = vmatprep.mubr.f32.mxu0 %v463_v49  ;;  %969 = vmatprep.mubr.f32.mxu1 %v471_v50 }
  0x91   : > { %958 = vmatmul.mubr.f32.vlgmr.msra.gmra.mxu0 %v464_v51  ;;  %970 = vmatmul.mubr.f32.vlgmr.msra.gmra.mxu1 %v472_v52 }
  0x92   : > { %960 = vmatprep.mubr.f32.mxu0 %v465_v53  ;;  %972 = vmatprep.mubr.f32.mxu1 %v473_v54 }
  0x95   : > { %961 = vmatmul.mubr.f32.gmra.mxu0 %v466_v55  ;;  %973 = vmatmul.mubr.f32.gmra.mxu1 %v474_v56 }
  0x96   : > { %963 = vmatprep.mubr.f32.mxu0 %v467_v57  ;;  %975 = vmatprep.mubr.f32.mxu1 %v475_v58 }
  0x99   : > { %964 = vmatmul.mubr.f32.gmra.mxu0 %v468_v59  ;;  %976 = vmatmul.mubr.f32.gmra.mxu1 %v476_v60 }
  0x9a   : > { %966 = vmatprep.mubr.f32.mxu0 %v469_v61  ;;  %978 = vmatprep.mubr.f32.mxu1 %v477_v62 }
  0x9d   : > { %967 = vmatmul.mubr.f32.gmra.mxu0 %v470_v63  ;;  %979 = vmatmul.mubr.f32.gmra.mxu1 %v478_v0 }
 0x151   : > { %v959_v3 = vpop.f32.mrf.mxu0  ;;  %v971_v4 = vpop.f32.mrf.mxu1 }
 0x152   : > { %v641_v7 = vadd.f32 %v959_v3, %v448_v1  ;;  %v649_v8 = vadd.f32 %v971_v4, %v456_v2 }
 0x153   : > { %v561_v9 = vpop.f32.mrf.mxu0  ;;  %v601_v10 = vpop.f32.mrf.mxu1 }
 0x154   : > { %657 = vst [vmem:[#allocation2] sm:$0xff] %v641_v7  ;;  %665 = vst [vmem:[#allocation2 + $0x20] sm:$0xff] %v649_v8  ;;  %v640_v13 = vadd.f32 %v561_v9, %v447_v5  ;;  %v648_v14 = vadd.f32 %v601_v10, %v455_v6 }
 0x155   : > { %v962_v15 = vpop.f32.mrf.mxu0  ;;  %v974_v16 = vpop.f32.mrf.mxu1 }
 0x156   : > { %656 = vst [vmem:[#allocation2 + $0x30] sm:$0xff] %v640_v13  ;;  %664 = vst [vmem:[#allocation2 + $0x40] sm:$0xff] %v648_v14  ;;  %v643_v19 = vadd.f32 %v962_v15, %v450_v11  ;;  %v651_v20 = vadd.f32 %v974_v16, %v458_v12 }
 0x157   : > { %v571_v21 = vpop.f32.mrf.mxu0  ;;  %v611_v22 = vpop.f32.mrf.mxu1 }
 0x158   : > { %659 = vst [vmem:[#allocation2 + $0x18] sm:$0xff] %v643_v19  ;;  %667 = vst [vmem:[#allocation2 + $0x38] sm:$0xff] %v651_v20  ;;  %v642_v25 = vadd.f32 %v571_v21, %v449_v17  ;;  %v650_v26 = vadd.f32 %v611_v22, %v457_v18 }
 0x159   : > { %v965_v27 = vpop.f32.mrf.mxu0  ;;  %v977_v28 = vpop.f32.mrf.mxu1 }
 0x15a   : > { %658 = vst [vmem:[#allocation2 + $0x58] sm:$0xff] %v642_v25  ;;  %666 = vst [vmem:[#allocation2 + $0x10] sm:$0xff] %v650_v26  ;;  %v645_v31 = vadd.f32 %v965_v27, %v452_v23  ;;  %v653_v32 = vadd.f32 %v977_v28, %v460_v24 }
 0x15b   : > { %v581_v33 = vpop.f32.mrf.mxu0  ;;  %v621_v34 = vpop.f32.mrf.mxu1 }
 0x15c   : > { %661 = vst [vmem:[#allocation2 + $0x68] sm:$0xff] %v645_v31  ;;  %669 = vst [vmem:[#allocation2 + $0x70] sm:$0xff] %v653_v32  ;;  %v644_v37 = vadd.f32 %v581_v33, %v451_v29  ;;  %v652_v38 = vadd.f32 %v621_v34, %v459_v30 }
 0x15d   : > { %v968_v39 = vpop.f32.mrf.mxu0  ;;  %v980_v40 = vpop.f32.mrf.mxu1 }
 0x15e   : > { %660 = vst [vmem:[#allocation2 + $0x50] sm:$0xff] %v644_v37  ;;  %668 = vst [vmem:[#allocation2 + $0x60] sm:$0xff] %v652_v38  ;;  %v647_v43 = vadd.f32 %v968_v39, %v454_v35  ;;  %v655_v44 = vadd.f32 %v980_v40, %v462_v36  ;;  %675 = sbr.rel (%p882_p9) target bundleno = 366 (0x16e), region = 116 }
 0x15f   : > { %v591_v45 = vpop.f32.mrf.mxu0  ;;  %v631_v46 = vpop.f32.mrf.mxu1 }
 0x160   : > { %663 = vst [vmem:[#allocation2 + $0x48] sm:$0xff] %v647_v43  ;;  %671 = vst [vmem:[#allocation2 + $0x28] sm:$0xff] %v655_v44  ;;  %v646_v47 = vadd.f32 %v591_v45, %v453_v41  ;;  %v654_v48 = vadd.f32 %v631_v46, %v461_v42 }
 0x162   : > { %662 = vst [vmem:[#allocation2 + $0x8] sm:$0xff] %v646_v47  ;;  %670 = vst [vmem:[#allocation2 + $0x78] sm:$0xff] %v654_v48 }
 0x163   : > { %v676_v49 = vld [vmem:[#allocation2 + $0x30] sm:$0xff]  ;;  %v883_v50 = vld [vmem:[%s425_s9] ss:$0 sm:$0xff]  ;;  %v678_v54 = vld [vmem:[#allocation2 + $0x58] sm:$0xff] }
 0x164   : > { %v677_v51 = vld [vmem:[#allocation2] sm:$0xff]  ;;  %v699_v52 = vadd.f32 %v883_v50, %v676_v49  ;;  %v679_v55 = vld [vmem:[#allocation2 + $0x18] sm:$0xff]  ;;  %v701_v57 = vadd.f32 %v883_v50, %v678_v54  ;;  %v681_v60 = vld [vmem:[#allocation2 + $0x68] sm:$0xff] }
 0x165   : > { %v700_v53 = vadd.f32 %v883_v50, %v677_v51  ;;  %v680_v56 = vld [vmem:[#allocation2 + $0x50] sm:$0xff]  ;;  %v702_v58 = vadd.f32 %v883_v50, %v679_v55  ;;  %v704_v63 = vadd.f32 %v883_v50, %v681_v60  ;;  %v684_v2 = vld [vmem:[#allocation2 + $0x40] sm:$0xff]  ;;  %v687_v8 = vld [vmem:[#allocation2 + $0x38] sm:$0xff] }
 0x166   : > { %v703_v59 = vadd.f32 %v883_v50, %v680_v56  ;;  %715 = vst [vmem:[%s1505_s30] sm:$0xff] %v699_v52  ;;  %v685_v3 = vld [vmem:[#allocation2 + $0x20] sm:$0xff]  ;;  %v686_v4 = vld [vmem:[#allocation2 + $0x10] sm:$0xff]  ;;  %717 = vst [vmem:[%s1505_s30 + $0x10] sm:$0xff] %v701_v57  ;;  %v707_v5 = vadd.f32 %v883_v50, %v684_v2  ;;  %v710_v11 = vadd.f32 %v883_v50, %v687_v8 }
 0x167   : > { %v683_v62 = vld [vmem:[#allocation2 + $0x48] sm:$0xff]  ;;  %716 = vst [vmem:[%s1505_s30 + $0x8] sm:$0xff] %v700_v53  ;;  %718 = vst [vmem:[%s1505_s30 + $0x18] sm:$0xff] %v702_v58  ;;  %v708_v6 = vadd.f32 %v883_v50, %v685_v3  ;;  %v709_v7 = vadd.f32 %v883_v50, %v686_v4  ;;  %v688_v9 = vld [vmem:[#allocation2 + $0x60] sm:$0xff] }
 0x168   : > { %v706_v1 = vadd.f32 %v883_v50, %v683_v62  ;;  %719 = vst [vmem:[%s1505_s30 + $0x20] sm:$0xff] %v703_v59  ;;  %v689_v10 = vld [vmem:[#allocation2 + $0x70] sm:$0xff]  ;;  %720 = vst [vmem:[%s1505_s30 + $0x28] sm:$0xff] %v704_v63  ;;  %v711_v12 = vadd.f32 %v883_v50, %v688_v9  ;;  %v691_v15 = vld [vmem:[#allocation2 + $0x28] sm:$0xff] }
 0x169   : > { %v682_v61 = vld [vmem:[#allocation2 + $0x8] sm:$0xff]  ;;  %v712_v13 = vadd.f32 %v883_v50, %v689_v10  ;;  %v690_v14 = vld [vmem:[#allocation2 + $0x78] sm:$0xff]  ;;  %723 = vst [vmem:[%s1505_s30 + $0x40] sm:$0xff] %v707_v5  ;;  %724 = vst [vmem:[%s1505_s30 + $0x48] sm:$0xff] %v708_v6  ;;  %v714_v17 = vadd.f32 %v883_v50, %v691_v15 }
 0x16a   : > { %v705_v0 = vadd.f32 %v883_v50, %v682_v61  ;;  %722 = vst [vmem:[%s1505_s30 + $0x38] sm:$0xff] %v706_v1  ;;  %725 = vst [vmem:[%s1505_s30 + $0x50] sm:$0xff] %v709_v7  ;;  %v713_v16 = vadd.f32 %v883_v50, %v690_v14 }
 0x16b   : > { %726 = vst [vmem:[%s1505_s30 + $0x58] sm:$0xff] %v710_v11  ;;  %727 = vst [vmem:[%s1505_s30 + $0x60] sm:$0xff] %v711_v12 }
 0x16c   : > { %721 = vst [vmem:[%s1505_s30 + $0x30] sm:$0xff] %v705_v0  ;;  %728 = vst [vmem:[%s1505_s30 + $0x68] sm:$0xff] %v712_v13 }
 0x16d   : > { %729 = vst [vmem:[%s1505_s30 + $0x70] sm:$0xff] %v713_v16  ;;  %730 = vst [vmem:[%s1505_s30 + $0x78] sm:$0xff] %v714_v17 }
 0x16e PF: > { %s1678_s7 = sld [smem:[#allocation9_spill]]  ;;  %s747_s28 = sshll.u32 %s1505_s30, 4  ;;  %s1565_s28 = int_to_ptr.vmem [resolvable:$true] %s747_s28 }
 0x16f   : > { %s1679_s2 = sld [smem:[#allocation16_spill]]  ;;  %s1574_s15 = scalar_lea.sflag [#allocation6], %s418_s26 }
 0x170   : > { %s1136_s0 = scalar_lea.vmem %s1565_s28, 2048 }
 0x171   : > { %p1137_p10 = scmp.ne.s32.totalorder %s1565_s28, %s1136_s0 }
 0x173   : > { %p1138_p11 = pnand %p1137_p10, %p1423_p0 }
 0x174   : > { %s892_s11 = sshll.u32 %s1678_s7, 5 }
 0x175   : > { %s744_s3 = sadd.s32 %s1256_s20, %s892_s11  ;;  %p1139_p12 = pneg %p1138_p11 }
 0x176   : > { %s887_s29 = sshll.u32 %s744_s3, 7  ;;  %s1279_s20 = smov [#allocation5]  }
 0x177   : > { %s1570_s9 = scalar_lea.hbm %s1679_s2, %s887_s29  ;;  %s1140_s30 = sshll.u32 %s1279_s20, 4  ;;  %s1141_s30 = int_to_ptr.vmem [resolvable:$false] %s1140_s30 }
 0x178   : > { %s1142_s1 = scalar_lea.vmem %s1141_s30, 4096  ;;  %p1143_p13 = scmp.lt.s32.totalorder %s1565_s28, %s1141_s30 }
 0x179   : > { %p1144_p1 = scmp.lt.s32.totalorder %s1142_s1, %s1136_s0 }
 0x17b   : > { %p1145_p3 = por %p1144_p1, %p1143_p13 }
 0x17d   : > { %p1146_p4 = pnand %p1145_p3, %p1139_p12 }
 0x17f   : > { %1149 = shalt.err (!%p1146_p4)
}
 0x180   : > { %s1150_s26 = scalar_lea.hbm %s1570_s9, 2048  ;;  %s1154_s7 = scalar_lea.hbm %s1679_s2, 16384 }
 0x181   : > { %p1151_p5 = scmp.ne.s32.totalorder %s1570_s9, %s1150_s26  ;;  %p1155_p8 = scmp.lt.s32.totalorder %s1570_s9, %s1679_s2 }
 0x182   : > { %p1156_p9 = scmp.lt.s32.totalorder %s1154_s7, %s1150_s26 }
 0x183   : > { %p1152_p6 = pnand %p1151_p5, %p1423_p0 }
 0x184   : > { %p1157_p10 = por %p1156_p9, %p1155_p8 }
 0x185   : > { %p1153_p7 = pneg %p1152_p6 }
 0x187   : > { %p1158_p11 = pnand %p1157_p10, %p1153_p7 }
 0x189   : > { %1161 = shalt.err (!%p1158_p11)
}
 0x18a   : > { %s1280_s29 = smov 128   ;;  %s1281_s4 = smov 256  }
 0x18b   : > { %s1282_s5 = smov 8  }
 0x18c   : > { %1013 = dma.vmem_to_hbm [thread:$0]  (%p1423_p0), %s1565_s28, 2048, %s1570_s9, %s1574_s15, %s1280_s29, %s1281_s4, %s1282_s5  }
 0x18d PF: > { %p1019_p12 = scmp.ge.s32.totalorder %s1276_s25, 2  ;;  %s762_s0 = sand.u32 1, %s1224_s12  }
 0x18e   : > { %s763_s20 = scalar_lea.sflag [#allocation6], %s762_s0 }
 0x18f   : > { %p1016_p13 = pnand %p1019_p12, %p1429_p2 }
 0x191   : > { %p1017_p1 = pneg %p1016_p13 }
 0x193   : > { %1219 = dma.done.wait (%p1017_p1), %s763_s20, 2048  }
 0x194   : > { %1221 = vsyncadd (%p1017_p1), %s763_s20, 4294965248  ;;  %s16_s25 = sadd.s32 1, %s1276_s25   ;;  %s1681_s10 = sld [smem:[#allocation10_spill]] }
 0x195   : > { %p1602_p3 = scmp.ge.s32.totalorder %s16_s25, 18   ;;  %s1682_s6 = sld [smem:[#allocation11_spill]] }
 0x196   : > { %s1683_s28 = sld [smem:[#allocation12_spill]]  ;;  %s1684_s12 = smov %s1228_s13 }
 0x197   : > { %s1685_s13 = smov %s1232_s14  ;;  %s1686_s14 = smov %s1421_s19 }
 0x198   : > { %s1687_s15 = smov %s1240_s16  ;;  %s1688_s16 = smov %s1407_s27 }
 0x199   : > { %s1689_s17 = smov %s1248_s18  ;;  %s1690_s18 = smov %s1418_s21 }
 0x19a   : > { %s1691_s19 = smov %s1264_s22  ;;  %s1692_s20 = smov %s1268_s23 }
 0x19b   : > { %s1693_s21 = smov %s1272_s24  ;;  %s1694_s22 = smov %s1681_s10 }
 0x19c   : > { %s1695_s23 = smov %s1682_s6  ;;  %s1696_s24 = smov %s1683_s28 }
 0x19d   :  { %15 = sbr.rel (!%p1602_p3) target bundleno = 13 (0xd), region = 167 }
 0x1a2   :  { %768 = vsyncpa [#allocation6], 1 }
 0x1a3   :  { %770 = vsyncpa [#allocation6 + $0x1], 1 }

// kernel: attention_forward.4
= control target key start
LH: loop header
LB: loop body
LE: loop exit
PB: predicated region body
PF: predicated region fallthrough
CT: control target
= control target key end

     0   :  { %s11023_s0 = inlined_call_operand.vmem [shape: f32[2,256,768], index: 0, kind: input, shape index: {}, may-alias: {0,1,2}]   ;;  %s11024_s1 = inlined_call_operand.vmem [shape: f32[2,256,768], index: 1, kind: input, shape index: {}, may-alias: {0,1,2}]   ;;  %s11025_s2 = inlined_call_operand.vmem [shape: f32[2,256,768], index: 2, kind: input, shape index: {}, may-alias: {0,1,2}]   ;;  %s11026_s3 = inlined_call_operand.vmem [shape: f32[2,256,256], index: 3, kind: output, shape index: {}]  }
   0x1   :  { %11135 = sst [smem:[#allocation93_spill]] %s11024_s1 }
   0x2   :  { %11136 = sst [smem:[#allocation94_spill]] %s11025_s2 }
   0x3   :  { %11137 = sst [smem:[#allocation95_spill]] %s11026_s3 }
   0x4   :  { %s7513_s12 = smov 0   ;;  %s7515_s13 = smov 0  }
   0x5   :  { %s7517_s14 = smov 0   ;;  %s7519_s15 = smov 0  }
   0x6   :  { %s7521_s16 = smov 0   ;;  %s7523_s17 = smov 0  }
   0x7   :  { %s7525_s18 = smov 0   ;;  %s7527_s19 = smov 0  }
   0x8   :  { %s7529_s20 = smov 0   ;;  %s7531_s21 = smov 0  }
   0x9   :  { %s7533_s22 = smov 0   ;;  %s7535_s23 = smov 0  }
   0xa   :  { %s7537_s24 = smov 0   ;;  %s7539_s25 = smov 0  }
   0xb   :  { %s7541_s26 = smov 0  }
   0xc LB: > { %11138 = sst [smem:[#allocation9_spill]] %s7433_s14  ;;  %s28_s28 = sadd.s32 1, %s7465_s22  ;;  %s7481_s26 = sphi %s7541_s26, %s13_s26   ;;  %s7477_s25 = sphi %s7539_s25, %s11535_s25   ;;  %s7473_s24 = sphi %s7537_s24, %s11534_s24   ;;  %s7469_s23 = sphi %s7535_s23, %s11533_s23   ;;  %s7465_s22 = sphi %s7533_s22, %s11532_s22   ;;  %s7461_s21 = sphi %s7531_s21, %s11531_s21   ;;  %s7457_s20 = sphi %s7529_s20, %s11530_s20   ;;  %s7453_s19 = sphi %s7527_s19, %s11529_s19   ;;  %s7449_s18 = sphi %s7525_s18, %s11528_s18   ;;  %s7445_s17 = sphi %s7523_s17, %s11527_s17   ;;  %s7441_s16 = sphi %s7521_s16, %s11526_s16   ;;  %s7437_s15 = sphi %s7519_s15, %s11525_s15   ;;  %s7433_s14 = sphi %s7517_s14, %s11524_s14   ;;  %s7429_s13 = sphi %s7515_s13, %s11523_s13   ;;  %s7425_s12 = sphi %s7513_s12, %s11522_s12  }
   0xd   : > { %11139 = sst [smem:[#allocation10_spill]] %s7449_s18  ;;  %p29_p0 = scmp.ge.s32.totalorder %s28_s28, 2 }
   0xe   : > { %11140 = sst [smem:[#allocation11_spill]] %s7453_s19  ;;  %s31_s29 = sadd.s32 1, %s7469_s23 }
   0xf   : > { %11141 = sst [smem:[#allocation12_spill]] %s7457_s20  ;;  %s35_s30 = sadd.s32 1, %s7473_s24 }
  0x10   : > { %11142 = sst [smem:[#allocation13_spill]] %s7461_s21  ;;  %s39_s4 = sadd.s32 1, %s7477_s25 }
  0x11   : > { %s11537_s28 = smov (%p29_p0, %s28_s28), 0  ;;  %s11539_s29 = smov (!%p29_p0, %s31_s29), %s7469_s23 }
  0x12   : > { %11143 = sst [smem:[#allocation14_spill]] %s11537_s28  ;;  %p57_p1 = scmp.ne.s32.totalorder %s7445_s17, %s7441_s16 }
  0x13   : > { %p33_p2 = scmp.ge.s32.totalorder %s11539_s29, 2  ;;  %p58_p3 = scmp.eq.s32.totalorder %s7481_s26, 0 }
  0x14   : > { %s73_s6 = sadd.s32 2, %s7473_s24  ;;  %s76_s7 = ssub.s32 %s7465_s22, %s11537_s28 }
  0x15   : > { %s11541_s29 = smov (%p33_p2, %s11539_s29), 0  ;;  %s11543_s30 = smov (!%p33_p2, %s35_s30), %s7473_s24 }
  0x16   : > { %11144 = sst [smem:[#allocation15_spill]] %s11541_s29  ;;  %s44_s8 = ssub.s32 %s7469_s23, %s11541_s29 }
  0x17   : > { %p7613_p4 = por %p58_p3, %p57_p1  ;;  %p37_p5 = scmp.ge.s32.totalorder %s11543_s30, 2 }
  0x18   : > { %s82_s10 = sadd.s32 1, %s7437_s15  ;;  %p89_p6 = scmp.ne.s32.totalorder %s7437_s15, %s7433_s14 }
  0x19   : > { %s105_s11 = sadd.s32 4, %s7473_s24  ;;  %s11545_s30 = smov (%p37_p5, %s11543_s30), 0 }
  0x1a   : > { %11146 = sst [smem:[#allocation16_spill]] %s11545_s30  ;;  %s11547_s4 = smov (!%p37_p5, %s39_s4), %s7477_s25 }
  0x1b   : > { %s46_s27 = ssub.s32 %s7473_s24, %s11545_s30  ;;  %s74_s5 = sadd.s32 2, %s11545_s30 }
  0x1c   : > { %p41_p7 = scmp.ge.s32.totalorder %s11547_s4, 2  ;;  %s78_s29 = ssub.s32 %s73_s6, %s74_s5 }
  0x1d   : > { %p7629_p8 = por %p89_p6, %p58_p3  ;;  %s106_s3 = sadd.s32 4, %s11545_s30 }
  0x1e   : > { %s11549_s4 = smov (%p41_p7, %s11547_s4), 0  ;;  %s110_s20 = ssub.s32 %s105_s11, %s106_s3 }
  0x1f   : > { %11148 = sst [smem:[#allocation17_spill]] %s11549_s4  ;;  %s114_s21 = sadd.s32 1, %s7429_s13 }
  0x20   : > { %s43_s19 = ssub.s32 %s7477_s25, %s11549_s4  ;;  %p121_p9 = scmp.ne.s32.totalorder %s7429_s13, %s7425_s12 }
  0x21   : > { %s45_s5 = sor.u32 %s44_s8, %s43_s19  ;;  %s77_s6 = sor.u32 %s76_s7, %s43_s19 }
  0x22   : > { %s47_s18 = sor.u32 %s46_s27, %s45_s5  ;;  %s79_s14 = sor.u32 %s78_s29, %s77_s6 }
  0x23   : > { %p48_p10 = scmp.eq.s32.totalorder %s47_s18, 0  ;;  %p80_p11 = scmp.eq.s32.totalorder %s79_s14, 0 }
  0x24   : > { %s111_s2 = sor.u32 %s110_s20, %s77_s6  ;;  %p7643_p12 = por %p121_p9, %p58_p3 }
  0x25   : > { %s11150_s1 = sadd.s32 1, %s7445_s17  ;;  %p112_p13 = scmp.eq.s32.totalorder %s111_s2, 0 }
  0x26   : > { %s7650_s3 = scalar_select %p48_p10, %s7445_s17, %s11150_s1  }
  0x27   : > { %s7653_s11 = scalar_select %p80_p11, %s7437_s15, %s82_s10  }
  0x28   : > { %s11151_s4 = sadd.s32 4294967295, %s7481_s26   ;;  %p5891_p3 = scmp.ge.s32.totalorder %s7481_s26, 16 }
  0x29   : > { %p155_p0 = scmp.eq.s32.totalorder %s11151_s4, 15 }
  0x2a   : > { %s7658_s8 = scalar_select %p112_p13, %s7429_s13, %s114_s21  }
  0x2b   : > { %p7663_p2 = por %p155_p0, %p57_p1  ;;  %177 = sbr.rel (%p5891_p3) target bundleno = 100 (0x64), region = 16 }
  0x30   : > { %180 = sbr.rel (!%p7613_p4) target bundleno = 64 (0x40), region = 20  ;;  %s182_s1 = sand.u32 (%p7613_p4), 1, %s7445_s17  }
  0x31   : > { %s6779_s2 = smul.u32 (%p7613_p4), 96, %s7469_s23  ;;  %s5892_s14 = sshll.u32 (%p7613_p4), %s182_s1, 7 }
  0x32   : > { %s6780_s19 = smul.u32 (%p7613_p4), 192, %s7477_s25  ;;  %s184_s9 = scalar_lea.vmem (%p7613_p4), [#allocation5], %s5892_s14 }
  0x33   : > { %s187_s20 = sadd.s32 (%p7613_p4), %s7473_s24, %s6779_s2 }
  0x34   : > { %s189_s21 = sadd.s32 (%p7613_p4), %s6780_s19, %s187_s20 }
  0x35   : > { %s5895_s27 = sshll.u32 %s189_s21, 3 }
  0x36   : > { %s7677_s7 = scalar_lea.vmem %s11023_s0, %s5895_s27 }
  0x37   : > { %v250_v0 = vld [vmem:[%s7677_s7] sm:$0xff]  ;;  %v252_v1 = vld [vmem:[%s7677_s7 + $0x30] sm:$0xff] }
  0x38   : > { %v254_v2 = vld [vmem:[%s7677_s7 + $0x60] sm:$0xff]  ;;  %251 = vst [vmem:[%s184_s9] sm:$0xff] %v250_v0  ;;  %253 = vst [vmem:[%s184_s9 + $0x8] sm:$0xff] %v252_v1  ;;  %v256_v3 = vld [vmem:[%s7677_s7 + $0x90] sm:$0xff] }
  0x39   : > { %255 = vst [vmem:[%s184_s9 + $0x10] sm:$0xff] %v254_v2  ;;  %v258_v4 = vld [vmem:[%s7677_s7 + $0xc0] sm:$0xff]  ;;  %v260_v5 = vld [vmem:[%s7677_s7 + $0xf0] sm:$0xff]  ;;  %257 = vst [vmem:[%s184_s9 + $0x18] sm:$0xff] %v256_v3 }
  0x3a   : > { %259 = vst [vmem:[%s184_s9 + $0x20] sm:$0xff] %v258_v4  ;;  %261 = vst [vmem:[%s184_s9 + $0x28] sm:$0xff] %v260_v5  ;;  %v262_v6 = vld [vmem:[%s7677_s7 + $0x120] sm:$0xff]  ;;  %v264_v7 = vld [vmem:[%s7677_s7 + $0x150] sm:$0xff] }
  0x3b   : > { %v266_v8 = vld [vmem:[%s7677_s7 + $0x180] sm:$0xff]  ;;  %263 = vst [vmem:[%s184_s9 + $0x30] sm:$0xff] %v262_v6  ;;  %265 = vst [vmem:[%s184_s9 + $0x38] sm:$0xff] %v264_v7  ;;  %v268_v9 = vld [vmem:[%s7677_s7 + $0x1b0] sm:$0xff] }
  0x3c   : > { %267 = vst [vmem:[%s184_s9 + $0x40] sm:$0xff] %v266_v8  ;;  %v270_v10 = vld [vmem:[%s7677_s7 + $0x1e0] sm:$0xff]  ;;  %v272_v11 = vld [vmem:[%s7677_s7 + $0x210] sm:$0xff]  ;;  %269 = vst [vmem:[%s184_s9 + $0x48] sm:$0xff] %v268_v9 }
  0x3d   : > { %271 = vst [vmem:[%s184_s9 + $0x50] sm:$0xff] %v270_v10  ;;  %273 = vst [vmem:[%s184_s9 + $0x58] sm:$0xff] %v272_v11  ;;  %v274_v12 = vld [vmem:[%s7677_s7 + $0x240] sm:$0xff]  ;;  %v276_v13 = vld [vmem:[%s7677_s7 + $0x270] sm:$0xff] }
  0x3e   : > { %v278_v14 = vld [vmem:[%s7677_s7 + $0x2a0] sm:$0xff]  ;;  %275 = vst [vmem:[%s184_s9 + $0x60] sm:$0xff] %v274_v12  ;;  %277 = vst [vmem:[%s184_s9 + $0x68] sm:$0xff] %v276_v13  ;;  %v280_v15 = vld [vmem:[%s7677_s7 + $0x2d0] sm:$0xff] }
  0x3f   : > { %279 = vst [vmem:[%s184_s9 + $0x70] sm:$0xff] %v278_v14  ;;  %281 = vst [vmem:[%s184_s9 + $0x78] sm:$0xff] %v280_v15 }
  0x40 PF: > { %287 = sbr.rel (!%p7629_p8) target bundleno = 82 (0x52), region = 58  ;;  %s289_s10 = sand.u32 (%p7629_p8), 1, %s7437_s15  }
  0x41   : > { %s5776_s5 = smul.u32 (%p7629_p8), 96, %s7465_s22  ;;  %s5896_s6 = sshll.u32 (%p7629_p8), %s289_s10, 7 }
  0x42   : > { %s5778_s1 = smul.u32 (%p7629_p8), 192, %s7477_s25  ;;  %s11153_s27 = sld [smem:[#allocation93_spill]] (%p7629_p8) }
  0x43   : > { %s5777_s2 = sadd.s32 (%p7629_p8), %s7473_s24, %s5776_s5  ;;  %s291_s28 = scalar_lea.vmem (%p7629_p8), [#allocation6], %s5896_s6 }
  0x44   : > { %s5779_s14 = sadd.s32 (%p7629_p8), %s5778_s1, %s5777_s2 }
  0x45   : > { %s5897_s19 = sshll.u32 %s5779_s14, 3 }
  0x48   : > { %s7704_s29 = scalar_lea.vmem %s11153_s27, %s5897_s19 }
  0x49   : > { %v5898_v16 = vld [vmem:[%s7704_s29 + $0x10] sm:$0xff]  ;;  %v5899_v17 = vld [vmem:[%s7704_s29 + $0x40] sm:$0xff] }
  0x4a   : > { %v5900_v18 = vld [vmem:[%s7704_s29 + $0x70] sm:$0xff]  ;;  %359 = vst [vmem:[%s291_s28] sm:$0xff] %v5898_v16  ;;  %361 = vst [vmem:[%s291_s28 + $0x8] sm:$0xff] %v5899_v17  ;;  %v5901_v19 = vld [vmem:[%s7704_s29 + $0xa0] sm:$0xff] }
  0x4b   : > { %363 = vst [vmem:[%s291_s28 + $0x10] sm:$0xff] %v5900_v18  ;;  %v5902_v20 = vld [vmem:[%s7704_s29 + $0xd0] sm:$0xff]  ;;  %v5903_v21 = vld [vmem:[%s7704_s29 + $0x100] sm:$0xff]  ;;  %365 = vst [vmem:[%s291_s28 + $0x18] sm:$0xff] %v5901_v19 }
  0x4c   : > { %367 = vst [vmem:[%s291_s28 + $0x20] sm:$0xff] %v5902_v20  ;;  %369 = vst [vmem:[%s291_s28 + $0x28] sm:$0xff] %v5903_v21  ;;  %v5904_v22 = vld [vmem:[%s7704_s29 + $0x130] sm:$0xff]  ;;  %v5905_v23 = vld [vmem:[%s7704_s29 + $0x160] sm:$0xff] }
  0x4d   : > { %v5906_v24 = vld [vmem:[%s7704_s29 + $0x190] sm:$0xff]  ;;  %371 = vst [vmem:[%s291_s28 + $0x30] sm:$0xff] %v5904_v22  ;;  %373 = vst [vmem:[%s291_s28 + $0x38] sm:$0xff] %v5905_v23  ;;  %v5907_v25 = vld [vmem:[%s7704_s29 + $0x1c0] sm:$0xff] }
  0x4e   : > { %375 = vst [vmem:[%s291_s28 + $0x40] sm:$0xff] %v5906_v24  ;;  %v5908_v26 = vld [vmem:[%s7704_s29 + $0x1f0] sm:$0xff]  ;;  %v5909_v27 = vld [vmem:[%s7704_s29 + $0x220] sm:$0xff]  ;;  %377 = vst [vmem:[%s291_s28 + $0x48] sm:$0xff] %v5907_v25 }
  0x4f   : > { %379 = vst [vmem:[%s291_s28 + $0x50] sm:$0xff] %v5908_v26  ;;  %381 = vst [vmem:[%s291_s28 + $0x58] sm:$0xff] %v5909_v27  ;;  %v5910_v28 = vld [vmem:[%s7704_s29 + $0x250] sm:$0xff]  ;;  %v5911_v29 = vld [vmem:[%s7704_s29 + $0x280] sm:$0xff] }
  0x50   : > { %v5912_v30 = vld [vmem:[%s7704_s29 + $0x2b0] sm:$0xff]  ;;  %383 = vst [vmem:[%s291_s28 + $0x60] sm:$0xff] %v5910_v28  ;;  %385 = vst [vmem:[%s291_s28 + $0x68] sm:$0xff] %v5911_v29  ;;  %v5913_v31 = vld [vmem:[%s7704_s29 + $0x2e0] sm:$0xff] }
  0x51   : > { %387 = vst [vmem:[%s291_s28 + $0x70] sm:$0xff] %v5912_v30  ;;  %389 = vst [vmem:[%s291_s28 + $0x78] sm:$0xff] %v5913_v31 }
  0x52 PF: > { %395 = sbr.rel (!%p7643_p12) target bundleno = 100 (0x64), region = 96  ;;  %s397_s4 = sand.u32 (%p7643_p12), 1, %s7429_s13  }
  0x53   : > { %s5785_s7 = smul.u32 (%p7643_p12), 96, %s7465_s22  ;;  %s5914_s9 = sshll.u32 (%p7643_p12), %s397_s4, 7 }
  0x54   : > { %s5787_s10 = smul.u32 (%p7643_p12), 192, %s7477_s25  ;;  %s11154_s19 = sld [smem:[#allocation94_spill]] (%p7643_p12) }
  0x55   : > { %s5786_s5 = sadd.s32 (%p7643_p12), %s7473_s24, %s5785_s7  ;;  %s399_s30 = scalar_lea.vmem (%p7643_p12), [#allocation7], %s5914_s9 }
  0x56   : > { %s5788_s6 = sadd.s32 (%p7643_p12), %s5787_s10, %s5786_s5 }
  0x57   : > { %s5915_s1 = sshll.u32 %s5788_s6, 3 }
  0x5a   : > { %s7731_s20 = scalar_lea.vmem %s11154_s19, %s5915_s1 }
  0x5b   : > { %v5916_v32 = vld [vmem:[%s7731_s20 + $0x20] sm:$0xff]  ;;  %v5917_v33 = vld [vmem:[%s7731_s20 + $0x50] sm:$0xff] }
  0x5c   : > { %v5918_v34 = vld [vmem:[%s7731_s20 + $0x80] sm:$0xff]  ;;  %467 = vst [vmem:[%s399_s30] sm:$0xff] %v5916_v32  ;;  %469 = vst [vmem:[%s399_s30 + $0x8] sm:$0xff] %v5917_v33  ;;  %v5919_v35 = vld [vmem:[%s7731_s20 + $0xb0] sm:$0xff] }
  0x5d   : > { %471 = vst [vmem:[%s399_s30 + $0x10] sm:$0xff] %v5918_v34  ;;  %v5920_v36 = vld [vmem:[%s7731_s20 + $0xe0] sm:$0xff]  ;;  %v5921_v37 = vld [vmem:[%s7731_s20 + $0x110] sm:$0xff]  ;;  %473 = vst [vmem:[%s399_s30 + $0x18] sm:$0xff] %v5919_v35 }
  0x5e   : > { %475 = vst [vmem:[%s399_s30 + $0x20] sm:$0xff] %v5920_v36  ;;  %477 = vst [vmem:[%s399_s30 + $0x28] sm:$0xff] %v5921_v37  ;;  %v5922_v38 = vld [vmem:[%s7731_s20 + $0x140] sm:$0xff]  ;;  %v5923_v39 = vld [vmem:[%s7731_s20 + $0x170] sm:$0xff] }
  0x5f   : > { %v5924_v40 = vld [vmem:[%s7731_s20 + $0x1a0] sm:$0xff]  ;;  %479 = vst [vmem:[%s399_s30 + $0x30] sm:$0xff] %v5922_v38  ;;  %481 = vst [vmem:[%s399_s30 + $0x38] sm:$0xff] %v5923_v39  ;;  %v5925_v41 = vld [vmem:[%s7731_s20 + $0x1d0] sm:$0xff] }
  0x60   : > { %483 = vst [vmem:[%s399_s30 + $0x40] sm:$0xff] %v5924_v40  ;;  %v5926_v42 = vld [vmem:[%s7731_s20 + $0x200] sm:$0xff]  ;;  %v5927_v43 = vld [vmem:[%s7731_s20 + $0x230] sm:$0xff]  ;;  %485 = vst [vmem:[%s399_s30 + $0x48] sm:$0xff] %v5925_v41 }
  0x61   : > { %487 = vst [vmem:[%s399_s30 + $0x50] sm:$0xff] %v5926_v42  ;;  %489 = vst [vmem:[%s399_s30 + $0x58] sm:$0xff] %v5927_v43  ;;  %v5928_v44 = vld [vmem:[%s7731_s20 + $0x260] sm:$0xff]  ;;  %v5929_v45 = vld [vmem:[%s7731_s20 + $0x290] sm:$0xff] }
  0x62   : > { %v5930_v46 = vld [vmem:[%s7731_s20 + $0x2c0] sm:$0xff]  ;;  %491 = vst [vmem:[%s399_s30 + $0x60] sm:$0xff] %v5928_v44  ;;  %493 = vst [vmem:[%s399_s30 + $0x68] sm:$0xff] %v5929_v45  ;;  %v5931_v47 = vld [vmem:[%s7731_s20 + $0x2f0] sm:$0xff] }
  0x63   : > { %495 = vst [vmem:[%s399_s30 + $0x70] sm:$0xff] %v5930_v46  ;;  %497 = vst [vmem:[%s399_s30 + $0x78] sm:$0xff] %v5931_v47 }
  0x64 PF: > { %p5932_p1 = scmp.ge.s32.totalorder %s7481_s26, 1  ;;  %p502_p4 = scmp.lt.s32.totalorder %s7481_s26, 17 }
  0x66   : > { %p503_p5 = pnand %p5932_p1, %p502_p4 }
  0x68   : > { %506 = sbr.rel (%p503_p5) target bundleno = 3215 (0xc8f), region = 134 }
  0x6d   : > { %s11155_s21 = sld [smem:[#allocation9_spill]]  ;;  %s509_s27 = sand.u32 1, %s7441_s16  }
  0x6e   : > { %s5933_s28 = sshll.u32 %s509_s27, 7  ;;  %s523_s7 = sand.u32 1, %s7425_s12  }
  0x6f   : > { %s5935_s9 = sshll.u32 %s523_s7, 7  ;;  %s7754_s10 = scalar_lea.vmem [#allocation5], %s5933_s28 }
  0x70   : > { %s7758_s6 = scalar_lea.vmem [#allocation7], %s5935_s9  ;;  %s7760_s1 = scalar_lea.vmem [#allocation8], %s5933_s28 }
  0x71   : > { %s11156_s2 = sld [smem:[#allocation10_spill]] }
  0x73   : > { %s516_s29 = sand.u32 1, %s11155_s21  }
  0x74   : > { %s5934_s4 = sshll.u32 %s516_s29, 7 }
  0x75   : > { %s7756_s5 = scalar_lea.vmem [#allocation6], %s5934_s4 }
  0x77   : > { %p5937_p6 = scmp.ne.s32.totalorder %s11156_s2, 0 }
  0x79   : > { %562 = sbr.rel (%p5937_p6) target bundleno = 223 (0xdf), region = 150 }
  0x7e   : > { %vm563_vm0 = vcmask 7168   ;;  %vm692_vm1 = vcmask 261120   ;;  %v7483_v48 = vmov -inf   ;;  %v7484_v49 = vmov 0.0  }
  0x7f   : > { %564 = vst.msk [vmem:[#allocation2] sm:$0xff] %vm563_vm0, %v7483_v48  ;;  %565 = vst.msk [vmem:[#allocation2 + $0x8] sm:$0xff] %vm563_vm0, %v7483_v48 }
  0x80   : > { %566 = vst.msk [vmem:[#allocation2 + $0x10] sm:$0xff] %vm563_vm0, %v7483_v48  ;;  %567 = vst.msk [vmem:[#allocation2 + $0x18] sm:$0xff] %vm563_vm0, %v7483_v48 }
  0x81   : > { %568 = vst.msk [vmem:[#allocation2 + $0x20] sm:$0xff] %vm563_vm0, %v7483_v48  ;;  %569 = vst.msk [vmem:[#allocation2 + $0x28] sm:$0xff] %vm563_vm0, %v7483_v48 }
  0x82   : > { %570 = vst.msk [vmem:[#allocation2 + $0x30] sm:$0xff] %vm563_vm0, %v7483_v48  ;;  %571 = vst.msk [vmem:[#allocation2 + $0x38] sm:$0xff] %vm563_vm0, %v7483_v48 }
  0x83   : > { %572 = vst.msk [vmem:[#allocation2 + $0x40] sm:$0xff] %vm563_vm0, %v7483_v48  ;;  %573 = vst.msk [vmem:[#allocation2 + $0x48] sm:$0xff] %vm563_vm0, %v7483_v48 }
  0x84   : > { %574 = vst.msk [vmem:[#allocation2 + $0x50] sm:$0xff] %vm563_vm0, %v7483_v48  ;;  %575 = vst.msk [vmem:[#allocation2 + $0x58] sm:$0xff] %vm563_vm0, %v7483_v48 }
  0x85   : > { %576 = vst.msk [vmem:[#allocation2 + $0x60] sm:$0xff] %vm563_vm0, %v7483_v48  ;;  %577 = vst.msk [vmem:[#allocation2 + $0x68] sm:$0xff] %vm563_vm0, %v7483_v48 }
  0x86   : > { %578 = vst.msk [vmem:[#allocation2 + $0x70] sm:$0xff] %vm563_vm0, %v7483_v48  ;;  %579 = vst.msk [vmem:[#allocation2 + $0x78] sm:$0xff] %vm563_vm0, %v7483_v48 }
  0x87   : > { %580 = vst.msk [vmem:[#allocation2 + $0x80] sm:$0xff] %vm563_vm0, %v7483_v48  ;;  %581 = vst.msk [vmem:[#allocation2 + $0x88] sm:$0xff] %vm563_vm0, %v7483_v48 }
  0x88   : > { %582 = vst.msk [vmem:[#allocation2 + $0x90] sm:$0xff] %vm563_vm0, %v7483_v48  ;;  %583 = vst.msk [vmem:[#allocation2 + $0x98] sm:$0xff] %vm563_vm0, %v7483_v48 }
  0x89   : > { %584 = vst.msk [vmem:[#allocation2 + $0xa0] sm:$0xff] %vm563_vm0, %v7483_v48  ;;  %585 = vst.msk [vmem:[#allocation2 + $0xa8] sm:$0xff] %vm563_vm0, %v7483_v48 }
  0x8a   : > { %586 = vst.msk [vmem:[#allocation2 + $0xb0] sm:$0xff] %vm563_vm0, %v7483_v48  ;;  %587 = vst.msk [vmem:[#allocation2 + $0xb8] sm:$0xff] %vm563_vm0, %v7483_v48 }
  0x8b   : > { %588 = vst.msk [vmem:[#allocation2 + $0xc0] sm:$0xff] %vm563_vm0, %v7483_v48  ;;  %589 = vst.msk [vmem:[#allocation2 + $0xc8] sm:$0xff] %vm563_vm0, %v7483_v48 }
  0x8c   : > { %590 = vst.msk [vmem:[#allocation2 + $0xd0] sm:$0xff] %vm563_vm0, %v7483_v48  ;;  %591 = vst.msk [vmem:[#allocation2 + $0xd8] sm:$0xff] %vm563_vm0, %v7483_v48 }
  0x8d   : > { %592 = vst.msk [vmem:[#allocation2 + $0xe0] sm:$0xff] %vm563_vm0, %v7483_v48  ;;  %593 = vst.msk [vmem:[#allocation2 + $0xe8] sm:$0xff] %vm563_vm0, %v7483_v48 }
  0x8e   : > { %594 = vst.msk [vmem:[#allocation2 + $0xf0] sm:$0xff] %vm563_vm0, %v7483_v48  ;;  %595 = vst.msk [vmem:[#allocation2 + $0xf8] sm:$0xff] %vm563_vm0, %v7483_v48 }
  0x8f   : > { %596 = vst.msk [vmem:[#allocation2 + $0x100] sm:$0xff] %vm563_vm0, %v7483_v48  ;;  %597 = vst.msk [vmem:[#allocation2 + $0x108] sm:$0xff] %vm563_vm0, %v7483_v48 }
  0x90   : > { %598 = vst.msk [vmem:[#allocation2 + $0x110] sm:$0xff] %vm563_vm0, %v7483_v48  ;;  %599 = vst.msk [vmem:[#allocation2 + $0x118] sm:$0xff] %vm563_vm0, %v7483_v48 }
  0x91   : > { %600 = vst.msk [vmem:[#allocation2 + $0x120] sm:$0xff] %vm563_vm0, %v7483_v48  ;;  %601 = vst.msk [vmem:[#allocation2 + $0x128] sm:$0xff] %vm563_vm0, %v7483_v48 }
  0x92   : > { %602 = vst.msk [vmem:[#allocation2 + $0x130] sm:$0xff] %vm563_vm0, %v7483_v48  ;;  %603 = vst.msk [vmem:[#allocation2 + $0x138] sm:$0xff] %vm563_vm0, %v7483_v48 }
  0x93   : > { %604 = vst.msk [vmem:[#allocation2 + $0x140] sm:$0xff] %vm563_vm0, %v7483_v48  ;;  %605 = vst.msk [vmem:[#allocation2 + $0x148] sm:$0xff] %vm563_vm0, %v7483_v48 }
  0x94   : > { %606 = vst.msk [vmem:[#allocation2 + $0x150] sm:$0xff] %vm563_vm0, %v7483_v48  ;;  %607 = vst.msk [vmem:[#allocation2 + $0x158] sm:$0xff] %vm563_vm0, %v7483_v48 }
  0x95   : > { %608 = vst.msk [vmem:[#allocation2 + $0x160] sm:$0xff] %vm563_vm0, %v7483_v48  ;;  %609 = vst.msk [vmem:[#allocation2 + $0x168] sm:$0xff] %vm563_vm0, %v7483_v48 }
  0x96   : > { %610 = vst.msk [vmem:[#allocation2 + $0x170] sm:$0xff] %vm563_vm0, %v7483_v48  ;;  %611 = vst.msk [vmem:[#allocation2 + $0x178] sm:$0xff] %vm563_vm0, %v7483_v48 }
  0x97   : > { %612 = vst.msk [vmem:[#allocation2 + $0x180] sm:$0xff] %vm563_vm0, %v7483_v48  ;;  %613 = vst.msk [vmem:[#allocation2 + $0x188] sm:$0xff] %vm563_vm0, %v7483_v48 }
  0x98   : > { %614 = vst.msk [vmem:[#allocation2 + $0x190] sm:$0xff] %vm563_vm0, %v7483_v48  ;;  %615 = vst.msk [vmem:[#allocation2 + $0x198] sm:$0xff] %vm563_vm0, %v7483_v48 }
  0x99   : > { %616 = vst.msk [vmem:[#allocation2 + $0x1a0] sm:$0xff] %vm563_vm0, %v7483_v48  ;;  %617 = vst.msk [vmem:[#allocation2 + $0x1a8] sm:$0xff] %vm563_vm0, %v7483_v48 }
  0x9a   : > { %618 = vst.msk [vmem:[#allocation2 + $0x1b0] sm:$0xff] %vm563_vm0, %v7483_v48  ;;  %619 = vst.msk [vmem:[#allocation2 + $0x1b8] sm:$0xff] %vm563_vm0, %v7483_v48 }
  0x9b   : > { %620 = vst.msk [vmem:[#allocation2 + $0x1c0] sm:$0xff] %vm563_vm0, %v7483_v48  ;;  %621 = vst.msk [vmem:[#allocation2 + $0x1c8] sm:$0xff] %vm563_vm0, %v7483_v48 }
  0x9c   : > { %622 = vst.msk [vmem:[#allocation2 + $0x1d0] sm:$0xff] %vm563_vm0, %v7483_v48  ;;  %623 = vst.msk [vmem:[#allocation2 + $0x1d8] sm:$0xff] %vm563_vm0, %v7483_v48 }
  0x9d   : > { %624 = vst.msk [vmem:[#allocation2 + $0x1e0] sm:$0xff] %vm563_vm0, %v7483_v48  ;;  %625 = vst.msk [vmem:[#allocation2 + $0x1e8] sm:$0xff] %vm563_vm0, %v7483_v48 }
  0x9e   : > { %626 = vst.msk [vmem:[#allocation2 + $0x1f0] sm:$0xff] %vm563_vm0, %v7483_v48  ;;  %627 = vst.msk [vmem:[#allocation2 + $0x1f8] sm:$0xff] %vm563_vm0, %v7483_v48 }
  0x9f   : > { %628 = vst.msk [vmem:[#allocation3] sm:$0xff] %vm563_vm0, %v7484_v49  ;;  %629 = vst.msk [vmem:[#allocation3 + $0x8] sm:$0xff] %vm563_vm0, %v7484_v49 }
  0xa0   : > { %630 = vst.msk [vmem:[#allocation3 + $0x10] sm:$0xff] %vm563_vm0, %v7484_v49  ;;  %631 = vst.msk [vmem:[#allocation3 + $0x18] sm:$0xff] %vm563_vm0, %v7484_v49 }
  0xa1   : > { %632 = vst.msk [vmem:[#allocation3 + $0x20] sm:$0xff] %vm563_vm0, %v7484_v49  ;;  %633 = vst.msk [vmem:[#allocation3 + $0x28] sm:$0xff] %vm563_vm0, %v7484_v49 }
  0xa2   : > { %634 = vst.msk [vmem:[#allocation3 + $0x30] sm:$0xff] %vm563_vm0, %v7484_v49  ;;  %635 = vst.msk [vmem:[#allocation3 + $0x38] sm:$0xff] %vm563_vm0, %v7484_v49 }
  0xa3   : > { %636 = vst.msk [vmem:[#allocation3 + $0x40] sm:$0xff] %vm563_vm0, %v7484_v49  ;;  %637 = vst.msk [vmem:[#allocation3 + $0x48] sm:$0xff] %vm563_vm0, %v7484_v49 }
  0xa4   : > { %638 = vst.msk [vmem:[#allocation3 + $0x50] sm:$0xff] %vm563_vm0, %v7484_v49  ;;  %639 = vst.msk [vmem:[#allocation3 + $0x58] sm:$0xff] %vm563_vm0, %v7484_v49 }
  0xa5   : > { %640 = vst.msk [vmem:[#allocation3 + $0x60] sm:$0xff] %vm563_vm0, %v7484_v49  ;;  %641 = vst.msk [vmem:[#allocation3 + $0x68] sm:$0xff] %vm563_vm0, %v7484_v49 }
  0xa6   : > { %642 = vst.msk [vmem:[#allocation3 + $0x70] sm:$0xff] %vm563_vm0, %v7484_v49  ;;  %643 = vst.msk [vmem:[#allocation3 + $0x78] sm:$0xff] %vm563_vm0, %v7484_v49 }
  0xa7   : > { %644 = vst.msk [vmem:[#allocation3 + $0x80] sm:$0xff] %vm563_vm0, %v7484_v49  ;;  %645 = vst.msk [vmem:[#allocation3 + $0x88] sm:$0xff] %vm563_vm0, %v7484_v49 }
  0xa8   : > { %646 = vst.msk [vmem:[#allocation3 + $0x90] sm:$0xff] %vm563_vm0, %v7484_v49  ;;  %647 = vst.msk [vmem:[#allocation3 + $0x98] sm:$0xff] %vm563_vm0, %v7484_v49 }
  0xa9   : > { %648 = vst.msk [vmem:[#allocation3 + $0xa0] sm:$0xff] %vm563_vm0, %v7484_v49  ;;  %649 = vst.msk [vmem:[#allocation3 + $0xa8] sm:$0xff] %vm563_vm0, %v7484_v49 }
  0xaa   : > { %650 = vst.msk [vmem:[#allocation3 + $0xb0] sm:$0xff] %vm563_vm0, %v7484_v49  ;;  %651 = vst.msk [vmem:[#allocation3 + $0xb8] sm:$0xff] %vm563_vm0, %v7484_v49 }
  0xab   : > { %652 = vst.msk [vmem:[#allocation3 + $0xc0] sm:$0xff] %vm563_vm0, %v7484_v49  ;;  %653 = vst.msk [vmem:[#allocation3 + $0xc8] sm:$0xff] %vm563_vm0, %v7484_v49 }
  0xac   : > { %654 = vst.msk [vmem:[#allocation3 + $0xd0] sm:$0xff] %vm563_vm0, %v7484_v49  ;;  %655 = vst.msk [vmem:[#allocation3 + $0xd8] sm:$0xff] %vm563_vm0, %v7484_v49 }
  0xad   : > { %656 = vst.msk [vmem:[#allocation3 + $0xe0] sm:$0xff] %vm563_vm0, %v7484_v49  ;;  %657 = vst.msk [vmem:[#allocation3 + $0xe8] sm:$0xff] %vm563_vm0, %v7484_v49 }
  0xae   : > { %658 = vst.msk [vmem:[#allocation3 + $0xf0] sm:$0xff] %vm563_vm0, %v7484_v49  ;;  %659 = vst.msk [vmem:[#allocation3 + $0xf8] sm:$0xff] %vm563_vm0, %v7484_v49 }
  0xaf   : > { %660 = vst.msk [vmem:[#allocation3 + $0x100] sm:$0xff] %vm563_vm0, %v7484_v49  ;;  %661 = vst.msk [vmem:[#allocation3 + $0x108] sm:$0xff] %vm563_vm0, %v7484_v49 }
  0xb0   : > { %662 = vst.msk [vmem:[#allocation3 + $0x110] sm:$0xff] %vm563_vm0, %v7484_v49  ;;  %663 = vst.msk [vmem:[#allocation3 + $0x118] sm:$0xff] %vm563_vm0, %v7484_v49 }
  0xb1   : > { %664 = vst.msk [vmem:[#allocation3 + $0x120] sm:$0xff] %vm563_vm0, %v7484_v49  ;;  %665 = vst.msk [vmem:[#allocation3 + $0x128] sm:$0xff] %vm563_vm0, %v7484_v49 }
  0xb2   : > { %666 = vst.msk [vmem:[#allocation3 + $0x130] sm:$0xff] %vm563_vm0, %v7484_v49  ;;  %667 = vst.msk [vmem:[#allocation3 + $0x138] sm:$0xff] %vm563_vm0, %v7484_v49 }
  0xb3   : > { %668 = vst.msk [vmem:[#allocation3 + $0x140] sm:$0xff] %vm563_vm0, %v7484_v49  ;;  %669 = vst.msk [vmem:[#allocation3 + $0x148] sm:$0xff] %vm563_vm0, %v7484_v49 }
  0xb4   : > { %670 = vst.msk [vmem:[#allocation3 + $0x150] sm:$0xff] %vm563_vm0, %v7484_v49  ;;  %671 = vst.msk [vmem:[#allocation3 + $0x158] sm:$0xff] %vm563_vm0, %v7484_v49 }
  0xb5   : > { %672 = vst.msk [vmem:[#allocation3 + $0x160] sm:$0xff] %vm563_vm0, %v7484_v49  ;;  %673 = vst.msk [vmem:[#allocation3 + $0x168] sm:$0xff] %vm563_vm0, %v7484_v49 }
  0xb6   : > { %674 = vst.msk [vmem:[#allocation3 + $0x170] sm:$0xff] %vm563_vm0, %v7484_v49  ;;  %675 = vst.msk [vmem:[#allocation3 + $0x178] sm:$0xff] %vm563_vm0, %v7484_v49 }
  0xb7   : > { %676 = vst.msk [vmem:[#allocation3 + $0x180] sm:$0xff] %vm563_vm0, %v7484_v49  ;;  %677 = vst.msk [vmem:[#allocation3 + $0x188] sm:$0xff] %vm563_vm0, %v7484_v49 }
  0xb8   : > { %678 = vst.msk [vmem:[#allocation3 + $0x190] sm:$0xff] %vm563_vm0, %v7484_v49  ;;  %679 = vst.msk [vmem:[#allocation3 + $0x198] sm:$0xff] %vm563_vm0, %v7484_v49 }
  0xb9   : > { %680 = vst.msk [vmem:[#allocation3 + $0x1a0] sm:$0xff] %vm563_vm0, %v7484_v49  ;;  %681 = vst.msk [vmem:[#allocation3 + $0x1a8] sm:$0xff] %vm563_vm0, %v7484_v49 }
  0xba   : > { %682 = vst.msk [vmem:[#allocation3 + $0x1b0] sm:$0xff] %vm563_vm0, %v7484_v49  ;;  %683 = vst.msk [vmem:[#allocation3 + $0x1b8] sm:$0xff] %vm563_vm0, %v7484_v49 }
  0xbb   : > { %684 = vst.msk [vmem:[#allocation3 + $0x1c0] sm:$0xff] %vm563_vm0, %v7484_v49  ;;  %685 = vst.msk [vmem:[#allocation3 + $0x1c8] sm:$0xff] %vm563_vm0, %v7484_v49 }
  0xbc   : > { %686 = vst.msk [vmem:[#allocation3 + $0x1d0] sm:$0xff] %vm563_vm0, %v7484_v49  ;;  %687 = vst.msk [vmem:[#allocation3 + $0x1d8] sm:$0xff] %vm563_vm0, %v7484_v49 }
  0xbd   : > { %688 = vst.msk [vmem:[#allocation3 + $0x1e0] sm:$0xff] %vm563_vm0, %v7484_v49  ;;  %689 = vst.msk [vmem:[#allocation3 + $0x1e8] sm:$0xff] %vm563_vm0, %v7484_v49 }
  0xbe   : > { %690 = vst.msk [vmem:[#allocation3 + $0x1f0] sm:$0xff] %vm563_vm0, %v7484_v49  ;;  %691 = vst.msk [vmem:[#allocation3 + $0x1f8] sm:$0xff] %vm563_vm0, %v7484_v49 }
  0xbf   : > { %693 = vst.msk [vmem:[#allocation4] sm:$0xff] %vm692_vm1, %v7484_v49  ;;  %694 = vst.msk [vmem:[#allocation4 + $0x8] sm:$0xff] %vm692_vm1, %v7484_v49 }
  0xc0   : > { %695 = vst.msk [vmem:[#allocation4 + $0x10] sm:$0xff] %vm692_vm1, %v7484_v49  ;;  %696 = vst.msk [vmem:[#allocation4 + $0x18] sm:$0xff] %vm692_vm1, %v7484_v49 }
  0xc1   : > { %697 = vst.msk [vmem:[#allocation4 + $0x20] sm:$0xff] %vm692_vm1, %v7484_v49  ;;  %698 = vst.msk [vmem:[#allocation4 + $0x28] sm:$0xff] %vm692_vm1, %v7484_v49 }
  0xc2   : > { %699 = vst.msk [vmem:[#allocation4 + $0x30] sm:$0xff] %vm692_vm1, %v7484_v49  ;;  %700 = vst.msk [vmem:[#allocation4 + $0x38] sm:$0xff] %vm692_vm1, %v7484_v49 }
  0xc3   : > { %701 = vst.msk [vmem:[#allocation4 + $0x40] sm:$0xff] %vm692_vm1, %v7484_v49  ;;  %702 = vst.msk [vmem:[#allocation4 + $0x48] sm:$0xff] %vm692_vm1, %v7484_v49 }
  0xc4   : > { %703 = vst.msk [vmem:[#allocation4 + $0x50] sm:$0xff] %vm692_vm1, %v7484_v49  ;;  %704 = vst.msk [vmem:[#allocation4 + $0x58] sm:$0xff] %vm692_vm1, %v7484_v49 }
  0xc5   : > { %705 = vst.msk [vmem:[#allocation4 + $0x60] sm:$0xff] %vm692_vm1, %v7484_v49  ;;  %706 = vst.msk [vmem:[#allocation4 + $0x68] sm:$0xff] %vm692_vm1, %v7484_v49 }
  0xc6   : > { %707 = vst.msk [vmem:[#allocation4 + $0x70] sm:$0xff] %vm692_vm1, %v7484_v49  ;;  %708 = vst.msk [vmem:[#allocation4 + $0x78] sm:$0xff] %vm692_vm1, %v7484_v49 }
  0xc7   : > { %709 = vst.msk [vmem:[#allocation4 + $0x80] sm:$0xff] %vm692_vm1, %v7484_v49  ;;  %710 = vst.msk [vmem:[#allocation4 + $0x88] sm:$0xff] %vm692_vm1, %v7484_v49 }
  0xc8   : > { %711 = vst.msk [vmem:[#allocation4 + $0x90] sm:$0xff] %vm692_vm1, %v7484_v49  ;;  %712 = vst.msk [vmem:[#allocation4 + $0x98] sm:$0xff] %vm692_vm1, %v7484_v49 }
  0xc9   : > { %713 = vst.msk [vmem:[#allocation4 + $0xa0] sm:$0xff] %vm692_vm1, %v7484_v49  ;;  %714 = vst.msk [vmem:[#allocation4 + $0xa8] sm:$0xff] %vm692_vm1, %v7484_v49 }
  0xca   : > { %715 = vst.msk [vmem:[#allocation4 + $0xb0] sm:$0xff] %vm692_vm1, %v7484_v49  ;;  %716 = vst.msk [vmem:[#allocation4 + $0xb8] sm:$0xff] %vm692_vm1, %v7484_v49 }
  0xcb   : > { %717 = vst.msk [vmem:[#allocation4 + $0xc0] sm:$0xff] %vm692_vm1, %v7484_v49  ;;  %718 = vst.msk [vmem:[#allocation4 + $0xc8] sm:$0xff] %vm692_vm1, %v7484_v49 }
  0xcc   : > { %719 = vst.msk [vmem:[#allocation4 + $0xd0] sm:$0xff] %vm692_vm1, %v7484_v49  ;;  %720 = vst.msk [vmem:[#allocation4 + $0xd8] sm:$0xff] %vm692_vm1, %v7484_v49 }
  0xcd   : > { %721 = vst.msk [vmem:[#allocation4 + $0xe0] sm:$0xff] %vm692_vm1, %v7484_v49  ;;  %722 = vst.msk [vmem:[#allocation4 + $0xe8] sm:$0xff] %vm692_vm1, %v7484_v49 }
  0xce   : > { %723 = vst.msk [vmem:[#allocation4 + $0xf0] sm:$0xff] %vm692_vm1, %v7484_v49  ;;  %724 = vst.msk [vmem:[#allocation4 + $0xf8] sm:$0xff] %vm692_vm1, %v7484_v49 }
  0xcf   : > { %725 = vst.msk [vmem:[#allocation4 + $0x100] sm:$0xff] %vm692_vm1, %v7484_v49  ;;  %726 = vst.msk [vmem:[#allocation4 + $0x108] sm:$0xff] %vm692_vm1, %v7484_v49 }
  0xd0   : > { %727 = vst.msk [vmem:[#allocation4 + $0x110] sm:$0xff] %vm692_vm1, %v7484_v49  ;;  %728 = vst.msk [vmem:[#allocation4 + $0x118] sm:$0xff] %vm692_vm1, %v7484_v49 }
  0xd1   : > { %729 = vst.msk [vmem:[#allocation4 + $0x120] sm:$0xff] %vm692_vm1, %v7484_v49  ;;  %730 = vst.msk [vmem:[#allocation4 + $0x128] sm:$0xff] %vm692_vm1, %v7484_v49 }
  0xd2   : > { %731 = vst.msk [vmem:[#allocation4 + $0x130] sm:$0xff] %vm692_vm1, %v7484_v49  ;;  %732 = vst.msk [vmem:[#allocation4 + $0x138] sm:$0xff] %vm692_vm1, %v7484_v49 }
  0xd3   : > { %733 = vst.msk [vmem:[#allocation4 + $0x140] sm:$0xff] %vm692_vm1, %v7484_v49  ;;  %734 = vst.msk [vmem:[#allocation4 + $0x148] sm:$0xff] %vm692_vm1, %v7484_v49 }
  0xd4   : > { %735 = vst.msk [vmem:[#allocation4 + $0x150] sm:$0xff] %vm692_vm1, %v7484_v49  ;;  %736 = vst.msk [vmem:[#allocation4 + $0x158] sm:$0xff] %vm692_vm1, %v7484_v49 }
  0xd5   : > { %737 = vst.msk [vmem:[#allocation4 + $0x160] sm:$0xff] %vm692_vm1, %v7484_v49  ;;  %738 = vst.msk [vmem:[#allocation4 + $0x168] sm:$0xff] %vm692_vm1, %v7484_v49 }
  0xd6   : > { %739 = vst.msk [vmem:[#allocation4 + $0x170] sm:$0xff] %vm692_vm1, %v7484_v49  ;;  %740 = vst.msk [vmem:[#allocation4 + $0x178] sm:$0xff] %vm692_vm1, %v7484_v49 }
  0xd7   : > { %741 = vst.msk [vmem:[#allocation4 + $0x180] sm:$0xff] %vm692_vm1, %v7484_v49  ;;  %742 = vst.msk [vmem:[#allocation4 + $0x188] sm:$0xff] %vm692_vm1, %v7484_v49 }
  0xd8   : > { %743 = vst.msk [vmem:[#allocation4 + $0x190] sm:$0xff] %vm692_vm1, %v7484_v49  ;;  %744 = vst.msk [vmem:[#allocation4 + $0x198] sm:$0xff] %vm692_vm1, %v7484_v49 }
  0xd9   : > { %745 = vst.msk [vmem:[#allocation4 + $0x1a0] sm:$0xff] %vm692_vm1, %v7484_v49  ;;  %746 = vst.msk [vmem:[#allocation4 + $0x1a8] sm:$0xff] %vm692_vm1, %v7484_v49 }
  0xda   : > { %747 = vst.msk [vmem:[#allocation4 + $0x1b0] sm:$0xff] %vm692_vm1, %v7484_v49  ;;  %748 = vst.msk [vmem:[#allocation4 + $0x1b8] sm:$0xff] %vm692_vm1, %v7484_v49 }
  0xdb   : > { %749 = vst.msk [vmem:[#allocation4 + $0x1c0] sm:$0xff] %vm692_vm1, %v7484_v49  ;;  %750 = vst.msk [vmem:[#allocation4 + $0x1c8] sm:$0xff] %vm692_vm1, %v7484_v49 }
  0xdc   : > { %751 = vst.msk [vmem:[#allocation4 + $0x1d0] sm:$0xff] %vm692_vm1, %v7484_v49  ;;  %752 = vst.msk [vmem:[#allocation4 + $0x1d8] sm:$0xff] %vm692_vm1, %v7484_v49 }
  0xdd   : > { %753 = vst.msk [vmem:[#allocation4 + $0x1e0] sm:$0xff] %vm692_vm1, %v7484_v49  ;;  %754 = vst.msk [vmem:[#allocation4 + $0x1e8] sm:$0xff] %vm692_vm1, %v7484_v49 }
  0xde   : > { %755 = vst.msk [vmem:[#allocation4 + $0x1f0] sm:$0xff] %vm692_vm1, %v7484_v49  ;;  %756 = vst.msk [vmem:[#allocation4 + $0x1f8] sm:$0xff] %vm692_vm1, %v7484_v49 }
  0xdf PF: > { %v8148_v50 = vld [vmem:[%s7756_s5 + $0x78] sm:$0xff]  ;;  %vm821_vm2 = vcmask 261120   ;;  %v8151_v51 = vld [vmem:[%s7756_s5 + $0x70] sm:$0xff]  ;;  %v8160_v52 = vld [vmem:[%s7756_s5 + $0x68] sm:$0xff]  ;;  %v7485_v42 = vmov 0   ;;  %vm1383_vm3 = vcmask 7168  }
  0xe0   : > { %6331 = vmatprep.subr.msk.mxu0 %vm821_vm2, %v8148_v50  ;;  %v757_v53 = vld [vmem:[%s7754_s10] sm:$0xff]  ;;  %v8179_v56 = vld [vmem:[%s7756_s5 + $0x58] sm:$0xff]  ;;  %v8186_v57 = vld [vmem:[%s7756_s5 + $0x50] sm:$0xff]  ;;  %6911 = vset.pattern.permute.xlu0 %v7485_v42  ;;  %s7486_s12 = smov 96   ;;  %s7487_s16 = smov 64  }
  0xe1   : > { %6332 = vmatpush3.xpose.msk.msra.mxu0 %vm821_vm2, %v8148_v50  ;;  %v8165_v54 = vmul.f32 0.17677669, %v757_v53  ;;  %v8170_v55 = vld [vmem:[%s7756_s5 + $0x60] sm:$0xff]  ;;  %v8193_v58 = vld [vmem:[%s7756_s5 + $0x48] sm:$0xff]  ;;  %v8207_v60 = vld [vmem:[%s7756_s5 + $0x38] sm:$0xff]  ;;  %6912 = vset.pattern.permute.xlu1 %v7485_v42  ;;  %s7488_s14 = smov 32  }
  0xe2   : > { %6333 = vmatprep.subr.msk.mxu0 %vm821_vm2, %v8151_v51  ;;  %v8200_v59 = vld [vmem:[%s7756_s5 + $0x40] sm:$0xff]  ;;  %v8214_v61 = vld [vmem:[%s7756_s5 + $0x30] sm:$0xff]  ;;  %v8221_v62 = vld [vmem:[%s7756_s5 + $0x28] sm:$0xff]  ;;  %s11511_s19 = sld [smem:[#allocation10_spill]] }
  0xe3   : > { %6363 = vmatprep.mubr.msk.f32.mxu0 %vm821_vm2, %v8165_v54  ;;  %v8228_v63 = vld [vmem:[%s7756_s5 + $0x20] sm:$0xff]  ;;  %v8235_v0 = vld [vmem:[%s7756_s5 + $0x18] sm:$0xff]  ;;  %v8242_v1 = vld [vmem:[%s7756_s5 + $0x10] sm:$0xff] }
  0xe4   : > { %v8249_v2 = vld [vmem:[%s7756_s5 + $0x8] sm:$0xff]  ;;  %v8256_v3 = vld [vmem:[%s7756_s5] sm:$0xff]  ;;  %v759_v5 = vld [vmem:[%s7754_s10 + $0x10] sm:$0xff] }
  0xe5   : > { %6334 = vmatpush3.xpose.msk.msra.mxu0 %vm821_vm2, %v8151_v51  ;;  %v758_v4 = vld [vmem:[%s7754_s10 + $0x8] sm:$0xff]  ;;  %v8268_v7 = vmul.f32 0.17677669, %v759_v5  ;;  %v760_v8 = vld [vmem:[%s7754_s10 + $0x18] sm:$0xff]  ;;  %v761_v9 = vld [vmem:[%s7754_s10 + $0x20] sm:$0xff] }
  0xe6   : > { %6335 = vmatprep.subr.msk.mxu0 %vm821_vm2, %v8160_v52  ;;  %v8264_v6 = vmul.f32 0.17677669, %v758_v4  ;;  %v8274_v10 = vmul.f32 0.17677669, %v760_v8  ;;  %v8278_v11 = vmul.f32 0.17677669, %v761_v9 }
  0xe7   : > { %v762_v12 = vld [vmem:[%s7754_s10 + $0x28] sm:$0xff]  ;;  %v763_v13 = vld [vmem:[%s7754_s10 + $0x30] sm:$0xff]  ;;  %v764_v16 = vld [vmem:[%s7754_s10 + $0x38] sm:$0xff] }
  0xe8   : > { %v8284_v14 = vmul.f32 0.17677669, %v762_v12  ;;  %v8288_v15 = vmul.f32 0.17677669, %v763_v13  ;;  %v765_v17 = vld [vmem:[%s7754_s10 + $0x40] sm:$0xff]  ;;  %v766_v20 = vld [vmem:[%s7754_s10 + $0x48] sm:$0xff] }
  0xe9   : > { %6336 = vmatpush3.xpose.msk.msra.mxu0 %vm821_vm2, %v8160_v52  ;;  %v8294_v18 = vmul.f32 0.17677669, %v764_v16  ;;  %v8298_v19 = vmul.f32 0.17677669, %v765_v17  ;;  %v767_v21 = vld [vmem:[%s7754_s10 + $0x50] sm:$0xff]  ;;  %v768_v24 = vld [vmem:[%s7754_s10 + $0x58] sm:$0xff] }
  0xea   : > { %6337 = vmatprep.subr.msk.mxu0 %vm821_vm2, %v8170_v55  ;;  %v8304_v22 = vmul.f32 0.17677669, %v766_v20  ;;  %v8308_v23 = vmul.f32 0.17677669, %v767_v21  ;;  %v769_v25 = vld [vmem:[%s7754_s10 + $0x60] sm:$0xff]  ;;  %v770_v28 = vld [vmem:[%s7754_s10 + $0x68] sm:$0xff] }
  0xeb   : > { %v8314_v26 = vmul.f32 0.17677669, %v768_v24  ;;  %v8318_v27 = vmul.f32 0.17677669, %v769_v25  ;;  %v771_v29 = vld [vmem:[%s7754_s10 + $0x70] sm:$0xff]  ;;  %v772_v32 = vld [vmem:[%s7754_s10 + $0x78] sm:$0xff] }
  0xec   : > { %v8324_v30 = vmul.f32 0.17677669, %v770_v28  ;;  %v8328_v31 = vmul.f32 0.17677669, %v771_v29  ;;  %v8333_v33 = vmul.f32 0.17677669, %v772_v32 }
  0xed   : > { %6338 = vmatpush3.xpose.msk.msra.mxu0 %vm821_vm2, %v8170_v55  ;;  %v8388_v4 = vld [vmem:[%s7758_s6 + $0x78] sm:$0xff]  ;;  %v8393_v5 = vld [vmem:[%s7758_s6 + $0x70] sm:$0xff]  ;;  %v8396_v8 = vld [vmem:[%s7758_s6 + $0x68] sm:$0xff]  ;;  %p6066_p7 = scmp.ne.s32.totalorder %s11511_s19, 1 }
  0xee   : > { %6339 = vmatprep.subr.msk.mxu0 %vm821_vm2, %v8179_v56  ;;  %6387 = vmatprep.subr.mxu1 %v8388_v4  ;;  %v8401_v9 = vld [vmem:[%s7758_s6 + $0x60] sm:$0xff]  ;;  %v8406_v12 = vld [vmem:[%s7758_s6 + $0x58] sm:$0xff]  ;;  %v8411_v13 = vld [vmem:[%s7758_s6 + $0x50] sm:$0xff]  ;;  %s7490_s20 = smov (!%p6066_p7), 32   ;;  %s7491_s30 = smov (!%p6066_p7), 64  }
  0xef   : > { %6388 = vmatpush3.msra.mxu1 %v8388_v4  ;;  %v8416_v16 = vld [vmem:[%s7758_s6 + $0x48] sm:$0xff]  ;;  %v8421_v17 = vld [vmem:[%s7758_s6 + $0x40] sm:$0xff]  ;;  %v8426_v20 = vld [vmem:[%s7758_s6 + $0x38] sm:$0xff]  ;;  %s7492_s21 = smov (!%p6066_p7), 96  }
  0xf0   : > { %6389 = vmatprep.subr.mxu1 %v8393_v5  ;;  %11161 = vst [vmem:[#allocation22_spill] sm:$0xff] %v8426_v20  ;;  %v8431_v21 = vld [vmem:[%s7758_s6 + $0x30] sm:$0xff]  ;;  %v8436_v24 = vld [vmem:[%s7758_s6 + $0x28] sm:$0xff]  ;;  %v8441_v25 = vld [vmem:[%s7758_s6 + $0x20] sm:$0xff] }
  0xf1   : > { %6340 = vmatpush3.xpose.msk.msra.mxu0 %vm821_vm2, %v8179_v56  ;;  %6390 = vmatpush3.msra.mxu1 %v8393_v5  ;;  %11162 = vst [vmem:[#allocation23_spill] sm:$0xff] %v8431_v21  ;;  %11163 = vst [vmem:[#allocation24_spill] sm:$0xff] %v8436_v24  ;;  %v8447_v28 = vld [vmem:[#allocation2] sm:$0xff]  ;;  %v8450_v29 = vld [vmem:[%s7758_s6 + $0x18] sm:$0xff] }
  0xf2   : > { %6341 = vmatprep.subr.msk.mxu0 %vm821_vm2, %v8186_v57  ;;  %6391 = vmatprep.subr.mxu1 %v8396_v8  ;;  %11164 = vst [vmem:[#allocation25_spill] sm:$0xff] %v8441_v25  ;;  %11165 = vst [vmem:[#allocation26_spill] sm:$0xff] %v8447_v28  ;;  %v8453_v42 = vld [vmem:[#allocation2 + $0x18] sm:$0xff] }
  0xf3   : > { %6392 = vmatpush3.msra.mxu1 %v8396_v8  ;;  %11166 = vst [vmem:[#allocation27_spill] sm:$0xff] %v8450_v29  ;;  %11167 = vst [vmem:[#allocation28_spill] sm:$0xff] %v8453_v42 }
  0xf4   : > { %6393 = vmatprep.subr.mxu1 %v8401_v9 }
  0xf5   : > { %6342 = vmatpush3.xpose.msk.msra.mxu0 %vm821_vm2, %v8186_v57  ;;  %6394 = vmatpush3.msra.mxu1 %v8401_v9 }
  0xf6   : > { %6343 = vmatprep.subr.msk.mxu0 %vm821_vm2, %v8193_v58  ;;  %6395 = vmatprep.subr.mxu1 %v8406_v12 }
  0xf7   : > { %6396 = vmatpush3.msra.mxu1 %v8406_v12 }
  0xf8   : > { %6397 = vmatprep.subr.mxu1 %v8411_v13 }
  0xf9   : > { %6344 = vmatpush3.xpose.msk.msra.mxu0 %vm821_vm2, %v8193_v58  ;;  %6398 = vmatpush3.msra.mxu1 %v8411_v13 }
  0xfa   : > { %6345 = vmatprep.subr.msk.mxu0 %vm821_vm2, %v8200_v59  ;;  %6399 = vmatprep.subr.mxu1 %v8416_v16 }
  0xfb   : > { %6400 = vmatpush3.msra.mxu1 %v8416_v16 }
  0xfc   : > { %6401 = vmatprep.subr.mxu1 %v8421_v17 }
  0xfd   : > { %6346 = vmatpush3.xpose.msk.msra.mxu0 %vm821_vm2, %v8200_v59  ;;  %6402 = vmatpush3.msra.mxu1 %v8421_v17 }
  0xfe   : > { %6347 = vmatprep.subr.msk.mxu0 %vm821_vm2, %v8207_v60  ;;  %6403 = vmatprep.subr.mxu1 %v8426_v20 }
  0xff   : > { %6404 = vmatpush3.msra.mxu1 %v8426_v20  ;;  %v8463_v20 = vld [vmem:[#allocation2 + $0x8] sm:$0xff] }
 0x100   : > { %6405 = vmatprep.subr.mxu1 %v8431_v21  ;;  %11170 = vst [vmem:[#allocation31_spill] sm:$0xff] %v8463_v20 }
 0x101   : > { %6348 = vmatpush3.xpose.msk.msra.mxu0 %vm821_vm2, %v8207_v60  ;;  %6406 = vmatpush3.msra.mxu1 %v8431_v21  ;;  %v8457_v21 = vld [vmem:[%s7758_s6 + $0x10] sm:$0xff] }
 0x102   : > { %6349 = vmatprep.subr.msk.mxu0 %vm821_vm2, %v8214_v61  ;;  %6407 = vmatprep.subr.mxu1 %v8436_v24  ;;  %11168 = vst [vmem:[#allocation29_spill] sm:$0xff] %v8457_v21 }
 0x103   : > { %6408 = vmatpush3.msra.mxu1 %v8436_v24 }
 0x104   : > { %6409 = vmatprep.subr.mxu1 %v8441_v25 }
 0x105   : > { %6350 = vmatpush3.xpose.msk.msra.mxu0 %vm821_vm2, %v8214_v61  ;;  %6410 = vmatpush3.msra.mxu1 %v8441_v25 }
 0x106   : > { %6351 = vmatprep.subr.msk.mxu0 %vm821_vm2, %v8221_v62  ;;  %6411 = vmatprep.subr.mxu1 %v8450_v29 }
 0x107   : > { %6412 = vmatpush3.msra.mxu1 %v8450_v29 }
 0x108   : > { %6413 = vmatprep.subr.mxu1 %v8457_v21 }
 0x109   : > { %6352 = vmatpush3.xpose.msk.msra.mxu0 %vm821_vm2, %v8221_v62  ;;  %6414 = vmatpush3.msra.mxu1 %v8457_v21  ;;  %v8482_v21 = vld [vmem:[%s7758_s6] sm:$0xff] }
 0x10a   : > { %6353 = vmatprep.subr.msk.mxu0 %vm821_vm2, %v8228_v63  ;;  %11173 = vst [vmem:[#allocation34_spill] sm:$0xff] %v8482_v21 }
 0x10d   : > { %6354 = vmatpush3.xpose.msk.msra.mxu0 %vm821_vm2, %v8228_v63 }
 0x10e   : > { %6355 = vmatprep.subr.msk.mxu0 %vm821_vm2, %v8235_v0 }
 0x111   : > { %6356 = vmatpush3.xpose.msk.msra.mxu0 %vm821_vm2, %v8235_v0 }
 0x112   : > { %6357 = vmatprep.subr.msk.mxu0 %vm821_vm2, %v8242_v1 }
 0x115   : > { %6358 = vmatpush3.xpose.msk.msra.mxu0 %vm821_vm2, %v8242_v1 }
 0x116   : > { %6359 = vmatprep.subr.msk.mxu0 %vm821_vm2, %v8249_v2 }
 0x119   : > { %6360 = vmatpush3.xpose.msk.msra.mxu0 %vm821_vm2, %v8249_v2 }
 0x11a   : > { %6361 = vmatprep.subr.msk.mxu0 %vm821_vm2, %v8256_v3 }
 0x11d   : > { %6362 = vmatpush3.xpose.msk.msra.mxu0 %vm821_vm2, %v8256_v3 }
 0x120   : > { %6364 = vmatmul.mubr.msk.f32.vlgmr.msra.gmra.mxu0 %vm821_vm2, %v8264_v6 }
 0x121   : > { %6366 = vmatprep.mubr.msk.f32.mxu0 %vm821_vm2, %v8268_v7 }
 0x124   : > { %6367 = vmatmul.mubr.msk.f32.gmra.mxu0 %vm821_vm2, %v8274_v10 }
 0x125   : > { %6369 = vmatprep.mubr.msk.f32.mxu0 %vm821_vm2, %v8278_v11 }
 0x128   : > { %6370 = vmatmul.mubr.msk.f32.gmra.mxu0 %vm821_vm2, %v8284_v14 }
 0x129   : > { %6372 = vmatprep.mubr.msk.f32.mxu0 %vm821_vm2, %v8288_v15 }
 0x12c   : > { %6373 = vmatmul.mubr.msk.f32.gmra.mxu0 %vm821_vm2, %v8294_v18 }
 0x12d   : > { %6375 = vmatprep.mubr.msk.f32.mxu0 %vm821_vm2, %v8298_v19 }
 0x130   : > { %6376 = vmatmul.mubr.msk.f32.gmra.mxu0 %vm821_vm2, %v8304_v22 }
 0x131   : > { %6378 = vmatprep.mubr.msk.f32.mxu0 %vm821_vm2, %v8308_v23 }
 0x134   : > { %6379 = vmatmul.mubr.msk.f32.gmra.mxu0 %vm821_vm2, %v8314_v26 }
 0x135   : > { %6381 = vmatprep.mubr.msk.f32.mxu0 %vm821_vm2, %v8318_v27 }
 0x138   : > { %6382 = vmatmul.mubr.msk.f32.gmra.mxu0 %vm821_vm2, %v8324_v30 }
 0x139   : > { %6384 = vmatprep.mubr.msk.f32.mxu0 %vm821_vm2, %v8328_v31 }
 0x13c   : > { %6385 = vmatmul.mubr.msk.f32.gmra.mxu0 %vm821_vm2, %v8333_v33 }
 0x1e0   : > { %v8339_v34 = vpop.f32.mrf.mxu0 }
 0x1e2   : > { %v8341_v35 = vpop.f32.mrf.mxu0 }
 0x1e3   : > { %1079 = vmax.xlane.f32.xlu0 %v8341_v35 }
 0x1e4   : > { %v8344_v36 = vpop.f32.mrf.mxu0 }
 0x1e5   : > { %1085 = vmax.xlane.f32.xlu1 %v8344_v36 }
 0x1e6   : > { %v8347_v37 = vpop.f32.mrf.mxu0 }
 0x1e7   : > { %1081 = vmax.xlane.f32.xlu0 %v8339_v34 }
 0x1e8   : > { %v8350_v38 = vpop.f32.mrf.mxu0 }
 0x1e9   : > { %1083 = vmax.xlane.f32.xlu1 %v8347_v37 }
 0x1ea   : > { %v8353_v39 = vpop.f32.mrf.mxu0 }
 0x1eb   : > { %1087 = vmax.xlane.f32.xlu0 %v8353_v39 }
 0x1ec   : > { %v8356_v40 = vpop.f32.mrf.mxu0 }
 0x1ed   : > { %1089 = vmax.xlane.f32.xlu1 %v8350_v38 }
 0x1ee   : > { %v8359_v41 = vpop.f32.mrf.mxu0 }
 0x1ef   : > { %1091 = vmax.xlane.f32.xlu0 %v8359_v41 }
 0x1f0   : > { %v8362_v43 = vpop.f32.mrf.mxu0 }
 0x1f1   : > { %1093 = vmax.xlane.f32.xlu1 %v8356_v40 }
 0x1f2   : > { %v8365_v44 = vpop.f32.mrf.mxu0 }
 0x1f3   : > { %1095 = vmax.xlane.f32.xlu0 %v8365_v44 }
 0x1f4   : > { %v8368_v45 = vpop.f32.mrf.mxu0 }
 0x1f5   : > { %1097 = vmax.xlane.f32.xlu1 %v8362_v43 }
 0x1f6   : > { %v8371_v46 = vpop.f32.mrf.mxu0 }
 0x1f7   : > { %1099 = vmax.xlane.f32.xlu0 %v8371_v46 }
 0x1f8   : > { %v8374_v47 = vpop.f32.mrf.mxu0 }
 0x1f9   : > { %11157 = vst [vmem:[#allocation18_spill] sm:$0xff] %v8374_v47  ;;  %1101 = vmax.xlane.f32.xlu1 %v8368_v45 }
 0x1fa   : > { %v8377_v48 = vpop.f32.mrf.mxu0 }
 0x1fb   : > { %11158 = vst [vmem:[#allocation19_spill] sm:$0xff] %v8377_v48  ;;  %1103 = vmax.xlane.f32.xlu0 %v8377_v48 }
 0x1fc   : > { %v8380_v49 = vpop.f32.mrf.mxu0 }
 0x1fd   : > { %11159 = vst [vmem:[#allocation20_spill] sm:$0xff] %v8380_v49  ;;  %1105 = vmax.xlane.f32.xlu1 %v8374_v47  ;;  %v8557_v47 = vld [vmem:[#allocation2 + $0x50] sm:$0xff] }
 0x1fe   : > { %v8383_v53 = vpop.f32.mrf.mxu0  ;;  %11183 = vst [vmem:[#allocation44_spill] sm:$0xff] %v8557_v47 }
 0x1ff   : > { %11160 = vst [vmem:[#allocation21_spill] sm:$0xff] %v8383_v53  ;;  %1107 = vmax.xlane.f32.xlu0 %v8383_v53  ;;  %v8478_v53 = vld [vmem:[#allocation2 + $0x10] sm:$0xff] }
 0x200   : > { %11172 = vst [vmem:[#allocation33_spill] sm:$0xff] %v8478_v53 }
 0x201   : > { %1109 = vmax.xlane.f32.xlu1 %v8380_v49  ;;  %v8467_v49 = vld [vmem:[%s7758_s6 + $0x8] sm:$0xff] }
 0x202   : > { %11171 = vst [vmem:[#allocation32_spill] sm:$0xff] %v8467_v49  ;;  %6415 = vmatprep.subr.mxu1 %v8467_v49 }
 0x203   : > { %6416 = vmatpush3.msra.mxu1 %v8467_v49 }
 0x204   : > { %6417 = vmatprep.subr.mxu1 %v8482_v21 }
 0x205   : > { %6418 = vmatpush3.msra.mxu1 %v8482_v21 }
 0x26c   : > { %v1080_v32 = vpop.xlane.xlu0 %1079 }
 0x26d   : > { %v8460_v24 = vmax.f32 %v8447_v28, %v1080_v32  ;;  %v8492_v28 = vld [vmem:[#allocation2 + $0x20] sm:$0xff] }
 0x26e   : > { %v1086_v25 = vpop.xlane.xlu1 %1085  ;;  %11175 = vst [vmem:[#allocation36_spill] sm:$0xff] %v8492_v28 }
 0x26f   : > { %11169 = vst [vmem:[#allocation30_spill] sm:$0xff] %v8460_v24  ;;  %1689 = vst.msk [vmem:[#allocation2] sm:$0xff] %vm1383_vm3, %v8460_v24  ;;  %v8474_v29 = vmax.f32 %v8453_v42, %v1086_v25  ;;  %1177 = vperm.xlu0 %6911, %v8460_v24  }
 0x270   : > { %v1082_v32 = vpop.xlane.xlu0 %1081 }
 0x271   : > { %1692 = vst.msk [vmem:[#allocation2 + $0x18] sm:$0xff] %vm1383_vm3, %v8474_v29  ;;  %v8489_v25 = vmax.f32 %v8463_v20, %v1082_v32  ;;  %v8505_v32 = vld [vmem:[#allocation2 + $0x28] sm:$0xff]  ;;  %v8514_v20 = vld [vmem:[#allocation2 + $0x30] sm:$0xff] }
 0x272   : > { %v1084_v24 = vpop.xlane.xlu1 %1083  ;;  %11176 = vst [vmem:[#allocation37_spill] sm:$0xff] %v8505_v32  ;;  %11177 = vst [vmem:[#allocation38_spill] sm:$0xff] %v8514_v20 }
 0x273   : > { %11174 = vst [vmem:[#allocation35_spill] sm:$0xff] %v8489_v25  ;;  %1690 = vst.msk [vmem:[#allocation2 + $0x8] sm:$0xff] %vm1383_vm3, %v8489_v25  ;;  %v8500_v48 = vmax.f32 %v8478_v53, %v1084_v24  ;;  %1182 = vperm.xlu1 %6912, %v8489_v25   ;;  %1759 = vrot.lane.b32.xlu0 %v8179_v56, %s7486_s12  ;;  %v8547_v53 = vld [vmem:[#allocation2 + $0x48] sm:$0xff] }
 0x274   : > { %v1088_v42 = vpop.xlane.xlu0 %1087  ;;  %11182 = vst [vmem:[#allocation43_spill] sm:$0xff] %v8547_v53 }
 0x275   : > { %1691 = vst.msk [vmem:[#allocation2 + $0x10] sm:$0xff] %vm1383_vm3, %v8500_v48  ;;  %v8512_v49 = vmax.f32 %v8492_v28, %v1088_v42  ;;  %v8527_v42 = vld [vmem:[#allocation2 + $0x38] sm:$0xff] }
 0x276   : > { %v1090_v24 = vpop.xlane.xlu1 %1089  ;;  %11178 = vst [vmem:[#allocation39_spill] sm:$0xff] %v8527_v42 }
 0x277   : > { %v8517_v25 = vmax.f32 %v8505_v32, %v1090_v24  ;;  %1767 = vrot.lane.b32.xlu1 %v8148_v50, %s7486_s12  ;;  %1755 = vrot.lane.b32.xlu0 %v8193_v58, %s7486_s12  ;;  %1693 = vst.msk [vmem:[#allocation2 + $0x20] sm:$0xff] %vm1383_vm3, %v8512_v49  ;;  %v8536_v58 = vld [vmem:[#allocation2 + $0x40] sm:$0xff] }
 0x278   : > { %v1092_v21 = vpop.xlane.xlu0 %1091  ;;  %11180 = vst [vmem:[#allocation41_spill] sm:$0xff] %v8536_v58 }
 0x279   : > { %1694 = vst.msk [vmem:[#allocation2 + $0x28] sm:$0xff] %vm1383_vm3, %v8517_v25  ;;  %v8534_v50 = vmax.f32 %v8514_v20, %v1092_v21  ;;  %v8578_v20 = vld [vmem:[#allocation2 + $0x60] sm:$0xff] }
 0x27a   : > { %v1094_v24 = vpop.xlane.xlu1 %1093  ;;  %11187 = vst [vmem:[#allocation48_spill] sm:$0xff] %v8578_v20 }
 0x27b   : > { %11179 = vst [vmem:[#allocation40_spill] sm:$0xff] %v8534_v50  ;;  %v8539_v56 = vmax.f32 %v8527_v42, %v1094_v24  ;;  %1765 = vrot.lane.b32.xlu1 %v8151_v51, %s7486_s12  ;;  %1695 = vst.msk [vmem:[#allocation2 + $0x30] sm:$0xff] %vm1383_vm3, %v8534_v50  ;;  %v8568_v42 = vld [vmem:[#allocation2 + $0x58] sm:$0xff] }
 0x27c   : > { %v1096_v32 = vpop.xlane.xlu0 %1095  ;;  %11185 = vst [vmem:[#allocation46_spill] sm:$0xff] %v8568_v42 }
 0x27d   : > { %11181 = vst [vmem:[#allocation42_spill] sm:$0xff] %v8539_v56  ;;  %1696 = vst.msk [vmem:[#allocation2 + $0x38] sm:$0xff] %vm1383_vm3, %v8539_v56  ;;  %1212 = vperm.xlu0 %6911, %v8539_v56   ;;  %v8555_v24 = vmax.f32 %v8536_v58, %v1096_v32  ;;  %v8589_v58 = vld [vmem:[#allocation2 + $0x68] sm:$0xff] }
 0x27e   : > { %v1098_v51 = vpop.xlane.xlu1 %1097  ;;  %11189 = vst [vmem:[#allocation50_spill] sm:$0xff] %v8589_v58 }
 0x27f   : > { %v8560_v28 = vmax.f32 %v8547_v53, %v1098_v51  ;;  %1763 = vrot.lane.b32.xlu1 %v8160_v52, %s7486_s12  ;;  %1697 = vst.msk [vmem:[#allocation2 + $0x40] sm:$0xff] %vm1383_vm3, %v8555_v24 }
 0x280   : > { %v1100_v56 = vpop.xlane.xlu0 %1099 }
 0x281   : > { %11184 = vst [vmem:[#allocation45_spill] sm:$0xff] %v8560_v28  ;;  %1698 = vst.msk [vmem:[#allocation2 + $0x48] sm:$0xff] %vm1383_vm3, %v8560_v28  ;;  %1207 = vperm.xlu0 %6911, %v8534_v50   ;;  %v8576_v51 = vmax.f32 %v8557_v47, %v1100_v56  ;;  %v8599_v50 = vld [vmem:[#allocation2 + $0x70] sm:$0xff]  ;;  %v8986_v47 = vld [vmem:[#allocation2 + $0xb8] sm:$0xff] }
 0x282   : > { %v1102_v52 = vpop.xlane.xlu1 %1101  ;;  %11191 = vst [vmem:[#allocation52_spill] sm:$0xff] %v8599_v50  ;;  %11239 = vst [vmem:[#allocation76_spill] sm:$0xff] %v8986_v47 }
 0x283   : > { %11186 = vst [vmem:[#allocation47_spill] sm:$0xff] %v8576_v51  ;;  %v8581_v21 = vmax.f32 %v8568_v42, %v1102_v52  ;;  %1761 = vrot.lane.b32.xlu1 %v8170_v55, %s7486_s12  ;;  %1699 = vst.msk [vmem:[#allocation2 + $0x50] sm:$0xff] %vm1383_vm3, %v8576_v51 }
 0x284   : > { %v1104_v53 = vpop.xlane.xlu0 %1103 }
 0x285   : > { %11188 = vst [vmem:[#allocation49_spill] sm:$0xff] %v8581_v21  ;;  %1700 = vst.msk [vmem:[#allocation2 + $0x58] sm:$0xff] %vm1383_vm3, %v8581_v21  ;;  %1232 = vperm.xlu0 %6911, %v8581_v21   ;;  %v8597_v52 = vmax.f32 %v8578_v20, %v1104_v53  ;;  %v8610_v21 = vld [vmem:[#allocation2 + $0x78] sm:$0xff] }
 0x286   : > { %v1106_v55 = vpop.xlane.xlu1 %1105  ;;  %11193 = vst [vmem:[#allocation54_spill] sm:$0xff] %v8610_v21 }
 0x287   : > { %11190 = vst [vmem:[#allocation51_spill] sm:$0xff] %v8597_v52  ;;  %1757 = vrot.lane.b32.xlu1 %v8186_v57, %s7486_s12  ;;  %1701 = vst.msk [vmem:[#allocation2 + $0x60] sm:$0xff] %vm1383_vm3, %v8597_v52  ;;  %v8608_v56 = vmax.f32 %v8589_v58, %v1106_v55 }
 0x288   : > { %v1108_v42 = vpop.xlane.xlu0 %1107 }
 0x289   : > { %11192 = vst [vmem:[#allocation53_spill] sm:$0xff] %v8608_v56  ;;  %1227 = vperm.xlu0 %6911, %v8576_v51   ;;  %1702 = vst.msk [vmem:[#allocation2 + $0x68] sm:$0xff] %vm1383_vm3, %v8608_v56  ;;  %v8618_v57 = vmax.f32 %v8599_v50, %v1108_v42  ;;  %v8958_v51 = vld [vmem:[#allocation2 + $0xa0] sm:$0xff] }
 0x28a   : > { %v1110_v32 = vpop.xlane.xlu1 %1109 }
 0x28b   : > { %11194 = vst [vmem:[#allocation55_spill] sm:$0xff] %v8618_v57  ;;  %1753 = vrot.lane.b32.xlu1 %v8200_v59, %s7486_s12  ;;  %1703 = vst.msk [vmem:[#allocation2 + $0x70] sm:$0xff] %vm1383_vm3, %v8618_v57  ;;  %v8627_v20 = vmax.f32 %v8610_v21, %v1110_v32  ;;  %v8905_v21 = vld [vmem:[#allocation2 + $0x80] sm:$0xff] }
 0x28c   : > { %11221 = vst [vmem:[#allocation70_spill] sm:$0xff] %v8905_v21 }
 0x28d   : > { %11195 = vst [vmem:[#allocation56_spill] sm:$0xff] %v8627_v20  ;;  %1751 = vrot.lane.b32.xlu0 %v8207_v60, %s7486_s12  ;;  %1704 = vst.msk [vmem:[#allocation2 + $0x78] sm:$0xff] %vm1383_vm3, %v8627_v20 }
 0x28f   : > { %1192 = vperm.xlu1 %6912, %v8474_v29  }
 0x291   : > { %1247 = vperm.xlu0 %6911, %v8618_v57  }
 0x293   : > { %1187 = vperm.xlu1 %6912, %v8500_v48  }
 0x295   : > { %1252 = vperm.xlu0 %6911, %v8627_v20  }
 0x297   : > { %1202 = vperm.xlu1 %6912, %v8517_v25  }
 0x299   : > { %1745 = vrot.lane.b32.xlu0 %v8228_v63, %s7486_s12 }
 0x29b   : > { %1197 = vperm.xlu1 %6912, %v8512_v49  }
 0x29d   : > { %1741 = vrot.lane.b32.xlu0 %v8242_v1, %s7486_s12 }
 0x29f   : > { %1222 = vperm.xlu1 %6912, %v8560_v28   ;;  %v8977_v28 = vld [vmem:[#allocation2 + $0xb0] sm:$0xff] }
 0x2a0   : > { %11237 = vst [vmem:[#allocation74_spill] sm:$0xff] %v8977_v28 }
 0x2a1   : > { %1737 = vrot.lane.b32.xlu0 %v8256_v3, %s7486_s12 }
 0x2a3   : > { %1217 = vperm.xlu1 %6912, %v8555_v24  }
 0x2a5   : > { %1707 = vrot.lane.b32.xlu0 %v8264_v6, %s7486_s12 }
 0x2a7   : > { %1242 = vperm.xlu1 %6912, %v8608_v56   ;;  %v11224_v56 = vld [vmem:[#allocation24_spill] sm:$0xff] }
 0x2a9   : > { %1711 = vrot.lane.b32.xlu0 %v8274_v10, %s7486_s12 }
 0x2ab   : > { %1237 = vperm.xlu1 %6912, %v8597_v52   ;;  %v11226_v52 = vld [vmem:[#allocation27_spill] sm:$0xff] }
 0x2ad   : > { %1715 = vrot.lane.b32.xlu0 %v8284_v14, %s7486_s12 }
 0x2af   : > { %1749 = vrot.lane.b32.xlu1 %v8214_v61, %s7486_s12 }
 0x2b1   : > { %1719 = vrot.lane.b32.xlu0 %v8294_v18, %s7486_s12 }
 0x2b3   : > { %1747 = vrot.lane.b32.xlu1 %v8221_v62, %s7486_s12 }
 0x2b5   : > { %1723 = vrot.lane.b32.xlu0 %v8304_v22, %s7486_s12 }
 0x2b7   : > { %1743 = vrot.lane.b32.xlu1 %v8235_v0, %s7486_s12 }
 0x2b9   : > { %1727 = vrot.lane.b32.xlu0 %v8314_v26, %s7486_s12 }
 0x2bb   : > { %1739 = vrot.lane.b32.xlu1 %v8249_v2, %s7486_s12 }
 0x2bd   : > { %1731 = vrot.lane.b32.xlu0 %v8324_v30, %s7486_s12 }
 0x2bf   : > { %1705 = vrot.lane.b32.xlu1 %v8165_v54, %s7486_s12 }
 0x2c1   : > { %1735 = vrot.lane.b32.xlu0 %v8333_v33, %s7486_s12 }
 0x2c3   : > { %1709 = vrot.lane.b32.xlu1 %v8268_v7, %s7486_s12 }
 0x2c5   : > { %2475 = vrot.lane.b32.xlu0 %v8388_v4, %s7486_s12 }
 0x2c7   : > { %1713 = vrot.lane.b32.xlu1 %v8278_v11, %s7486_s12 }
 0x2c9   : > { %2469 = vrot.lane.b32.xlu0 %v8401_v9, %s7486_s12 }
 0x2cb   : > { %1717 = vrot.lane.b32.xlu1 %v8288_v15, %s7486_s12 }
 0x2cd   : > { %2465 = vrot.lane.b32.xlu0 %v8411_v13, %s7486_s12 }
 0x2cf   : > { %1721 = vrot.lane.b32.xlu1 %v8298_v19, %s7486_s12 }
 0x2d1   : > { %2461 = vrot.lane.b32.xlu0 %v8421_v17, %s7486_s12 }
 0x2d3   : > { %1725 = vrot.lane.b32.xlu1 %v8308_v23, %s7486_s12 }
 0x2d7   : > { %1729 = vrot.lane.b32.xlu1 %v8318_v27, %s7486_s12 }
 0x2db   : > { %1733 = vrot.lane.b32.xlu1 %v8328_v31, %s7486_s12 }
 0x2df   : > { %2473 = vrot.lane.b32.xlu1 %v8393_v5, %s7486_s12 }
 0x2e3   : > { %2471 = vrot.lane.b32.xlu1 %v8396_v8, %s7486_s12 }
 0x2e7   : > { %2467 = vrot.lane.b32.xlu1 %v8406_v12, %s7486_s12 }
 0x2ea   : > { %v1178_v59 = vpop.permute.xlu0 %1177 }
 0x2eb   : > { %v1255_v60 = vsub.f32 %v8341_v35, %v1178_v59  ;;  %2463 = vrot.lane.b32.xlu1 %v8416_v16, %s7486_s12 }
 0x2ed   : > { %v1271_v61 = vmul.f32 1.442695, %v1255_v60 }
 0x2ee   : > { %v1183_v62 = vpop.permute.xlu1 %1182  ;;  %v1760_v2 = vpop.permute.xlu0 %1759 }
 0x2ef   : > { %6913 = vpow2.f32 %v1271_v61  ;;  %v1256_v63 = vsub.f32 %v8339_v34, %v1183_v62 }
 0x2f1   : > { %v1273_v0 = vmul.f32 1.442695, %v1256_v63 }
 0x2f2   : > { %v1768_v1 = vpop.permute.xlu1 %1767  ;;  %v1756_v5 = vpop.permute.xlu0 %1755 }
 0x2f3   : > { %6915 = vpow2.f32 %v1273_v0  ;;  %6443 = vmatprep.subr.msk.mxu1 %vm821_vm2, %v1768_v1 }
 0x2f6   : > { %v1766_v3 = vpop.permute.xlu1 %1765 }
 0x2f8   : > { %v1213_v12 = vpop.permute.xlu0 %1212 }
 0x2fa   : > { %v1764_v4 = vpop.permute.xlu1 %1763 }
 0x2fc   : > { %v8710_v8 = vpop.eup %6913  ;;  %v1208_v16 = vpop.permute.xlu0 %1207 }
 0x2fd   : > { %6419 = vmatprep.mubr.f32.mxu1 %v8710_v8 }
 0x2fe   : > { %v1762_v35 = vpop.permute.xlu1 %1761 }
 0x300   : > { %v8713_v9 = vpop.eup %6915  ;;  %v1233_v32 = vpop.permute.xlu0 %1232 }
 0x301   : > { %6420 = vmatmul.mubr.f32.vlgmr.msra.gmra.mxu1 %v8713_v9 }
 0x302   : > { %6444 = vmatpush3.xpose.msk.msra.mxu1 %vm821_vm2, %v1768_v1  ;;  %v1758_v34 = vpop.permute.xlu1 %1757 }
 0x303   : > { %6445 = vmatprep.subr.msk.mxu1 %vm821_vm2, %v1766_v3 }
 0x304   : > { %v1228_v1 = vpop.permute.xlu0 %1227 }
 0x306   : > { %6446 = vmatpush3.xpose.msk.msra.mxu1 %vm821_vm2, %v1766_v3  ;;  %v1754_v13 = vpop.permute.xlu1 %1753 }
 0x307   : > { %6447 = vmatprep.subr.msk.mxu1 %vm821_vm2, %v1764_v4 }
 0x30a   : > { %6448 = vmatpush3.xpose.msk.msra.mxu1 %vm821_vm2, %v1764_v4  ;;  %v1193_v17 = vpop.permute.xlu1 %1192 }
 0x30b   : > { %6449 = vmatprep.subr.msk.mxu1 %vm821_vm2, %v1762_v35  ;;  %v1258_v59 = vsub.f32 %v8344_v36, %v1193_v17  ;;  %v1261_v36 = vsub.f32 %v8359_v41, %v1208_v16  ;;  %v1266_v16 = vsub.f32 %v8368_v45, %v1233_v32 }
 0x30d   : > { %v1277_v62 = vmul.f32 1.442695, %v1258_v59  ;;  %v1283_v17 = vmul.f32 1.442695, %v1261_v36  ;;  %v1752_v59 = vpop.permute.xlu0 %1751 }
 0x30e   : > { %6450 = vmatpush3.xpose.msk.msra.mxu1 %vm821_vm2, %v1762_v35  ;;  %v1188_v60 = vpop.permute.xlu1 %1187  ;;  %v1262_v35 = vsub.f32 %v8356_v40, %v1213_v12 }
 0x30f   : > { %v1257_v61 = vsub.f32 %v8347_v37, %v1188_v60  ;;  %6451 = vmatprep.subr.msk.mxu1 %vm821_vm2, %v1760_v2 }
 0x311   : > { %v1275_v63 = vmul.f32 1.442695, %v1257_v61  ;;  %v1248_v12 = vpop.permute.xlu0 %1247 }
 0x312   : > { %6452 = vmatpush3.xpose.msk.msra.mxu1 %vm821_vm2, %v1760_v2  ;;  %v1203_v0 = vpop.permute.xlu1 %1202 }
 0x313   : > { %6917 = vpow2.f32 %v1275_v63  ;;  %6453 = vmatprep.subr.msk.mxu1 %vm821_vm2, %v1758_v34  ;;  %v1260_v3 = vsub.f32 %v8350_v38, %v1203_v0  ;;  %v1285_v38 = vmul.f32 1.442695, %v1262_v35 }
 0x314   : > { %6919 = vpow2.f32 %v1277_v62 }
 0x315   : > { %v1281_v2 = vmul.f32 1.442695, %v1260_v3  ;;  %v11197_v3 = vld [vmem:[#allocation21_spill] sm:$0xff]  ;;  %v1253_v32 = vpop.permute.xlu0 %1252 }
 0x316   : > { %6454 = vmatpush3.xpose.msk.msra.mxu1 %vm821_vm2, %v1758_v34  ;;  %v1198_v4 = vpop.permute.xlu1 %1197  ;;  %v1269_v45 = vsub.f32 %v11197_v3, %v1248_v12 }
 0x317   : > { %v1259_v37 = vsub.f32 %v8353_v39, %v1198_v4  ;;  %6455 = vmatprep.subr.msk.mxu1 %vm821_vm2, %v1756_v5  ;;  %v1265_v39 = vsub.f32 %v8371_v46, %v1228_v1  ;;  %v11198_v4 = vld [vmem:[#allocation19_spill] sm:$0xff] }
 0x319   : > { %v1279_v60 = vmul.f32 1.442695, %v1259_v37  ;;  %v1291_v63 = vmul.f32 1.442695, %v1265_v39  ;;  %v1746_v12 = vpop.permute.xlu0 %1745 }
 0x31a   : > { %6456 = vmatpush3.xpose.msk.msra.mxu1 %vm821_vm2, %v1756_v5  ;;  %v1223_v61 = vpop.permute.xlu1 %1222 }
 0x31b   : > { %6921 = vpow2.f32 %v1279_v60  ;;  %6457 = vmatprep.subr.msk.mxu1 %vm821_vm2, %v1754_v13  ;;  %v1264_v41 = vsub.f32 %v8362_v43, %v1223_v61  ;;  %v1299_v61 = vmul.f32 1.442695, %v1269_v45 }
 0x31c   : > { %6923 = vpow2.f32 %v1281_v2  ;;  %v11199_v2 = vld [vmem:[#allocation20_spill] sm:$0xff] }
 0x31d   : > { %6925 = vpow2.f32 %v1283_v17  ;;  %v1289_v62 = vmul.f32 1.442695, %v1264_v41  ;;  %v1270_v17 = vsub.f32 %v11199_v2, %v1253_v32 }
 0x31e   : > { %6458 = vmatpush3.xpose.msk.msra.mxu1 %vm821_vm2, %v1754_v13  ;;  %v1218_v40 = vpop.permute.xlu1 %1217  ;;  %6927 = vpow2.f32 %v1285_v38  ;;  %v11196_v13 = vld [vmem:[#allocation18_spill] sm:$0xff] }
 0x31f   : > { %v1263_v34 = vsub.f32 %v8365_v44, %v1218_v40  ;;  %6459 = vmatprep.subr.msk.mxu1 %vm821_vm2, %v1752_v59  ;;  %v1293_v44 = vmul.f32 1.442695, %v1266_v16  ;;  %v1301_v40 = vmul.f32 1.442695, %v1270_v17 }
 0x320   : > { %v8741_v5 = vpop.eup %6917 }
 0x321   : > { %v1287_v0 = vmul.f32 1.442695, %v1263_v34  ;;  %6422 = vmatprep.mubr.f32.mxu1 %v8741_v5  ;;  %v8745_v43 = vpop.eup %6919 }
 0x322   : > { %6460 = vmatpush3.xpose.msk.msra.mxu1 %vm821_vm2, %v1752_v59  ;;  %v1243_v46 = vpop.permute.xlu1 %1242 }
 0x323   : > { %6929 = vpow2.f32 %v1287_v0  ;;  %6423 = vmatmul.mubr.f32.gmra.mxu1 %v8745_v43  ;;  %v1268_v1 = vsub.f32 %v11196_v13, %v1243_v46 }
 0x324   : > { %6931 = vpow2.f32 %v1289_v62 }
 0x325   : > { %6933 = vpow2.f32 %v1291_v63  ;;  %v1297_v59 = vmul.f32 1.442695, %v1268_v1  ;;  %v1742_v63 = vpop.permute.xlu0 %1741 }
 0x326   : > { %v1238_v36 = vpop.permute.xlu1 %1237  ;;  %6935 = vpow2.f32 %v1293_v44 }
 0x327   : > { %v1267_v37 = vsub.f32 %v11198_v4, %v1238_v36 }
 0x328   : > { %v8752_v35 = vpop.eup %6921 }
 0x329   : > { %v8755_v60 = vpop.eup %6923  ;;  %v1295_v38 = vmul.f32 1.442695, %v1267_v37  ;;  %6425 = vmatprep.mubr.f32.mxu1 %v8752_v35  ;;  %v1738_v13 = vpop.permute.xlu0 %1737 }
 0x32a   : > { %v8758_v41 = vpop.eup %6925  ;;  %v1750_v39 = vpop.permute.xlu1 %1749  ;;  %6426 = vmatmul.mubr.f32.gmra.mxu1 %v8755_v60 }
 0x32b   : > { %6937 = vpow2.f32 %v1295_v38  ;;  %6428 = vmatprep.mubr.f32.mxu1 %v8758_v41  ;;  %6461 = vmatprep.subr.msk.mxu1 %vm821_vm2, %v1750_v39  ;;  %v8764_v34 = vpop.eup %6927 }
 0x32c   : > { %6939 = vpow2.f32 %v1297_v59  ;;  %6462 = vmatpush3.xpose.msk.msra.mxu1 %vm821_vm2, %v1750_v39 }
 0x32d   : > { %6941 = vpow2.f32 %v1299_v61  ;;  %v1708_v37 = vpop.permute.xlu0 %1707 }
 0x32e   : > { %v1748_v16 = vpop.permute.xlu1 %1747  ;;  %6429 = vmatmul.mubr.f32.gmra.mxu1 %v8764_v34  ;;  %6943 = vpow2.f32 %v1301_v40 }
 0x32f   : > { %6463 = vmatprep.subr.msk.mxu1 %vm821_vm2, %v1748_v16 }
 0x330   : > { %v8768_v62 = vpop.eup %6929  ;;  %6464 = vmatpush3.xpose.msk.msra.mxu1 %vm821_vm2, %v1748_v16 }
 0x331   : > { %v8771_v0 = vpop.eup %6931  ;;  %6431 = vmatprep.mubr.f32.mxu1 %v8768_v62  ;;  %6465 = vmatprep.subr.msk.mxu1 %vm821_vm2, %v1746_v12  ;;  %v1712_v59 = vpop.permute.xlu0 %1711 }
 0x332   : > { %v8775_v46 = vpop.eup %6933  ;;  %6432 = vmatmul.mubr.f32.gmra.mxu1 %v8771_v0  ;;  %v1744_v44 = vpop.permute.xlu1 %1743 }
 0x333   : > { %6434 = vmatprep.mubr.f32.mxu1 %v8775_v46  ;;  %v8780_v1 = vpop.eup %6935 }
 0x334   : > { %6466 = vmatpush3.xpose.msk.msra.mxu1 %vm821_vm2, %v1746_v12 }
 0x335   : > { %6467 = vmatprep.subr.msk.mxu1 %vm821_vm2, %v1744_v44  ;;  %v1716_v38 = vpop.permute.xlu0 %1715 }
 0x336   : > { %6435 = vmatmul.mubr.f32.gmra.mxu1 %v8780_v1  ;;  %v1740_v3 = vpop.permute.xlu1 %1739 }
 0x338   : > { %v8784_v45 = vpop.eup %6937  ;;  %6468 = vmatpush3.xpose.msk.msra.mxu1 %vm821_vm2, %v1744_v44 }
 0x339   : > { %v8787_v32 = vpop.eup %6939  ;;  %6437 = vmatprep.mubr.f32.mxu1 %v8784_v45  ;;  %6469 = vmatprep.subr.msk.mxu1 %vm821_vm2, %v1742_v63  ;;  %v1720_v40 = vpop.permute.xlu0 %1719 }
 0x33a   : > { %v8791_v36 = vpop.eup %6941  ;;  %6438 = vmatmul.mubr.f32.gmra.mxu1 %v8787_v32  ;;  %v1706_v4 = vpop.permute.xlu1 %1705 }
 0x33b   : > { %6440 = vmatprep.mubr.f32.mxu1 %v8791_v36  ;;  %v8796_v2 = vpop.eup %6943 }
 0x33c   : > { %6470 = vmatpush3.xpose.msk.msra.mxu1 %vm821_vm2, %v1742_v63 }
 0x33d   : > { %6471 = vmatprep.subr.msk.mxu1 %vm821_vm2, %v1740_v3  ;;  %v1724_v16 = vpop.permute.xlu0 %1723 }
 0x33e   : > { %6441 = vmatmul.mubr.f32.gmra.mxu1 %v8796_v2  ;;  %v1710_v17 = vpop.permute.xlu1 %1709 }
 0x33f   : > { %6475 = vmatprep.mubr.msk.f32.mxu1 %vm821_vm2, %v1706_v4 }
 0x340   : > { %6472 = vmatpush3.xpose.msk.msra.mxu1 %vm821_vm2, %v1740_v3 }
 0x341   : > { %6473 = vmatprep.subr.msk.mxu1 %vm821_vm2, %v1738_v13  ;;  %v1728_v44 = vpop.permute.xlu0 %1727 }
 0x342   : > { %v1714_v61 = vpop.permute.xlu1 %1713 }
 0x344   : > { %6474 = vmatpush3.xpose.msk.msra.mxu1 %vm821_vm2, %v1738_v13 }
 0x345   : > { %v1732_v3 = vpop.permute.xlu0 %1731 }
 0x346   : > { %v1718_v39 = vpop.permute.xlu1 %1717 }
 0x347   : > { %6476 = vmatmul.mubr.msk.f32.vlgmr.msra.gmra.mxu1 %vm821_vm2, %v1708_v37 }
 0x348   : > { %6478 = vmatprep.mubr.msk.f32.mxu1 %vm821_vm2, %v1710_v17 }
 0x349   : > { %v1736_v37 = vpop.permute.xlu0 %1735 }
 0x34a   : > { %v1722_v12 = vpop.permute.xlu1 %1721 }
 0x34b   : > { %6479 = vmatmul.mubr.msk.f32.gmra.mxu1 %vm821_vm2, %v1712_v59 }
 0x34c   : > { %6481 = vmatprep.mubr.msk.f32.mxu1 %vm821_vm2, %v1714_v61 }
 0x34d   : > { %v2476_v17 = vpop.permute.xlu0 %2475 }
 0x34e   : > { %v1726_v63 = vpop.permute.xlu1 %1725  ;;  %6499 = vmatprep.subr.mxu0 %v2476_v17 }
 0x34f   : > { %6482 = vmatmul.mubr.msk.f32.gmra.mxu1 %vm821_vm2, %v1716_v38  ;;  %6500 = vmatpush3.msra.mxu0 %v2476_v17 }
 0x350   : > { %6484 = vmatprep.mubr.msk.f32.mxu1 %vm821_vm2, %v1718_v39 }
 0x351   : > { %v2470_v38 = vpop.permute.xlu0 %2469 }
 0x352   : > { %v1730_v13 = vpop.permute.xlu1 %1729 }
 0x353   : > { %6485 = vmatmul.mubr.msk.f32.gmra.mxu1 %vm821_vm2, %v1720_v40 }
 0x354   : > { %6487 = vmatprep.mubr.msk.f32.mxu1 %vm821_vm2, %v1722_v12 }
 0x355   : > { %v2466_v40 = vpop.permute.xlu0 %2465 }
 0x356   : > { %v1734_v4 = vpop.permute.xlu1 %1733 }
 0x357   : > { %6488 = vmatmul.mubr.msk.f32.gmra.mxu1 %vm821_vm2, %v1724_v16 }
 0x358   : > { %6490 = vmatprep.mubr.msk.f32.mxu1 %vm821_vm2, %v1726_v63 }
 0x359   : > { %v2462_v16 = vpop.permute.xlu0 %2461 }
 0x35a   : > { %v2474_v59 = vpop.permute.xlu1 %2473 }
 0x35b   : > { %6491 = vmatmul.mubr.msk.f32.gmra.mxu1 %vm821_vm2, %v1728_v44  ;;  %6501 = vmatprep.subr.mxu0 %v2474_v59 }
 0x35c   : > { %6493 = vmatprep.mubr.msk.f32.mxu1 %vm821_vm2, %v1730_v13  ;;  %6502 = vmatpush3.msra.mxu0 %v2474_v59 }
 0x35e   : > { %v2472_v61 = vpop.permute.xlu1 %2471 }
 0x35f   : > { %6494 = vmatmul.mubr.msk.f32.gmra.mxu1 %vm821_vm2, %v1732_v3  ;;  %6503 = vmatprep.subr.mxu0 %v2472_v61 }
 0x360   : > { %6496 = vmatprep.mubr.msk.f32.mxu1 %vm821_vm2, %v1734_v4  ;;  %6504 = vmatpush3.msra.mxu0 %v2472_v61 }
 0x361   : > { %6505 = vmatprep.subr.mxu0 %v2470_v38 }
 0x362   : > { %v2468_v39 = vpop.permute.xlu1 %2467  ;;  %6506 = vmatpush3.msra.mxu0 %v2470_v38 }
 0x363   : > { %6497 = vmatmul.mubr.msk.f32.gmra.mxu1 %vm821_vm2, %v1736_v37  ;;  %6507 = vmatprep.subr.mxu0 %v2468_v39 }
 0x364   : > { %6508 = vmatpush3.msra.mxu0 %v2468_v39 }
 0x365   : > { %6509 = vmatprep.subr.mxu0 %v2466_v40 }
 0x366   : > { %v2464_v12 = vpop.permute.xlu1 %2463  ;;  %6510 = vmatpush3.msra.mxu0 %v2466_v40 }
 0x367   : > { %6511 = vmatprep.subr.mxu0 %v2464_v12 }
 0x368   : > { %6512 = vmatpush3.msra.mxu0 %v2464_v12 }
 0x369   : > { %6513 = vmatprep.subr.mxu0 %v2462_v16 }
 0x36a   : > { %6514 = vmatpush3.msra.mxu0 %v2462_v16 }
 0x3c1   : > { %v8819_v63 = vpop.f32.mrf.mxu1 }
 0x3c2   : > { %11200 = vst [vmem:[#allocation18_spill] sm:$0xff] %v8819_v63  ;;  %v8903_v63 = vld [vmem:[#allocation2 + $0x88] sm:$0xff] }
 0x3c3   : > { %v8821_v44 = vpop.f32.mrf.mxu1  ;;  %11220 = vst [vmem:[#allocation69_spill] sm:$0xff] %v8903_v63 }
 0x3c4   : > { %11201 = vst [vmem:[#allocation21_spill] sm:$0xff] %v8821_v44 }
 0x3e3   : > { %v8823_v13 = vpop.f32.mrf.mxu1 }
 0x3e4   : > { %11202 = vst [vmem:[#allocation19_spill] sm:$0xff] %v8823_v13 }
 0x3e5   : > { %v8825_v3 = vpop.f32.mrf.mxu1 }
 0x3e6   : > { %11203 = vst [vmem:[#allocation20_spill] sm:$0xff] %v8825_v3 }
 0x3ea   : > { %v8827_v4 = vpop.f32.mrf.mxu1 }
 0x3eb   : > { %11204 = vst [vmem:[#allocation57_spill] sm:$0xff] %v8827_v4 }
 0x3ec   : > { %v8829_v37 = vpop.f32.mrf.mxu1 }
 0x3ed   : > { %11205 = vst [vmem:[#allocation58_spill] sm:$0xff] %v8829_v37 }
 0x3ee   : > { %v8831_v17 = vpop.f32.mrf.mxu1 }
 0x3ef   : > { %11206 = vst [vmem:[#allocation59_spill] sm:$0xff] %v8831_v17 }
 0x3f0   : > { %v8833_v59 = vpop.f32.mrf.mxu1 }
 0x3f1   : > { %11207 = vst [vmem:[#allocation60_spill] sm:$0xff] %v8833_v59 }
 0x3f2   : > { %v8835_v61 = vpop.f32.mrf.mxu1 }
 0x3f3   : > { %11208 = vst [vmem:[#allocation61_spill] sm:$0xff] %v8835_v61 }
 0x3f4   : > { %v8837_v38 = vpop.f32.mrf.mxu1 }
 0x3f5   : > { %11209 = vst [vmem:[#allocation62_spill] sm:$0xff] %v8837_v38 }
 0x3f6   : > { %v8839_v39 = vpop.f32.mrf.mxu1 }
 0x3f7   : > { %11210 = vst [vmem:[#allocation63_spill] sm:$0xff] %v8839_v39  ;;  %v11216_v39 = vld [vmem:[#allocation22_spill] sm:$0xff] }
 0x3f8   : > { %v8841_v40 = vpop.f32.mrf.mxu1 }
 0x3f9   : > { %11211 = vst [vmem:[#allocation64_spill] sm:$0xff] %v8841_v40  ;;  %v11217_v40 = vld [vmem:[#allocation23_spill] sm:$0xff] }
 0x3fa   : > { %v8843_v12 = vpop.f32.mrf.mxu1 }
 0x3fb   : > { %11212 = vst [vmem:[#allocation65_spill] sm:$0xff] %v8843_v12 }
 0x3fc   : > { %v8845_v16 = vpop.f32.mrf.mxu1 }
 0x3fd   : > { %11213 = vst [vmem:[#allocation66_spill] sm:$0xff] %v8845_v16 }
 0x3fe   : > { %v8847_v42 = vpop.f32.mrf.mxu1 }
 0x3ff   : > { %11214 = vst [vmem:[#allocation67_spill] sm:$0xff] %v8847_v42 }
 0x400   : > { %v8849_v55 = vpop.f32.mrf.mxu1 }
 0x401   : > { %11215 = vst [vmem:[#allocation68_spill] sm:$0xff] %v8849_v55 }
 0x407   : > { %v8851_v53 = vpop.f32.mrf.mxu1 }
 0x408   : > { %1997 = vmax.xlane.f32.xlu0 %v8851_v53 }
 0x409   : > { %v8854_v17 = vpop.f32.mrf.mxu1 }
 0x40a   : > { %1995 = vmax.xlane.f32.xlu1 %v8854_v17 }
 0x40b   : > { %v8861_v12 = vpop.f32.mrf.mxu1 }
 0x40d   : > { %v8863_v16 = vpop.f32.mrf.mxu1 }
 0x40f   : > { %v8865_v42 = vpop.f32.mrf.mxu1 }
 0x411   : > { %v8867_v55 = vpop.f32.mrf.mxu1 }
 0x413   : > { %v8869_v61 = vpop.f32.mrf.mxu1 }
 0x415   : > { %v8871_v38 = vpop.f32.mrf.mxu1 }
 0x417   : > { %v8873_v59 = vpop.f32.mrf.mxu1 }
 0x419   : > { %v8875_v4 = vpop.f32.mrf.mxu1 }
 0x41b   : > { %2459 = vrot.lane.b32.xlu1 %v11216_v39, %s7486_s12  ;;  %v8879_v39 = vpop.f32.mrf.mxu1 }
 0x41e   : > { %2457 = vrot.lane.b32.xlu0 %v11217_v40, %s7486_s12  ;;  %v8883_v40 = vpop.f32.mrf.mxu1 }
 0x420   : > { %v8887_v37 = vpop.f32.mrf.mxu1 }
 0x422   : > { %v8891_v13 = vpop.f32.mrf.mxu1 }
 0x424   : > { %v8894_v3 = vpop.f32.mrf.mxu1 }
 0x425   : > { %11218 = vst [vmem:[#allocation22_spill] sm:$0xff] %v8894_v3 }
 0x426   : > { %v8898_v44 = vpop.f32.mrf.mxu1 }
 0x427   : > { %11219 = vst [vmem:[#allocation23_spill] sm:$0xff] %v8898_v44 }
 0x43d   : > { %1999 = vmax.xlane.f32.xlu0 %v8863_v16 }
 0x43f   : > { %2001 = vmax.xlane.f32.xlu1 %v8861_v12 }
 0x441   : > { %2003 = vmax.xlane.f32.xlu0 %v8867_v55 }
 0x443   : > { %2005 = vmax.xlane.f32.xlu1 %v8865_v42 }
 0x445   : > { %2007 = vmax.xlane.f32.xlu0 %v8871_v38 }
 0x447   : > { %2009 = vmax.xlane.f32.xlu1 %v8869_v61 }
 0x449   : > { %2011 = vmax.xlane.f32.xlu0 %v8875_v4 }
 0x44b   : > { %2013 = vmax.xlane.f32.xlu1 %v8873_v59 }
 0x44d   : > { %2015 = vmax.xlane.f32.xlu0 %v8883_v40 }
 0x44f   : > { %2017 = vmax.xlane.f32.xlu1 %v8879_v39 }
 0x451   : > { %2019 = vmax.xlane.f32.xlu0 %v8891_v13 }
 0x453   : > { %2021 = vmax.xlane.f32.xlu1 %v8887_v37 }
 0x455   : > { %2023 = vmax.xlane.f32.xlu0 %v8898_v44  ;;  %v9017_v44 = vld [vmem:[#allocation2 + $0xd0] sm:$0xff] }
 0x456   : > { %11243 = vst [vmem:[#allocation80_spill] sm:$0xff] %v9017_v44 }
 0x457   : > { %2025 = vmax.xlane.f32.xlu1 %v8894_v3 }
 0x491   : > { %v1998_v20 = vpop.xlane.xlu0 %1997 }
 0x492   : > { %v8908_v57 = vmax.f32 %v8903_v63, %v1998_v20  ;;  %v11227_v63 = vld [vmem:[#allocation29_spill] sm:$0xff] }
 0x493   : > { %v1996_v50 = vpop.xlane.xlu1 %1995  ;;  %11233 = vst [vmem:[#allocation29_spill] sm:$0xff] %v8958_v51 }
 0x494   : > { %11222 = vst [vmem:[#allocation71_spill] sm:$0xff] %v8908_v57  ;;  %2671 = vst.msk [vmem:[#allocation2 + $0x88] sm:$0xff] %vm1383_vm3, %v8908_v57  ;;  %v8915_v58 = vmax.f32 %v8905_v21, %v1996_v50  ;;  %2098 = vperm.xlu1 %6912, %v8908_v57   ;;  %v11225_v57 = vld [vmem:[#allocation25_spill] sm:$0xff]  ;;  %v7176_v21 = vld [vmem:[%s7756_s5 + $0x40] sm:$0xff] }
 0x495   : > { %v2458_v50 = vpop.permute.xlu0 %2457 }
 0x496   : > { %11223 = vst [vmem:[#allocation72_spill] sm:$0xff] %v8915_v58  ;;  %2670 = vst.msk [vmem:[#allocation2 + $0x80] sm:$0xff] %vm1383_vm3, %v8915_v58  ;;  %2093 = vperm.xlu0 %6911, %v8915_v58   ;;  %v11228_v58 = vld [vmem:[#allocation32_spill] sm:$0xff] }
 0x497   : > { %v2460_v20 = vpop.permute.xlu1 %2459 }
 0x498   : > { %6515 = vmatprep.subr.mxu0 %v2460_v20  ;;  %2455 = vrot.lane.b32.xlu1 %v11224_v56, %s7486_s12  ;;  %v11229_v56 = vld [vmem:[#allocation34_spill] sm:$0xff] }
 0x499   : > { %6516 = vmatpush3.msra.mxu0 %v2460_v20  ;;  %v7169_v20 = vld [vmem:[%s7756_s5 + $0x78] sm:$0xff] }
 0x49a   : > { %6517 = vmatprep.subr.mxu0 %v2458_v50  ;;  %2453 = vrot.lane.b32.xlu0 %v11225_v57, %s7486_s12  ;;  %v7170_v57 = vld [vmem:[%s7756_s5 + $0x70] sm:$0xff] }
 0x49b   : > { %6518 = vmatpush3.msra.mxu0 %v2458_v50  ;;  %v7171_v50 = vld [vmem:[%s7756_s5 + $0x68] sm:$0xff] }
 0x49c   : > { %2451 = vrot.lane.b32.xlu1 %v11226_v52, %s7486_s12  ;;  %v7172_v52 = vld [vmem:[%s7756_s5 + $0x58] sm:$0xff] }
 0x49e   : > { %2449 = vrot.lane.b32.xlu0 %v11227_v63, %s7486_s12  ;;  %v7173_v63 = vld [vmem:[%s7756_s5 + $0x60] sm:$0xff] }
 0x4a0   : > { %2447 = vrot.lane.b32.xlu1 %v11228_v58, %s7486_s12  ;;  %v7174_v58 = vld [vmem:[%s7756_s5 + $0x48] sm:$0xff] }
 0x4a2   : > { %2445 = vrot.lane.b32.xlu0 %v11229_v56, %s7486_s12  ;;  %v7175_v56 = vld [vmem:[%s7756_s5 + $0x50] sm:$0xff] }
 0x4a4   : > { %2748 = vrot.lane.b32.xlu1 %v7169_v20, %s7487_s16  ;;  %v8951_v20 = vld [vmem:[#allocation2 + $0x90] sm:$0xff] }
 0x4a5   : > { %11230 = vst [vmem:[#allocation24_spill] sm:$0xff] %v8951_v20 }
 0x4a6   : > { %2746 = vrot.lane.b32.xlu0 %v7170_v57, %s7487_s16  ;;  %v8953_v57 = vld [vmem:[#allocation2 + $0x98] sm:$0xff] }
 0x4a7   : > { %11231 = vst [vmem:[#allocation25_spill] sm:$0xff] %v8953_v57 }
 0x4a8   : > { %2744 = vrot.lane.b32.xlu1 %v7171_v50, %s7487_s16 }
 0x4aa   : > { %2740 = vrot.lane.b32.xlu0 %v7172_v52, %s7487_s16 }
 0x4ac   : > { %2742 = vrot.lane.b32.xlu1 %v7173_v63, %s7487_s16 }
 0x4ae   : > { %2736 = vrot.lane.b32.xlu0 %v7174_v58, %s7487_s16 }
 0x4b0   : > { %2738 = vrot.lane.b32.xlu1 %v7175_v56, %s7487_s16 }
 0x4b4   : > { %2734 = vrot.lane.b32.xlu1 %v7176_v21, %s7487_s16  ;;  %v8967_v21 = vld [vmem:[#allocation2 + $0xa8] sm:$0xff] }
 0x4b5   : > { %11235 = vst [vmem:[#allocation34_spill] sm:$0xff] %v8967_v21 }
 0x4c6   : > { %v2000_v50 = vpop.xlane.xlu0 %1999 }
 0x4c7   : > { %v8956_v3 = vmax.f32 %v8951_v20, %v2000_v50  ;;  %v8997_v20 = vld [vmem:[#allocation2 + $0xc0] sm:$0xff] }
 0x4c8   : > { %v2002_v52 = vpop.xlane.xlu1 %2001  ;;  %11240 = vst [vmem:[#allocation77_spill] sm:$0xff] %v8997_v20 }
 0x4c9   : > { %11232 = vst [vmem:[#allocation27_spill] sm:$0xff] %v8956_v3  ;;  %v8961_v63 = vmax.f32 %v8953_v57, %v2002_v52  ;;  %2672 = vst.msk [vmem:[#allocation2 + $0x90] sm:$0xff] %vm1383_vm3, %v8956_v3 }
 0x4ca   : > { %v2004_v56 = vpop.xlane.xlu0 %2003 }
 0x4cb   : > { %11234 = vst [vmem:[#allocation32_spill] sm:$0xff] %v8961_v63  ;;  %2673 = vst.msk [vmem:[#allocation2 + $0x98] sm:$0xff] %vm1383_vm3, %v8961_v63  ;;  %2108 = vperm.xlu0 %6911, %v8961_v63   ;;  %v8975_v50 = vmax.f32 %v8958_v51, %v2004_v56  ;;  %v9006_v63 = vld [vmem:[#allocation2 + $0xc8] sm:$0xff] }
 0x4cc   : > { %v2006_v52 = vpop.xlane.xlu1 %2005  ;;  %11242 = vst [vmem:[#allocation79_spill] sm:$0xff] %v9006_v63 }
 0x4cd   : > { %11236 = vst [vmem:[#allocation73_spill] sm:$0xff] %v8975_v50  ;;  %v8980_v58 = vmax.f32 %v8967_v21, %v2006_v52  ;;  %2674 = vst.msk [vmem:[#allocation2 + $0xa0] sm:$0xff] %vm1383_vm3, %v8975_v50  ;;  %v9026_v21 = vld [vmem:[#allocation2 + $0xd8] sm:$0xff] }
 0x4ce   : > { %v2008_v57 = vpop.xlane.xlu0 %2007  ;;  %11245 = vst [vmem:[#allocation82_spill] sm:$0xff] %v9026_v21 }
 0x4cf   : > { %11238 = vst [vmem:[#allocation75_spill] sm:$0xff] %v8980_v58  ;;  %2675 = vst.msk [vmem:[#allocation2 + $0xa8] sm:$0xff] %vm1383_vm3, %v8980_v58  ;;  %2118 = vperm.xlu1 %6912, %v8980_v58   ;;  %2103 = vperm.xlu0 %6911, %v8956_v3   ;;  %v8995_v56 = vmax.f32 %v8977_v28, %v2008_v57  ;;  %v9037_v3 = vld [vmem:[#allocation2 + $0xe0] sm:$0xff] }
 0x4d0   : > { %v2010_v52 = vpop.xlane.xlu1 %2009  ;;  %11247 = vst [vmem:[#allocation84_spill] sm:$0xff] %v9037_v3 }
 0x4d1   : > { %v9000_v51 = vmax.f32 %v8986_v47, %v2010_v52  ;;  %2676 = vst.msk [vmem:[#allocation2 + $0xb0] sm:$0xff] %vm1383_vm3, %v8995_v56  ;;  %v9046_v47 = vld [vmem:[#allocation2 + $0xe8] sm:$0xff] }
 0x4d2   : > { %v2012_v58 = vpop.xlane.xlu0 %2011  ;;  %11249 = vst [vmem:[#allocation86_spill] sm:$0xff] %v9046_v47 }
 0x4d3   : > { %11241 = vst [vmem:[#allocation78_spill] sm:$0xff] %v9000_v51  ;;  %2677 = vst.msk [vmem:[#allocation2 + $0xb8] sm:$0xff] %vm1383_vm3, %v9000_v51  ;;  %2128 = vperm.xlu0 %6911, %v9000_v51   ;;  %2113 = vperm.xlu1 %6912, %v8975_v50   ;;  %v9015_v57 = vmax.f32 %v8997_v20, %v2012_v58  ;;  %v9057_v50 = vld [vmem:[#allocation2 + $0xf0] sm:$0xff] }
 0x4d4   : > { %v2014_v52 = vpop.xlane.xlu1 %2013  ;;  %11251 = vst [vmem:[#allocation88_spill] sm:$0xff] %v9057_v50 }
 0x4d5   : > { %v9020_v28 = vmax.f32 %v9006_v63, %v2014_v52  ;;  %2678 = vst.msk [vmem:[#allocation2 + $0xc0] sm:$0xff] %vm1383_vm3, %v9015_v57 }
 0x4d6   : > { %v2016_v51 = vpop.xlane.xlu0 %2015 }
 0x4d7   : > { %11244 = vst [vmem:[#allocation81_spill] sm:$0xff] %v9020_v28  ;;  %2679 = vst.msk [vmem:[#allocation2 + $0xc8] sm:$0xff] %vm1383_vm3, %v9020_v28  ;;  %2138 = vperm.xlu1 %6912, %v9020_v28   ;;  %2123 = vperm.xlu0 %6911, %v8995_v56   ;;  %v9035_v58 = vmax.f32 %v9017_v44, %v2016_v51 }
 0x4d8   : > { %v2018_v52 = vpop.xlane.xlu1 %2017 }
 0x4d9   : > { %11246 = vst [vmem:[#allocation83_spill] sm:$0xff] %v9035_v58  ;;  %v9040_v20 = vmax.f32 %v9026_v21, %v2018_v52  ;;  %2680 = vst.msk [vmem:[#allocation2 + $0xd0] sm:$0xff] %vm1383_vm3, %v9035_v58  ;;  %v9066_v21 = vld [vmem:[#allocation2 + $0xf8] sm:$0xff] }
 0x4da   : > { %v2020_v28 = vpop.xlane.xlu0 %2019  ;;  %11253 = vst [vmem:[#allocation90_spill] sm:$0xff] %v9066_v21 }
 0x4db   : > { %11248 = vst [vmem:[#allocation85_spill] sm:$0xff] %v9040_v20  ;;  %2681 = vst.msk [vmem:[#allocation2 + $0xd8] sm:$0xff] %vm1383_vm3, %v9040_v20  ;;  %2148 = vperm.xlu0 %6911, %v9040_v20   ;;  %2133 = vperm.xlu1 %6912, %v9015_v57   ;;  %v9055_v51 = vmax.f32 %v9037_v3, %v2020_v28  ;;  %v7179_v28 = vld [vmem:[%s7756_s5 + $0x28] sm:$0xff] }
 0x4dc   : > { %v2022_v52 = vpop.xlane.xlu1 %2021 }
 0x4dd   : > { %11250 = vst [vmem:[#allocation87_spill] sm:$0xff] %v9055_v51  ;;  %v9060_v44 = vmax.f32 %v9046_v47, %v2022_v52  ;;  %2682 = vst.msk [vmem:[#allocation2 + $0xe0] sm:$0xff] %vm1383_vm3, %v9055_v51  ;;  %v7183_v47 = vld [vmem:[%s7756_s5 + $0x10] sm:$0xff] }
 0x4de   : > { %v2024_v20 = vpop.xlane.xlu0 %2023 }
 0x4df   : > { %11252 = vst [vmem:[#allocation89_spill] sm:$0xff] %v9060_v44  ;;  %2683 = vst.msk [vmem:[#allocation2 + $0xe8] sm:$0xff] %vm1383_vm3, %v9060_v44  ;;  %2158 = vperm.xlu1 %6912, %v9060_v44   ;;  %2143 = vperm.xlu0 %6911, %v9035_v58   ;;  %v9075_v52 = vmax.f32 %v9057_v50, %v2024_v20  ;;  %v7177_v20 = vld [vmem:[%s7756_s5 + $0x38] sm:$0xff]  ;;  %v1307_v50 = vld [vmem:[#allocation3 + $0x20] sm:$0xff] }
 0x4e0   : > { %v2026_v63 = vpop.xlane.xlu1 %2025  ;;  %v7180_v44 = vld [vmem:[%s7756_s5 + $0x18] sm:$0xff] }
 0x4e1   : > { %11254 = vst [vmem:[#allocation91_spill] sm:$0xff] %v9075_v52  ;;  %v9078_v3 = vmax.f32 %v9066_v21, %v2026_v63  ;;  %2684 = vst.msk [vmem:[#allocation2 + $0xf0] sm:$0xff] %vm1383_vm3, %v9075_v52  ;;  %v7178_v63 = vld [vmem:[%s7756_s5 + $0x30] sm:$0xff]  ;;  %v7181_v21 = vld [vmem:[%s7756_s5 + $0x20] sm:$0xff] }
 0x4e3   : > { %11255 = vst [vmem:[#allocation92_spill] sm:$0xff] %v9078_v3  ;;  %2685 = vst.msk [vmem:[#allocation2 + $0xf8] sm:$0xff] %vm1383_vm3, %v9078_v3  ;;  %2732 = vrot.lane.b32.xlu0 %v7177_v20, %s7487_s16  ;;  %2153 = vperm.xlu1 %6912, %v9055_v51   ;;  %v7182_v20 = vld [vmem:[%s7756_s5 + $0x8] sm:$0xff] }
 0x4e7   : > { %2730 = vrot.lane.b32.xlu1 %v7178_v63, %s7487_s16  ;;  %2163 = vperm.xlu0 %6911, %v9075_v52   ;;  %v7184_v63 = vld [vmem:[%s7756_s5] sm:$0xff] }
 0x4eb   : > { %2728 = vrot.lane.b32.xlu1 %v7179_v28, %s7487_s16  ;;  %2168 = vperm.xlu0 %6911, %v9078_v3  }
 0x4ef   : > { %2724 = vrot.lane.b32.xlu1 %v7180_v44, %s7487_s16  ;;  %2726 = vrot.lane.b32.xlu0 %v7181_v21, %s7487_s16 }
 0x4f3   : > { %2720 = vrot.lane.b32.xlu1 %v7182_v20, %s7487_s16  ;;  %2722 = vrot.lane.b32.xlu0 %v7183_v47, %s7487_s16 }
 0x4f7   : > { %2686 = vrot.lane.b32.xlu1 %v8165_v54, %s7487_s16  ;;  %2718 = vrot.lane.b32.xlu0 %v7184_v63, %s7487_s16 }
 0x4fb   : > { %2690 = vrot.lane.b32.xlu1 %v8268_v7, %s7487_s16  ;;  %2688 = vrot.lane.b32.xlu0 %v8264_v6, %s7487_s16 }
 0x4ff   : > { %2694 = vrot.lane.b32.xlu1 %v8278_v11, %s7487_s16  ;;  %2692 = vrot.lane.b32.xlu0 %v8274_v10, %s7487_s16 }
 0x503   : > { %2698 = vrot.lane.b32.xlu1 %v8288_v15, %s7487_s16  ;;  %2696 = vrot.lane.b32.xlu0 %v8284_v14, %s7487_s16 }
 0x507   : > { %2702 = vrot.lane.b32.xlu1 %v8298_v19, %s7487_s16  ;;  %2700 = vrot.lane.b32.xlu0 %v8294_v18, %s7487_s16 }
 0x50b   : > { %2706 = vrot.lane.b32.xlu1 %v8308_v23, %s7487_s16  ;;  %2704 = vrot.lane.b32.xlu0 %v8304_v22, %s7487_s16 }
 0x50f   : > { %v2099_v47 = vpop.permute.xlu1 %2098  ;;  %2710 = vrot.lane.b32.xlu1 %v8318_v27, %s7487_s16  ;;  %2708 = vrot.lane.b32.xlu0 %v8314_v26, %s7487_s16 }
 0x510   : > { %v2172_v44 = vsub.f32 %v8851_v53, %v2099_v47 }
 0x511   : > { %v2094_v21 = vpop.permute.xlu0 %2093 }
 0x512   : > { %v2171_v28 = vsub.f32 %v8854_v17, %v2094_v21  ;;  %v2189_v20 = vmul.f32 1.442695, %v2172_v44 }
 0x513   : > { %2714 = vrot.lane.b32.xlu1 %v8328_v31, %s7487_s16  ;;  %2712 = vrot.lane.b32.xlu0 %v8324_v30, %s7487_s16  ;;  %v2456_v63 = vpop.permute.xlu1 %2455 }
 0x514   : > { %v2187_v3 = vmul.f32 1.442695, %v2171_v28  ;;  %6519 = vmatprep.subr.mxu0 %v2456_v63 }
 0x515   : > { %6520 = vmatpush3.msra.mxu0 %v2456_v63  ;;  %v2454_v52 = vpop.permute.xlu0 %2453 }
 0x516   : > { %6945 = vpow2.f32 %v2187_v3  ;;  %6521 = vmatprep.subr.mxu0 %v2454_v52 }
 0x517   : > { %6947 = vpow2.f32 %v2189_v20  ;;  %2716 = vrot.lane.b32.xlu0 %v8333_v33, %s7487_s16  ;;  %v2452_v53 = vpop.permute.xlu1 %2451  ;;  %6522 = vmatpush3.msra.mxu0 %v2454_v52 }
 0x518   : > { %6523 = vmatprep.subr.mxu0 %v2452_v53 }
 0x519   : > { %6524 = vmatpush3.msra.mxu0 %v2452_v53  ;;  %v2450_v17 = vpop.permute.xlu0 %2449 }
 0x51a   : > { %6525 = vmatprep.subr.mxu0 %v2450_v17 }
 0x51b   : > { %v2448_v47 = vpop.permute.xlu1 %2447  ;;  %6526 = vmatpush3.msra.mxu0 %v2450_v17 }
 0x51c   : > { %6527 = vmatprep.subr.mxu0 %v2448_v47 }
 0x51d   : > { %6528 = vmatpush3.msra.mxu0 %v2448_v47  ;;  %v2446_v44 = vpop.permute.xlu0 %2445 }
 0x51e   : > { %6529 = vmatprep.subr.mxu0 %v2446_v44 }
 0x51f   : > { %v2749_v21 = vpop.permute.xlu1 %2748  ;;  %6530 = vmatpush3.msra.mxu0 %v2446_v44 }
 0x520   : > { %6555 = vmatprep.subr.msk.mxu0 %vm821_vm2, %v2749_v21 }
 0x521   : > { %v2747_v52 = vpop.permute.xlu0 %2746 }
 0x523   : > { %v9142_v3 = vpop.eup %6945  ;;  %v2745_v20 = vpop.permute.xlu1 %2744 }
 0x524   : > { %v9144_v28 = vpop.eup %6947  ;;  %6531 = vmatprep.mubr.f32.mxu0 %v9142_v3 }
 0x525   : > { %6532 = vmatmul.mubr.f32.vlgmr.msra.gmra.mxu0 %v9144_v28  ;;  %v2741_v53 = vpop.permute.xlu0 %2740 }
 0x526   : > { %6556 = vmatpush3.xpose.msk.msra.mxu0 %vm821_vm2, %v2749_v21 }
 0x527   : > { %6557 = vmatprep.subr.msk.mxu0 %vm821_vm2, %v2747_v52  ;;  %v2743_v63 = vpop.permute.xlu1 %2742 }
 0x529   : > { %v2737_v47 = vpop.permute.xlu0 %2736 }
 0x52a   : > { %6558 = vmatpush3.xpose.msk.msra.mxu0 %vm821_vm2, %v2747_v52  ;;  %v11256_v52 = vld [vmem:[#allocation31_spill] sm:$0xff] }
 0x52b   : > { %6559 = vmatprep.subr.msk.mxu0 %vm821_vm2, %v2745_v20  ;;  %v2739_v17 = vpop.permute.xlu1 %2738 }
 0x52e   : > { %6560 = vmatpush3.xpose.msk.msra.mxu0 %vm821_vm2, %v2745_v20 }
 0x52f   : > { %6561 = vmatprep.subr.msk.mxu0 %vm821_vm2, %v2743_v63  ;;  %v2735_v44 = vpop.permute.xlu1 %2734 }
 0x532   : > { %6562 = vmatpush3.xpose.msk.msra.mxu0 %vm821_vm2, %v2743_v63 }
 0x533   : > { %6563 = vmatprep.subr.msk.mxu0 %vm821_vm2, %v2741_v53 }
 0x536   : > { %6564 = vmatpush3.xpose.msk.msra.mxu0 %vm821_vm2, %v2741_v53  ;;  %1337 = vadd.xlane.f32.xlu0 %v8713_v9 }
 0x537   : > { %1335 = vadd.xlane.f32.xlu1 %v8710_v8  ;;  %6565 = vmatprep.subr.msk.mxu0 %vm821_vm2, %v2739_v17 }
 0x53a   : > { %6566 = vmatpush3.xpose.msk.msra.mxu0 %vm821_vm2, %v2739_v17  ;;  %1339 = vadd.xlane.f32.xlu0 %v8741_v5  ;;  %v11260_v17 = vld [vmem:[#allocation30_spill] sm:$0xff] }
 0x53b   : > { %6567 = vmatprep.subr.msk.mxu0 %vm821_vm2, %v2737_v47  ;;  %1341 = vadd.xlane.f32.xlu1 %v8745_v43 }
 0x53e   : > { %6568 = vmatpush3.xpose.msk.msra.mxu0 %vm821_vm2, %v2737_v47  ;;  %1343 = vadd.xlane.f32.xlu0 %v8752_v35 }
 0x53f   : > { %6569 = vmatprep.subr.msk.mxu0 %vm821_vm2, %v2735_v44  ;;  %1345 = vadd.xlane.f32.xlu1 %v8755_v60 }
 0x542   : > { %6570 = vmatpush3.xpose.msk.msra.mxu0 %vm821_vm2, %v2735_v44  ;;  %1347 = vadd.xlane.f32.xlu0 %v8758_v41 }
 0x543   : > { %1349 = vadd.xlane.f32.xlu1 %v8764_v34 }
 0x546   : > { %1351 = vadd.xlane.f32.xlu0 %v8768_v62  ;;  %v2109_v8 = vpop.permute.xlu0 %2108 }
 0x547   : > { %1353 = vadd.xlane.f32.xlu1 %v8771_v0  ;;  %v2174_v9 = vsub.f32 %v8861_v12, %v2109_v8 }
 0x549   : > { %v2193_v60 = vmul.f32 1.442695, %v2174_v9  ;;  %v11262_v9 = vld [vmem:[#allocation33_spill] sm:$0xff] }
 0x54a   : > { %v2119_v5 = vpop.permute.xlu1 %2118  ;;  %1355 = vadd.xlane.f32.xlu0 %v8775_v46  ;;  %v2104_v43 = vpop.permute.xlu0 %2103 }
 0x54b   : > { %v2173_v35 = vsub.f32 %v8863_v16, %v2104_v43  ;;  %1357 = vadd.xlane.f32.xlu1 %v8780_v1  ;;  %v2176_v41 = vsub.f32 %v8865_v42, %v2119_v5  ;;  %v11257_v1 = vld [vmem:[#allocation35_spill] sm:$0xff]  ;;  %v11263_v5 = vsub.f32 %v11262_v9, %v8500_v48 }
 0x54c   : > { %v11258_v20 = vsub.f32 %v11256_v52, %v11257_v1 }
 0x54d   : > { %v2191_v21 = vmul.f32 1.442695, %v2173_v35  ;;  %v2197_v46 = vmul.f32 1.442695, %v2176_v41  ;;  %v11264_v41 = vld [vmem:[#allocation28_spill] sm:$0xff] }
 0x54e   : > { %v2114_v34 = vpop.permute.xlu1 %2113  ;;  %1359 = vadd.xlane.f32.xlu0 %v8784_v45  ;;  %v2129_v62 = vpop.permute.xlu0 %2128  ;;  %v1145_v63 = vmul.f32 1.442695, %v11258_v20  ;;  %v11259_v45 = vld [vmem:[#allocation26_spill] sm:$0xff] }
 0x54f   : > { %v2175_v0 = vsub.f32 %v8867_v55, %v2114_v34  ;;  %1361 = vadd.xlane.f32.xlu1 %v8787_v32  ;;  %6949 = vpow2.f32 %v2191_v21  ;;  %v2178_v16 = vsub.f32 %v8869_v61, %v2129_v62  ;;  %v11261_v47 = vsub.f32 %v11259_v45, %v11260_v17  ;;  %v11266_v62 = vld [vmem:[#allocation36_spill] sm:$0xff] }
 0x550   : > { %6951 = vpow2.f32 %v2193_v60  ;;  %v11267_v48 = vsub.f32 %v11266_v62, %v8512_v49  ;;  %v11270_v49 = vld [vmem:[#allocation38_spill] sm:$0xff] }
 0x551   : > { %v2195_v12 = vmul.f32 1.442695, %v2175_v0  ;;  %v1143_v55 = vmul.f32 1.442695, %v11261_v47  ;;  %v2201_v44 = vmul.f32 1.442695, %v2178_v16 }
 0x552   : > { %v2139_v42 = vpop.permute.xlu1 %2138  ;;  %1363 = vadd.xlane.f32.xlu0 %v8791_v36  ;;  %v2124_v53 = vpop.permute.xlu0 %2123  ;;  %v1147_v36 = vmul.f32 1.442695, %v11263_v5  ;;  %v1151_v0 = vmul.f32 1.442695, %v11267_v48  ;;  %v11268_v16 = vld [vmem:[#allocation37_spill] sm:$0xff] }
 0x553   : > { %6953 = vpow2.f32 %v2195_v12  ;;  %v2177_v32 = vsub.f32 %v8871_v38, %v2124_v53  ;;  %1365 = vadd.xlane.f32.xlu1 %v8796_v2  ;;  %v2180_v61 = vsub.f32 %v8873_v59, %v2139_v42  ;;  %v11265_v38 = vsub.f32 %v11264_v41, %v8474_v29  ;;  %v11271_v53 = vld [vmem:[#allocation40_spill] sm:$0xff] }
 0x554   : > { %6955 = vpow2.f32 %v2197_v46  ;;  %v11272_v45 = vsub.f32 %v11270_v49, %v11271_v53 }
 0x555   : > { %v2199_v8 = vmul.f32 1.442695, %v2177_v32  ;;  %6957 = vpow2.f32 %v1145_v63  ;;  %v1149_v21 = vmul.f32 1.442695, %v11265_v38  ;;  %v2205_v2 = vmul.f32 1.442695, %v2180_v61 }
 0x556   : > { %v2134_v43 = vpop.permute.xlu1 %2133  ;;  %v2149_v35 = vpop.permute.xlu0 %2148  ;;  %6959 = vpow2.f32 %v1143_v55  ;;  %v1155_v17 = vmul.f32 1.442695, %v11272_v45  ;;  %v11273_v55 = vld [vmem:[#allocation39_spill] sm:$0xff]  ;;  %v11274_v32 = vld [vmem:[#allocation42_spill] sm:$0xff] }
 0x557   : > { %v2179_v60 = vsub.f32 %v8875_v4, %v2134_v43  ;;  %6961 = vpow2.f32 %v2199_v8  ;;  %v2182_v59 = vsub.f32 %v8879_v39, %v2149_v35  ;;  %v11269_v4 = vsub.f32 %v11268_v16, %v8517_v25  ;;  %v11278_v38 = vld [vmem:[#allocation23_spill] sm:$0xff] }
 0x558   : > { %6963 = vpow2.f32 %v2201_v44  ;;  %v11275_v44 = vsub.f32 %v11273_v55, %v11274_v32  ;;  %v11283_v16 = vld [vmem:[#allocation47_spill] sm:$0xff] }
 0x559   : > { %v2203_v34 = vmul.f32 1.442695, %v2179_v60  ;;  %6965 = vpow2.f32 %v1147_v36  ;;  %v1153_v52 = vmul.f32 1.442695, %v11269_v4  ;;  %v2209_v20 = vmul.f32 1.442695, %v2182_v59 }
 0x55a   : > { %v2159_v46 = vpop.permute.xlu1 %2158  ;;  %v2144_v12 = vpop.permute.xlu0 %2143  ;;  %v1157_v61 = vmul.f32 1.442695, %v11275_v44  ;;  %v11280_v59 = vld [vmem:[#allocation45_spill] sm:$0xff]  ;;  %v11289_v44 = vld [vmem:[#allocation48_spill] sm:$0xff] }
 0x55b   : > { %6967 = vpow2.f32 %v2203_v34  ;;  %v2181_v29 = vsub.f32 %v8883_v40, %v2144_v12  ;;  %v2184_v39 = vsub.f32 %v8887_v37, %v2159_v46  ;;  %v11279_v34 = vld [vmem:[#allocation43_spill] sm:$0xff]  ;;  %v11282_v12 = vld [vmem:[#allocation44_spill] sm:$0xff] }
 0x55c   : > { %6969 = vpow2.f32 %v1149_v21  ;;  %v9207_v1 = vpop.eup %6949  ;;  %v11281_v62 = vsub.f32 %v11279_v34, %v11280_v59  ;;  %v11284_v4 = vsub.f32 %v11282_v12, %v11283_v16  ;;  %v11293_v34 = vld [vmem:[#allocation53_spill] sm:$0xff] }
 0x55d   : > { %6971 = vpow2.f32 %v2205_v2  ;;  %v2207_v63 = vmul.f32 1.442695, %v2181_v29  ;;  %v9210_v42 = vpop.eup %6951  ;;  %6534 = vmatprep.mubr.f32.mxu0 %v9207_v1  ;;  %v2213_v8 = vmul.f32 1.442695, %v2184_v39 }
 0x55e   : > { %6973 = vpow2.f32 %v1151_v0  ;;  %v2154_v25 = vpop.permute.xlu1 %2153  ;;  %v2733_v47 = vpop.permute.xlu0 %2732  ;;  %6535 = vmatmul.mubr.f32.gmra.mxu0 %v9210_v42  ;;  %v1161_v48 = vmul.f32 1.442695, %v11281_v62 }
 0x55f   : > { %6975 = vpow2.f32 %v1153_v52  ;;  %v2183_v40 = vsub.f32 %v8891_v13, %v2154_v25  ;;  %6571 = vmatprep.subr.msk.mxu0 %vm821_vm2, %v2733_v47  ;;  %v11276_v13 = vld [vmem:[#allocation41_spill] sm:$0xff]  ;;  %v1163_v52 = vmul.f32 1.442695, %v11284_v4 }
 0x560   : > { %v9219_v37 = vpop.eup %6953  ;;  %6977 = vpow2.f32 %v2207_v63  ;;  %6572 = vmatpush3.xpose.msk.msra.mxu0 %vm821_vm2, %v2733_v47  ;;  %v11277_v36 = vsub.f32 %v11276_v13, %v8555_v24  ;;  %v11285_v63 = vld [vmem:[#allocation22_spill] sm:$0xff]  ;;  %v11287_v25 = vld [vmem:[#allocation49_spill] sm:$0xff] }
 0x561   : > { %6979 = vpow2.f32 %v2209_v20  ;;  %v2211_v9 = vmul.f32 1.442695, %v2183_v40  ;;  %6537 = vmatprep.mubr.f32.mxu0 %v9219_v37  ;;  %v9226_v5 = vpop.eup %6955 }
 0x562   : > { %6981 = vpow2.f32 %v1155_v17  ;;  %v1159_v43 = vmul.f32 1.442695, %v11277_v36  ;;  %v2731_v35 = vpop.permute.xlu1 %2730  ;;  %v2164_v60 = vpop.permute.xlu0 %2163  ;;  %6538 = vmatmul.mubr.f32.gmra.mxu0 %v9226_v5  ;;  %v11286_v17 = vld [vmem:[#allocation46_spill] sm:$0xff] }
 0x563   : > { %v9231_v41 = vpop.eup %6957  ;;  %6983 = vpow2.f32 %v2211_v9  ;;  %v2185_v21 = vsub.f32 %v11278_v38, %v2164_v60  ;;  %6573 = vmatprep.subr.msk.mxu0 %vm821_vm2, %v2731_v35  ;;  %v11288_v47 = vsub.f32 %v11286_v17, %v11287_v25 }
 0x564   : > { %v9236_v2 = vpop.eup %6959  ;;  %6985 = vpow2.f32 %v1157_v61  ;;  %1423 = vperm.xlu1 %6912, %v9231_v41   ;;  %6574 = vmatpush3.xpose.msk.msra.mxu0 %vm821_vm2, %v2731_v35  ;;  %v11290_v61 = vld [vmem:[#allocation51_spill] sm:$0xff] }
 0x565   : > { %v9240_v24 = vpop.eup %6961  ;;  %6987 = vpow2.f32 %v2213_v8  ;;  %v2215_v0 = vmul.f32 1.442695, %v2185_v21  ;;  %v1165_v40 = vmul.f32 1.442695, %v11288_v47  ;;  %v11291_v8 = vsub.f32 %v11289_v44, %v11290_v61  ;;  %v11292_v21 = vld [vmem:[#allocation50_spill] sm:$0xff] }
 0x566   : > { %v9245_v46 = vpop.eup %6963  ;;  %6989 = vpow2.f32 %v1159_v43  ;;  %6540 = vmatprep.mubr.f32.mxu0 %v9240_v24  ;;  %v2729_v29 = vpop.permute.xlu1 %2728  ;;  %v11294_v59 = vsub.f32 %v11292_v21, %v11293_v34  ;;  %v7185_v34 = vld [vmem:[%s7758_s6 + $0x78] sm:$0xff] }
 0x567   : > { %v2169_v20 = vpop.permute.xlu0 %2168  ;;  %v9251_v39 = vpop.eup %6965  ;;  %6991 = vpow2.f32 %v2215_v0  ;;  %6541 = vmatmul.mubr.f32.gmra.mxu0 %v9245_v46  ;;  %6575 = vmatprep.subr.msk.mxu0 %vm821_vm2, %v2729_v29  ;;  %v1167_v9 = vmul.f32 1.442695, %v11291_v8 }
 0x568   : > { %v2186_v49 = vsub.f32 %v11285_v63, %v2169_v20  ;;  %v9256_v53 = vpop.eup %6967  ;;  %1428 = vperm.xlu1 %6912, %v9251_v39   ;;  %1418 = vperm.xlu0 %6911, %v9236_v2   ;;  %6993 = vpow2.f32 %v1161_v48  ;;  %v1169_v62 = vmul.f32 1.442695, %v11294_v59 }
 0x569   : > { %v9260_v45 = vpop.eup %6969  ;;  %6576 = vmatpush3.xpose.msk.msra.mxu0 %vm821_vm2, %v2729_v29  ;;  %6543 = vmatprep.mubr.f32.mxu0 %v9256_v53  ;;  %6995 = vpow2.f32 %v1163_v52 }
 0x56a   : > { %v2217_v55 = vmul.f32 1.442695, %v2186_v49  ;;  %v9267_v32 = vpop.eup %6971  ;;  %v2725_v36 = vpop.permute.xlu1 %2724 }
 0x56b   : > { %v2727_v13 = vpop.permute.xlu0 %2726  ;;  %v9272_v43 = vpop.eup %6973  ;;  %6544 = vmatmul.mubr.f32.gmra.mxu0 %v9267_v32 }
 0x56c   : > { %6997 = vpow2.f32 %v2217_v55  ;;  %6577 = vmatprep.subr.msk.mxu0 %vm821_vm2, %v2727_v13  ;;  %v9276_v35 = vpop.eup %6975  ;;  %1438 = vperm.xlu1 %6912, %v9272_v43  }
 0x56d   : > { %1433 = vperm.xlu0 %6911, %v9260_v45   ;;  %v9280_v60 = vpop.eup %6977  ;;  %6999 = vpow2.f32 %v1165_v40  ;;  %6578 = vmatpush3.xpose.msk.msra.mxu0 %vm821_vm2, %v2727_v13 }
 0x56e   : > { %v9283_v38 = vpop.eup %6979  ;;  %7001 = vpow2.f32 %v1167_v9  ;;  %6546 = vmatprep.mubr.f32.mxu0 %v9280_v60  ;;  %6579 = vmatprep.subr.msk.mxu0 %vm821_vm2, %v2725_v36  ;;  %v2721_v0 = vpop.permute.xlu1 %2720 }
 0x56f   : > { %v2723_v48 = vpop.permute.xlu0 %2722  ;;  %v9290_v12 = vpop.eup %6981  ;;  %6547 = vmatmul.mubr.f32.gmra.mxu0 %v9283_v38  ;;  %7003 = vpow2.f32 %v1169_v62  ;;  %v7186_v62 = vld [vmem:[%s7758_s6 + $0x70] sm:$0xff] }
 0x570   : > { %v9293_v16 = vpop.eup %6983  ;;  %1448 = vperm.xlu1 %6912, %v9290_v12  }
 0x571   : > { %1443 = vperm.xlu0 %6911, %v9276_v35   ;;  %v9297_v4 = vpop.eup %6985  ;;  %6580 = vmatpush3.xpose.msk.msra.mxu0 %vm821_vm2, %v2725_v36 }
 0x572   : > { %6549 = vmatprep.mubr.f32.mxu0 %v9293_v16  ;;  %v9301_v52 = vpop.eup %6987  ;;  %6581 = vmatprep.subr.msk.mxu0 %vm821_vm2, %v2723_v48  ;;  %v2687_v20 = vpop.permute.xlu1 %2686 }
 0x573   : > { %v2719_v29 = vpop.permute.xlu0 %2718  ;;  %v9304_v63 = vpop.eup %6989  ;;  %6550 = vmatmul.mubr.f32.gmra.mxu0 %v9301_v52 }
 0x574   : > { %v9307_v49 = vpop.eup %6991  ;;  %1458 = vperm.xlu1 %6912, %v9304_v63  }
 0x575   : > { %1453 = vperm.xlu0 %6911, %v9297_v4   ;;  %6582 = vmatpush3.xpose.msk.msra.mxu0 %vm821_vm2, %v2723_v48  ;;  %v9313_v17 = vpop.eup %6993  ;;  %v7187_v48 = vld [vmem:[%s7758_s6 + $0x68] sm:$0xff] }
 0x576   : > { %6552 = vmatprep.mubr.f32.mxu0 %v9307_v49  ;;  %6583 = vmatprep.subr.msk.mxu0 %vm821_vm2, %v2721_v0  ;;  %v2691_v47 = vpop.permute.xlu1 %2690  ;;  %v9316_v40 = vpop.eup %6995 }
 0x577   : > { %v2689_v25 = vpop.permute.xlu0 %2688 }
 0x578   : > { %1468 = vperm.xlu1 %6912, %v9316_v40  }
 0x579   : > { %v9318_v55 = vpop.eup %6997  ;;  %1463 = vperm.xlu0 %6911, %v9313_v17   ;;  %6584 = vmatpush3.xpose.msk.msra.mxu0 %vm821_vm2, %v2721_v0 }
 0x57a   : > { %v9323_v44 = vpop.eup %6999  ;;  %6553 = vmatmul.mubr.f32.gmra.mxu0 %v9318_v55  ;;  %6585 = vmatprep.subr.msk.mxu0 %vm821_vm2, %v2719_v29  ;;  %v2695_v8 = vpop.permute.xlu1 %2694 }
 0x57b   : > { %v2693_v61 = vpop.permute.xlu0 %2692  ;;  %v9327_v9 = vpop.eup %7001  ;;  %6587 = vmatprep.mubr.msk.f32.mxu0 %vm821_vm2, %v2687_v20 }
 0x57c   : > { %1478 = vperm.xlu1 %6912, %v9327_v9   ;;  %v9333_v36 = vpop.eup %7003 }
 0x57d   : > { %1473 = vperm.xlu0 %6911, %v9323_v44   ;;  %6586 = vmatpush3.xpose.msk.msra.mxu0 %vm821_vm2, %v2719_v29  ;;  %v7188_v29 = vld [vmem:[%s7758_s6 + $0x58] sm:$0xff] }
 0x57e   : > { %v2699_v21 = vpop.permute.xlu1 %2698 }
 0x57f   : > { %v2697_v13 = vpop.permute.xlu0 %2696 }
 0x580   : > { %6588 = vmatmul.mubr.msk.f32.vlgmr.msra.gmra.mxu0 %vm821_vm2, %v2689_v25  ;;  %3440 = vrot.lane.b32.xlu1 %v7185_v34, %s7487_s16  ;;  %v7189_v25 = vld [vmem:[%s7758_s6 + $0x60] sm:$0xff] }
 0x581   : > { %1483 = vperm.xlu0 %6911, %v9333_v36   ;;  %6590 = vmatprep.mubr.msk.f32.mxu0 %vm821_vm2, %v2691_v47 }
 0x582   : > { %v2703_v0 = vpop.permute.xlu1 %2702 }
 0x583   : > { %v2701_v59 = vpop.permute.xlu0 %2700 }
 0x584   : > { %6591 = vmatmul.mubr.msk.f32.gmra.mxu0 %vm821_vm2, %v2693_v61  ;;  %3436 = vrot.lane.b32.xlu1 %v7187_v48, %s7487_s16  ;;  %v7190_v61 = vld [vmem:[%s7758_s6 + $0x48] sm:$0xff] }
 0x585   : > { %3438 = vrot.lane.b32.xlu0 %v7186_v62, %s7487_s16  ;;  %6593 = vmatprep.mubr.msk.f32.mxu0 %vm821_vm2, %v2695_v8  ;;  %v7191_v8 = vld [vmem:[%s7758_s6 + $0x50] sm:$0xff] }
 0x586   : > { %v2707_v47 = vpop.permute.xlu1 %2706 }
 0x587   : > { %v2705_v20 = vpop.permute.xlu0 %2704 }
 0x588   : > { %6594 = vmatmul.mubr.msk.f32.gmra.mxu0 %vm821_vm2, %v2697_v13  ;;  %3434 = vrot.lane.b32.xlu1 %v7189_v25, %s7487_s16 }
 0x589   : > { %3432 = vrot.lane.b32.xlu0 %v7188_v29, %s7487_s16  ;;  %6596 = vmatprep.mubr.msk.f32.mxu0 %vm821_vm2, %v2699_v21  ;;  %v7192_v21 = vld [vmem:[%s7758_s6 + $0x40] sm:$0xff] }
 0x58a   : > { %v2711_v34 = vpop.permute.xlu1 %2710  ;;  %v1303_v29 = vld [vmem:[#allocation3] sm:$0xff] }
 0x58b   : > { %v2709_v13 = vpop.permute.xlu0 %2708 }
 0x58c   : > { %6597 = vmatmul.mubr.msk.f32.gmra.mxu0 %vm821_vm2, %v2701_v59  ;;  %3430 = vrot.lane.b32.xlu1 %v7191_v8, %s7487_s16 }
 0x58d   : > { %3428 = vrot.lane.b32.xlu0 %v7190_v61, %s7487_s16  ;;  %6599 = vmatprep.mubr.msk.f32.mxu0 %vm821_vm2, %v2703_v0  ;;  %v1304_v0 = vld [vmem:[#allocation3 + $0x8] sm:$0xff]  ;;  %v1305_v61 = vld [vmem:[#allocation3 + $0x10] sm:$0xff] }
 0x58e   : > { %v2715_v62 = vpop.permute.xlu1 %2714 }
 0x58f   : > { %v2713_v59 = vpop.permute.xlu0 %2712 }
 0x590   : > { %6600 = vmatmul.mubr.msk.f32.gmra.mxu0 %vm821_vm2, %v2705_v20  ;;  %3426 = vrot.lane.b32.xlu1 %v7192_v21, %s7487_s16  ;;  %v1320_v20 = vmul.f32 %v9231_v41, %v1304_v0  ;;  %v1306_v21 = vld [vmem:[#allocation3 + $0x18] sm:$0xff]  ;;  %v1308_v0 = vld [vmem:[#allocation3 + $0x28] sm:$0xff] }
 0x591   : > { %6602 = vmatprep.mubr.msk.f32.mxu0 %vm821_vm2, %v2707_v47  ;;  %v1319_v47 = vmul.f32 %v9236_v2, %v1303_v29  ;;  %v11295_v2 = vld [vmem:[#allocation52_spill] sm:$0xff]  ;;  %v11296_v29 = vld [vmem:[#allocation55_spill] sm:$0xff] }
 0x593   : > { %v2717_v48 = vpop.permute.xlu0 %2716 }
 0x594   : > { %6603 = vmatmul.mubr.msk.f32.gmra.mxu0 %vm821_vm2, %v2709_v13 }
 0x595   : > { %6605 = vmatprep.mubr.msk.f32.mxu0 %vm821_vm2, %v2711_v34 }
 0x598   : > { %6606 = vmatmul.mubr.msk.f32.gmra.mxu0 %vm821_vm2, %v2713_v59  ;;  %v1321_v59 = vmul.f32 %v9251_v39, %v1305_v61  ;;  %v11299_v39 = vld [vmem:[#allocation56_spill] sm:$0xff] }
 0x599   : > { %6608 = vmatprep.mubr.msk.f32.mxu0 %vm821_vm2, %v2715_v62 }
 0x59c   : > { %6609 = vmatmul.mubr.msk.f32.gmra.mxu0 %vm821_vm2, %v2717_v48  ;;  %v1322_v48 = vmul.f32 %v9260_v45, %v1306_v21  ;;  %v1324_v21 = vmul.f32 %v9276_v35, %v1308_v0  ;;  %v1312_v35 = vld [vmem:[#allocation3 + $0x48] sm:$0xff] }
 0x5bf   : > { %v1338_v25 = vpop.xlane.xlu0 %1337 }
 0x5c0   : > { %v1368_v8 = vadd.f32 %v1338_v25, %v1320_v20  ;;  %v1336_v13 = vpop.xlane.xlu1 %1335  ;;  %v11297_v20 = vsub.f32 %v11295_v2, %v11296_v29 }
 0x5c1   : > { %v1367_v34 = vadd.f32 %v1336_v13, %v1319_v47  ;;  %v1323_v47 = vmul.f32 %v9272_v43, %v1307_v50 }
 0x5c2   : > { %1385 = vst.msk [vmem:[#allocation3 + $0x8] sm:$0xff] %vm1383_vm3, %v1368_v8  ;;  %v1171_v25 = vmul.f32 1.442695, %v11297_v20  ;;  %v11298_v8 = vld [vmem:[#allocation54_spill] sm:$0xff] }
 0x5c3   : > { %1384 = vst.msk [vmem:[#allocation3] sm:$0xff] %vm1383_vm3, %v1367_v34  ;;  %v1340_v62 = vpop.xlane.xlu0 %1339  ;;  %v11300_v61 = vsub.f32 %v11298_v8, %v11299_v39  ;;  %v1309_v34 = vld [vmem:[#allocation3 + $0x30] sm:$0xff] }
 0x5c4   : > { %v1369_v51 = vadd.f32 %v1340_v62, %v1321_v59  ;;  %v1342_v41 = vpop.xlane.xlu1 %1341  ;;  %7005 = vpow2.f32 %v1171_v25 }
 0x5c5   : > { %v1370_v58 = vadd.f32 %v1342_v41, %v1322_v48  ;;  %v1173_v13 = vmul.f32 1.442695, %v11300_v61  ;;  %v1310_v48 = vld [vmem:[#allocation3 + $0x38] sm:$0xff] }
 0x5c6   : > { %1386 = vst.msk [vmem:[#allocation3 + $0x10] sm:$0xff] %vm1383_vm3, %v1369_v51  ;;  %v1325_v51 = vmul.f32 %v9290_v12, %v1309_v34  ;;  %v1326_v43 = vmul.f32 %v9297_v4, %v1310_v48  ;;  %v1328_v12 = vmul.f32 %v9313_v17, %v1312_v35  ;;  %v1314_v61 = vld [vmem:[#allocation3 + $0x58] sm:$0xff] }
 0x5c7   : > { %1387 = vst.msk [vmem:[#allocation3 + $0x18] sm:$0xff] %vm1383_vm3, %v1370_v58  ;;  %v1344_v45 = vpop.xlane.xlu0 %1343  ;;  %7007 = vpow2.f32 %v1173_v13  ;;  %v1311_v58 = vld [vmem:[#allocation3 + $0x40] sm:$0xff] }
 0x5c8   : > { %v1371_v59 = vadd.f32 %v1344_v45, %v1323_v47  ;;  %v1346_v62 = vpop.xlane.xlu1 %1345  ;;  %v1327_v20 = vmul.f32 %v9304_v63, %v1311_v58  ;;  %v1313_v47 = vld [vmem:[#allocation3 + $0x50] sm:$0xff]  ;;  %v1315_v63 = vld [vmem:[#allocation3 + $0x60] sm:$0xff] }
 0x5c9   : > { %v1372_v41 = vadd.f32 %v1346_v62, %v1324_v21  ;;  %v1329_v4 = vmul.f32 %v9316_v40, %v1313_v47  ;;  %v1330_v21 = vmul.f32 %v9323_v44, %v1314_v61  ;;  %v1316_v62 = vld [vmem:[#allocation3 + $0x68] sm:$0xff]  ;;  %v1331_v17 = vmul.f32 %v9327_v9, %v1315_v63  ;;  %v1402_v61 = vld [vmem:[#allocation4 + $0x10] sm:$0xff] }
 0x5ca   : > { %1388 = vst.msk [vmem:[#allocation3 + $0x20] sm:$0xff] %vm1383_vm3, %v1371_v59  ;;  %v1332_v40 = vmul.f32 %v9333_v36, %v1316_v62  ;;  %v1401_v36 = vld [vmem:[#allocation4 + $0x8] sm:$0xff]  ;;  %v11302_v62 = vld [vmem:[#allocation21_spill] sm:$0xff] }
 0x5cb   : > { %1389 = vst.msk [vmem:[#allocation3 + $0x28] sm:$0xff] %vm1383_vm3, %v1372_v41  ;;  %v1348_v50 = vpop.xlane.xlu0 %1347 }
 0x5cc   : > { %v1373_v2 = vadd.f32 %v1348_v50, %v1325_v51  ;;  %v1350_v29 = vpop.xlane.xlu1 %1349  ;;  %v1317_v50 = vld [vmem:[#allocation3 + $0x70] sm:$0xff] }
 0x5cd   : > { %v1374_v0 = vadd.f32 %v1350_v29, %v1326_v43 }
 0x5ce   : > { %1390 = vst.msk [vmem:[#allocation3 + $0x30] sm:$0xff] %vm1383_vm3, %v1373_v2  ;;  %v1318_v2 = vld [vmem:[#allocation3 + $0x78] sm:$0xff] }
 0x5cf   : > { %1391 = vst.msk [vmem:[#allocation3 + $0x38] sm:$0xff] %vm1383_vm3, %v1374_v0  ;;  %v1352_v25 = vpop.xlane.xlu0 %1351 }
 0x5d0   : > { %v1375_v8 = vadd.f32 %v1352_v25, %v1327_v20  ;;  %v1354_v39 = vpop.xlane.xlu1 %1353 }
 0x5d1   : > { %v1376_v13 = vadd.f32 %v1354_v39, %v1328_v12  ;;  %v9397_v41 = vpop.eup %7005  ;;  %v1400_v39 = vld [vmem:[#allocation4] sm:$0xff] }
 0x5d2   : > { %1392 = vst.msk [vmem:[#allocation3 + $0x40] sm:$0xff] %vm1383_vm3, %v1375_v8  ;;  %v1333_v35 = vmul.f32 %v9397_v41, %v1317_v50 }
 0x5d3   : > { %1393 = vst.msk [vmem:[#allocation3 + $0x48] sm:$0xff] %vm1383_vm3, %v1376_v13  ;;  %v1356_v45 = vpop.xlane.xlu0 %1355  ;;  %v11301_v13 = vld [vmem:[#allocation18_spill] sm:$0xff] }
 0x5d4   : > { %v1377_v34 = vadd.f32 %v1356_v45, %v1329_v4  ;;  %v1358_v59 = vpop.xlane.xlu1 %1357  ;;  %v9401_v43 = vpop.eup %7007 }
 0x5d5   : > { %v1378_v48 = vadd.f32 %v1358_v59, %v1330_v21  ;;  %v1334_v0 = vmul.f32 %v9401_v43, %v1318_v2  ;;  %v1403_v59 = vld [vmem:[#allocation4 + $0x18] sm:$0xff] }
 0x5d6   : > { %1394 = vst.msk [vmem:[#allocation3 + $0x50] sm:$0xff] %vm1383_vm3, %v1377_v34 }
 0x5d7   : > { %1395 = vst.msk [vmem:[#allocation3 + $0x58] sm:$0xff] %vm1383_vm3, %v1378_v48  ;;  %v1360_v51 = vpop.xlane.xlu0 %1359 }
 0x5d8   : > { %v1379_v44 = vadd.f32 %v1360_v51, %v1331_v17  ;;  %v1362_v58 = vpop.xlane.xlu1 %1361  ;;  %v1404_v17 = vld [vmem:[#allocation4 + $0x20] sm:$0xff]  ;;  %v11303_v51 = vld [vmem:[#allocation20_spill] sm:$0xff] }
 0x5d9   : > { %v1380_v29 = vadd.f32 %v1362_v58, %v1332_v40 }
 0x5da   : > { %1396 = vst.msk [vmem:[#allocation3 + $0x60] sm:$0xff] %vm1383_vm3, %v1379_v44 }
 0x5db   : > { %1397 = vst.msk [vmem:[#allocation3 + $0x68] sm:$0xff] %vm1383_vm3, %v1380_v29  ;;  %v1364_v9 = vpop.xlane.xlu0 %1363  ;;  %v1405_v29 = vld [vmem:[#allocation4 + $0x28] sm:$0xff] }
 0x5dc   : > { %v1381_v20 = vadd.f32 %v1364_v9, %v1333_v35  ;;  %v1366_v25 = vpop.xlane.xlu1 %1365  ;;  %v11304_v35 = vld [vmem:[#allocation19_spill] sm:$0xff] }
 0x5dd   : > { %v1382_v12 = vadd.f32 %v1366_v25, %v1334_v0  ;;  %v1406_v0 = vld [vmem:[#allocation4 + $0x30] sm:$0xff] }
 0x5de   : > { %1398 = vst.msk [vmem:[#allocation3 + $0x70] sm:$0xff] %vm1383_vm3, %v1381_v20  ;;  %v11305_v20 = vld [vmem:[#allocation58_spill] sm:$0xff] }
 0x5df   : > { %1399 = vst.msk [vmem:[#allocation3 + $0x78] sm:$0xff] %vm1383_vm3, %v1382_v12 }
 0x5e0   : > { %v1424_v47 = vpop.permute.xlu1 %1423 }
 0x5e1   : > { %v1497_v8 = vmul.f32 %v1424_v47, %v1401_v36 }
 0x5e3   : > { %v1658_v4 = vadd.f32 %v11301_v13, %v1497_v8  ;;  %v1419_v45 = vpop.permute.xlu0 %1418 }
 0x5e4   : > { %v1496_v21 = vmul.f32 %v1419_v45, %v1400_v39  ;;  %v1429_v63 = vpop.permute.xlu1 %1428  ;;  %v1407_v39 = vld [vmem:[#allocation4 + $0x38] sm:$0xff]  ;;  %v11307_v45 = vld [vmem:[#allocation60_spill] sm:$0xff] }
 0x5e5   : > { %1674 = vst.msk [vmem:[#allocation4 + $0x8] sm:$0xff] %vm821_vm2, %v1658_v4  ;;  %v1498_v34 = vmul.f32 %v1429_v63, %v1402_v61  ;;  %v11306_v61 = vld [vmem:[#allocation57_spill] sm:$0xff]  ;;  %v1408_v4 = vld [vmem:[#allocation4 + $0x40] sm:$0xff] }
 0x5e6   : > { %v1657_v48 = vadd.f32 %v11302_v62, %v1496_v21 }
 0x5e7   : > { %v1659_v40 = vadd.f32 %v11303_v51, %v1498_v34 }
 0x5e8   : > { %v1434_v50 = vpop.permute.xlu0 %1433  ;;  %1673 = vst.msk [vmem:[#allocation4] sm:$0xff] %vm821_vm2, %v1657_v48  ;;  %v1439_v58 = vpop.permute.xlu1 %1438  ;;  %v1409_v48 = vld [vmem:[#allocation4 + $0x48] sm:$0xff] }
 0x5e9   : > { %v1499_v44 = vmul.f32 %v1434_v50, %v1403_v59  ;;  %1675 = vst.msk [vmem:[#allocation4 + $0x10] sm:$0xff] %vm821_vm2, %v1659_v40  ;;  %v1500_v2 = vmul.f32 %v1439_v58, %v1404_v17  ;;  %v11308_v17 = vld [vmem:[#allocation59_spill] sm:$0xff]  ;;  %v1410_v40 = vld [vmem:[#allocation4 + $0x50] sm:$0xff]  ;;  %v11309_v50 = vld [vmem:[#allocation62_spill] sm:$0xff] }
 0x5eb   : > { %v1660_v9 = vadd.f32 %v11304_v35, %v1499_v44  ;;  %v1661_v25 = vadd.f32 %v11305_v20, %v1500_v2 }
 0x5ec   : > { %v1444_v12 = vpop.permute.xlu0 %1443  ;;  %v1449_v47 = vpop.permute.xlu1 %1448 }
 0x5ed   : > { %1676 = vst.msk [vmem:[#allocation4 + $0x18] sm:$0xff] %vm821_vm2, %v1660_v9  ;;  %v1501_v36 = vmul.f32 %v1444_v12, %v1405_v29  ;;  %1677 = vst.msk [vmem:[#allocation4 + $0x20] sm:$0xff] %vm821_vm2, %v1661_v25  ;;  %v1502_v8 = vmul.f32 %v1449_v47, %v1406_v0  ;;  %v1411_v9 = vld [vmem:[#allocation4 + $0x58] sm:$0xff]  ;;  %v1412_v25 = vld [vmem:[#allocation4 + $0x60] sm:$0xff] }
 0x5ee   : > { %v11310_v0 = vld [vmem:[#allocation61_spill] sm:$0xff]  ;;  %v11311_v12 = vld [vmem:[#allocation64_spill] sm:$0xff] }
 0x5ef   : > { %v1662_v13 = vadd.f32 %v11306_v61, %v1501_v36  ;;  %v1663_v21 = vadd.f32 %v11307_v45, %v1502_v8 }
 0x5f0   : > { %v1454_v63 = vpop.permute.xlu0 %1453  ;;  %v1459_v59 = vpop.permute.xlu1 %1458 }
 0x5f1   : > { %1678 = vst.msk [vmem:[#allocation4 + $0x28] sm:$0xff] %vm821_vm2, %v1662_v13  ;;  %v1503_v34 = vmul.f32 %v1454_v63, %v1407_v39  ;;  %1679 = vst.msk [vmem:[#allocation4 + $0x30] sm:$0xff] %vm821_vm2, %v1663_v21  ;;  %v1504_v62 = vmul.f32 %v1459_v59, %v1408_v4  ;;  %v1413_v13 = vld [vmem:[#allocation4 + $0x68] sm:$0xff]  ;;  %v11313_v21 = vld [vmem:[#allocation66_spill] sm:$0xff] }
 0x5f2   : > { %v11312_v4 = vld [vmem:[#allocation63_spill] sm:$0xff] }
 0x5f3   : > { %v1664_v51 = vadd.f32 %v11308_v17, %v1503_v34  ;;  %v1665_v44 = vadd.f32 %v11309_v50, %v1504_v62 }
 0x5f4   : > { %v1464_v58 = vpop.permute.xlu0 %1463  ;;  %v1469_v29 = vpop.permute.xlu1 %1468 }
 0x5f5   : > { %1680 = vst.msk [vmem:[#allocation4 + $0x38] sm:$0xff] %vm821_vm2, %v1664_v51  ;;  %v1505_v2 = vmul.f32 %v1464_v58, %v1409_v48  ;;  %1681 = vst.msk [vmem:[#allocation4 + $0x40] sm:$0xff] %vm821_vm2, %v1665_v44  ;;  %v1506_v35 = vmul.f32 %v1469_v29, %v1410_v40  ;;  %v11314_v48 = vld [vmem:[#allocation65_spill] sm:$0xff] }
 0x5f7   : > { %v1666_v20 = vadd.f32 %v11310_v0, %v1505_v2  ;;  %v1667_v36 = vadd.f32 %v11311_v12, %v1506_v35  ;;  %v9437_v35 = vpop.f32.mrf.mxu0 }
 0x5f8   : > { %v1474_v47 = vpop.permute.xlu0 %1473  ;;  %v1479_v39 = vpop.permute.xlu1 %1478  ;;  %11315 = vst [vmem:[#allocation31_spill] sm:$0xff] %v9437_v35  ;;  %v9571_v35 = vld [vmem:[#allocation2 + $0x130] sm:$0xff] }
 0x5f9   : > { %1682 = vst.msk [vmem:[#allocation4 + $0x48] sm:$0xff] %vm821_vm2, %v1666_v20  ;;  %v1507_v8 = vmul.f32 %v1474_v47, %v1411_v9  ;;  %1683 = vst.msk [vmem:[#allocation4 + $0x50] sm:$0xff] %vm821_vm2, %v1667_v36  ;;  %v1508_v61 = vmul.f32 %v1479_v39, %v1412_v25  ;;  %v9439_v9 = vpop.f32.mrf.mxu0 }
 0x5fa   : > { %11316 = vst [vmem:[#allocation35_spill] sm:$0xff] %v9439_v9  ;;  %11336 = vst [vmem:[#allocation48_spill] sm:$0xff] %v9571_v35  ;;  %v9586_v9 = vld [vmem:[#allocation2 + $0x178] sm:$0xff] }
 0x5fb   : > { %v1668_v45 = vadd.f32 %v11312_v4, %v1507_v8  ;;  %v1669_v63 = vadd.f32 %v11313_v21, %v1508_v61  ;;  %11339 = vst [vmem:[#allocation53_spill] sm:$0xff] %v9586_v9 }
 0x5fc   : > { %v1484_v34 = vpop.permute.xlu0 %1483  ;;  %v3441_v62 = vpop.permute.xlu1 %3440 }
 0x5fd   : > { %1684 = vst.msk [vmem:[#allocation4 + $0x58] sm:$0xff] %vm821_vm2, %v1668_v45  ;;  %v1509_v59 = vmul.f32 %v1484_v34, %v1413_v13  ;;  %1685 = vst.msk [vmem:[#allocation4 + $0x60] sm:$0xff] %vm821_vm2, %v1669_v63  ;;  %6611 = vmatprep.subr.mxu1 %v3441_v62 }
 0x5fe   : > { %6612 = vmatpush3.msra.mxu1 %v3441_v62  ;;  %v7193_v62 = vld [vmem:[%s7758_s6 + $0x30] sm:$0xff] }
 0x5ff   : > { %v1670_v17 = vadd.f32 %v11314_v48, %v1509_v59 }
 0x600   : > { %v3439_v51 = vpop.permute.xlu0 %3438  ;;  %v3437_v40 = vpop.permute.xlu1 %3436 }
 0x601   : > { %1686 = vst.msk [vmem:[#allocation4 + $0x68] sm:$0xff] %vm821_vm2, %v1670_v17  ;;  %6613 = vmatprep.subr.mxu1 %v3439_v51  ;;  %v7194_v17 = vld [vmem:[%s7758_s6 + $0x38] sm:$0xff] }
 0x602   : > { %6614 = vmatpush3.msra.mxu1 %v3439_v51 }
 0x603   : > { %6615 = vmatprep.subr.mxu1 %v3437_v40 }
 0x604   : > { %6616 = vmatpush3.msra.mxu1 %v3437_v40  ;;  %v3435_v50 = vpop.permute.xlu1 %3434  ;;  %v3433_v44 = vpop.permute.xlu0 %3432 }
 0x605   : > { %6617 = vmatprep.subr.mxu1 %v3435_v50 }
 0x606   : > { %6618 = vmatpush3.msra.mxu1 %v3435_v50 }
 0x607   : > { %6619 = vmatprep.subr.mxu1 %v3433_v44 }
 0x608   : > { %v3431_v58 = vpop.permute.xlu1 %3430  ;;  %6620 = vmatpush3.msra.mxu1 %v3433_v44  ;;  %v3429_v2 = vpop.permute.xlu0 %3428 }
 0x609   : > { %6621 = vmatprep.subr.mxu1 %v3431_v58 }
 0x60a   : > { %6622 = vmatpush3.msra.mxu1 %v3431_v58 }
 0x60b   : > { %6623 = vmatprep.subr.mxu1 %v3429_v2 }
 0x60c   : > { %v3427_v29 = vpop.permute.xlu1 %3426  ;;  %6624 = vmatpush3.msra.mxu1 %v3429_v2 }
 0x60d   : > { %6625 = vmatprep.subr.mxu1 %v3427_v29 }
 0x60e   : > { %6626 = vmatpush3.msra.mxu1 %v3427_v29 }
 0x61e   : > { %v9441_v0 = vpop.f32.mrf.mxu0 }
 0x61f   : > { %11317 = vst [vmem:[#allocation26_spill] sm:$0xff] %v9441_v0  ;;  %v7197_v0 = vld [vmem:[%s7758_s6 + $0x18] sm:$0xff] }
 0x620   : > { %v9443_v20 = vpop.f32.mrf.mxu0 }
 0x621   : > { %11318 = vst [vmem:[#allocation30_spill] sm:$0xff] %v9443_v20  ;;  %v7208_v20 = vld [vmem:[%s7756_s5 + $0x40] sm:$0xff] }
 0x622   : > { %v9445_v25 = vpop.f32.mrf.mxu0 }
 0x623   : > { %11319 = vst [vmem:[#allocation33_spill] sm:$0xff] %v9445_v25  ;;  %v7195_v25 = vld [vmem:[%s7758_s6 + $0x28] sm:$0xff] }
 0x624   : > { %v9447_v12 = vpop.f32.mrf.mxu0 }
 0x625   : > { %11320 = vst [vmem:[#allocation28_spill] sm:$0xff] %v9447_v12  ;;  %v7199_v12 = vld [vmem:[%s7758_s6 + $0x8] sm:$0xff] }
 0x627   : > { %v9449_v36 = vpop.f32.mrf.mxu0 }
 0x628   : > { %11321 = vst [vmem:[#allocation36_spill] sm:$0xff] %v9449_v36 }
 0x629   : > { %v9451_v47 = vpop.f32.mrf.mxu0 }
 0x62a   : > { %11322 = vst [vmem:[#allocation37_spill] sm:$0xff] %v9451_v47 }
 0x62b   : > { %v9453_v8 = vpop.f32.mrf.mxu0 }
 0x62c   : > { %11323 = vst [vmem:[#allocation38_spill] sm:$0xff] %v9453_v8 }
 0x62d   : > { %v9455_v39 = vpop.f32.mrf.mxu0 }
 0x62e   : > { %11324 = vst [vmem:[#allocation40_spill] sm:$0xff] %v9455_v39 }
 0x62f   : > { %v9457_v61 = vpop.f32.mrf.mxu0 }
 0x630   : > { %11325 = vst [vmem:[#allocation39_spill] sm:$0xff] %v9457_v61 }
 0x631   : > { %v9459_v13 = vpop.f32.mrf.mxu0 }
 0x632   : > { %11326 = vst [vmem:[#allocation42_spill] sm:$0xff] %v9459_v13  ;;  %v9523_v13 = vld [vmem:[#allocation2 + $0x100] sm:$0xff] }
 0x633   : > { %v9461_v4 = vpop.f32.mrf.mxu0  ;;  %11332 = vst [vmem:[#allocation47_spill] sm:$0xff] %v9523_v13 }
 0x634   : > { %11327 = vst [vmem:[#allocation41_spill] sm:$0xff] %v9461_v4 }
 0x635   : > { %v9463_v45 = vpop.f32.mrf.mxu0 }
 0x636   : > { %11328 = vst [vmem:[#allocation23_spill] sm:$0xff] %v9463_v45  ;;  %v9521_v45 = vld [vmem:[#allocation2 + $0x108] sm:$0xff] }
 0x637   : > { %11331 = vst [vmem:[#allocation44_spill] sm:$0xff] %v9521_v45 }
 0x63a   : > { %v9465_v21 = vpop.f32.mrf.mxu0 }
 0x63b   : > { %11329 = vst [vmem:[#allocation43_spill] sm:$0xff] %v9465_v21 }
 0x63c   : > { %v9467_v63 = vpop.f32.mrf.mxu0 }
 0x63d   : > { %11330 = vst [vmem:[#allocation45_spill] sm:$0xff] %v9467_v63 }
 0x640   : > { %v9469_v34 = vpop.f32.mrf.mxu0 }
 0x641   : > { %2978 = vmax.xlane.f32.xlu1 %v9469_v34 }
 0x642   : > { %v9472_v59 = vpop.f32.mrf.mxu0 }
 0x643   : > { %2976 = vmax.xlane.f32.xlu0 %v9472_v59 }
 0x644   : > { %v9477_v48 = vpop.f32.mrf.mxu0 }
 0x646   : > { %v9481_v51 = vpop.f32.mrf.mxu0 }
 0x648   : > { %v9483_v40 = vpop.f32.mrf.mxu0 }
 0x64a   : > { %v9485_v50 = vpop.f32.mrf.mxu0 }
 0x64c   : > { %v9487_v44 = vpop.f32.mrf.mxu0 }
 0x64e   : > { %v9489_v58 = vpop.f32.mrf.mxu0 }
 0x650   : > { %v9491_v2 = vpop.f32.mrf.mxu0 }
 0x652   : > { %3422 = vrot.lane.b32.xlu1 %v7193_v62, %s7487_s16  ;;  %v9493_v29 = vpop.f32.mrf.mxu0 }
 0x654   : > { %v9495_v62 = vpop.f32.mrf.mxu0 }
 0x656   : > { %v9497_v21 = vpop.f32.mrf.mxu0 }
 0x658   : > { %v9499_v4 = vpop.f32.mrf.mxu0 }
 0x659   : > { %3424 = vrot.lane.b32.xlu0 %v7194_v17, %s7487_s16 }
 0x65a   : > { %v9503_v17 = vpop.f32.mrf.mxu0 }
 0x65c   : > { %v9506_v63 = vpop.f32.mrf.mxu0 }
 0x65e   : > { %v9518_v61 = vpop.f32.mrf.mxu0 }
 0x676   : > { %2982 = vmax.xlane.f32.xlu1 %v9477_v48 }
 0x678   : > { %2988 = vmax.xlane.f32.xlu0 %v9489_v58 }
 0x67a   : > { %2980 = vmax.xlane.f32.xlu1 %v9481_v51 }
 0x67c   : > { %3006 = vmax.xlane.f32.xlu0 %v9506_v63 }
 0x67e   : > { %2986 = vmax.xlane.f32.xlu1 %v9483_v40 }
 0x682   : > { %2984 = vmax.xlane.f32.xlu1 %v9485_v50 }
 0x686   : > { %2990 = vmax.xlane.f32.xlu1 %v9487_v44 }
 0x68a   : > { %2994 = vmax.xlane.f32.xlu1 %v9491_v2 }
 0x68e   : > { %2992 = vmax.xlane.f32.xlu1 %v9493_v29 }
 0x692   : > { %2998 = vmax.xlane.f32.xlu1 %v9495_v62 }
 0x696   : > { %2996 = vmax.xlane.f32.xlu1 %v9497_v21 }
 0x69a   : > { %3002 = vmax.xlane.f32.xlu1 %v9499_v4 }
 0x69e   : > { %3000 = vmax.xlane.f32.xlu1 %v9503_v17 }
 0x6a2   : > { %3004 = vmax.xlane.f32.xlu1 %v9518_v61 }
 0x6ca   : > { %v2979_v8 = vpop.xlane.xlu1 %2978 }
 0x6cb   : > { %v9526_v36 = vmax.f32 %v9521_v45, %v2979_v8  ;;  %v7198_v45 = vld [vmem:[%s7758_s6 + $0x10] sm:$0xff] }
 0x6cc   : > { %v2977_v39 = vpop.xlane.xlu0 %2976 }
 0x6cd   : > { %11333 = vst [vmem:[#allocation22_spill] sm:$0xff] %v9526_v36  ;;  %3636 = vst.msk [vmem:[#allocation2 + $0x108] sm:$0xff] %vm1383_vm3, %v9526_v36  ;;  %v9533_v47 = vmax.f32 %v9523_v13, %v2977_v39  ;;  %3079 = vperm.xlu0 %6911, %v9526_v36   ;;  %v7196_v36 = vld [vmem:[%s7758_s6 + $0x20] sm:$0xff] }
 0x6ce   : > { %v3423_v39 = vpop.permute.xlu1 %3422  ;;  %v9612_v13 = vld [vmem:[#allocation2 + $0x120] sm:$0xff] }
 0x6cf   : > { %11334 = vst [vmem:[#allocation46_spill] sm:$0xff] %v9533_v47  ;;  %3635 = vst.msk [vmem:[#allocation2 + $0x100] sm:$0xff] %vm1383_vm3, %v9533_v47  ;;  %3074 = vperm.xlu1 %6912, %v9533_v47  }
 0x6d0   : > { %v3425_v8 = vpop.permute.xlu0 %3424  ;;  %11343 = vst [vmem:[#allocation56_spill] sm:$0xff] %v9612_v13 }
 0x6d1   : > { %6627 = vmatprep.subr.mxu1 %v3425_v8  ;;  %3420 = vrot.lane.b32.xlu0 %v7195_v25, %s7487_s16  ;;  %v7200_v25 = vld [vmem:[%s7758_s6] sm:$0xff] }
 0x6d2   : > { %6628 = vmatpush3.msra.mxu1 %v3425_v8  ;;  %v7201_v8 = vld [vmem:[%s7756_s5 + $0x78] sm:$0xff] }
 0x6d3   : > { %6629 = vmatprep.subr.mxu1 %v3423_v39  ;;  %3418 = vrot.lane.b32.xlu1 %v7196_v36, %s7487_s16  ;;  %v7202_v36 = vld [vmem:[%s7756_s5 + $0x70] sm:$0xff] }
 0x6d4   : > { %6630 = vmatpush3.msra.mxu1 %v3423_v39  ;;  %v7205_v39 = vld [vmem:[%s7756_s5 + $0x60] sm:$0xff] }
 0x6d5   : > { %3416 = vrot.lane.b32.xlu0 %v7197_v0, %s7487_s16  ;;  %v7203_v0 = vld [vmem:[%s7756_s5 + $0x68] sm:$0xff] }
 0x6d7   : > { %3414 = vrot.lane.b32.xlu1 %v7198_v45, %s7487_s16  ;;  %v7204_v45 = vld [vmem:[%s7756_s5 + $0x58] sm:$0xff] }
 0x6d9   : > { %3412 = vrot.lane.b32.xlu0 %v7199_v12, %s7487_s16  ;;  %v7206_v12 = vld [vmem:[%s7756_s5 + $0x48] sm:$0xff] }
 0x6db   : > { %3410 = vrot.lane.b32.xlu1 %v7200_v25, %s7487_s16  ;;  %v7207_v25 = vld [vmem:[%s7756_s5 + $0x50] sm:$0xff] }
 0x6dd   : > { %3713 = vrot.lane.b32.xlu0 %v7201_v8, %s7488_s14  ;;  %v9569_v8 = vld [vmem:[#allocation2 + $0x118] sm:$0xff] }
 0x6de   : > { %11335 = vst [vmem:[#allocation49_spill] sm:$0xff] %v9569_v8 }
 0x6df   : > { %3711 = vrot.lane.b32.xlu1 %v7202_v36, %s7488_s14 }
 0x6e1   : > { %3709 = vrot.lane.b32.xlu0 %v7203_v0, %s7488_s14 }
 0x6e3   : > { %3705 = vrot.lane.b32.xlu1 %v7204_v45, %s7488_s14  ;;  %v9576_v45 = vld [vmem:[#allocation2 + $0x110] sm:$0xff] }
 0x6e5   : > { %3707 = vrot.lane.b32.xlu0 %v7205_v39, %s7488_s14 }
 0x6e7   : > { %3701 = vrot.lane.b32.xlu1 %v7206_v12, %s7488_s14  ;;  %v9595_v12 = vld [vmem:[#allocation2 + $0x128] sm:$0xff] }
 0x6e8   : > { %11341 = vst [vmem:[#allocation55_spill] sm:$0xff] %v9595_v12 }
 0x6e9   : > { %3703 = vrot.lane.b32.xlu0 %v7207_v25, %s7488_s14 }
 0x6ed   : > { %3699 = vrot.lane.b32.xlu0 %v7208_v20, %s7488_s14 }
 0x6ff   : > { %v2983_v36 = vpop.xlane.xlu1 %2982 }
 0x700   : > { %v9574_v0 = vmax.f32 %v9569_v8, %v2983_v36 }
 0x701   : > { %v2989_v39 = vpop.xlane.xlu0 %2988 }
 0x702   : > { %11337 = vst [vmem:[#allocation51_spill] sm:$0xff] %v9574_v0  ;;  %3638 = vst.msk [vmem:[#allocation2 + $0x118] sm:$0xff] %vm1383_vm3, %v9574_v0  ;;  %3089 = vperm.xlu1 %6912, %v9574_v0   ;;  %v9584_v20 = vmax.f32 %v9571_v35, %v2989_v39 }
 0x703   : > { %v2981_v25 = vpop.xlane.xlu1 %2980 }
 0x704   : > { %11338 = vst [vmem:[#allocation50_spill] sm:$0xff] %v9584_v20  ;;  %v9589_v36 = vmax.f32 %v9576_v45, %v2981_v25  ;;  %3641 = vst.msk [vmem:[#allocation2 + $0x130] sm:$0xff] %vm1383_vm3, %v9584_v20 }
 0x705   : > { %v3007_v8 = vpop.xlane.xlu0 %3006 }
 0x706   : > { %11340 = vst [vmem:[#allocation52_spill] sm:$0xff] %v9589_v36  ;;  %3637 = vst.msk [vmem:[#allocation2 + $0x110] sm:$0xff] %vm1383_vm3, %v9589_v36  ;;  %3084 = vperm.xlu1 %6912, %v9589_v36   ;;  %v9603_v39 = vmax.f32 %v9586_v9, %v3007_v8  ;;  %v9622_v36 = vld [vmem:[#allocation2 + $0x138] sm:$0xff] }
 0x707   : > { %v2987_v25 = vpop.xlane.xlu1 %2986  ;;  %11344 = vst [vmem:[#allocation18_spill] sm:$0xff] %v9622_v36 }
 0x708   : > { %v9606_v47 = vmax.f32 %v9595_v12, %v2987_v25  ;;  %3650 = vst.msk [vmem:[#allocation2 + $0x178] sm:$0xff] %vm1383_vm3, %v9603_v39  ;;  %v9632_v12 = vld [vmem:[#allocation2 + $0x148] sm:$0xff] }
 0x709   : > { %11346 = vst [vmem:[#allocation20_spill] sm:$0xff] %v9632_v12 }
 0x70a   : > { %11342 = vst [vmem:[#allocation54_spill] sm:$0xff] %v9606_v47  ;;  %3640 = vst.msk [vmem:[#allocation2 + $0x128] sm:$0xff] %vm1383_vm3, %v9606_v47  ;;  %3099 = vperm.xlu0 %6911, %v9606_v47  }
 0x70b   : > { %v2985_v8 = vpop.xlane.xlu1 %2984 }
 0x70c   : > { %v9620_v25 = vmax.f32 %v9612_v13, %v2985_v8  ;;  %v9642_v13 = vld [vmem:[#allocation2 + $0x140] sm:$0xff] }
 0x70d   : > { %11348 = vst [vmem:[#allocation58_spill] sm:$0xff] %v9642_v13 }
 0x70e   : > { %3639 = vst.msk [vmem:[#allocation2 + $0x120] sm:$0xff] %vm1383_vm3, %v9620_v25  ;;  %3094 = vperm.xlu0 %6911, %v9620_v25  }
 0x70f   : > { %v2991_v0 = vpop.xlane.xlu1 %2990 }
 0x710   : > { %v9630_v9 = vmax.f32 %v9622_v36, %v2991_v0 }
 0x712   : > { %11345 = vst [vmem:[#allocation21_spill] sm:$0xff] %v9630_v9  ;;  %3642 = vst.msk [vmem:[#allocation2 + $0x138] sm:$0xff] %vm1383_vm3, %v9630_v9  ;;  %3109 = vperm.xlu1 %6912, %v9630_v9   ;;  %v9653_v9 = vld [vmem:[#allocation2 + $0x158] sm:$0xff] }
 0x713   : > { %v2995_v35 = vpop.xlane.xlu1 %2994  ;;  %11350 = vst [vmem:[#allocation60_spill] sm:$0xff] %v9653_v9 }
 0x714   : > { %v9640_v47 = vmax.f32 %v9632_v12, %v2995_v35 }
 0x716   : > { %11347 = vst [vmem:[#allocation19_spill] sm:$0xff] %v9640_v47  ;;  %3644 = vst.msk [vmem:[#allocation2 + $0x148] sm:$0xff] %vm1383_vm3, %v9640_v47  ;;  %3119 = vperm.xlu0 %6911, %v9640_v47   ;;  %3104 = vperm.xlu1 %6912, %v9584_v20   ;;  %v9663_v47 = vld [vmem:[#allocation2 + $0x150] sm:$0xff]  ;;  %v9683_v20 = vld [vmem:[#allocation2 + $0x160] sm:$0xff] }
 0x717   : > { %v2993_v8 = vpop.xlane.xlu1 %2992 }
 0x718   : > { %v9651_v36 = vmax.f32 %v9642_v13, %v2993_v8 }
 0x71a   : > { %11349 = vst [vmem:[#allocation57_spill] sm:$0xff] %v9651_v36  ;;  %3643 = vst.msk [vmem:[#allocation2 + $0x140] sm:$0xff] %vm1383_vm3, %v9651_v36  ;;  %3114 = vperm.xlu0 %6911, %v9651_v36   ;;  %v9673_v36 = vld [vmem:[#allocation2 + $0x168] sm:$0xff] }
 0x71b   : > { %v2999_v0 = vpop.xlane.xlu1 %2998  ;;  %11353 = vst [vmem:[#allocation61_spill] sm:$0xff] %v9673_v36 }
 0x71c   : > { %v9661_v12 = vmax.f32 %v9653_v9, %v2999_v0  ;;  %v7209_v0 = vld [vmem:[%s7756_s5 + $0x38] sm:$0xff] }
 0x71e   : > { %11351 = vst [vmem:[#allocation59_spill] sm:$0xff] %v9661_v12  ;;  %3646 = vst.msk [vmem:[#allocation2 + $0x158] sm:$0xff] %vm1383_vm3, %v9661_v12  ;;  %3129 = vperm.xlu1 %6912, %v9661_v12  }
 0x71f   : > { %v2997_v35 = vpop.xlane.xlu1 %2996 }
 0x720   : > { %v9671_v13 = vmax.f32 %v9663_v47, %v2997_v35  ;;  %v7211_v35 = vld [vmem:[%s7756_s5 + $0x28] sm:$0xff] }
 0x722   : > { %11352 = vst [vmem:[#allocation62_spill] sm:$0xff] %v9671_v13  ;;  %3645 = vst.msk [vmem:[#allocation2 + $0x150] sm:$0xff] %vm1383_vm3, %v9671_v13  ;;  %3124 = vperm.xlu1 %6912, %v9671_v13   ;;  %v9695_v13 = vld [vmem:[#allocation2 + $0x170] sm:$0xff] }
 0x723   : > { %v3003_v8 = vpop.xlane.xlu1 %3002  ;;  %11356 = vst [vmem:[#allocation66_spill] sm:$0xff] %v9695_v13 }
 0x724   : > { %v9681_v9 = vmax.f32 %v9673_v36, %v3003_v8  ;;  %v7210_v36 = vld [vmem:[%s7756_s5 + $0x30] sm:$0xff] }
 0x726   : > { %11354 = vst [vmem:[#allocation64_spill] sm:$0xff] %v9681_v9  ;;  %3648 = vst.msk [vmem:[#allocation2 + $0x168] sm:$0xff] %vm1383_vm3, %v9681_v9  ;;  %3139 = vperm.xlu0 %6911, %v9681_v9   ;;  %3697 = vrot.lane.b32.xlu1 %v7209_v0, %s7488_s14 }
 0x727   : > { %v3001_v12 = vpop.xlane.xlu1 %3000 }
 0x728   : > { %v9693_v8 = vmax.f32 %v9683_v20, %v3001_v12  ;;  %v7214_v12 = vld [vmem:[%s7756_s5 + $0x8] sm:$0xff] }
 0x72a   : > { %11355 = vst [vmem:[#allocation63_spill] sm:$0xff] %v9693_v8  ;;  %3647 = vst.msk [vmem:[#allocation2 + $0x160] sm:$0xff] %vm1383_vm3, %v9693_v8  ;;  %3134 = vperm.xlu0 %6911, %v9693_v8   ;;  %v7212_v8 = vld [vmem:[%s7756_s5 + $0x18] sm:$0xff] }
 0x72b   : > { %v3005_v9 = vpop.xlane.xlu1 %3004 }
 0x72c   : > { %v9703_v0 = vmax.f32 %v9695_v13, %v3005_v9  ;;  %v7213_v9 = vld [vmem:[%s7756_s5 + $0x20] sm:$0xff]  ;;  %v7215_v13 = vld [vmem:[%s7756_s5 + $0x10] sm:$0xff] }
 0x72e   : > { %3649 = vst.msk [vmem:[#allocation2 + $0x170] sm:$0xff] %vm1383_vm3, %v9703_v0  ;;  %3695 = vrot.lane.b32.xlu0 %v7210_v36, %s7488_s14  ;;  %3144 = vperm.xlu1 %6912, %v9703_v0   ;;  %v7216_v36 = vld [vmem:[%s7756_s5] sm:$0xff] }
 0x732   : > { %3693 = vrot.lane.b32.xlu0 %v7211_v35, %s7488_s14  ;;  %3149 = vperm.xlu1 %6912, %v9603_v39  }
 0x736   : > { %3689 = vrot.lane.b32.xlu0 %v7212_v8, %s7488_s14  ;;  %3691 = vrot.lane.b32.xlu1 %v7213_v9, %s7488_s14 }
 0x73a   : > { %3685 = vrot.lane.b32.xlu0 %v7214_v12, %s7488_s14  ;;  %3687 = vrot.lane.b32.xlu1 %v7215_v13, %s7488_s14 }
 0x73e   : > { %3651 = vrot.lane.b32.xlu0 %v8165_v54, %s7488_s14  ;;  %3683 = vrot.lane.b32.xlu1 %v7216_v36, %s7488_s14 }
 0x742   : > { %3655 = vrot.lane.b32.xlu0 %v8268_v7, %s7488_s14  ;;  %3653 = vrot.lane.b32.xlu1 %v8264_v6, %s7488_s14 }
 0x746   : > { %3659 = vrot.lane.b32.xlu0 %v8278_v11, %s7488_s14  ;;  %3657 = vrot.lane.b32.xlu1 %v8274_v10, %s7488_s14 }
 0x748   : > { %v3080_v35 = vpop.permute.xlu0 %3079 }
 0x749   : > { %v3153_v13 = vsub.f32 %v9469_v34, %v3080_v35 }
 0x74a   : > { %3663 = vrot.lane.b32.xlu0 %v8288_v15, %s7488_s14  ;;  %v3075_v54 = vpop.permute.xlu1 %3074  ;;  %3661 = vrot.lane.b32.xlu1 %v8284_v14, %s7488_s14 }
 0x74b   : > { %v3152_v7 = vsub.f32 %v9472_v59, %v3075_v54  ;;  %v3170_v8 = vmul.f32 1.442695, %v3153_v13 }
 0x74c   : > { %v3421_v6 = vpop.permute.xlu0 %3420 }
 0x74d   : > { %v3168_v12 = vmul.f32 1.442695, %v3152_v7  ;;  %6631 = vmatprep.subr.mxu1 %v3421_v6 }
 0x74e   : > { %3667 = vrot.lane.b32.xlu0 %v8298_v19, %s7488_s14  ;;  %3665 = vrot.lane.b32.xlu1 %v8294_v18, %s7488_s14  ;;  %v3419_v10 = vpop.permute.xlu1 %3418 }
 0x74f   : > { %7009 = vpow2.f32 %v3168_v12  ;;  %6632 = vmatpush3.msra.mxu1 %v3421_v6 }
 0x750   : > { %7011 = vpow2.f32 %v3170_v8  ;;  %6633 = vmatprep.subr.mxu1 %v3419_v10  ;;  %v3417_v11 = vpop.permute.xlu0 %3416 }
 0x751   : > { %6634 = vmatpush3.msra.mxu1 %v3419_v10 }
 0x752   : > { %3671 = vrot.lane.b32.xlu0 %v8308_v23, %s7488_s14  ;;  %3669 = vrot.lane.b32.xlu1 %v8304_v22, %s7488_s14  ;;  %v3415_v14 = vpop.permute.xlu1 %3414 }
 0x753   : > { %6635 = vmatprep.subr.mxu1 %v3417_v11 }
 0x754   : > { %6636 = vmatpush3.msra.mxu1 %v3417_v11  ;;  %v3413_v15 = vpop.permute.xlu0 %3412 }
 0x755   : > { %6637 = vmatprep.subr.mxu1 %v3415_v14 }
 0x756   : > { %3675 = vrot.lane.b32.xlu0 %v8318_v27, %s7488_s14  ;;  %3673 = vrot.lane.b32.xlu1 %v8314_v26, %s7488_s14  ;;  %v3411_v18 = vpop.permute.xlu1 %3410 }
 0x757   : > { %6638 = vmatpush3.msra.mxu1 %v3415_v14 }
 0x758   : > { %6639 = vmatprep.subr.mxu1 %v3413_v15  ;;  %v3714_v19 = vpop.permute.xlu0 %3713 }
 0x759   : > { %6640 = vmatpush3.msra.mxu1 %v3413_v15 }
 0x75a   : > { %3679 = vrot.lane.b32.xlu0 %v8328_v31, %s7488_s14  ;;  %3677 = vrot.lane.b32.xlu1 %v8324_v30, %s7488_s14  ;;  %v3712_v26 = vpop.permute.xlu1 %3711 }
 0x75b   : > { %6641 = vmatprep.subr.mxu1 %v3411_v18 }
 0x75c   : > { %v9757_v22 = vpop.eup %7009  ;;  %6642 = vmatpush3.msra.mxu1 %v3411_v18  ;;  %v3710_v27 = vpop.permute.xlu0 %3709 }
 0x75d   : > { %v9759_v23 = vpop.eup %7011  ;;  %6643 = vmatprep.mubr.f32.mxu1 %v9757_v22  ;;  %6667 = vmatprep.subr.msk.mxu1 %vm821_vm2, %v3714_v19 }
 0x75e   : > { %3681 = vrot.lane.b32.xlu1 %v8333_v33, %s7488_s14  ;;  %6644 = vmatmul.mubr.f32.vlgmr.msra.gmra.mxu1 %v9759_v23  ;;  %v3706_v31 = vpop.permute.xlu1 %3705 }
 0x75f   : > { %6668 = vmatpush3.xpose.msk.msra.mxu1 %vm821_vm2, %v3714_v19  ;;  %v11361_v19 = vld [vmem:[#allocation71_spill] sm:$0xff] }
 0x760   : > { %6669 = vmatprep.subr.msk.mxu1 %vm821_vm2, %v3712_v26  ;;  %v3708_v30 = vpop.permute.xlu0 %3707 }
 0x762   : > { %v3702_v34 = vpop.permute.xlu1 %3701 }
 0x763   : > { %6670 = vmatpush3.xpose.msk.msra.mxu1 %vm821_vm2, %v3712_v26 }
 0x764   : > { %6671 = vmatprep.subr.msk.mxu1 %vm821_vm2, %v3710_v27  ;;  %v3704_v33 = vpop.permute.xlu0 %3703 }
 0x767   : > { %6672 = vmatpush3.xpose.msk.msra.mxu1 %vm821_vm2, %v3710_v27 }
 0x768   : > { %6673 = vmatprep.subr.msk.mxu1 %vm821_vm2, %v3708_v30  ;;  %v3700_v59 = vpop.permute.xlu0 %3699 }
 0x76b   : > { %6674 = vmatpush3.xpose.msk.msra.mxu1 %vm821_vm2, %v3708_v30 }
 0x76c   : > { %6675 = vmatprep.subr.msk.mxu1 %vm821_vm2, %v3706_v31 }
 0x76f   : > { %6676 = vmatpush3.xpose.msk.msra.mxu1 %vm821_vm2, %v3706_v31  ;;  %v11364_v31 = vld [vmem:[#allocation27_spill] sm:$0xff] }
 0x770   : > { %6677 = vmatprep.subr.msk.mxu1 %vm821_vm2, %v3704_v33 }
 0x773   : > { %6678 = vmatpush3.xpose.msk.msra.mxu1 %vm821_vm2, %v3704_v33 }
 0x774   : > { %6679 = vmatprep.subr.msk.mxu1 %vm821_vm2, %v3702_v34 }
 0x777   : > { %6680 = vmatpush3.xpose.msk.msra.mxu1 %vm821_vm2, %v3702_v34 }
 0x778   : > { %6681 = vmatprep.subr.msk.mxu1 %vm821_vm2, %v3700_v59 }
 0x779   : > { %2252 = vadd.xlane.f32.xlu0 %v9142_v3 }
 0x77b   : > { %6682 = vmatpush3.xpose.msk.msra.mxu1 %vm821_vm2, %v3700_v59 }
 0x77d   : > { %2256 = vadd.xlane.f32.xlu0 %v9207_v1  ;;  %v3090_v9 = vpop.permute.xlu1 %3089 }
 0x77e   : > { %v3155_v36 = vsub.f32 %v9477_v48, %v3090_v9 }
 0x780   : > { %v3174_v54 = vmul.f32 1.442695, %v3155_v36 }
 0x781   : > { %2258 = vadd.xlane.f32.xlu0 %v9210_v42  ;;  %v3085_v35 = vpop.permute.xlu1 %3084 }
 0x782   : > { %v3154_v13 = vsub.f32 %v9481_v51, %v3085_v35  ;;  %2254 = vadd.xlane.f32.xlu1 %v9144_v28 }
 0x784   : > { %v3172_v7 = vmul.f32 1.442695, %v3154_v13  ;;  %v11366_v13 = vld [vmem:[#allocation25_spill] sm:$0xff] }
 0x785   : > { %2262 = vadd.xlane.f32.xlu0 %v9226_v5  ;;  %v3100_v8 = vpop.permute.xlu0 %3099 }
 0x786   : > { %7013 = vpow2.f32 %v3172_v7  ;;  %2260 = vadd.xlane.f32.xlu1 %v9219_v37  ;;  %v3157_v3 = vsub.f32 %v9483_v40, %v3100_v8 }
 0x787   : > { %7015 = vpow2.f32 %v3174_v54  ;;  %v11367_v54 = vld [vmem:[#allocation32_spill] sm:$0xff] }
 0x788   : > { %v3178_v48 = vmul.f32 1.442695, %v3157_v3  ;;  %v11368_v7 = vsub.f32 %v11366_v13, %v11367_v54  ;;  %v11369_v3 = vld [vmem:[#allocation29_spill] sm:$0xff] }
 0x789   : > { %2266 = vadd.xlane.f32.xlu0 %v9245_v46  ;;  %v3095_v1 = vpop.permute.xlu0 %3094 }
 0x78a   : > { %v3156_v42 = vsub.f32 %v9485_v50, %v3095_v1  ;;  %2264 = vadd.xlane.f32.xlu1 %v9240_v24  ;;  %v2065_v8 = vmul.f32 1.442695, %v11368_v7  ;;  %v11370_v1 = vld [vmem:[#allocation73_spill] sm:$0xff]  ;;  %v11388_v7 = vld [vmem:[#allocation84_spill] sm:$0xff] }
 0x78c   : > { %v3176_v28 = vmul.f32 1.442695, %v3156_v42  ;;  %v11371_v42 = vsub.f32 %v11369_v3, %v11370_v1 }
 0x78d   : > { %2270 = vadd.xlane.f32.xlu0 %v9267_v32  ;;  %v3110_v51 = vpop.permute.xlu1 %3109 }
 0x78e   : > { %7017 = vpow2.f32 %v3176_v28  ;;  %2268 = vadd.xlane.f32.xlu1 %v9256_v53  ;;  %v3159_v37 = vsub.f32 %v9487_v44, %v3110_v51 }
 0x78f   : > { %7019 = vpow2.f32 %v3178_v48  ;;  %v2067_v48 = vmul.f32 1.442695, %v11371_v42 }
 0x790   : > { %v3182_v50 = vmul.f32 1.442695, %v3159_v37 }
 0x791   : > { %2274 = vadd.xlane.f32.xlu0 %v9283_v38  ;;  %v3105_v5 = vpop.permute.xlu1 %3104  ;;  %v3120_v46 = vpop.permute.xlu0 %3119 }
 0x792   : > { %v3158_v40 = vsub.f32 %v9489_v58, %v3105_v5  ;;  %2272 = vadd.xlane.f32.xlu1 %v9280_v60  ;;  %v3161_v32 = vsub.f32 %v9491_v2, %v3120_v46  ;;  %v11372_v46 = vld [vmem:[#allocation34_spill] sm:$0xff] }
 0x793   : > { %v9799_v24 = vpop.eup %7013 }
 0x794   : > { %v9802_v6 = vpop.eup %7015  ;;  %v3180_v12 = vmul.f32 1.442695, %v3158_v40  ;;  %6646 = vmatprep.mubr.f32.mxu1 %v9799_v24  ;;  %v3186_v60 = vmul.f32 1.442695, %v3161_v32  ;;  %v11373_v40 = vld [vmem:[#allocation75_spill] sm:$0xff] }
 0x795   : > { %2278 = vadd.xlane.f32.xlu0 %v9301_v52  ;;  %6647 = vmatmul.mubr.f32.gmra.mxu1 %v9802_v6  ;;  %v3115_v53 = vpop.permute.xlu0 %3114 }
 0x796   : > { %7021 = vpow2.f32 %v3180_v12  ;;  %v3160_v38 = vsub.f32 %v9493_v29, %v3115_v53  ;;  %2276 = vadd.xlane.f32.xlu1 %v9293_v16  ;;  %v11357_v29 = vld [vmem:[#allocation70_spill] sm:$0xff]  ;;  %v11358_v16 = vld [vmem:[#allocation72_spill] sm:$0xff] }
 0x797   : > { %7023 = vpow2.f32 %v3182_v50  ;;  %v11359_v11 = vsub.f32 %v11357_v29, %v11358_v16  ;;  %v11374_v50 = vsub.f32 %v11372_v46, %v11373_v40  ;;  %v11375_v53 = vld [vmem:[#allocation74_spill] sm:$0xff] }
 0x798   : > { %v3184_v44 = vmul.f32 1.442695, %v3160_v38  ;;  %v11376_v38 = vsub.f32 %v11375_v53, %v8995_v56  ;;  %v11378_v29 = vld [vmem:[#allocation78_spill] sm:$0xff]  ;;  %v11394_v53 = vld [vmem:[#allocation88_spill] sm:$0xff] }
 0x799   : > { %2282 = vadd.xlane.f32.xlu0 %v9318_v55  ;;  %v3130_v58 = vpop.permute.xlu1 %3129  ;;  %v2059_v14 = vmul.f32 1.442695, %v11359_v11  ;;  %v2069_v32 = vmul.f32 1.442695, %v11374_v50 }
 0x79a   : > { %7025 = vpow2.f32 %v3184_v44  ;;  %2280 = vadd.xlane.f32.xlu1 %v9307_v49  ;;  %v3163_v52 = vsub.f32 %v9495_v62, %v3130_v58  ;;  %v11360_v49 = vld [vmem:[#allocation69_spill] sm:$0xff]  ;;  %v11363_v62 = vld [vmem:[#allocation24_spill] sm:$0xff] }
 0x79b   : > { %v9811_v2 = vpop.eup %7017  ;;  %7027 = vpow2.f32 %v3186_v60  ;;  %v11362_v26 = vsub.f32 %v11360_v49, %v11361_v19  ;;  %v11365_v33 = vsub.f32 %v11363_v62, %v11364_v31  ;;  %v2071_v60 = vmul.f32 1.442695, %v11376_v38  ;;  %v11395_v38 = vld [vmem:[#allocation91_spill] sm:$0xff] }
 0x79c   : > { %v9814_v10 = vpop.eup %7019  ;;  %6649 = vmatprep.mubr.f32.mxu1 %v9811_v2  ;;  %v3190_v18 = vmul.f32 1.442695, %v3163_v52  ;;  %7029 = vpow2.f32 %v2059_v14  ;;  %v11377_v52 = vld [vmem:[#allocation76_spill] sm:$0xff]  ;;  %v11380_v14 = vld [vmem:[#allocation77_spill] sm:$0xff] }
 0x79d   : > { %v3125_v15 = vpop.permute.xlu1 %3124  ;;  %6650 = vmatmul.mubr.f32.gmra.mxu1 %v9814_v10  ;;  %v2061_v27 = vmul.f32 1.442695, %v11362_v26  ;;  %v2063_v34 = vmul.f32 1.442695, %v11365_v33  ;;  %v11379_v16 = vsub.f32 %v11377_v52, %v11378_v29  ;;  %v11385_v33 = vld [vmem:[#allocation80_spill] sm:$0xff]  ;;  %v11397_v29 = vld [vmem:[#allocation86_spill] sm:$0xff] }
 0x79e   : > { %v3162_v55 = vsub.f32 %v9497_v21, %v3125_v15  ;;  %v11381_v15 = vsub.f32 %v11380_v14, %v9015_v57  ;;  %v11382_v57 = vld [vmem:[#allocation79_spill] sm:$0xff] }
 0x79f   : > { %v2073_v56 = vmul.f32 1.442695, %v11379_v16  ;;  %v11398_v16 = vld [vmem:[#allocation89_spill] sm:$0xff] }
 0x7a0   : > { %v3188_v30 = vmul.f32 1.442695, %v3162_v55  ;;  %v2075_v55 = vmul.f32 1.442695, %v11381_v15 }
 0x7a1   : > { %v3698_v59 = vpop.permute.xlu1 %3697  ;;  %v3140_v9 = vpop.permute.xlu0 %3139 }
 0x7a2   : > { %7031 = vpow2.f32 %v3188_v30  ;;  %6683 = vmatprep.subr.msk.mxu1 %vm821_vm2, %v3698_v59  ;;  %v3165_v21 = vsub.f32 %v9499_v4, %v3140_v9 }
 0x7a3   : > { %v9829_v36 = vpop.eup %7021  ;;  %7033 = vpow2.f32 %v3190_v18  ;;  %6684 = vmatpush3.xpose.msk.msra.mxu1 %vm821_vm2, %v3698_v59 }
 0x7a4   : > { %v9833_v35 = vpop.eup %7023  ;;  %7035 = vpow2.f32 %v2061_v27  ;;  %6652 = vmatprep.mubr.f32.mxu1 %v9829_v36  ;;  %v3194_v37 = vmul.f32 1.442695, %v3165_v21  ;;  %v11383_v27 = vld [vmem:[#allocation81_spill] sm:$0xff] }
 0x7a5   : > { %7037 = vpow2.f32 %v2063_v34  ;;  %6653 = vmatmul.mubr.f32.gmra.mxu1 %v9833_v35  ;;  %v3135_v28 = vpop.permute.xlu0 %3134  ;;  %v11384_v30 = vsub.f32 %v11382_v57, %v11383_v27  ;;  %v11386_v34 = vld [vmem:[#allocation83_spill] sm:$0xff]  ;;  %v11401_v57 = vld [vmem:[#allocation92_spill] sm:$0xff] }
 0x7a6   : > { %v3164_v4 = vsub.f32 %v9503_v17, %v3135_v28  ;;  %7039 = vpow2.f32 %v2065_v8  ;;  %v11389_v8 = vld [vmem:[#allocation87_spill] sm:$0xff] }
 0x7a7   : > { %v9844_v51 = vpop.eup %7025  ;;  %7041 = vpow2.f32 %v2067_v48  ;;  %v2077_v62 = vmul.f32 1.442695, %v11384_v30  ;;  %v11390_v3 = vsub.f32 %v11388_v7, %v11389_v8 }
 0x7a8   : > { %v9846_v5 = vpop.eup %7027  ;;  %v3192_v12 = vmul.f32 1.442695, %v3164_v4  ;;  %6655 = vmatprep.mubr.f32.mxu1 %v9844_v51  ;;  %v11391_v4 = vld [vmem:[#allocation82_spill] sm:$0xff] }
 0x7a9   : > { %v3145_v44 = vpop.permute.xlu1 %3144  ;;  %6656 = vmatmul.mubr.f32.gmra.mxu1 %v9846_v5  ;;  %v3696_v17 = vpop.permute.xlu0 %3695  ;;  %v2083_v1 = vmul.f32 1.442695, %v11390_v3 }
 0x7aa   : > { %7043 = vpow2.f32 %v3192_v12  ;;  %v3166_v58 = vsub.f32 %v9518_v61, %v3145_v44  ;;  %6685 = vmatprep.subr.msk.mxu1 %vm821_vm2, %v3696_v17  ;;  %v9866_v49 = vpop.eup %7029 }
 0x7ab   : > { %7045 = vpow2.f32 %v3194_v37  ;;  %1493 = vperm.xlu1 %6912, %v9401_v43   ;;  %6686 = vmatpush3.xpose.msk.msra.mxu1 %vm821_vm2, %v3696_v17  ;;  %v11392_v37 = vld [vmem:[#allocation85_spill] sm:$0xff] }
 0x7ac   : > { %7047 = vpow2.f32 %v2069_v32  ;;  %v3196_v11 = vmul.f32 1.442695, %v3166_v58  ;;  %v11393_v46 = vsub.f32 %v11391_v4, %v11392_v37 }
 0x7ad   : > { %7049 = vpow2.f32 %v2071_v60  ;;  %v3150_v18 = vpop.permute.xlu1 %3149  ;;  %v3694_v61 = vpop.permute.xlu0 %3693  ;;  %v11396_v60 = vsub.f32 %v11394_v53, %v11395_v38  ;;  %v7217_v38 = vld [vmem:[%s7758_s6 + $0x78] sm:$0xff] }
 0x7ae   : > { %7051 = vpow2.f32 %v3196_v11  ;;  %v3167_v43 = vsub.f32 %v9506_v63, %v3150_v18  ;;  %6687 = vmatprep.subr.msk.mxu1 %vm821_vm2, %v3694_v61  ;;  %v2081_v40 = vmul.f32 1.442695, %v11393_v46 }
 0x7af   : > { %v9870_v19 = vpop.eup %7031  ;;  %1488 = vperm.xlu0 %6911, %v9397_v41   ;;  %2335 = vperm.xlu1 %6912, %v9866_v49   ;;  %7053 = vpow2.f32 %v2073_v56  ;;  %v11387_v41 = vsub.f32 %v11385_v33, %v11386_v34  ;;  %v2087_v44 = vmul.f32 1.442695, %v11396_v60  ;;  %v11399_v56 = vsub.f32 %v11397_v29, %v11398_v16  ;;  %v7219_v29 = vld [vmem:[%s7758_s6 + $0x58] sm:$0xff] }
 0x7b0   : > { %v9874_v26 = vpop.eup %7033  ;;  %v3198_v31 = vmul.f32 1.442695, %v3167_v43  ;;  %6688 = vmatpush3.xpose.msk.msra.mxu1 %vm821_vm2, %v3694_v61  ;;  %6658 = vmatprep.mubr.f32.mxu1 %v9870_v19  ;;  %7055 = vpow2.f32 %v2075_v55  ;;  %v11400_v43 = vld [vmem:[#allocation90_spill] sm:$0xff] }
 0x7b1   : > { %v9881_v63 = vpop.eup %7035  ;;  %v2079_v59 = vmul.f32 1.442695, %v11387_v41  ;;  %v3692_v9 = vpop.permute.xlu1 %3691  ;;  %6659 = vmatmul.mubr.f32.gmra.mxu1 %v9874_v26  ;;  %v2085_v11 = vmul.f32 1.442695, %v11399_v56  ;;  %v11402_v27 = vsub.f32 %v11400_v43, %v11401_v57  ;;  %v7220_v56 = vld [vmem:[%s7758_s6 + $0x70] sm:$0xff] }
 0x7b2   : > { %v3690_v21 = vpop.permute.xlu0 %3689  ;;  %v9887_v13 = vpop.eup %7037  ;;  %7057 = vpow2.f32 %v3198_v31  ;;  %6689 = vmatprep.subr.msk.mxu1 %vm821_vm2, %v3692_v9 }
 0x7b3   : > { %2340 = vperm.xlu0 %6911, %v9881_v63   ;;  %2345 = vperm.xlu1 %6912, %v9887_v13   ;;  %7059 = vpow2.f32 %v2077_v62  ;;  %v9893_v54 = vpop.eup %7039  ;;  %v2089_v30 = vmul.f32 1.442695, %v11402_v27  ;;  %v2220_v27 = vld [vmem:[#allocation3 + $0x80] sm:$0xff] }
 0x7b4   : > { %6690 = vmatpush3.xpose.msk.msra.mxu1 %vm821_vm2, %v3692_v9  ;;  %7061 = vpow2.f32 %v2079_v59  ;;  %v9899_v28 = vpop.eup %7041  ;;  %v11403_v59 = vld [vmem:[#allocation47_spill] sm:$0xff]  ;;  %v11404_v9 = vld [vmem:[#allocation46_spill] sm:$0xff] }
 0x7b5   : > { %6691 = vmatprep.subr.msk.mxu1 %vm821_vm2, %v3690_v21  ;;  %v3688_v42 = vpop.permute.xlu1 %3687  ;;  %7063 = vpow2.f32 %v2083_v1 }
 0x7b6   : > { %v3686_v48 = vpop.permute.xlu0 %3685  ;;  %7065 = vpow2.f32 %v2081_v40 }
 0x7b7   : > { %v9904_v50 = vpop.eup %7043  ;;  %2355 = vperm.xlu0 %6911, %v9899_v28   ;;  %2350 = vperm.xlu1 %6912, %v9893_v54   ;;  %7067 = vpow2.f32 %v2087_v44 }
 0x7b8   : > { %v9908_v32 = vpop.eup %7045  ;;  %6692 = vmatpush3.xpose.msk.msra.mxu1 %vm821_vm2, %v3690_v21  ;;  %6661 = vmatprep.mubr.f32.mxu1 %v9904_v50  ;;  %7069 = vpow2.f32 %v2085_v11  ;;  %v11405_v21 = vsub.f32 %v11403_v59, %v11404_v9 }
 0x7b9   : > { %v9912_v12 = vpop.eup %7047  ;;  %6662 = vmatmul.mubr.f32.gmra.mxu1 %v9908_v32  ;;  %6693 = vmatprep.subr.msk.mxu1 %vm821_vm2, %v3688_v42  ;;  %v3684_v17 = vpop.permute.xlu1 %3683  ;;  %7071 = vpow2.f32 %v2089_v30  ;;  %v2236_v30 = vmul.f32 %v9866_v49, %v2220_v27  ;;  %v2225_v49 = vld [vmem:[#allocation3 + $0xa8] sm:$0xff] }
 0x7ba   : > { %v3652_v58 = vpop.permute.xlu0 %3651  ;;  %v9919_v52 = vpop.eup %7049  ;;  %v3040_v7 = vmul.f32 1.442695, %v11405_v21 }
 0x7bb   : > { %v9924_v14 = vpop.eup %7051  ;;  %2365 = vperm.xlu0 %6911, %v9919_v52   ;;  %2360 = vperm.xlu1 %6912, %v9912_v12  }
 0x7bc   : > { %6694 = vmatpush3.xpose.msk.msra.mxu1 %vm821_vm2, %v3688_v42  ;;  %6664 = vmatprep.mubr.f32.mxu1 %v9924_v14  ;;  %v9930_v15 = vpop.eup %7053  ;;  %7073 = vpow2.f32 %v3040_v7  ;;  %v2221_v7 = vld [vmem:[#allocation3 + $0x88] sm:$0xff] }
 0x7bd   : > { %6695 = vmatprep.subr.msk.mxu1 %vm821_vm2, %v3686_v48  ;;  %v3654_v55 = vpop.permute.xlu1 %3653  ;;  %v9933_v61 = vpop.eup %7055 }
 0x7be   : > { %v3656_v18 = vpop.permute.xlu0 %3655 }
 0x7bf   : > { %v9938_v62 = vpop.eup %7057  ;;  %2375 = vperm.xlu0 %6911, %v9933_v61   ;;  %2370 = vperm.xlu1 %6912, %v9930_v15  }
 0x7c0   : > { %6696 = vmatpush3.xpose.msk.msra.mxu1 %vm821_vm2, %v3686_v48  ;;  %v9943_v31 = vpop.eup %7059 }
 0x7c1   : > { %6665 = vmatmul.mubr.f32.gmra.mxu1 %v9938_v62  ;;  %6697 = vmatprep.subr.msk.mxu1 %vm821_vm2, %v3684_v17  ;;  %v3658_v33 = vpop.permute.xlu1 %3657  ;;  %v9947_v41 = vpop.eup %7061 }
 0x7c2   : > { %v3660_v34 = vpop.permute.xlu0 %3659  ;;  %6699 = vmatprep.mubr.msk.f32.mxu1 %vm821_vm2, %v3652_v58  ;;  %v9956_v1 = vpop.eup %7063 }
 0x7c3   : > { %2385 = vperm.xlu0 %6911, %v9947_v41   ;;  %2380 = vperm.xlu1 %6912, %v9943_v31   ;;  %v9958_v42 = vpop.eup %7065 }
 0x7c4   : > { %6698 = vmatpush3.xpose.msk.msra.mxu1 %vm821_vm2, %v3684_v17  ;;  %v9964_v4 = vpop.eup %7067  ;;  %v7218_v17 = vld [vmem:[%s7758_s6 + $0x60] sm:$0xff] }
 0x7c5   : > { %v3662_v8 = vpop.permute.xlu1 %3661  ;;  %v9966_v37 = vpop.eup %7069 }
 0x7c6   : > { %v3664_v3 = vpop.permute.xlu0 %3663  ;;  %v9972_v53 = vpop.eup %7071 }
 0x7c7   : > { %6700 = vmatmul.mubr.msk.f32.vlgmr.msra.gmra.mxu1 %vm821_vm2, %v3654_v55  ;;  %2395 = vperm.xlu0 %6911, %v9956_v1   ;;  %v7221_v55 = vld [vmem:[%s7758_s6 + $0x50] sm:$0xff] }
 0x7c8   : > { %2390 = vperm.xlu1 %6912, %v9958_v42   ;;  %6702 = vmatprep.mubr.msk.f32.mxu1 %vm821_vm2, %v3656_v18  ;;  %v7222_v18 = vld [vmem:[%s7758_s6 + $0x68] sm:$0xff] }
 0x7c9   : > { %v3666_v48 = vpop.permute.xlu1 %3665  ;;  %v9979_v44 = vpop.eup %7073 }
 0x7ca   : > { %v3668_v46 = vpop.permute.xlu0 %3667 }
 0x7cb   : > { %6703 = vmatmul.mubr.msk.f32.gmra.mxu1 %vm821_vm2, %v3658_v33  ;;  %2405 = vperm.xlu0 %6911, %v9964_v4  }
 0x7cc   : > { %2400 = vperm.xlu1 %6912, %v9966_v37   ;;  %6705 = vmatprep.mubr.msk.f32.mxu1 %vm821_vm2, %v3660_v34  ;;  %v2222_v34 = vld [vmem:[#allocation3 + $0x90] sm:$0xff] }
 0x7cd   : > { %v3670_v40 = vpop.permute.xlu1 %3669  ;;  %v2238_v9 = vmul.f32 %v9887_v13, %v2222_v34 }
 0x7ce   : > { %v3672_v60 = vpop.permute.xlu0 %3671 }
 0x7cf   : > { %6706 = vmatmul.mubr.msk.f32.gmra.mxu1 %vm821_vm2, %v3662_v8  ;;  %4405 = vrot.lane.b32.xlu0 %v7217_v38, %s7488_s14 }
 0x7d0   : > { %2410 = vperm.xlu1 %6912, %v9972_v53   ;;  %6708 = vmatprep.mubr.msk.f32.mxu1 %vm821_vm2, %v3664_v3  ;;  %v2224_v3 = vld [vmem:[#allocation3 + $0xa0] sm:$0xff] }
 0x7d1   : > { %v3674_v58 = vpop.permute.xlu1 %3673 }
 0x7d2   : > { %v3676_v16 = vpop.permute.xlu0 %3675 }
 0x7d3   : > { %6709 = vmatmul.mubr.msk.f32.gmra.mxu1 %vm821_vm2, %v3666_v48  ;;  %4399 = vrot.lane.b32.xlu0 %v7218_v17, %s7488_s14  ;;  %v2227_v48 = vld [vmem:[#allocation3 + $0xb8] sm:$0xff] }
 0x7d4   : > { %3316 = vperm.xlu1 %6912, %v9979_v44   ;;  %6711 = vmatprep.mubr.msk.f32.mxu1 %vm821_vm2, %v3668_v46 }
 0x7d5   : > { %v3678_v11 = vpop.permute.xlu1 %3677 }
 0x7d6   : > { %v3680_v43 = vpop.permute.xlu0 %3679 }
 0x7d7   : > { %6712 = vmatmul.mubr.msk.f32.gmra.mxu1 %vm821_vm2, %v3670_v40  ;;  %4397 = vrot.lane.b32.xlu0 %v7219_v29, %s7488_s14  ;;  %v2226_v40 = vld [vmem:[#allocation3 + $0xb0] sm:$0xff] }
 0x7d8   : > { %4403 = vrot.lane.b32.xlu1 %v7220_v56, %s7488_s14  ;;  %6714 = vmatprep.mubr.msk.f32.mxu1 %vm821_vm2, %v3672_v60  ;;  %v2229_v60 = vld [vmem:[#allocation3 + $0xc8] sm:$0xff] }
 0x7d9   : > { %v3682_v57 = vpop.permute.xlu1 %3681 }
 0x7db   : > { %6715 = vmatmul.mubr.msk.f32.gmra.mxu1 %vm821_vm2, %v3674_v58  ;;  %4395 = vrot.lane.b32.xlu0 %v7221_v55, %s7488_s14  ;;  %v2228_v58 = vld [vmem:[#allocation3 + $0xc0] sm:$0xff] }
 0x7dc   : > { %4401 = vrot.lane.b32.xlu1 %v7222_v18, %s7488_s14  ;;  %6717 = vmatprep.mubr.msk.f32.mxu1 %vm821_vm2, %v3676_v16  ;;  %v2231_v16 = vld [vmem:[#allocation3 + $0xd8] sm:$0xff]  ;;  %v2233_v18 = vld [vmem:[#allocation3 + $0xe8] sm:$0xff] }
 0x7df   : > { %6718 = vmatmul.mubr.msk.f32.gmra.mxu1 %vm821_vm2, %v3678_v11  ;;  %v2230_v11 = vld [vmem:[#allocation3 + $0xd0] sm:$0xff] }
 0x7e0   : > { %6720 = vmatprep.mubr.msk.f32.mxu1 %vm821_vm2, %v3680_v43 }
 0x7e3   : > { %6721 = vmatmul.mubr.msk.f32.gmra.mxu1 %vm821_vm2, %v3682_v57  ;;  %v2232_v57 = vld [vmem:[#allocation3 + $0xe0] sm:$0xff] }
 0x7fa   : > { %3233 = vadd.xlane.f32.xlu0 %v9757_v22 }
 0x7fe   : > { %3239 = vadd.xlane.f32.xlu0 %v9802_v6  ;;  %v2223_v6 = vld [vmem:[#allocation3 + $0x98] sm:$0xff] }
 0x800   : > { %3235 = vadd.xlane.f32.xlu1 %v9759_v23  ;;  %v2239_v23 = vmul.f32 %v9893_v54, %v2223_v6 }
 0x802   : > { %3237 = vadd.xlane.f32.xlu0 %v9799_v24  ;;  %v2253_v33 = vpop.xlane.xlu0 %2252 }
 0x803   : > { %v2284_v59 = vadd.f32 %v2253_v33, %v2236_v30  ;;  %v2235_v33 = vld [vmem:[#allocation3 + $0xf8] sm:$0xff] }
 0x804   : > { %3241 = vadd.xlane.f32.xlu1 %v9811_v2  ;;  %v2237_v2 = vmul.f32 %v9881_v63, %v2221_v7 }
 0x805   : > { %2300 = vst.msk [vmem:[#allocation3 + $0x80] sm:$0xff] %vm1383_vm3, %v2284_v59  ;;  %v2234_v59 = vld [vmem:[#allocation3 + $0xf0] sm:$0xff] }
 0x806   : > { %3243 = vadd.xlane.f32.xlu0 %v9814_v10  ;;  %v2257_v22 = vpop.xlane.xlu0 %2256  ;;  %v2250_v6 = vmul.f32 %v9964_v4, %v2234_v59 }
 0x807   : > { %v2286_v21 = vadd.f32 %v2257_v22, %v2238_v9 }
 0x808   : > { %3245 = vadd.xlane.f32.xlu1 %v9829_v36  ;;  %v2241_v36 = vmul.f32 %v9912_v12, %v2225_v49  ;;  %v2317_v49 = vld [vmem:[#allocation4 + $0x80] sm:$0xff] }
 0x809   : > { %2302 = vst.msk [vmem:[#allocation3 + $0x90] sm:$0xff] %vm1383_vm3, %v2286_v21 }
 0x80a   : > { %3247 = vadd.xlane.f32.xlu0 %v9833_v35  ;;  %v2259_v24 = vpop.xlane.xlu0 %2258  ;;  %v2240_v35 = vmul.f32 %v9899_v28, %v2224_v3 }
 0x80b   : > { %v2287_v8 = vadd.f32 %v2259_v24, %v2239_v23  ;;  %v2255_v13 = vpop.xlane.xlu1 %2254 }
 0x80c   : > { %v2285_v10 = vadd.f32 %v2255_v13, %v2237_v2  ;;  %3249 = vadd.xlane.f32.xlu1 %v9844_v51  ;;  %v2243_v51 = vmul.f32 %v9930_v15, %v2227_v48  ;;  %v1414_v2 = vld [vmem:[#allocation4 + $0x70] sm:$0xff] }
 0x80d   : > { %2303 = vst.msk [vmem:[#allocation3 + $0x98] sm:$0xff] %vm1383_vm3, %v2287_v8  ;;  %v11406_v8 = vld [vmem:[#allocation67_spill] sm:$0xff]  ;;  %v2319_v48 = vld [vmem:[#allocation4 + $0x90] sm:$0xff] }
 0x80e   : > { %2301 = vst.msk [vmem:[#allocation3 + $0x88] sm:$0xff] %vm1383_vm3, %v2285_v10  ;;  %3251 = vadd.xlane.f32.xlu0 %v9846_v5  ;;  %v2263_v54 = vpop.xlane.xlu0 %2262  ;;  %v2242_v5 = vmul.f32 %v9919_v52, %v2226_v40 }
 0x80f   : > { %v2289_v63 = vadd.f32 %v2263_v54, %v2241_v36  ;;  %v2261_v46 = vpop.xlane.xlu1 %2260  ;;  %v2318_v36 = vld [vmem:[#allocation4 + $0x88] sm:$0xff]  ;;  %v11407_v54 = vld [vmem:[#allocation68_spill] sm:$0xff] }
 0x810   : > { %v2288_v38 = vadd.f32 %v2261_v46, %v2240_v35  ;;  %3253 = vadd.xlane.f32.xlu1 %v9870_v19  ;;  %v2245_v19 = vmul.f32 %v9943_v31, %v2229_v60  ;;  %v11409_v60 = vld [vmem:[#allocation31_spill] sm:$0xff] }
 0x811   : > { %2305 = vst.msk [vmem:[#allocation3 + $0xa8] sm:$0xff] %vm1383_vm3, %v2289_v63  ;;  %v11408_v63 = vld [vmem:[#allocation35_spill] sm:$0xff] }
 0x812   : > { %2304 = vst.msk [vmem:[#allocation3 + $0xa0] sm:$0xff] %vm1383_vm3, %v2288_v38  ;;  %3255 = vadd.xlane.f32.xlu0 %v9874_v26  ;;  %v2267_v12 = vpop.xlane.xlu0 %2266  ;;  %v2244_v26 = vmul.f32 %v9933_v61, %v2228_v58  ;;  %v11410_v58 = vld [vmem:[#allocation30_spill] sm:$0xff] }
 0x813   : > { %v2291_v28 = vadd.f32 %v2267_v12, %v2243_v51  ;;  %v2265_v17 = vpop.xlane.xlu1 %2264 }
 0x814   : > { %v2290_v29 = vadd.f32 %v2265_v17, %v2242_v5  ;;  %3257 = vadd.xlane.f32.xlu1 %v9904_v50  ;;  %v2247_v50 = vmul.f32 %v9958_v42, %v2231_v16  ;;  %v2248_v42 = vmul.f32 %v9956_v1, %v2232_v57  ;;  %v1415_v1 = vld [vmem:[#allocation4 + $0x78] sm:$0xff]  ;;  %v2321_v5 = vld [vmem:[#allocation4 + $0xa0] sm:$0xff] }
 0x815   : > { %2307 = vst.msk [vmem:[#allocation3 + $0xb8] sm:$0xff] %vm1383_vm3, %v2291_v28  ;;  %v2320_v17 = vld [vmem:[#allocation4 + $0x98] sm:$0xff]  ;;  %v2325_v57 = vld [vmem:[#allocation4 + $0xc0] sm:$0xff] }
 0x816   : > { %2306 = vst.msk [vmem:[#allocation3 + $0xb0] sm:$0xff] %vm1383_vm3, %v2290_v29  ;;  %3259 = vadd.xlane.f32.xlu0 %v9908_v32  ;;  %v2271_v15 = vpop.xlane.xlu0 %2270  ;;  %v2246_v32 = vmul.f32 %v9947_v41, %v2230_v11  ;;  %v2251_v41 = vmul.f32 %v9972_v53, %v2235_v33 }
 0x817   : > { %v2293_v52 = vadd.f32 %v2271_v15, %v2245_v19  ;;  %v2269_v56 = vpop.xlane.xlu1 %2268 }
 0x818   : > { %v2292_v55 = vadd.f32 %v2269_v56, %v2244_v26  ;;  %3261 = vadd.xlane.f32.xlu1 %v9924_v14  ;;  %v2249_v14 = vmul.f32 %v9966_v37, %v2233_v18  ;;  %v11411_v56 = vld [vmem:[#allocation28_spill] sm:$0xff] }
 0x819   : > { %2309 = vst.msk [vmem:[#allocation3 + $0xc8] sm:$0xff] %vm1383_vm3, %v2293_v52  ;;  %v2323_v52 = vld [vmem:[#allocation4 + $0xb0] sm:$0xff] }
 0x81a   : > { %2308 = vst.msk [vmem:[#allocation3 + $0xc0] sm:$0xff] %vm1383_vm3, %v2292_v55  ;;  %3263 = vadd.xlane.f32.xlu0 %v9938_v62  ;;  %v2275_v31 = vpop.xlane.xlu0 %2274  ;;  %v2322_v55 = vld [vmem:[#allocation4 + $0xa8] sm:$0xff] }
 0x81b   : > { %v2295_v61 = vadd.f32 %v2275_v31, %v2247_v50  ;;  %v2273_v43 = vpop.xlane.xlu1 %2272  ;;  %v11412_v50 = vld [vmem:[#allocation26_spill] sm:$0xff] }
 0x81c   : > { %v2294_v27 = vadd.f32 %v2273_v43, %v2246_v32 }
 0x81d   : > { %2311 = vst.msk [vmem:[#allocation3 + $0xd8] sm:$0xff] %vm1383_vm3, %v2295_v61 }
 0x81e   : > { %2310 = vst.msk [vmem:[#allocation3 + $0xd0] sm:$0xff] %vm1383_vm3, %v2294_v27  ;;  %v2279_v30 = vpop.xlane.xlu0 %2278  ;;  %v11413_v27 = vld [vmem:[#allocation37_spill] sm:$0xff] }
 0x81f   : > { %v2297_v34 = vadd.f32 %v2279_v30, %v2249_v14  ;;  %v2277_v62 = vpop.xlane.xlu1 %2276  ;;  %v2324_v30 = vld [vmem:[#allocation4 + $0xb8] sm:$0xff] }
 0x820   : > { %v2296_v9 = vadd.f32 %v2277_v62, %v2248_v42  ;;  %v11414_v42 = vld [vmem:[#allocation33_spill] sm:$0xff] }
 0x821   : > { %2313 = vst.msk [vmem:[#allocation3 + $0xe8] sm:$0xff] %vm1383_vm3, %v2297_v34 }
 0x822   : > { %2312 = vst.msk [vmem:[#allocation3 + $0xe0] sm:$0xff] %vm1383_vm3, %v2296_v9  ;;  %v2283_v22 = vpop.xlane.xlu0 %2282 }
 0x823   : > { %v2299_v37 = vadd.f32 %v2283_v22, %v2251_v41  ;;  %v2281_v21 = vpop.xlane.xlu1 %2280  ;;  %v2327_v41 = vld [vmem:[#allocation4 + $0xd0] sm:$0xff] }
 0x824   : > { %v2298_v7 = vadd.f32 %v2281_v21, %v2250_v6  ;;  %v11415_v22 = vld [vmem:[#allocation40_spill] sm:$0xff] }
 0x825   : > { %2315 = vst.msk [vmem:[#allocation3 + $0xf8] sm:$0xff] %vm1383_vm3, %v2299_v37  ;;  %v2326_v37 = vld [vmem:[#allocation4 + $0xc8] sm:$0xff]  ;;  %v11416_v21 = vld [vmem:[#allocation36_spill] sm:$0xff] }
 0x826   : > { %2314 = vst.msk [vmem:[#allocation3 + $0xf0] sm:$0xff] %vm1383_vm3, %v2298_v7 }
 0x827   : > { %v1494_v23 = vpop.permute.xlu1 %1493 }
 0x828   : > { %v1511_v24 = vmul.f32 %v1494_v23, %v1415_v1 }
 0x82a   : > { %v1672_v13 = vadd.f32 %v11406_v8, %v1511_v24  ;;  %v1489_v53 = vpop.permute.xlu0 %1488  ;;  %v11417_v8 = vld [vmem:[#allocation42_spill] sm:$0xff] }
 0x82b   : > { %v1510_v3 = vmul.f32 %v1489_v53, %v1414_v2  ;;  %v2336_v10 = vpop.permute.xlu1 %2335  ;;  %v2328_v53 = vld [vmem:[#allocation4 + $0xd8] sm:$0xff] }
 0x82c   : > { %1688 = vst.msk [vmem:[#allocation4 + $0x78] sm:$0xff] %vm821_vm2, %v1672_v13  ;;  %v2413_v4 = vmul.f32 %v2336_v10, %v2317_v49  ;;  %v2329_v49 = vld [vmem:[#allocation4 + $0xe0] sm:$0xff] }
 0x82d   : > { %v1671_v35 = vadd.f32 %v11407_v54, %v1510_v3  ;;  %v11418_v3 = vld [vmem:[#allocation38_spill] sm:$0xff] }
 0x82e   : > { %v2638_v46 = vadd.f32 %v11408_v63, %v2413_v4  ;;  %v2341_v40 = vpop.permute.xlu0 %2340  ;;  %v11419_v63 = vld [vmem:[#allocation23_spill] sm:$0xff] }
 0x82f   : > { %1687 = vst.msk [vmem:[#allocation4 + $0x70] sm:$0xff] %vm821_vm2, %v1671_v35  ;;  %v2414_v38 = vmul.f32 %v2341_v40, %v2318_v36  ;;  %v2346_v51 = vpop.permute.xlu1 %2345  ;;  %v2330_v40 = vld [vmem:[#allocation4 + $0xe8] sm:$0xff] }
 0x830   : > { %2654 = vst.msk [vmem:[#allocation4 + $0x80] sm:$0xff] %vm821_vm2, %v2638_v46  ;;  %v2415_v12 = vmul.f32 %v2346_v51, %v2319_v48  ;;  %v2331_v48 = vld [vmem:[#allocation4 + $0xf0] sm:$0xff] }
 0x831   : > { %v2639_v28 = vadd.f32 %v11409_v60, %v2414_v38  ;;  %v11420_v38 = vld [vmem:[#allocation39_spill] sm:$0xff] }
 0x832   : > { %v2640_v29 = vadd.f32 %v11410_v58, %v2415_v12  ;;  %v2356_v19 = vpop.permute.xlu0 %2355 }
 0x833   : > { %2655 = vst.msk [vmem:[#allocation4 + $0x88] sm:$0xff] %vm821_vm2, %v2639_v28  ;;  %v2417_v15 = vmul.f32 %v2356_v19, %v2321_v5  ;;  %v2351_v26 = vpop.permute.xlu1 %2350  ;;  %v11422_v19 = vld [vmem:[#allocation41_spill] sm:$0xff] }
 0x834   : > { %2656 = vst.msk [vmem:[#allocation4 + $0x90] sm:$0xff] %vm821_vm2, %v2640_v29  ;;  %v2416_v16 = vmul.f32 %v2351_v26, %v2320_v17  ;;  %v11421_v17 = vld [vmem:[#allocation45_spill] sm:$0xff] }
 0x835   : > { %v2642_v11 = vadd.f32 %v11411_v56, %v2417_v15  ;;  %v2332_v29 = vld [vmem:[#allocation4 + $0xf8] sm:$0xff]  ;;  %v10083_v56 = vpop.f32.mrf.mxu1 }
 0x836   : > { %v2641_v31 = vadd.f32 %v11412_v50, %v2416_v16  ;;  %v2366_v32 = vpop.permute.xlu0 %2365  ;;  %11423 = vst [vmem:[#allocation65_spill] sm:$0xff] %v10083_v56  ;;  %v10385_v56 = vld [vmem:[#allocation2 + $0x1e8] sm:$0xff] }
 0x837   : > { %2658 = vst.msk [vmem:[#allocation4 + $0xa0] sm:$0xff] %vm821_vm2, %v2642_v11  ;;  %v2419_v18 = vmul.f32 %v2366_v32, %v2323_v52  ;;  %v2361_v61 = vpop.permute.xlu1 %2360  ;;  %v3298_v11 = vld [vmem:[#allocation4 + $0x100] sm:$0xff] }
 0x838   : > { %2657 = vst.msk [vmem:[#allocation4 + $0x98] sm:$0xff] %vm821_vm2, %v2641_v31  ;;  %v2418_v43 = vmul.f32 %v2361_v61, %v2322_v55  ;;  %v11424_v55 = vld [vmem:[#allocation43_spill] sm:$0xff] }
 0x839   : > { %v2644_v14 = vadd.f32 %v11413_v27, %v2419_v18  ;;  %v3524_v18 = vpop.f32.mrf.mxu1 }
 0x83a   : > { %v2643_v33 = vadd.f32 %v11414_v42, %v2418_v43  ;;  %v2376_v34 = vpop.permute.xlu0 %2375 }
 0x83b   : > { %2660 = vst.msk [vmem:[#allocation4 + $0xb0] sm:$0xff] %vm821_vm2, %v2644_v14  ;;  %v2421_v62 = vmul.f32 %v2376_v34, %v2325_v57  ;;  %v2371_v59 = vpop.permute.xlu1 %2370 }
 0x83c   : > { %2659 = vst.msk [vmem:[#allocation4 + $0xa8] sm:$0xff] %vm821_vm2, %v2643_v33  ;;  %v2420_v9 = vmul.f32 %v2371_v59, %v2324_v30 }
 0x83d   : > { %v2646_v6 = vadd.f32 %v11415_v22, %v2421_v62  ;;  %v11430_v22 = vld [vmem:[#allocation49_spill] sm:$0xff] }
 0x83e   : > { %v2645_v7 = vadd.f32 %v11416_v21, %v2420_v9  ;;  %v2386_v1 = vpop.permute.xlu0 %2385 }
 0x83f   : > { %2662 = vst.msk [vmem:[#allocation4 + $0xc0] sm:$0xff] %vm821_vm2, %v2646_v6  ;;  %v2423_v23 = vmul.f32 %v2386_v1, %v2327_v41  ;;  %v2381_v24 = vpop.permute.xlu1 %2380  ;;  %v11431_v6 = vld [vmem:[#allocation51_spill] sm:$0xff]  ;;  %v11434_v1 = vld [vmem:[#allocation44_spill] sm:$0xff] }
 0x840   : > { %2661 = vst.msk [vmem:[#allocation4 + $0xb8] sm:$0xff] %vm821_vm2, %v2645_v7  ;;  %v2422_v2 = vmul.f32 %v2381_v24, %v2326_v37  ;;  %v11432_v37 = vsub.f32 %v11430_v22, %v11431_v6  ;;  %v3202_v22 = vld [vmem:[#allocation3 + $0x108] sm:$0xff]  ;;  %v11464_v6 = vld [vmem:[#allocation60_spill] sm:$0xff] }
 0x841   : > { %v2648_v13 = vadd.f32 %v11417_v8, %v2423_v23  ;;  %v11435_v23 = vld [vmem:[#allocation22_spill] sm:$0xff]  ;;  %v11438_v8 = vld [vmem:[#allocation52_spill] sm:$0xff] }
 0x842   : > { %v2647_v10 = vadd.f32 %v11418_v3, %v2422_v2  ;;  %v2396_v4 = vpop.permute.xlu0 %2395  ;;  %v3046_v21 = vmul.f32 1.442695, %v11432_v37  ;;  %v11436_v24 = vsub.f32 %v11434_v1, %v11435_v23  ;;  %v11440_v3 = vld [vmem:[#allocation56_spill] sm:$0xff]  ;;  %v11465_v37 = vld [vmem:[#allocation59_spill] sm:$0xff] }
 0x843   : > { %2664 = vst.msk [vmem:[#allocation4 + $0xd0] sm:$0xff] %vm821_vm2, %v2648_v13  ;;  %v2425_v36 = vmul.f32 %v2396_v4, %v2329_v49  ;;  %v2391_v54 = vpop.permute.xlu1 %2390  ;;  %v11439_v13 = vsub.f32 %v9576_v45, %v11438_v8  ;;  %v11467_v8 = vld [vmem:[#allocation63_spill] sm:$0xff] }
 0x844   : > { %2663 = vst.msk [vmem:[#allocation4 + $0xc8] sm:$0xff] %vm821_vm2, %v2647_v10  ;;  %v2424_v35 = vmul.f32 %v2391_v54, %v2328_v53  ;;  %v3042_v2 = vmul.f32 1.442695, %v11436_v24  ;;  %7075 = vpow2.f32 %v3046_v21  ;;  %v11441_v10 = vsub.f32 %v11440_v3, %v9620_v25  ;;  %v11443_v54 = vld [vmem:[#allocation55_spill] sm:$0xff] }
 0x845   : > { %v2650_v46 = vadd.f32 %v11419_v63, %v2425_v36  ;;  %v3044_v53 = vmul.f32 1.442695, %v11439_v13  ;;  %v11466_v21 = vsub.f32 %v11464_v6, %v11465_v37  ;;  %v11468_v13 = vsub.f32 %v9683_v20, %v11467_v8 }
 0x846   : > { %v2649_v51 = vadd.f32 %v11420_v38, %v2424_v35  ;;  %v2406_v12 = vpop.permute.xlu0 %2405  ;;  %7077 = vpow2.f32 %v3042_v2  ;;  %v3048_v4 = vmul.f32 1.442695, %v11441_v10  ;;  %v11444_v35 = vld [vmem:[#allocation54_spill] sm:$0xff]  ;;  %v3203_v2 = vld [vmem:[#allocation3 + $0x110] sm:$0xff] }
 0x847   : > { %2666 = vst.msk [vmem:[#allocation4 + $0xe0] sm:$0xff] %vm821_vm2, %v2650_v46  ;;  %v2427_v5 = vmul.f32 %v2406_v12, %v2331_v48  ;;  %v2401_v60 = vpop.permute.xlu1 %2400  ;;  %7079 = vpow2.f32 %v3044_v53  ;;  %v11445_v48 = vsub.f32 %v11443_v54, %v11444_v35  ;;  %v11448_v38 = vld [vmem:[#allocation50_spill] sm:$0xff]  ;;  %v3064_v53 = vmul.f32 1.442695, %v11468_v13 }
 0x848   : > { %2665 = vst.msk [vmem:[#allocation4 + $0xd8] sm:$0xff] %vm821_vm2, %v2649_v51  ;;  %v2426_v28 = vmul.f32 %v2401_v60, %v2330_v40  ;;  %7081 = vpow2.f32 %v3048_v4  ;;  %v11447_v40 = vld [vmem:[#allocation48_spill] sm:$0xff]  ;;  %v11450_v12 = vld [vmem:[#allocation18_spill] sm:$0xff] }
 0x849   : > { %v2652_v58 = vadd.f32 %v11421_v17, %v2427_v5  ;;  %v3050_v63 = vmul.f32 1.442695, %v11445_v48  ;;  %v11449_v51 = vsub.f32 %v11447_v40, %v11448_v38  ;;  %v11451_v5 = vld [vmem:[#allocation21_spill] sm:$0xff]  ;;  %v3201_v17 = vld [vmem:[#allocation3 + $0x100] sm:$0xff]  ;;  %v11470_v40 = vld [vmem:[#allocation64_spill] sm:$0xff] }
 0x84a   : > { %v2651_v15 = vadd.f32 %v11422_v19, %v2426_v28  ;;  %v4406_v26 = vpop.permute.xlu0 %4405  ;;  %v11452_v60 = vsub.f32 %v11450_v12, %v11451_v5  ;;  %v3205_v48 = vld [vmem:[#allocation3 + $0x120] sm:$0xff] }
 0x84b   : > { %2668 = vst.msk [vmem:[#allocation4 + $0xf0] sm:$0xff] %vm821_vm2, %v2652_v58  ;;  %v2411_v16 = vpop.permute.xlu1 %2410  ;;  %6723 = vmatprep.subr.mxu0 %v4406_v26  ;;  %v3052_v45 = vmul.f32 1.442695, %v11449_v51  ;;  %7083 = vpow2.f32 %v3050_v63  ;;  %v11454_v58 = vld [vmem:[#allocation58_spill] sm:$0xff]  ;;  %v11469_v63 = vld [vmem:[#allocation61_spill] sm:$0xff] }
 0x84c   : > { %2667 = vst.msk [vmem:[#allocation4 + $0xe8] sm:$0xff] %vm821_vm2, %v2651_v15  ;;  %v2428_v52 = vmul.f32 %v2411_v16, %v2332_v29  ;;  %6724 = vmatpush3.msra.mxu0 %v4406_v26  ;;  %v3054_v25 = vmul.f32 1.442695, %v11452_v60  ;;  %v11455_v29 = vld [vmem:[#allocation57_spill] sm:$0xff]  ;;  %v11458_v16 = vld [vmem:[#allocation20_spill] sm:$0xff]  ;;  %v11471_v38 = vsub.f32 %v11469_v63, %v11470_v40 }
 0x84d   : > { %7085 = vpow2.f32 %v3052_v45  ;;  %v11456_v19 = vsub.f32 %v11454_v58, %v11455_v29 }
 0x84e   : > { %v2653_v50 = vadd.f32 %v11424_v55, %v2428_v52  ;;  %v4400_v61 = vpop.permute.xlu0 %4399  ;;  %7087 = vpow2.f32 %v3054_v25  ;;  %v11459_v52 = vld [vmem:[#allocation19_spill] sm:$0xff]  ;;  %v3066_v51 = vmul.f32 1.442695, %v11471_v38  ;;  %v3211_v38 = vld [vmem:[#allocation3 + $0x150] sm:$0xff] }
 0x84f   : > { %v3317_v31 = vpop.permute.xlu1 %3316  ;;  %v3056_v15 = vmul.f32 1.442695, %v11456_v19  ;;  %v3206_v25 = vld [vmem:[#allocation3 + $0x128] sm:$0xff] }
 0x850   : > { %2669 = vst.msk [vmem:[#allocation4 + $0xf8] sm:$0xff] %vm821_vm2, %v2653_v50  ;;  %v3394_v32 = vmul.f32 %v3317_v31, %v3298_v11  ;;  %v11460_v11 = vsub.f32 %v11458_v16, %v11459_v52  ;;  %v3217_v50 = vmul.f32 %v9979_v44, %v3201_v17  ;;  %v3062_v44 = vmul.f32 1.442695, %v11466_v21  ;;  %v11472_v17 = vld [vmem:[#allocation66_spill] sm:$0xff] }
 0x851   : > { %v10142_v31 = vpop.eup %7075  ;;  %7089 = vpow2.f32 %v3056_v15  ;;  %v11473_v58 = vsub.f32 %v11472_v17, %v9703_v0  ;;  %v3212_v17 = vld [vmem:[#allocation3 + $0x158] sm:$0xff] }
 0x852   : > { %v3603_v43 = vadd.f32 %v3524_v18, %v3394_v32  ;;  %v4398_v27 = vpop.permute.xlu0 %4397  ;;  %v3058_v55 = vmul.f32 1.442695, %v11460_v11  ;;  %v3204_v18 = vld [vmem:[#allocation3 + $0x118] sm:$0xff] }
 0x853   : > { %v4404_v57 = vpop.permute.xlu1 %4403  ;;  %v3220_v1 = vmul.f32 %v10142_v31, %v3204_v18  ;;  %v3068_v29 = vmul.f32 1.442695, %v11473_v58 }
 0x854   : > { %3619 = vst.msk [vmem:[#allocation4 + $0x100] sm:$0xff] %vm821_vm2, %v3603_v43  ;;  %6725 = vmatprep.subr.mxu0 %v4404_v57  ;;  %7091 = vpow2.f32 %v3058_v55  ;;  %v3207_v55 = vld [vmem:[#allocation3 + $0x130] sm:$0xff] }
 0x855   : > { %6726 = vmatpush3.msra.mxu0 %v4404_v57  ;;  %v10088_v30 = vpop.f32.mrf.mxu1 }
 0x856   : > { %11425 = vst [vmem:[#allocation70_spill] sm:$0xff] %v10088_v30  ;;  %v4396_v42 = vpop.permute.xlu0 %4395 }
 0x857   : > { %v4402_v14 = vpop.permute.xlu1 %4401  ;;  %v10090_v33 = vpop.f32.mrf.mxu1 }
 0x858   : > { %6727 = vmatprep.subr.mxu0 %v4402_v14 }
 0x859   : > { %6728 = vmatpush3.msra.mxu0 %v4402_v14  ;;  %v10147_v14 = vpop.eup %7077 }
 0x85a   : > { %6729 = vmatprep.subr.mxu0 %v4400_v61  ;;  %v10156_v23 = vpop.eup %7079  ;;  %v3218_v10 = vmul.f32 %v10147_v14, %v3202_v22  ;;  %v3208_v22 = vld [vmem:[#allocation3 + $0x138] sm:$0xff] }
 0x85b   : > { %6730 = vmatpush3.msra.mxu0 %v4400_v61  ;;  %v11461_v61 = vld [vmem:[#allocation62_spill] sm:$0xff]  ;;  %v10165_v4 = vpop.eup %7081  ;;  %v3219_v45 = vmul.f32 %v10156_v23, %v3203_v2 }
 0x85c   : > { %6731 = vmatprep.subr.mxu0 %v4398_v27  ;;  %v11462_v43 = vsub.f32 %v9663_v47, %v11461_v61  ;;  %v10175_v12 = vpop.eup %7083  ;;  %v3221_v15 = vmul.f32 %v10165_v4, %v3205_v48 }
 0x85d   : > { %6732 = vmatpush3.msra.mxu0 %v4398_v27  ;;  %v10092_v34 = vpop.f32.mrf.mxu1  ;;  %v10185_v16 = vpop.eup %7085  ;;  %v3222_v61 = vmul.f32 %v10175_v12, %v3206_v25 }
 0x85e   : > { %6733 = vmatprep.subr.mxu0 %v4396_v42  ;;  %11426 = vst [vmem:[#allocation72_spill] sm:$0xff] %v10092_v34  ;;  %v3060_v57 = vmul.f32 1.442695, %v11462_v43  ;;  %v10195_v43 = vpop.eup %7087  ;;  %v3223_v6 = vmul.f32 %v10185_v16, %v3207_v55  ;;  %v3213_v55 = vld [vmem:[#allocation3 + $0x160] sm:$0xff] }
 0x85f   : > { %6734 = vmatpush3.msra.mxu0 %v4396_v42  ;;  %v10094_v62 = vpop.f32.mrf.mxu1  ;;  %v10202_v37 = vpop.eup %7089  ;;  %v3224_v2 = vmul.f32 %v10195_v43, %v3208_v22 }
 0x860   : > { %7093 = vpow2.f32 %v3060_v57 }
 0x861   : > { %7095 = vpow2.f32 %v3062_v44  ;;  %v10209_v8 = vpop.eup %7091 }
 0x862   : > { %7097 = vpow2.f32 %v3064_v53 }
 0x863   : > { %7099 = vpow2.f32 %v3066_v51 }
 0x864   : > { %7101 = vpow2.f32 %v3068_v29 }
 0x865   : > { %v10096_v59 = vpop.f32.mrf.mxu1 }
 0x866   : > { %11427 = vst [vmem:[#allocation69_spill] sm:$0xff] %v10096_v59  ;;  %v10368_v59 = vld [vmem:[#allocation2 + $0x1d8] sm:$0xff] }
 0x867   : > { %v10098_v9 = vpop.f32.mrf.mxu1 }
 0x868   : > { %11428 = vst [vmem:[#allocation71_spill] sm:$0xff] %v10098_v9 }
 0x869   : > { %v10100_v41 = vpop.f32.mrf.mxu1 }
 0x86a   : > { %11429 = vst [vmem:[#allocation24_spill] sm:$0xff] %v10100_v41 }
 0x86b   : > { %v10105_v7 = vpop.f32.mrf.mxu1 }
 0x86c   : > { %11433 = vst [vmem:[#allocation27_spill] sm:$0xff] %v10105_v7 }
 0x86d   : > { %v10216_v48 = vpop.eup %7093 }
 0x86e   : > { %v3227_v29 = vmul.f32 %v10216_v48, %v3211_v38 }
 0x871   : > { %v10110_v49 = vpop.f32.mrf.mxu1 }
 0x872   : > { %11437 = vst [vmem:[#allocation25_spill] sm:$0xff] %v10110_v49 }
 0x873   : > { %v10118_v36 = vpop.f32.mrf.mxu1 }
 0x874   : > { %11442 = vst [vmem:[#allocation32_spill] sm:$0xff] %v10118_v36 }
 0x879   : > { %v10123_v46 = vpop.f32.mrf.mxu1 }
 0x87a   : > { %11446 = vst [vmem:[#allocation29_spill] sm:$0xff] %v10123_v46 }
 0x87b   : > { %v10131_v28 = vpop.f32.mrf.mxu1 }
 0x87c   : > { %11453 = vst [vmem:[#allocation73_spill] sm:$0xff] %v10131_v28 }
 0x881   : > { %v10136_v26 = vpop.f32.mrf.mxu1 }
 0x882   : > { %11457 = vst [vmem:[#allocation34_spill] sm:$0xff] %v10136_v26  ;;  %v10351_v26 = vld [vmem:[#allocation2 + $0x1c8] sm:$0xff] }
 0x883   : > { %v3234_v32 = vpop.xlane.xlu0 %3233  ;;  %v10149_v42 = vpop.f32.mrf.mxu1 }
 0x884   : > { %v3265_v27 = vadd.f32 %v3234_v32, %v3217_v50  ;;  %11463 = vst [vmem:[#allocation75_spill] sm:$0xff] %v10149_v42  ;;  %v11474_v50 = vld [vmem:[#allocation53_spill] sm:$0xff] }
 0x885   : > { %v11475_v32 = vsub.f32 %v11474_v50, %v9603_v39 }
 0x886   : > { %3281 = vst.msk [vmem:[#allocation3 + $0x100] sm:$0xff] %vm1383_vm3, %v3265_v27 }
 0x887   : > { %v10158_v24 = vpop.f32.mrf.mxu1  ;;  %v3240_v47 = vpop.xlane.xlu0 %3239  ;;  %v3070_v18 = vmul.f32 1.442695, %v11475_v32 }
 0x888   : > { %3943 = vmax.xlane.f32.xlu1 %v10158_v24  ;;  %v3268_v3 = vadd.f32 %v3240_v47, %v3220_v1  ;;  %v3209_v1 = vld [vmem:[#allocation3 + $0x140] sm:$0xff] }
 0x889   : > { %v3236_v54 = vpop.xlane.xlu1 %3235  ;;  %v10167_v35 = vpop.f32.mrf.mxu1  ;;  %7103 = vpow2.f32 %v3070_v18 }
 0x88a   : > { %3284 = vst.msk [vmem:[#allocation3 + $0x118] sm:$0xff] %vm1383_vm3, %v3268_v3  ;;  %v3266_v20 = vadd.f32 %v3236_v54, %v3218_v10  ;;  %3941 = vmax.xlane.f32.xlu0 %v10167_v35  ;;  %v3210_v3 = vld [vmem:[#allocation3 + $0x148] sm:$0xff]  ;;  %v3225_v54 = vmul.f32 %v10202_v37, %v3209_v1 }
 0x88b   : > { %v10177_v5 = vpop.f32.mrf.mxu1  ;;  %v3238_v60 = vpop.xlane.xlu0 %3237 }
 0x88c   : > { %3282 = vst.msk [vmem:[#allocation3 + $0x108] sm:$0xff] %vm1383_vm3, %v3266_v20  ;;  %3947 = vmax.xlane.f32.xlu1 %v10177_v5  ;;  %v3267_v19 = vadd.f32 %v3238_v60, %v3219_v45  ;;  %v3226_v20 = vmul.f32 %v10209_v8, %v3210_v3  ;;  %v10223_v45 = vpop.eup %7095 }
 0x88d   : > { %v3242_v52 = vpop.xlane.xlu1 %3241  ;;  %v10187_v11 = vpop.f32.mrf.mxu1  ;;  %v3228_v32 = vmul.f32 %v10223_v45, %v3212_v17 }
 0x88e   : > { %3283 = vst.msk [vmem:[#allocation3 + $0x110] sm:$0xff] %vm1383_vm3, %v3267_v19  ;;  %v3269_v0 = vadd.f32 %v3242_v52, %v3221_v15  ;;  %3945 = vmax.xlane.f32.xlu0 %v10187_v11  ;;  %v10230_v19 = vpop.eup %7097 }
 0x88f   : > { %v10197_v57 = vpop.f32.mrf.mxu1  ;;  %v3244_v27 = vpop.xlane.xlu0 %3243 }
 0x890   : > { %3285 = vst.msk [vmem:[#allocation3 + $0x120] sm:$0xff] %vm1383_vm3, %v3269_v0  ;;  %3951 = vmax.xlane.f32.xlu1 %v10197_v57  ;;  %v3270_v39 = vadd.f32 %v3244_v27, %v3222_v61  ;;  %v10237_v18 = vpop.eup %7099  ;;  %v3214_v27 = vld [vmem:[#allocation3 + $0x168] sm:$0xff] }
 0x891   : > { %v3246_v21 = vpop.xlane.xlu1 %3245  ;;  %v10204_v44 = vpop.f32.mrf.mxu1 }
 0x892   : > { %3286 = vst.msk [vmem:[#allocation3 + $0x128] sm:$0xff] %vm1383_vm3, %v3270_v39  ;;  %v3271_v47 = vadd.f32 %v3246_v21, %v3223_v6  ;;  %3949 = vmax.xlane.f32.xlu0 %v10204_v44  ;;  %v3229_v39 = vmul.f32 %v10230_v19, %v3213_v55  ;;  %v10244_v6 = vpop.eup %7101 }
 0x893   : > { %v10211_v13 = vpop.f32.mrf.mxu1  ;;  %v3248_v53 = vpop.xlane.xlu0 %3247 }
 0x894   : > { %3287 = vst.msk [vmem:[#allocation3 + $0x130] sm:$0xff] %vm1383_vm3, %v3271_v47  ;;  %3955 = vmax.xlane.f32.xlu1 %v10211_v13  ;;  %v3272_v10 = vadd.f32 %v3248_v53, %v3224_v2  ;;  %v3215_v47 = vld [vmem:[#allocation3 + $0x170] sm:$0xff]  ;;  %v3230_v53 = vmul.f32 %v10237_v18, %v3214_v27  ;;  %v7225_v27 = vld [vmem:[%s7758_s6 + $0x38] sm:$0xff] }
 0x895   : > { %v3250_v63 = vpop.xlane.xlu1 %3249  ;;  %v10218_v40 = vpop.f32.mrf.mxu1 }
 0x896   : > { %3288 = vst.msk [vmem:[#allocation3 + $0x138] sm:$0xff] %vm1383_vm3, %v3272_v10  ;;  %v3273_v51 = vadd.f32 %v3250_v63, %v3225_v54  ;;  %3953 = vmax.xlane.f32.xlu0 %v10218_v40  ;;  %v10251_v3 = vpop.eup %7103  ;;  %v3216_v63 = vld [vmem:[#allocation3 + $0x178] sm:$0xff] }
 0x897   : > { %v10225_v60 = vpop.f32.mrf.mxu1  ;;  %v3252_v25 = vpop.xlane.xlu0 %3251 }
 0x898   : > { %3289 = vst.msk [vmem:[#allocation3 + $0x140] sm:$0xff] %vm1383_vm3, %v3273_v51  ;;  %3959 = vmax.xlane.f32.xlu1 %v10225_v60  ;;  %v3274_v58 = vadd.f32 %v3252_v25, %v3226_v20  ;;  %v3231_v51 = vmul.f32 %v10244_v6, %v3215_v47  ;;  %v7229_v47 = vld [vmem:[%s7758_s6 + $0x18] sm:$0xff] }
 0x899   : > { %v3254_v15 = vpop.xlane.xlu1 %3253  ;;  %v10232_v52 = vpop.f32.mrf.mxu1 }
 0x89a   : > { %3290 = vst.msk [vmem:[#allocation3 + $0x148] sm:$0xff] %vm1383_vm3, %v3274_v58  ;;  %v3275_v50 = vadd.f32 %v3254_v15, %v3227_v29  ;;  %3957 = vmax.xlane.f32.xlu0 %v10232_v52  ;;  %v3232_v58 = vmul.f32 %v10251_v3, %v3216_v63  ;;  %v10291_v63 = vld [vmem:[#allocation2 + $0x188] sm:$0xff] }
 0x89b   : > { %v10239_v0 = vpop.f32.mrf.mxu1  ;;  %v3256_v61 = vpop.xlane.xlu0 %3255 }
 0x89c   : > { %3291 = vst.msk [vmem:[#allocation3 + $0x150] sm:$0xff] %vm1383_vm3, %v3275_v50  ;;  %3963 = vmax.xlane.f32.xlu1 %v10239_v0  ;;  %v3276_v22 = vadd.f32 %v3256_v61, %v3228_v32  ;;  %v7223_v32 = vld [vmem:[%s7758_s6 + $0x48] sm:$0xff]  ;;  %v7224_v61 = vld [vmem:[%s7758_s6 + $0x40] sm:$0xff] }
 0x89d   : > { %v3258_v21 = vpop.xlane.xlu1 %3257  ;;  %v10246_v1 = vpop.f32.mrf.mxu1 }
 0x89e   : > { %11476 = vst [vmem:[#allocation74_spill] sm:$0xff] %v10246_v1  ;;  %3292 = vst.msk [vmem:[#allocation3 + $0x158] sm:$0xff] %vm1383_vm3, %v3276_v22  ;;  %v3277_v2 = vadd.f32 %v3258_v21, %v3229_v39  ;;  %3961 = vmax.xlane.f32.xlu0 %v10246_v1  ;;  %v7226_v22 = vld [vmem:[%s7758_s6 + $0x30] sm:$0xff]  ;;  %v7227_v39 = vld [vmem:[%s7758_s6 + $0x28] sm:$0xff] }
 0x89f   : > { %v10253_v10 = vpop.f32.mrf.mxu1  ;;  %v3260_v54 = vpop.xlane.xlu0 %3259  ;;  %v7228_v21 = vld [vmem:[%s7758_s6 + $0x20] sm:$0xff] }
 0x8a0   : > { %11477 = vst [vmem:[#allocation76_spill] sm:$0xff] %v10253_v10  ;;  %3293 = vst.msk [vmem:[#allocation3 + $0x160] sm:$0xff] %vm1383_vm3, %v3277_v2  ;;  %3967 = vmax.xlane.f32.xlu1 %v10253_v10  ;;  %v3278_v38 = vadd.f32 %v3260_v54, %v3230_v53  ;;  %v7230_v2 = vld [vmem:[%s7758_s6 + $0x10] sm:$0xff]  ;;  %v7231_v53 = vld [vmem:[%s7758_s6 + $0x8] sm:$0xff] }
 0x8a1   : > { %v3262_v20 = vpop.xlane.xlu1 %3261  ;;  %v10258_v25 = vpop.f32.mrf.mxu1  ;;  %v7232_v54 = vld [vmem:[%s7758_s6] sm:$0xff] }
 0x8a2   : > { %11478 = vst [vmem:[#allocation78_spill] sm:$0xff] %v10258_v25  ;;  %3294 = vst.msk [vmem:[#allocation3 + $0x168] sm:$0xff] %vm1383_vm3, %v3278_v38  ;;  %v3279_v17 = vadd.f32 %v3262_v20, %v3231_v51  ;;  %3965 = vmax.xlane.f32.xlu0 %v10258_v25  ;;  %v10293_v51 = vld [vmem:[#allocation2 + $0x180] sm:$0xff]  ;;  %v10402_v25 = vld [vmem:[#allocation2 + $0x1f8] sm:$0xff] }
 0x8a3   : > { %v10263_v29 = vpop.f32.mrf.mxu1  ;;  %v3264_v15 = vpop.xlane.xlu0 %3263 }
 0x8a4   : > { %11479 = vst [vmem:[#allocation77_spill] sm:$0xff] %v10263_v29  ;;  %3295 = vst.msk [vmem:[#allocation3 + $0x170] sm:$0xff] %vm1383_vm3, %v3279_v17  ;;  %3971 = vmax.xlane.f32.xlu1 %v10263_v29  ;;  %v3280_v55 = vadd.f32 %v3264_v15, %v3232_v58  ;;  %v10298_v58 = vld [vmem:[#allocation2 + $0x198] sm:$0xff]  ;;  %v10413_v29 = vld [vmem:[#allocation2 + $0x1f0] sm:$0xff] }
 0x8a5   : > { %v10267_v50 = vpop.f32.mrf.mxu1  ;;  %11481 = vst [vmem:[#allocation81_spill] sm:$0xff] %v10413_v29 }
 0x8a6   : > { %11480 = vst [vmem:[#allocation79_spill] sm:$0xff] %v10267_v50  ;;  %3296 = vst.msk [vmem:[#allocation3 + $0x178] sm:$0xff] %vm1383_vm3, %v3280_v55  ;;  %3969 = vmax.xlane.f32.xlu0 %v10267_v50 }
 0x8bc   : > { %4393 = vrot.lane.b32.xlu0 %v7223_v32, %s7488_s14  ;;  %v10306_v32 = vld [vmem:[#allocation2 + $0x190] sm:$0xff] }
 0x8c0   : > { %4391 = vrot.lane.b32.xlu0 %v7224_v61, %s7488_s14  ;;  %v10344_v61 = vld [vmem:[#allocation2 + $0x1b0] sm:$0xff] }
 0x8c4   : > { %4389 = vrot.lane.b32.xlu0 %v7225_v27, %s7488_s14 }
 0x8c8   : > { %4387 = vrot.lane.b32.xlu0 %v7226_v22, %s7488_s14  ;;  %v10315_v22 = vld [vmem:[#allocation2 + $0x1a8] sm:$0xff] }
 0x8cc   : > { %4385 = vrot.lane.b32.xlu0 %v7227_v39, %s7488_s14 }
 0x8d0   : > { %4383 = vrot.lane.b32.xlu0 %v7228_v21, %s7488_s14 }
 0x8d4   : > { %4381 = vrot.lane.b32.xlu0 %v7229_v47, %s7488_s14 }
 0x8d8   : > { %4379 = vrot.lane.b32.xlu0 %v7230_v2, %s7488_s14 }
 0x8dc   : > { %4377 = vrot.lane.b32.xlu0 %v7231_v53, %s7488_s14  ;;  %v10325_v53 = vld [vmem:[#allocation2 + $0x1a0] sm:$0xff] }
 0x8e0   : > { %4375 = vrot.lane.b32.xlu0 %v7232_v54, %s7488_s14 }
 0x911   : > { %v3944_v38 = vpop.xlane.xlu1 %3943 }
 0x912   : > { %v10296_v20 = vmax.f32 %v10291_v63, %v3944_v38 }
 0x913   : > { %v3942_v17 = vpop.xlane.xlu0 %3941 }
 0x914   : > { %4601 = vst.msk [vmem:[#allocation2 + $0x188] sm:$0xff] %vm1383_vm3, %v10296_v20  ;;  %v10303_v15 = vmax.f32 %v10293_v51, %v3942_v17  ;;  %4044 = vperm.xlu1 %6912, %v10296_v20   ;;  %v10334_v17 = vld [vmem:[#allocation2 + $0x1b8] sm:$0xff] }
 0x915   : > { %v3948_v55 = vpop.xlane.xlu1 %3947 }
 0x916   : > { %4600 = vst.msk [vmem:[#allocation2 + $0x180] sm:$0xff] %vm1383_vm3, %v10303_v15  ;;  %v10313_v27 = vmax.f32 %v10298_v58, %v3948_v55 }
 0x917   : > { %v3946_v39 = vpop.xlane.xlu0 %3945 }
 0x918   : > { %4603 = vst.msk [vmem:[#allocation2 + $0x198] sm:$0xff] %vm1383_vm3, %v10313_v27  ;;  %4039 = vperm.xlu1 %6912, %v10303_v15   ;;  %v10323_v47 = vmax.f32 %v10306_v32, %v3946_v39 }
 0x919   : > { %v3952_v2 = vpop.xlane.xlu1 %3951 }
 0x91a   : > { %v10328_v54 = vmax.f32 %v10315_v22, %v3952_v2  ;;  %4602 = vst.msk [vmem:[#allocation2 + $0x190] sm:$0xff] %vm1383_vm3, %v10323_v47 }
 0x91b   : > { %v3950_v55 = vpop.xlane.xlu0 %3949 }
 0x91c   : > { %4605 = vst.msk [vmem:[#allocation2 + $0x1a8] sm:$0xff] %vm1383_vm3, %v10328_v54  ;;  %4054 = vperm.xlu1 %6912, %v10313_v27   ;;  %v10342_v39 = vmax.f32 %v10325_v53, %v3950_v55 }
 0x91d   : > { %v3956_v2 = vpop.xlane.xlu1 %3955 }
 0x91e   : > { %v10347_v38 = vmax.f32 %v10334_v17, %v3956_v2  ;;  %4604 = vst.msk [vmem:[#allocation2 + $0x1a0] sm:$0xff] %vm1383_vm3, %v10342_v39  ;;  %v10361_v2 = vld [vmem:[#allocation2 + $0x1c0] sm:$0xff] }
 0x91f   : > { %v3954_v21 = vpop.xlane.xlu0 %3953 }
 0x920   : > { %4607 = vst.msk [vmem:[#allocation2 + $0x1b8] sm:$0xff] %vm1383_vm3, %v10347_v38  ;;  %4049 = vperm.xlu1 %6912, %v10323_v47   ;;  %v10359_v55 = vmax.f32 %v10344_v61, %v3954_v21 }
 0x921   : > { %v3960_v49 = vpop.xlane.xlu1 %3959 }
 0x922   : > { %v10364_v41 = vmax.f32 %v10351_v26, %v3960_v49  ;;  %4606 = vst.msk [vmem:[#allocation2 + $0x1b0] sm:$0xff] %vm1383_vm3, %v10359_v55  ;;  %v10378_v49 = vld [vmem:[#allocation2 + $0x1d0] sm:$0xff] }
 0x923   : > { %v3958_v46 = vpop.xlane.xlu0 %3957 }
 0x924   : > { %4609 = vst.msk [vmem:[#allocation2 + $0x1c8] sm:$0xff] %vm1383_vm3, %v10364_v41  ;;  %4064 = vperm.xlu1 %6912, %v10328_v54   ;;  %v10376_v21 = vmax.f32 %v10361_v2, %v3958_v46 }
 0x925   : > { %v3964_v30 = vpop.xlane.xlu1 %3963 }
 0x926   : > { %v10381_v42 = vmax.f32 %v10368_v59, %v3964_v30  ;;  %4608 = vst.msk [vmem:[#allocation2 + $0x1c0] sm:$0xff] %vm1383_vm3, %v10376_v21  ;;  %v10395_v30 = vld [vmem:[#allocation2 + $0x1e0] sm:$0xff] }
 0x927   : > { %v3962_v34 = vpop.xlane.xlu0 %3961 }
 0x928   : > { %4611 = vst.msk [vmem:[#allocation2 + $0x1d8] sm:$0xff] %vm1383_vm3, %v10381_v42  ;;  %4059 = vperm.xlu1 %6912, %v10342_v39   ;;  %v10393_v46 = vmax.f32 %v10378_v49, %v3962_v34 }
 0x929   : > { %v3968_v50 = vpop.xlane.xlu1 %3967 }
 0x92a   : > { %v10398_v36 = vmax.f32 %v10385_v56, %v3968_v50  ;;  %4610 = vst.msk [vmem:[#allocation2 + $0x1d0] sm:$0xff] %vm1383_vm3, %v10393_v46 }
 0x92b   : > { %v3966_v28 = vpop.xlane.xlu0 %3965 }
 0x92c   : > { %4613 = vst.msk [vmem:[#allocation2 + $0x1e8] sm:$0xff] %vm1383_vm3, %v10398_v36  ;;  %4104 = vperm.xlu0 %6911, %v10398_v36   ;;  %4074 = vperm.xlu1 %6912, %v10347_v38   ;;  %v10411_v34 = vmax.f32 %v10395_v30, %v3966_v28 }
 0x92d   : > { %v3972_v50 = vpop.xlane.xlu1 %3971 }
 0x92e   : > { %v10416_v1 = vmax.f32 %v10402_v25, %v3972_v50  ;;  %4612 = vst.msk [vmem:[#allocation2 + $0x1e0] sm:$0xff] %vm1383_vm3, %v10411_v34 }
 0x92f   : > { %v3970_v7 = vpop.xlane.xlu0 %3969 }
 0x930   : > { %4615 = vst.msk [vmem:[#allocation2 + $0x1f8] sm:$0xff] %vm1383_vm3, %v10416_v1  ;;  %4114 = vperm.xlu0 %6911, %v10416_v1   ;;  %4069 = vperm.xlu1 %6912, %v10359_v55   ;;  %v10427_v28 = vmax.f32 %v10413_v29, %v3970_v7  ;;  %v3990_v7 = vsub.f32 %v10291_v63, %v10296_v20 }
 0x932   : > { %4614 = vst.msk [vmem:[#allocation2 + $0x1f0] sm:$0xff] %vm1383_vm3, %v10427_v28 }
 0x933   : > { %v4394_v10 = vpop.permute.xlu0 %4393 }
 0x934   : > { %3326 = vperm.xlu0 %6911, %v10156_v23   ;;  %4084 = vperm.xlu1 %6912, %v10364_v41   ;;  %v4007_v23 = vmul.f32 1.442695, %v3990_v7 }
 0x935   : > { %6735 = vmatprep.subr.mxu0 %v4394_v10 }
 0x936   : > { %6736 = vmatpush3.msra.mxu0 %v4394_v10  ;;  %v3993_v10 = vsub.f32 %v10325_v53, %v10342_v39  ;;  %7105 = vpow2.f32 %v4007_v23 }
 0x937   : > { %v4392_v9 = vpop.permute.xlu0 %4391 }
 0x938   : > { %3336 = vperm.xlu0 %6911, %v10165_v4   ;;  %4079 = vperm.xlu1 %6912, %v10376_v21   ;;  %v4013_v4 = vmul.f32 1.442695, %v3993_v10 }
 0x939   : > { %6737 = vmatprep.subr.mxu0 %v4392_v9 }
 0x93a   : > { %6738 = vmatpush3.msra.mxu0 %v4392_v9  ;;  %v3995_v9 = vsub.f32 %v10344_v61, %v10359_v55  ;;  %7107 = vpow2.f32 %v4013_v4 }
 0x93b   : > { %v4390_v50 = vpop.permute.xlu0 %4389 }
 0x93c   : > { %3346 = vperm.xlu0 %6911, %v10185_v16   ;;  %4094 = vperm.xlu1 %6912, %v10381_v42   ;;  %v4017_v63 = vmul.f32 1.442695, %v3995_v9 }
 0x93d   : > { %6739 = vmatprep.subr.mxu0 %v4390_v50 }
 0x93e   : > { %6740 = vmatpush3.msra.mxu0 %v4390_v50  ;;  %7109 = vpow2.f32 %v4017_v63 }
 0x93f   : > { %v4388_v29 = vpop.permute.xlu0 %4387 }
 0x940   : > { %3356 = vperm.xlu0 %6911, %v10202_v37   ;;  %4089 = vperm.xlu1 %6912, %v10393_v46   ;;  %v3997_v37 = vsub.f32 %v10361_v2, %v10376_v21 }
 0x941   : > { %6741 = vmatprep.subr.mxu0 %v4388_v29 }
 0x942   : > { %6742 = vmatpush3.msra.mxu0 %v4388_v29  ;;  %v4021_v29 = vmul.f32 1.442695, %v3997_v37 }
 0x943   : > { %v4386_v16 = vpop.permute.xlu0 %4385  ;;  %v10459_v39 = vpop.eup %7105 }
 0x944   : > { %3366 = vperm.xlu0 %6911, %v10216_v48   ;;  %4099 = vperm.xlu1 %6912, %v10411_v34   ;;  %v3999_v48 = vsub.f32 %v10378_v49, %v10393_v46  ;;  %7111 = vpow2.f32 %v4021_v29 }
 0x945   : > { %6743 = vmatprep.subr.mxu0 %v4386_v16 }
 0x946   : > { %6744 = vmatpush3.msra.mxu0 %v4386_v16  ;;  %v4025_v53 = vmul.f32 1.442695, %v3999_v48 }
 0x947   : > { %v4384_v20 = vpop.permute.xlu0 %4383 }
 0x948   : > { %3376 = vperm.xlu0 %6911, %v10230_v19   ;;  %4109 = vperm.xlu1 %6912, %v10427_v28   ;;  %v4001_v19 = vsub.f32 %v10395_v30, %v10411_v34  ;;  %7113 = vpow2.f32 %v4025_v53 }
 0x949   : > { %6745 = vmatprep.subr.mxu0 %v4384_v20 }
 0x94a   : > { %6746 = vmatpush3.msra.mxu0 %v4384_v20  ;;  %v4029_v2 = vmul.f32 1.442695, %v4001_v19 }
 0x94b   : > { %v4382_v61 = vpop.permute.xlu0 %4381 }
 0x94c   : > { %3386 = vperm.xlu0 %6911, %v10244_v6   ;;  %3321 = vperm.xlu1 %6912, %v10147_v14   ;;  %v10463_v6 = vpop.eup %7107  ;;  %7115 = vpow2.f32 %v4029_v2 }
 0x94d   : > { %6747 = vmatprep.subr.mxu0 %v4382_v61  ;;  %v10467_v21 = vpop.eup %7109 }
 0x94e   : > { %6748 = vmatpush3.msra.mxu0 %v4382_v61 }
 0x94f   : > { %v4380_v55 = vpop.permute.xlu0 %4379 }
 0x950   : > { %4286 = vperm.xlu0 %6911, %v10459_v39   ;;  %3331 = vperm.xlu1 %6912, %v10142_v31   ;;  %v11482_v31 = vsub.f32 %v10293_v51, %v10303_v15 }
 0x951   : > { %6749 = vmatprep.subr.mxu0 %v4380_v55  ;;  %v10474_v30 = vpop.eup %7111 }
 0x952   : > { %6750 = vmatpush3.msra.mxu0 %v4380_v55  ;;  %v4005_v46 = vmul.f32 1.442695, %v11482_v31 }
 0x953   : > { %v4378_v14 = vpop.permute.xlu0 %4377 }
 0x954   : > { %4301 = vperm.xlu0 %6911, %v10463_v6   ;;  %3341 = vperm.xlu1 %6912, %v10175_v12   ;;  %7117 = vpow2.f32 %v4005_v46  ;;  %v11483_v12 = vsub.f32 %v10306_v32, %v10323_v47 }
 0x955   : > { %6751 = vmatprep.subr.mxu0 %v4378_v14  ;;  %v10481_v50 = vpop.eup %7113 }
 0x956   : > { %6752 = vmatpush3.msra.mxu0 %v4378_v14  ;;  %v4009_v34 = vmul.f32 1.442695, %v11483_v12 }
 0x957   : > { %v4376_v49 = vpop.permute.xlu0 %4375 }
 0x958   : > { %4311 = vperm.xlu0 %6911, %v10467_v21   ;;  %3351 = vperm.xlu1 %6912, %v10195_v43   ;;  %v11484_v43 = vsub.f32 %v10298_v58, %v10313_v27  ;;  %7119 = vpow2.f32 %v4009_v34 }
 0x959   : > { %6753 = vmatprep.subr.mxu0 %v4376_v49  ;;  %v10488_v15 = vpop.eup %7115 }
 0x95a   : > { %6754 = vmatpush3.msra.mxu0 %v4376_v49  ;;  %v4011_v51 = vmul.f32 1.442695, %v11484_v43 }
 0x95c   : > { %4321 = vperm.xlu0 %6911, %v10474_v30   ;;  %3361 = vperm.xlu1 %6912, %v10209_v8   ;;  %7121 = vpow2.f32 %v4011_v51  ;;  %v11485_v8 = vsub.f32 %v10315_v22, %v10328_v54  ;;  %v3300_v51 = vld [vmem:[#allocation4 + $0x110] sm:$0xff] }
 0x95e   : > { %v4015_v32 = vmul.f32 1.442695, %v11485_v8 }
 0x960   : > { %4331 = vperm.xlu0 %6911, %v10481_v50   ;;  %3371 = vperm.xlu1 %6912, %v10223_v45   ;;  %7123 = vpow2.f32 %v4015_v32  ;;  %v11486_v45 = vsub.f32 %v10334_v17, %v10347_v38  ;;  %v11489_v38 = vsub.f32 %v10385_v56, %v10398_v36 }
 0x961   : > { %v10499_v27 = vpop.eup %7117 }
 0x962   : > { %v4019_v58 = vmul.f32 1.442695, %v11486_v45  ;;  %v4031_v17 = vmul.f32 1.442695, %v11489_v38 }
 0x964   : > { %4341 = vperm.xlu0 %6911, %v10488_v15   ;;  %3381 = vperm.xlu1 %6912, %v10237_v18   ;;  %7125 = vpow2.f32 %v4019_v58  ;;  %v11487_v18 = vsub.f32 %v10351_v26, %v10364_v41 }
 0x965   : > { %v10505_v7 = vpop.eup %7119 }
 0x966   : > { %v4023_v47 = vmul.f32 1.442695, %v11487_v18 }
 0x968   : > { %3391 = vperm.xlu1 %6912, %v10251_v3   ;;  %7127 = vpow2.f32 %v4023_v47  ;;  %v11488_v3 = vsub.f32 %v10368_v59, %v10381_v42  ;;  %v3302_v47 = vld [vmem:[#allocation4 + $0x120] sm:$0xff] }
 0x969   : > { %v10511_v54 = vpop.eup %7121 }
 0x96a   : > { %v4027_v22 = vmul.f32 1.442695, %v11488_v3 }
 0x96c   : > { %4281 = vperm.xlu1 %6912, %v10499_v27   ;;  %7129 = vpow2.f32 %v4027_v22 }
 0x96d   : > { %v10517_v41 = vpop.eup %7123  ;;  %7131 = vpow2.f32 %v4031_v17 }
 0x970   : > { %4291 = vperm.xlu1 %6912, %v10505_v7  }
 0x971   : > { %v10520_v26 = vpop.eup %7125 }
 0x974   : > { %4296 = vperm.xlu1 %6912, %v10511_v54  }
 0x975   : > { %v10523_v59 = vpop.eup %7127 }
 0x978   : > { %4306 = vperm.xlu1 %6912, %v10517_v41  }
 0x979   : > { %v10526_v42 = vpop.eup %7129 }
 0x97a   : > { %v10529_v23 = vpop.eup %7131 }
 0x97c   : > { %4316 = vperm.xlu1 %6912, %v10520_v26  }
 0x980   : > { %4326 = vperm.xlu1 %6912, %v10523_v59  }
 0x984   : > { %4336 = vperm.xlu1 %6912, %v10526_v42  }
 0x988   : > { %4346 = vperm.xlu1 %6912, %v10529_v23  }
 0x98f   : > { %v4045_v56 = vpop.permute.xlu1 %4044 }
 0x990   : > { %v4118_v36 = vsub.f32 %v10158_v24, %v4045_v56 }
 0x992   : > { %v4135_v9 = vmul.f32 1.442695, %v4118_v36 }
 0x993   : > { %v4040_v10 = vpop.permute.xlu1 %4039 }
 0x994   : > { %v4117_v4 = vsub.f32 %v10167_v35, %v4040_v10  ;;  %v3304_v10 = vld [vmem:[#allocation4 + $0x130] sm:$0xff] }
 0x996   : > { %v4133_v16 = vmul.f32 1.442695, %v4117_v4 }
 0x997   : > { %v4055_v63 = vpop.permute.xlu1 %4054 }
 0x998   : > { %7133 = vpow2.f32 %v4133_v16  ;;  %v4120_v37 = vsub.f32 %v10177_v5, %v4055_v63 }
 0x999   : > { %7135 = vpow2.f32 %v4135_v9 }
 0x99a   : > { %v4139_v20 = vmul.f32 1.442695, %v4120_v37 }
 0x99b   : > { %v4050_v29 = vpop.permute.xlu1 %4049 }
 0x99c   : > { %7137 = vpow2.f32 %v4139_v20  ;;  %v4119_v48 = vsub.f32 %v10187_v11, %v4050_v29  ;;  %v11490_v20 = vld [vmem:[#allocation76_spill] sm:$0xff]  ;;  %v3306_v29 = vld [vmem:[#allocation4 + $0x140] sm:$0xff] }
 0x99e   : > { %v4137_v61 = vmul.f32 1.442695, %v4119_v48 }
 0x99f   : > { %v4065_v53 = vpop.permute.xlu1 %4064 }
 0x9a0   : > { %7139 = vpow2.f32 %v4137_v61  ;;  %v4122_v24 = vsub.f32 %v10197_v57, %v4065_v53  ;;  %v11491_v61 = vld [vmem:[#allocation71_spill] sm:$0xff] }
 0x9a2   : > { %v4143_v19 = vmul.f32 1.442695, %v4122_v24 }
 0x9a3   : > { %v4060_v55 = vpop.permute.xlu1 %4059 }
 0x9a4   : > { %7141 = vpow2.f32 %v4143_v19  ;;  %v4121_v35 = vsub.f32 %v10204_v44, %v4060_v55  ;;  %v11492_v19 = vld [vmem:[#allocation74_spill] sm:$0xff] }
 0x9a5   : > { %v7134_v2 = vpop.eup %7133 }
 0x9a6   : > { %v7136_v14 = vpop.eup %7135  ;;  %v4141_v49 = vmul.f32 1.442695, %v4121_v35  ;;  %6755 = vmatprep.mubr.f32.mxu0 %v7134_v2  ;;  %4198 = vadd.xlane.f32.xlu0 %v7134_v2 }
 0x9a7   : > { %v4075_v5 = vpop.permute.xlu1 %4074  ;;  %6756 = vmatmul.mubr.f32.vlgmr.msra.gmra.mxu0 %v7136_v14  ;;  %v4105_v31 = vpop.permute.xlu0 %4104 }
 0x9a8   : > { %7143 = vpow2.f32 %v4141_v49  ;;  %v4124_v11 = vsub.f32 %v10211_v13, %v4075_v5  ;;  %v3308_v5 = vld [vmem:[#allocation4 + $0x150] sm:$0xff] }
 0x9a9   : > { %v7138_v46 = vpop.eup %7137 }
 0x9aa   : > { %v4147_v12 = vmul.f32 1.442695, %v4124_v11  ;;  %4204 = vadd.xlane.f32.xlu0 %v7138_v46  ;;  %v11494_v11 = vld [vmem:[#allocation27_spill] sm:$0xff] }
 0x9ab   : > { %v4070_v57 = vpop.permute.xlu1 %4069  ;;  %v10539_v34 = vpop.permute.xlu0 %4114 }
 0x9ac   : > { %7145 = vpow2.f32 %v4147_v12  ;;  %v4123_v44 = vsub.f32 %v10218_v40, %v4070_v57  ;;  %4200 = vadd.xlane.f32.xlu1 %v7136_v14 }
 0x9ad   : > { %v7140_v43 = vpop.eup %7139 }
 0x9ae   : > { %v4145_v8 = vmul.f32 1.442695, %v4123_v44  ;;  %4202 = vadd.xlane.f32.xlu0 %v7140_v43  ;;  %6758 = vmatprep.mubr.f32.mxu0 %v7140_v43  ;;  %v11495_v44 = vld [vmem:[#allocation78_spill] sm:$0xff] }
 0x9af   : > { %v4085_v32 = vpop.permute.xlu1 %4084  ;;  %6759 = vmatmul.mubr.f32.gmra.mxu0 %v7138_v46  ;;  %v3327_v45 = vpop.permute.xlu0 %3326 }
 0x9b0   : > { %7147 = vpow2.f32 %v4145_v8  ;;  %v4126_v13 = vsub.f32 %v10225_v60, %v4085_v32  ;;  %v3396_v58 = vmul.f32 %v3327_v45, %v3300_v51  ;;  %v3310_v45 = vld [vmem:[#allocation4 + $0x160] sm:$0xff] }
 0x9b1   : > { %v7142_v18 = vpop.eup %7141 }
 0x9b2   : > { %v4151_v3 = vmul.f32 1.442695, %v4126_v13  ;;  %v3605_v22 = vadd.f32 %v10090_v33, %v3396_v58  ;;  %4208 = vadd.xlane.f32.xlu0 %v7142_v18  ;;  %v11496_v13 = vld [vmem:[#allocation32_spill] sm:$0xff] }
 0x9b3   : > { %v4080_v40 = vpop.permute.xlu1 %4079  ;;  %v3337_v38 = vpop.permute.xlu0 %3336 }
 0x9b4   : > { %7149 = vpow2.f32 %v4151_v3  ;;  %3621 = vst.msk [vmem:[#allocation4 + $0x110] sm:$0xff] %vm821_vm2, %v3605_v22  ;;  %v4125_v17 = vsub.f32 %v10232_v52, %v4080_v40  ;;  %v3398_v56 = vmul.f32 %v3337_v38, %v3302_v47  ;;  %v4130_v52 = vsub.f32 %v11490_v20, %v4105_v31  ;;  %v11497_v3 = vld [vmem:[#allocation79_spill] sm:$0xff]  ;;  %v11499_v20 = vld [vmem:[#allocation65_spill] sm:$0xff] }
 0x9b5   : > { %v7144_v36 = vpop.eup %7143 }
 0x9b6   : > { %v4149_v4 = vmul.f32 1.442695, %v4125_v17  ;;  %v3607_v60 = vadd.f32 %v10094_v62, %v3398_v56  ;;  %4206 = vadd.xlane.f32.xlu1 %v7144_v36  ;;  %6761 = vmatprep.mubr.f32.mxu0 %v7144_v36  ;;  %v4159_v14 = vmul.f32 1.442695, %v4130_v52  ;;  %v3299_v17 = vld [vmem:[#allocation4 + $0x108] sm:$0xff]  ;;  %v3312_v56 = vld [vmem:[#allocation4 + $0x170] sm:$0xff] }
 0x9b7   : > { %v4095_v9 = vpop.permute.xlu1 %4094  ;;  %6762 = vmatmul.mubr.f32.gmra.mxu0 %v7142_v18  ;;  %v3347_v16 = vpop.permute.xlu0 %3346 }
 0x9b8   : > { %7151 = vpow2.f32 %v4149_v4  ;;  %3623 = vst.msk [vmem:[#allocation4 + $0x120] sm:$0xff] %vm821_vm2, %v3607_v60  ;;  %v4128_v33 = vsub.f32 %v10239_v0, %v4095_v9  ;;  %v3400_v63 = vmul.f32 %v3347_v16, %v3304_v10  ;;  %v11493_v0 = vld [vmem:[#allocation77_spill] sm:$0xff] }
 0x9b9   : > { %v7146_v37 = vpop.eup %7145  ;;  %v4132_v49 = vsub.f32 %v11493_v0, %v10539_v34  ;;  %v11498_v10 = vld [vmem:[#allocation73_spill] sm:$0xff] }
 0x9ba   : > { %v4155_v48 = vmul.f32 1.442695, %v4128_v33  ;;  %v3609_v53 = vadd.f32 %v11491_v61, %v3400_v63  ;;  %4212 = vadd.xlane.f32.xlu0 %v7146_v37 }
 0x9bb   : > { %v4090_v62 = vpop.permute.xlu1 %4089  ;;  %v3357_v24 = vpop.permute.xlu0 %3356  ;;  %v4163_v32 = vmul.f32 1.442695, %v4132_v49  ;;  %v3305_v49 = vld [vmem:[#allocation4 + $0x138] sm:$0xff] }
 0x9bc   : > { %7153 = vpow2.f32 %v4155_v48  ;;  %3625 = vst.msk [vmem:[#allocation4 + $0x130] sm:$0xff] %vm821_vm2, %v3609_v53  ;;  %v4127_v55 = vsub.f32 %v11492_v19, %v4090_v62  ;;  %v3402_v35 = vmul.f32 %v3357_v24, %v3306_v29  ;;  %v11500_v29 = vld [vmem:[#allocation75_spill] sm:$0xff] }
 0x9bd   : > { %v7148_v2 = vpop.eup %7147  ;;  %v3303_v24 = vld [vmem:[#allocation4 + $0x128] sm:$0xff] }
 0x9be   : > { %v4153_v31 = vmul.f32 1.442695, %v4127_v55  ;;  %v3611_v46 = vadd.f32 %v11494_v11, %v3402_v35  ;;  %4210 = vadd.xlane.f32.xlu1 %v7148_v2  ;;  %6764 = vmatprep.mubr.f32.mxu0 %v7148_v2  ;;  %v11501_v55 = vld [vmem:[#allocation70_spill] sm:$0xff] }
 0x9bf   : > { %v4100_v12 = vpop.permute.xlu1 %4099  ;;  %6765 = vmatmul.mubr.f32.gmra.mxu0 %v7146_v37  ;;  %v3367_v57 = vpop.permute.xlu0 %3366  ;;  %v3301_v37 = vld [vmem:[#allocation4 + $0x118] sm:$0xff] }
 0x9c0   : > { %7155 = vpow2.f32 %v4153_v31  ;;  %3627 = vst.msk [vmem:[#allocation4 + $0x140] sm:$0xff] %vm821_vm2, %v3611_v46  ;;  %v4129_v43 = vsub.f32 %v11495_v44, %v4100_v12  ;;  %v3404_v51 = vmul.f32 %v3367_v57, %v3308_v5  ;;  %v11502_v31 = vld [vmem:[#allocation72_spill] sm:$0xff]  ;;  %v11503_v44 = vsub.f32 %v10402_v25, %v10416_v1 }
 0x9c1   : > { %v7150_v8 = vpop.eup %7149  ;;  %7157 = vpow2.f32 %v4159_v14 }
 0x9c2   : > { %v4157_v34 = vmul.f32 1.442695, %v4129_v43  ;;  %v3613_v58 = vadd.f32 %v11496_v13, %v3404_v51  ;;  %4216 = vadd.xlane.f32.xlu0 %v7150_v8  ;;  %v4035_v43 = vmul.f32 1.442695, %v11503_v44  ;;  %v3307_v51 = vld [vmem:[#allocation4 + $0x148] sm:$0xff] }
 0x9c3   : > { %v4110_v18 = vpop.permute.xlu1 %4109  ;;  %v3377_v47 = vpop.permute.xlu0 %3376 }
 0x9c4   : > { %7159 = vpow2.f32 %v4157_v34  ;;  %3629 = vst.msk [vmem:[#allocation4 + $0x150] sm:$0xff] %vm821_vm2, %v3613_v58  ;;  %v4131_v22 = vsub.f32 %v11497_v3, %v4110_v18  ;;  %v3406_v40 = vmul.f32 %v3377_v47, %v3310_v45  ;;  %v11505_v45 = vld [vmem:[#allocation81_spill] sm:$0xff]  ;;  %v11507_v3 = vld [vmem:[#allocation24_spill] sm:$0xff] }
 0x9c5   : > { %v7152_v38 = vpop.eup %7151  ;;  %7161 = vpow2.f32 %v4163_v32  ;;  %v11506_v34 = vsub.f32 %v11505_v45, %v10427_v28  ;;  %v3309_v47 = vld [vmem:[#allocation4 + $0x158] sm:$0xff] }
 0x9c6   : > { %v4161_v36 = vmul.f32 1.442695, %v4131_v22  ;;  %v3615_v4 = vadd.f32 %v11498_v10, %v3406_v40  ;;  %4214 = vadd.xlane.f32.xlu1 %v7152_v38  ;;  %6767 = vmatprep.mubr.f32.mxu0 %v7152_v38  ;;  %v3311_v40 = vld [vmem:[#allocation4 + $0x168] sm:$0xff]  ;;  %v11508_v38 = vld [vmem:[#allocation25_spill] sm:$0xff] }
 0x9c7   : > { %v3322_v60 = vpop.permute.xlu1 %3321  ;;  %6768 = vmatmul.mubr.f32.gmra.mxu0 %v7150_v8  ;;  %v3387_v9 = vpop.permute.xlu0 %3386  ;;  %v11504_v8 = vld [vmem:[#allocation69_spill] sm:$0xff]  ;;  %v4033_v13 = vmul.f32 1.442695, %v11506_v34 }
 0x9c8   : > { %7163 = vpow2.f32 %v4161_v36  ;;  %3631 = vst.msk [vmem:[#allocation4 + $0x160] sm:$0xff] %vm821_vm2, %v3615_v4  ;;  %v3395_v16 = vmul.f32 %v3322_v60, %v3299_v17  ;;  %v3408_v33 = vmul.f32 %v3387_v9, %v3312_v56  ;;  %v3313_v36 = vld [vmem:[#allocation4 + $0x178] sm:$0xff] }
 0x9c9   : > { %v7154_v63 = vpop.eup %7153  ;;  %7165 = vpow2.f32 %v4035_v43  ;;  %v11509_v10 = vld [vmem:[#allocation29_spill] sm:$0xff]  ;;  %v4168_v43 = vld [vmem:[#allocation3 + $0x190] sm:$0xff] }
 0x9ca   : > { %v3604_v52 = vadd.f32 %v11499_v20, %v3395_v16  ;;  %v3617_v48 = vadd.f32 %v11500_v29, %v3408_v33  ;;  %4220 = vadd.xlane.f32.xlu0 %v7154_v63  ;;  %7167 = vpow2.f32 %v4033_v13  ;;  %v11510_v33 = vld [vmem:[#allocation34_spill] sm:$0xff]  ;;  %v4171_v13 = vld [vmem:[#allocation3 + $0x1a8] sm:$0xff] }
 0x9cb   : > { %v3332_v61 = vpop.permute.xlu1 %3331 }
 0x9cc   : > { %3620 = vst.msk [vmem:[#allocation4 + $0x108] sm:$0xff] %vm821_vm2, %v3604_v52  ;;  %3633 = vst.msk [vmem:[#allocation4 + $0x170] sm:$0xff] %vm821_vm2, %v3617_v48  ;;  %v3397_v53 = vmul.f32 %v3332_v61, %v3301_v37  ;;  %v10595_v52 = vpop.permute.xlu0 %4286 }
 0x9cd   : > { %v7156_v62 = vpop.eup %7155 }
 0x9ce   : > { %v7158_v19 = vpop.eup %7157  ;;  %v3606_v35 = vadd.f32 %v11501_v55, %v3397_v53  ;;  %4218 = vadd.xlane.f32.xlu1 %v7156_v62  ;;  %6770 = vmatprep.mubr.f32.mxu0 %v7156_v62 }
 0x9cf   : > { %4224 = vadd.xlane.f32.xlu0 %v7158_v19  ;;  %v3342_v2 = vpop.permute.xlu1 %3341  ;;  %6771 = vmatmul.mubr.f32.gmra.mxu0 %v7154_v63 }
 0x9d0   : > { %3622 = vst.msk [vmem:[#allocation4 + $0x118] sm:$0xff] %vm821_vm2, %v3606_v35  ;;  %v3399_v14 = vmul.f32 %v3342_v2, %v3303_v24  ;;  %v10599_v48 = vpop.permute.xlu0 %4301 }
 0x9d1   : > { %v7160_v0 = vpop.eup %7159 }
 0x9d2   : > { %v7162_v5 = vpop.eup %7161  ;;  %v3608_v11 = vadd.f32 %v11502_v31, %v3399_v14  ;;  %4222 = vadd.xlane.f32.xlu1 %v7160_v0  ;;  %6773 = vmatprep.mubr.f32.mxu0 %v7160_v0  ;;  %v4166_v0 = vld [vmem:[#allocation3 + $0x180] sm:$0xff]  ;;  %v4169_v31 = vld [vmem:[#allocation3 + $0x198] sm:$0xff] }
 0x9d3   : > { %4228 = vadd.xlane.f32.xlu0 %v7162_v5  ;;  %v3352_v46 = vpop.permute.xlu1 %3351  ;;  %6774 = vmatmul.mubr.f32.gmra.mxu0 %v7158_v19 }
 0x9d4   : > { %3624 = vst.msk [vmem:[#allocation4 + $0x128] sm:$0xff] %vm821_vm2, %v3608_v11  ;;  %v3401_v12 = vmul.f32 %v3352_v46, %v3305_v49  ;;  %v10603_v53 = vpop.permute.xlu0 %4311  ;;  %v4182_v49 = vmul.f32 %v10499_v27, %v4166_v0  ;;  %v4184_v27 = vmul.f32 %v10505_v7, %v4168_v43  ;;  %v4181_v43 = vld [vmem:[#allocation3 + $0x1f8] sm:$0xff] }
 0x9d5   : > { %v7164_v57 = vpop.eup %7163 }
 0x9d6   : > { %v3610_v32 = vadd.f32 %v11504_v8, %v3401_v12  ;;  %4226 = vadd.xlane.f32.xlu1 %v7164_v57  ;;  %6776 = vmatprep.mubr.f32.mxu0 %v7164_v57  ;;  %v10585_v16 = vpop.eup %7165  ;;  %v4167_v12 = vld [vmem:[#allocation3 + $0x188] sm:$0xff]  ;;  %v4185_v57 = vmul.f32 %v10511_v54, %v4169_v31  ;;  %v4187_v54 = vmul.f32 %v10517_v41, %v4171_v13 }
 0x9d7   : > { %v3362_v58 = vpop.permute.xlu1 %3361  ;;  %6777 = vmatmul.mubr.f32.gmra.mxu0 %v7162_v5  ;;  %v10589_v37 = vpop.eup %7167  ;;  %v4183_v8 = vmul.f32 %v10459_v39, %v4167_v12  ;;  %v4179_v31 = vld [vmem:[#allocation3 + $0x1e8] sm:$0xff] }
 0x9d8   : > { %3626 = vst.msk [vmem:[#allocation4 + $0x138] sm:$0xff] %vm821_vm2, %v3610_v32  ;;  %v3403_v18 = vmul.f32 %v3362_v58, %v3307_v51  ;;  %v10607_v24 = vpop.permute.xlu0 %4321  ;;  %v4195_v12 = vmul.f32 %v10529_v23, %v4179_v31 }
 0x9da   : > { %v3612_v22 = vadd.f32 %v11507_v3, %v3403_v18 }
 0x9db   : > { %v3372_v1 = vpop.permute.xlu1 %3371 }
 0x9dc   : > { %3628 = vst.msk [vmem:[#allocation4 + $0x148] sm:$0xff] %vm821_vm2, %v3612_v22  ;;  %v3405_v25 = vmul.f32 %v3372_v1, %v3309_v47  ;;  %v10611_v55 = vpop.permute.xlu0 %4331  ;;  %v4170_v47 = vld [vmem:[#allocation3 + $0x1a0] sm:$0xff]  ;;  %v4173_v1 = vld [vmem:[#allocation3 + $0x1b8] sm:$0xff] }
 0x9dd   : > { %v4186_v39 = vmul.f32 %v10463_v6, %v4170_v47  ;;  %v4189_v7 = vmul.f32 %v10520_v26, %v4173_v1  ;;  %v4266_v1 = vld [vmem:[#allocation4 + $0x198] sm:$0xff] }
 0x9de   : > { %v3614_v17 = vadd.f32 %v11508_v38, %v3405_v25  ;;  %v4172_v38 = vld [vmem:[#allocation3 + $0x1b0] sm:$0xff] }
 0x9df   : > { %v3382_v56 = vpop.permute.xlu1 %3381  ;;  %v4188_v41 = vmul.f32 %v10467_v21, %v4172_v38 }
 0x9e0   : > { %3630 = vst.msk [vmem:[#allocation4 + $0x158] sm:$0xff] %vm821_vm2, %v3614_v17  ;;  %v3407_v28 = vmul.f32 %v3382_v56, %v3311_v40  ;;  %v10615_v2 = vpop.permute.xlu0 %4341 }
 0x9e2   : > { %v3616_v4 = vadd.f32 %v11509_v10, %v3407_v28  ;;  %v4175_v28 = vld [vmem:[#allocation3 + $0x1c8] sm:$0xff] }
 0x9e3   : > { %v3392_v60 = vpop.permute.xlu1 %3391  ;;  %v4191_v6 = vmul.f32 %v10523_v59, %v4175_v28 }
 0x9e4   : > { %3632 = vst.msk [vmem:[#allocation4 + $0x168] sm:$0xff] %vm821_vm2, %v3616_v4  ;;  %v3409_v9 = vmul.f32 %v3392_v60, %v3313_v36  ;;  %v4174_v4 = vld [vmem:[#allocation3 + $0x1c0] sm:$0xff] }
 0x9e5   : > { %v4190_v26 = vmul.f32 %v10474_v30, %v4174_v4  ;;  %v4269_v4 = vld [vmem:[#allocation4 + $0x1b0] sm:$0xff] }
 0x9e6   : > { %v3618_v63 = vadd.f32 %v11510_v33, %v3409_v9  ;;  %v4177_v33 = vld [vmem:[#allocation3 + $0x1d8] sm:$0xff] }
 0x9e7   : > { %4356 = vperm.xlu1 %6912, %v10585_v16   ;;  %v10593_v20 = vpop.permute.xlu1 %4281  ;;  %v4193_v21 = vmul.f32 %v10526_v42, %v4177_v33 }
 0x9e8   : > { %3634 = vst.msk [vmem:[#allocation4 + $0x178] sm:$0xff] %vm821_vm2, %v3618_v63 }
 0x9e9   : > { %4351 = vperm.xlu0 %6911, %v10589_v37  }
 0x9eb   : > { %v10597_v29 = vpop.permute.xlu1 %4291 }
 0x9ef   : > { %v10601_v61 = vpop.permute.xlu1 %4296 }
 0x9f3   : > { %v10605_v62 = vpop.permute.xlu1 %4306 }
 0x9f7   : > { %v10609_v19 = vpop.permute.xlu1 %4316 }
 0x9fb   : > { %v10613_v35 = vpop.permute.xlu1 %4326 }
 0x9ff   : > { %v10617_v14 = vpop.permute.xlu1 %4336 }
 0xa03   : > { %v10620_v46 = vpop.permute.xlu1 %4346 }
 0xa2f   : > { %v4199_v5 = vpop.xlane.xlu0 %4198 }
 0xa30   : > { %v4230_v11 = vadd.f32 %v4199_v5, %v4182_v49  ;;  %v4176_v49 = vld [vmem:[#allocation3 + $0x1d0] sm:$0xff] }
 0xa31   : > { %v4192_v59 = vmul.f32 %v10481_v50, %v4176_v49 }
 0xa32   : > { %4246 = vst.msk [vmem:[#allocation3 + $0x180] sm:$0xff] %vm1383_vm3, %v4230_v11 }
 0xa33   : > { %v4205_v44 = vpop.xlane.xlu0 %4204 }
 0xa34   : > { %v4233_v51 = vadd.f32 %v4205_v44, %v4185_v57  ;;  %v4178_v57 = vld [vmem:[#allocation3 + $0x1e0] sm:$0xff] }
 0xa35   : > { %v4201_v32 = vpop.xlane.xlu1 %4200  ;;  %v4194_v42 = vmul.f32 %v10488_v15, %v4178_v57  ;;  %v4264_v15 = vld [vmem:[#allocation4 + $0x188] sm:$0xff] }
 0xa36   : > { %4249 = vst.msk [vmem:[#allocation3 + $0x198] sm:$0xff] %vm1383_vm3, %v4233_v51  ;;  %v4231_v45 = vadd.f32 %v4201_v32, %v4183_v8  ;;  %v4197_v32 = vmul.f32 %v10585_v16, %v4181_v43  ;;  %v4276_v57 = vld [vmem:[#allocation4 + $0x1e8] sm:$0xff] }
 0xa37   : > { %v4203_v34 = vpop.xlane.xlu0 %4202 }
 0xa38   : > { %4247 = vst.msk [vmem:[#allocation3 + $0x188] sm:$0xff] %vm1383_vm3, %v4231_v45  ;;  %v4232_v58 = vadd.f32 %v4203_v34, %v4184_v27  ;;  %v4180_v45 = vld [vmem:[#allocation3 + $0x1f0] sm:$0xff] }
 0xa39   : > { %v4196_v23 = vmul.f32 %v10589_v37, %v4180_v45  ;;  %v4265_v37 = vld [vmem:[#allocation4 + $0x190] sm:$0xff] }
 0xa3a   : > { %4248 = vst.msk [vmem:[#allocation3 + $0x190] sm:$0xff] %vm1383_vm3, %v4232_v58 }
 0xa3b   : > { %v4209_v18 = vpop.xlane.xlu0 %4208 }
 0xa3c   : > { %v4235_v3 = vadd.f32 %v4209_v18, %v4187_v54  ;;  %v4263_v54 = vld [vmem:[#allocation4 + $0x180] sm:$0xff]  ;;  %v4360_v18 = vmul.f32 %v10595_v52, %v4264_v15 }
 0xa3d   : > { %v4359_v16 = vmul.f32 %v10593_v20, %v4263_v54  ;;  %v4268_v20 = vld [vmem:[#allocation4 + $0x1a8] sm:$0xff] }
 0xa3e   : > { %4251 = vst.msk [vmem:[#allocation3 + $0x1a8] sm:$0xff] %vm1383_vm3, %v4235_v3 }
 0xa3f   : > { %v4207_v22 = vpop.xlane.xlu1 %4206 }
 0xa40   : > { %v4234_v25 = vadd.f32 %v4207_v22, %v4186_v39 }
 0xa42   : > { %4250 = vst.msk [vmem:[#allocation3 + $0x1a0] sm:$0xff] %vm1383_vm3, %v4234_v25  ;;  %v4362_v25 = vmul.f32 %v10601_v61, %v4266_v1 }
 0xa43   : > { %v4213_v40 = vpop.xlane.xlu0 %4212 }
 0xa44   : > { %v4237_v17 = vadd.f32 %v4213_v40, %v4189_v7  ;;  %v4361_v40 = vmul.f32 %v10597_v29, %v4265_v37  ;;  %v4270_v29 = vld [vmem:[#allocation4 + $0x1b8] sm:$0xff] }
 0xa46   : > { %4253 = vst.msk [vmem:[#allocation3 + $0x1b8] sm:$0xff] %vm1383_vm3, %v4237_v17 }
 0xa47   : > { %v4211_v56 = vpop.xlane.xlu1 %4210 }
 0xa48   : > { %v4236_v36 = vadd.f32 %v4211_v56, %v4188_v41  ;;  %v4267_v41 = vld [vmem:[#allocation4 + $0x1a0] sm:$0xff]  ;;  %v4364_v56 = vmul.f32 %v10605_v62, %v4268_v20 }
 0xa4a   : > { %4252 = vst.msk [vmem:[#allocation3 + $0x1b0] sm:$0xff] %vm1383_vm3, %v4236_v36  ;;  %v4363_v36 = vmul.f32 %v10599_v48, %v4267_v41  ;;  %v4272_v48 = vld [vmem:[#allocation4 + $0x1c8] sm:$0xff] }
 0xa4b   : > { %v4217_v10 = vpop.xlane.xlu0 %4216 }
 0xa4c   : > { %v4239_v60 = vadd.f32 %v4217_v10, %v4191_v6 }
 0xa4e   : > { %4255 = vst.msk [vmem:[#allocation3 + $0x1c8] sm:$0xff] %vm1383_vm3, %v4239_v60  ;;  %v4366_v60 = vmul.f32 %v10609_v19, %v4270_v29 }
 0xa4f   : > { %v4215_v9 = vpop.xlane.xlu1 %4214 }
 0xa50   : > { %v4238_v63 = vadd.f32 %v4215_v9, %v4190_v26  ;;  %v4365_v9 = vmul.f32 %v10603_v53, %v4269_v4  ;;  %v4274_v53 = vld [vmem:[#allocation4 + $0x1d8] sm:$0xff] }
 0xa52   : > { %4254 = vst.msk [vmem:[#allocation3 + $0x1c0] sm:$0xff] %vm1383_vm3, %v4238_v63 }
 0xa53   : > { %v4221_v0 = vpop.xlane.xlu0 %4220 }
 0xa54   : > { %v4241_v5 = vadd.f32 %v4221_v0, %v4193_v21  ;;  %v4271_v21 = vld [vmem:[#allocation4 + $0x1c0] sm:$0xff]  ;;  %v4368_v0 = vmul.f32 %v10613_v35, %v4272_v48 }
 0xa55   : > { %v4275_v35 = vld [vmem:[#allocation4 + $0x1e0] sm:$0xff] }
 0xa56   : > { %4257 = vst.msk [vmem:[#allocation3 + $0x1d8] sm:$0xff] %vm1383_vm3, %v4241_v5  ;;  %v4367_v5 = vmul.f32 %v10607_v24, %v4271_v21  ;;  %v4372_v24 = vmul.f32 %v10620_v46, %v4276_v57 }
 0xa57   : > { %v4219_v11 = vpop.xlane.xlu1 %4218 }
 0xa58   : > { %v4240_v30 = vadd.f32 %v4219_v11, %v4192_v59  ;;  %v4225_v44 = vpop.xlane.xlu0 %4224  ;;  %v4273_v11 = vld [vmem:[#allocation4 + $0x1d0] sm:$0xff] }
 0xa59   : > { %v4243_v51 = vadd.f32 %v4225_v44, %v4195_v12  ;;  %v4370_v12 = vmul.f32 %v10617_v14, %v4274_v53  ;;  %v4369_v44 = vmul.f32 %v10611_v55, %v4273_v11 }
 0xa5a   : > { %4256 = vst.msk [vmem:[#allocation3 + $0x1d0] sm:$0xff] %vm1383_vm3, %v4240_v30 }
 0xa5b   : > { %4259 = vst.msk [vmem:[#allocation3 + $0x1e8] sm:$0xff] %vm1383_vm3, %v4243_v51  ;;  %v4223_v8 = vpop.xlane.xlu1 %4222 }
 0xa5c   : > { %v4242_v27 = vadd.f32 %v4223_v8, %v4194_v42  ;;  %v4229_v50 = vpop.xlane.xlu0 %4228  ;;  %v4278_v8 = vld [vmem:[#allocation4 + $0x1f8] sm:$0xff] }
 0xa5d   : > { %v4245_v34 = vadd.f32 %v4229_v50, %v4197_v32  ;;  %v4277_v50 = vld [vmem:[#allocation4 + $0x1f0] sm:$0xff] }
 0xa5e   : > { %4258 = vst.msk [vmem:[#allocation3 + $0x1e0] sm:$0xff] %vm1383_vm3, %v4242_v27  ;;  %v4371_v27 = vmul.f32 %v10615_v2, %v4275_v35 }
 0xa5f   : > { %4261 = vst.msk [vmem:[#allocation3 + $0x1f8] sm:$0xff] %vm1383_vm3, %v4245_v34  ;;  %v4227_v13 = vpop.xlane.xlu1 %4226 }
 0xa60   : > { %v4244_v58 = vadd.f32 %v4227_v13, %v4196_v23 }
 0xa62   : > { %4260 = vst.msk [vmem:[#allocation3 + $0x1f0] sm:$0xff] %vm1383_vm3, %v4244_v58 }
 0xa63   : > { %v4357_v32 = vpop.permute.xlu1 %4356 }
 0xa64   : > { %v4352_v34 = vpop.permute.xlu0 %4351  ;;  %v4374_v55 = vmul.f32 %v4357_v32, %v4278_v8 }
 0xa65   : > { %v4373_v46 = vmul.f32 %v4352_v34, %v4277_v50 }
 0xa67   : > { %v6757_v47 = vpop.f32.mrf.mxu0 }
 0xa68   : > { %v4569_v3 = vadd.f32 %v6757_v47, %v4360_v18 }
 0xa69   : > { %v4489_v39 = vpop.f32.mrf.mxu0 }
 0xa6a   : > { %4585 = vst.msk [vmem:[#allocation4 + $0x188] sm:$0xff] %vm821_vm2, %v4569_v3  ;;  %v4568_v22 = vadd.f32 %v4489_v39, %v4359_v16 }
 0xa6c   : > { %4584 = vst.msk [vmem:[#allocation4 + $0x180] sm:$0xff] %vm821_vm2, %v4568_v22 }
 0xa6f   : > { %v6760_v7 = vpop.f32.mrf.mxu0 }
 0xa70   : > { %v4571_v38 = vadd.f32 %v6760_v7, %v4362_v25 }
 0xa71   : > { %v4499_v17 = vpop.f32.mrf.mxu0 }
 0xa72   : > { %4587 = vst.msk [vmem:[#allocation4 + $0x198] sm:$0xff] %vm821_vm2, %v4571_v38  ;;  %v4570_v52 = vadd.f32 %v4499_v17, %v4361_v40 }
 0xa74   : > { %4586 = vst.msk [vmem:[#allocation4 + $0x190] sm:$0xff] %vm821_vm2, %v4570_v52 }
 0xa77   : > { %v6763_v28 = vpop.f32.mrf.mxu0 }
 0xa78   : > { %v4573_v6 = vadd.f32 %v6763_v28, %v4364_v56 }
 0xa79   : > { %v4509_v10 = vpop.f32.mrf.mxu0 }
 0xa7a   : > { %4589 = vst.msk [vmem:[#allocation4 + $0x1a8] sm:$0xff] %vm821_vm2, %v4573_v6  ;;  %v4572_v61 = vadd.f32 %v4509_v10, %v4363_v36 }
 0xa7c   : > { %4588 = vst.msk [vmem:[#allocation4 + $0x1a0] sm:$0xff] %vm821_vm2, %v4572_v61 }
 0xa7f   : > { %v6766_v26 = vpop.f32.mrf.mxu0 }
 0xa80   : > { %v4575_v33 = vadd.f32 %v6766_v26, %v4366_v60 }
 0xa81   : > { %v4519_v63 = vpop.f32.mrf.mxu0 }
 0xa82   : > { %4591 = vst.msk [vmem:[#allocation4 + $0x1b8] sm:$0xff] %vm821_vm2, %v4575_v33  ;;  %v4574_v62 = vadd.f32 %v4519_v63, %v4365_v9 }
 0xa84   : > { %4590 = vst.msk [vmem:[#allocation4 + $0x1b0] sm:$0xff] %vm821_vm2, %v4574_v62 }
 0xa87   : > { %v6769_v49 = vpop.f32.mrf.mxu0 }
 0xa88   : > { %v4577_v31 = vadd.f32 %v6769_v49, %v4368_v0 }
 0xa89   : > { %v4529_v59 = vpop.f32.mrf.mxu0 }
 0xa8a   : > { %4593 = vst.msk [vmem:[#allocation4 + $0x1c8] sm:$0xff] %vm821_vm2, %v4577_v31  ;;  %v4576_v19 = vadd.f32 %v4529_v59, %v4367_v5 }
 0xa8c   : > { %4592 = vst.msk [vmem:[#allocation4 + $0x1c0] sm:$0xff] %vm821_vm2, %v4576_v19 }
 0xa8f   : > { %v6772_v30 = vpop.f32.mrf.mxu0 }
 0xa90   : > { %v4579_v43 = vadd.f32 %v6772_v30, %v4370_v12 }
 0xa91   : > { %v4539_v51 = vpop.f32.mrf.mxu0 }
 0xa92   : > { %4595 = vst.msk [vmem:[#allocation4 + $0x1d8] sm:$0xff] %vm821_vm2, %v4579_v43  ;;  %v4578_v42 = vadd.f32 %v4539_v51, %v4369_v44 }
 0xa93   : > { %v6775_v45 = vpop.f32.mrf.mxu0 }
 0xa94   : > { %4594 = vst.msk [vmem:[#allocation4 + $0x1d0] sm:$0xff] %vm821_vm2, %v4578_v42  ;;  %v4581_v14 = vadd.f32 %v6775_v45, %v4372_v24 }
 0xa95   : > { %v4549_v23 = vpop.f32.mrf.mxu0 }
 0xa96   : > { %4597 = vst.msk [vmem:[#allocation4 + $0x1e8] sm:$0xff] %vm821_vm2, %v4581_v14  ;;  %v4580_v13 = vadd.f32 %v4549_v23, %v4371_v27 }
 0xa97   : > { %v6778_v58 = vpop.f32.mrf.mxu0 }
 0xa98   : > { %4596 = vst.msk [vmem:[#allocation4 + $0x1e0] sm:$0xff] %vm821_vm2, %v4580_v13  ;;  %v4583_v15 = vadd.f32 %v6778_v58, %v4374_v55  ;;  %4619 = sbr.rel (%p6066_p7) target bundleno = 3195 (0xc7b), region = 154 }
 0xa99   : > { %v4559_v54 = vpop.f32.mrf.mxu0 }
 0xa9a   : > { %4599 = vst.msk [vmem:[#allocation4 + $0x1f8] sm:$0xff] %vm821_vm2, %v4583_v15  ;;  %v4582_v18 = vadd.f32 %v4559_v54, %v4373_v46 }
 0xa9c   : > { %4598 = vst.msk [vmem:[#allocation4 + $0x1f0] sm:$0xff] %vm821_vm2, %v4582_v18 }
 0xa9d   : > { %v4622_v2 = vld [vmem:[#allocation3 + $0x10] sm:$0xff]  ;;  %v4620_v47 = vld [vmem:[#allocation3] sm:$0xff]  ;;  %v4623_v16 = vld [vmem:[#allocation3 + $0x18] sm:$0xff]  ;;  %v7489_v3 = vmov 0   ;;  %vm5084_vm4 = vcmask 523520   ;;  %vm5357_vm5 = vcmask 785920  }
 0xa9e   : > { %7234 = vset.pattern.permute.xlu1 %v7489_v3  ;;  %7233 = vset.pattern.permute.xlu0 %v7489_v3  ;;  %7235 = vrcp.f32 %v4622_v2  ;;  %v4621_v39 = vld [vmem:[#allocation3 + $0x8] sm:$0xff]  ;;  %v4624_v1 = vld [vmem:[#allocation3 + $0x20] sm:$0xff]  ;;  %v4627_v37 = vld [vmem:[#allocation3 + $0x38] sm:$0xff]  ;;  %vm5630_vm6 = vcmask 1048320  }
 0xa9f   : > { %7237 = vrcp.f32 %v4620_v47  ;;  %v4625_v22 = vld [vmem:[#allocation3 + $0x28] sm:$0xff]  ;;  %v4626_v25 = vld [vmem:[#allocation3 + $0x30] sm:$0xff]  ;;  %v4628_v40 = vld [vmem:[#allocation3 + $0x40] sm:$0xff] }
 0xaa0   : > { %7239 = vrcp.f32 %v4623_v16  ;;  %v4629_v7 = vld [vmem:[#allocation3 + $0x48] sm:$0xff]  ;;  %v4631_v38 = vld [vmem:[#allocation3 + $0x58] sm:$0xff]  ;;  %v10684_v17 = vld [vmem:[#allocation3 + $0x50] sm:$0xff] }
 0xaa1   : > { %7241 = vrcp.f32 %v4621_v39  ;;  %v10687_v20 = vld [vmem:[#allocation3 + $0x68] sm:$0xff]  ;;  %v10689_v28 = vld [vmem:[#allocation3 + $0x60] sm:$0xff]  ;;  %v10693_v9 = vld [vmem:[#allocation3 + $0x78] sm:$0xff] }
 0xaa2   : > { %7243 = vrcp.f32 %v4625_v22  ;;  %v10695_v21 = vld [vmem:[#allocation3 + $0x70] sm:$0xff]  ;;  %v4829_v43 = vld [vmem:[#allocation3 + $0x88] sm:$0xff]  ;;  %v10699_v51 = vld [vmem:[#allocation3 + $0x80] sm:$0xff] }
 0xaa3   : > { %7245 = vrcp.f32 %v4624_v1  ;;  %v4831_v50 = vld [vmem:[#allocation3 + $0x98] sm:$0xff]  ;;  %v10702_v23 = vld [vmem:[#allocation3 + $0x90] sm:$0xff] }
 0xaa4   : > { %7247 = vrcp.f32 %v4627_v37 }
 0xaa5   : > { %7249 = vrcp.f32 %v4626_v25 }
 0xaa6   : > { %7251 = vrcp.f32 %v4629_v7 }
 0xaa7   : > { %7253 = vrcp.f32 %v4628_v40 }
 0xaa8   : > { %7255 = vrcp.f32 %v4631_v38 }
 0xaa9   : > { %7257 = vrcp.f32 %v10684_v17 }
 0xaaa   : > { %7259 = vrcp.f32 %v10687_v20 }
 0xaab   : > { %v7236_v52 = vpop.eup %7235  ;;  %7261 = vrcp.f32 %v10689_v28 }
 0xaac   : > { %v7238_v41 = vpop.eup %7237  ;;  %v4654_v56 = vmul.f32 %v7236_v52, %v4622_v2  ;;  %7263 = vrcp.f32 %v10693_v9  ;;  %v4833_v2 = vld [vmem:[#allocation3 + $0xa8] sm:$0xff] }
 0xaad   : > { %v7240_v36 = vpop.eup %7239  ;;  %v4652_v6 = vmul.f32 %v7238_v41, %v4620_v47  ;;  %7265 = vrcp.f32 %v10695_v21 }
 0xaae   : > { %v7242_v10 = vpop.eup %7241  ;;  %v4670_v61 = vsub.f32 2.0, %v4654_v56  ;;  %v4655_v29 = vmul.f32 %v7240_v36, %v4623_v16  ;;  %7267 = vrcp.f32 %v4829_v43  ;;  %v10706_v16 = vld [vmem:[#allocation3 + $0xa0] sm:$0xff] }
 0xaaf   : > { %v7244_v4 = vpop.eup %7243  ;;  %v4668_v60 = vsub.f32 2.0, %v4652_v6  ;;  %v4653_v26 = vmul.f32 %v7242_v10, %v4621_v39  ;;  %7269 = vrcp.f32 %v10699_v51 }
 0xab0   : > { %v7246_v33 = vpop.eup %7245  ;;  %v4686_v63 = vmul.f32 %v7236_v52, %v4670_v61  ;;  %v4671_v62 = vsub.f32 2.0, %v4655_v29  ;;  %v4657_v48 = vmul.f32 %v7244_v4, %v4625_v22  ;;  %7271 = vrcp.f32 %v4831_v50  ;;  %v10716_v29 = vld [vmem:[#allocation3 + $0xc0] sm:$0xff] }
 0xab1   : > { %v7248_v0 = vpop.eup %7247  ;;  %v4684_v49 = vmul.f32 %v7238_v41, %v4668_v60  ;;  %v4669_v5 = vsub.f32 2.0, %v4653_v26  ;;  %v4656_v31 = vmul.f32 %v7246_v33, %v4624_v1  ;;  %7273 = vrcp.f32 %v10702_v23 }
 0xab2   : > { %v7250_v59 = vpop.eup %7249  ;;  %4728 = vperm.xlu1 %7234, %v4686_v63   ;;  %v4687_v19 = vmul.f32 %v7240_v36, %v4671_v62  ;;  %v4673_v53 = vsub.f32 2.0, %v4657_v48  ;;  %v4659_v11 = vmul.f32 %v7248_v0, %v4627_v37  ;;  %7275 = vrcp.f32 %v4833_v2  ;;  %v4839_v48 = vld [vmem:[#allocation3 + $0xd8] sm:$0xff] }
 0xab3   : > { %v7252_v12 = vpop.eup %7251  ;;  %4718 = vperm.xlu0 %7233, %v4684_v49   ;;  %v4685_v57 = vmul.f32 %v7242_v10, %v4669_v5  ;;  %v4672_v30 = vsub.f32 2.0, %v4656_v31  ;;  %v4658_v44 = vmul.f32 %v7250_v59, %v4626_v25  ;;  %7277 = vrcp.f32 %v10706_v16 }
 0xab4   : > { %v7254_v35 = vpop.eup %7253  ;;  %v4689_v24 = vmul.f32 %v7244_v4, %v4673_v53  ;;  %v4675_v42 = vsub.f32 2.0, %v4659_v11  ;;  %v4661_v8 = vmul.f32 %v7252_v12, %v4629_v7 }
 0xab5   : > { %v7256_v32 = vpop.eup %7255  ;;  %v4688_v45 = vmul.f32 %v7246_v33, %v4672_v30  ;;  %v4674_v27 = vsub.f32 2.0, %v4658_v44  ;;  %v4660_v14 = vmul.f32 %v7254_v35, %v4628_v40  ;;  %v4835_v40 = vld [vmem:[#allocation3 + $0xb8] sm:$0xff]  ;;  %v10724_v30 = vld [vmem:[#allocation3 + $0xe0] sm:$0xff] }
 0xab6   : > { %4733 = vperm.xlu1 %7234, %v4687_v19   ;;  %v7258_v34 = vpop.eup %7257  ;;  %v4691_v55 = vmul.f32 %v7248_v0, %v4675_v42  ;;  %v4677_v13 = vsub.f32 2.0, %v4661_v8  ;;  %v4663_v58 = vmul.f32 %v7256_v32, %v4631_v38  ;;  %7279 = vrcp.f32 %v4835_v40  ;;  %v10720_v0 = vld [vmem:[#allocation3 + $0xd0] sm:$0xff] }
 0xab7   : > { %4723 = vperm.xlu0 %7233, %v4685_v57   ;;  %v7260_v46 = vpop.eup %7259  ;;  %v4690_v15 = vmul.f32 %v7250_v59, %v4674_v27  ;;  %v4676_v54 = vsub.f32 2.0, %v4660_v14  ;;  %v4662_v18 = vmul.f32 %v7258_v34, %v10684_v17  ;;  %v10711_v17 = vld [vmem:[#allocation3 + $0xb0] sm:$0xff] }
 0xab8   : > { %v7262_v47 = vpop.eup %7261  ;;  %v4693_v3 = vmul.f32 %v7252_v12, %v4677_v13  ;;  %v4679_v39 = vsub.f32 2.0, %v4663_v58  ;;  %v4665_v22 = vmul.f32 %v7260_v46, %v10687_v20  ;;  %7281 = vrcp.f32 %v10711_v17  ;;  %v4841_v12 = vld [vmem:[#allocation3 + $0xe8] sm:$0xff]  ;;  %v10728_v27 = vld [vmem:[#allocation3 + $0xf0] sm:$0xff] }
 0xab9   : > { %v7264_v1 = vpop.eup %7263  ;;  %v4692_v37 = vmul.f32 %v7254_v35, %v4676_v54  ;;  %v4678_v25 = vsub.f32 2.0, %v4662_v18  ;;  %v4664_v7 = vmul.f32 %v7262_v47, %v10689_v28  ;;  %v4837_v28 = vld [vmem:[#allocation3 + $0xc8] sm:$0xff]  ;;  %v10732_v54 = vld [vmem:[#allocation3 + $0x100] sm:$0xff] }
 0xaba   : > { %4743 = vperm.xlu1 %7234, %v4689_v24   ;;  %v7266_v38 = vpop.eup %7265  ;;  %v4695_v52 = vmul.f32 %v7256_v32, %v4679_v39  ;;  %v4681_v41 = vsub.f32 2.0, %v4665_v22  ;;  %v4667_v56 = vmul.f32 %v7264_v1, %v10693_v9  ;;  %7283 = vrcp.f32 %v4837_v28  ;;  %v4843_v32 = vld [vmem:[#allocation3 + $0xf8] sm:$0xff] }
 0xabb   : > { %4738 = vperm.xlu0 %7233, %v4688_v45   ;;  %v7268_v20 = vpop.eup %7267  ;;  %v4694_v36 = vmul.f32 %v7258_v34, %v4678_v25  ;;  %v4680_v6 = vsub.f32 2.0, %v4664_v7  ;;  %v4666_v10 = vmul.f32 %v7266_v38, %v10695_v21  ;;  %7285 = vrcp.f32 %v10716_v29  ;;  %v10736_v25 = vld [vmem:[#allocation3 + $0x110] sm:$0xff] }
 0xabc   : > { %v7270_v61 = vpop.eup %7269  ;;  %v4697_v4 = vmul.f32 %v7260_v46, %v4681_v41  ;;  %v4683_v60 = vsub.f32 2.0, %v4667_v56  ;;  %v4861_v26 = vmul.f32 %v7268_v20, %v4829_v43  ;;  %7287 = vrcp.f32 %v4839_v48  ;;  %v5102_v46 = vld [vmem:[#allocation3 + $0x108] sm:$0xff] }
 0xabd   : > { %v7272_v33 = vpop.eup %7271  ;;  %v4696_v9 = vmul.f32 %v7262_v47, %v4680_v6  ;;  %v4682_v63 = vsub.f32 2.0, %v4666_v10  ;;  %v4860_v62 = vmul.f32 %v7270_v61, %v10699_v51  ;;  %7289 = vrcp.f32 %v10720_v0  ;;  %v10740_v6 = vld [vmem:[#allocation3 + $0x120] sm:$0xff] }
 0xabe   : > { %4753 = vperm.xlu1 %7234, %v4691_v55   ;;  %v7274_v21 = vpop.eup %7273  ;;  %v4699_v49 = vmul.f32 %v7264_v1, %v4683_v60  ;;  %v4877_v5 = vsub.f32 2.0, %v4861_v26  ;;  %v4863_v31 = vmul.f32 %v7272_v33, %v4831_v50  ;;  %7291 = vrcp.f32 %v4841_v12  ;;  %v5104_v1 = vld [vmem:[#allocation3 + $0x118] sm:$0xff] }
 0xabf   : > { %4748 = vperm.xlu0 %7233, %v4690_v15   ;;  %v7276_v59 = vpop.eup %7275  ;;  %v4698_v19 = vmul.f32 %v7266_v38, %v4682_v63  ;;  %v4876_v53 = vsub.f32 2.0, %v4860_v62  ;;  %v4862_v11 = vmul.f32 %v7274_v21, %v10702_v23  ;;  %7293 = vrcp.f32 %v10724_v30  ;;  %v10744_v63 = vld [vmem:[#allocation3 + $0x130] sm:$0xff] }
 0xac0   : > { %v7278_v57 = vpop.eup %7277  ;;  %v4893_v44 = vmul.f32 %v7268_v20, %v4877_v5  ;;  %v4879_v43 = vsub.f32 2.0, %v4863_v31  ;;  %v4865_v35 = vmul.f32 %v7276_v59, %v4833_v2  ;;  %7295 = vrcp.f32 %v4843_v32  ;;  %v5106_v20 = vld [vmem:[#allocation3 + $0x128] sm:$0xff] }
 0xac1   : > { %v4892_v24 = vmul.f32 %v7270_v61, %v4876_v53  ;;  %v4878_v42 = vsub.f32 2.0, %v4862_v11  ;;  %v4864_v8 = vmul.f32 %v7278_v57, %v10706_v16  ;;  %7297 = vrcp.f32 %v10728_v27  ;;  %v10748_v53 = vld [vmem:[#allocation3 + $0x140] sm:$0xff] }
 0xac2   : > { %4763 = vperm.xlu1 %7234, %v4693_v3   ;;  %v4895_v14 = vmul.f32 %v7272_v33, %v4879_v43  ;;  %v4881_v50 = vsub.f32 2.0, %v4865_v35  ;;  %7299 = vrcp.f32 %v5102_v46  ;;  %v5108_v33 = vld [vmem:[#allocation3 + $0x138] sm:$0xff] }
 0xac3   : > { %4758 = vperm.xlu0 %7233, %v4692_v37   ;;  %v7280_v51 = vpop.eup %7279  ;;  %v4894_v55 = vmul.f32 %v7274_v21, %v4878_v42  ;;  %v4880_v13 = vsub.f32 2.0, %v4864_v8  ;;  %7301 = vrcp.f32 %v10732_v54  ;;  %v10752_v42 = vld [vmem:[#allocation3 + $0x150] sm:$0xff] }
 0xac4   : > { %v4867_v34 = vmul.f32 %v7280_v51, %v4835_v40  ;;  %v4897_v18 = vmul.f32 %v7276_v59, %v4881_v50  ;;  %7303 = vrcp.f32 %v5104_v1  ;;  %v5110_v59 = vld [vmem:[#allocation3 + $0x148] sm:$0xff] }
 0xac5   : > { %v7282_v45 = vpop.eup %7281  ;;  %v4896_v3 = vmul.f32 %v7278_v57, %v4880_v13  ;;  %7305 = vrcp.f32 %v10736_v25  ;;  %v10756_v13 = vld [vmem:[#allocation3 + $0x160] sm:$0xff] }
 0xac6   : > { %4773 = vperm.xlu1 %7234, %v4695_v52   ;;  %v4866_v58 = vmul.f32 %v7282_v45, %v10711_v17  ;;  %v4883_v2 = vsub.f32 2.0, %v4867_v34  ;;  %7307 = vrcp.f32 %v5106_v20 }
 0xac7   : > { %4768 = vperm.xlu0 %7233, %v4694_v36   ;;  %v7284_v23 = vpop.eup %7283  ;;  %7309 = vrcp.f32 %v10740_v6 }
 0xac8   : > { %v7286_v15 = vpop.eup %7285  ;;  %v4869_v47 = vmul.f32 %v7284_v23, %v4837_v28  ;;  %v4882_v39 = vsub.f32 2.0, %v4866_v58  ;;  %v4899_v7 = vmul.f32 %v7280_v51, %v4883_v2  ;;  %7311 = vrcp.f32 %v5108_v33  ;;  %v5112_v51 = vld [vmem:[#allocation3 + $0x158] sm:$0xff] }
 0xac9   : > { %v7288_v16 = vpop.eup %7287  ;;  %v4868_v22 = vmul.f32 %v7286_v15, %v10716_v29  ;;  %7313 = vrcp.f32 %v10744_v63 }
 0xaca   : > { %4783 = vperm.xlu1 %7234, %v4697_v4   ;;  %v7290_v37 = vpop.eup %7289  ;;  %v4885_v40 = vsub.f32 2.0, %v4869_v47  ;;  %v4871_v38 = vmul.f32 %v7288_v16, %v4839_v48  ;;  %v4898_v52 = vmul.f32 %v7282_v45, %v4882_v39  ;;  %7315 = vrcp.f32 %v5110_v59  ;;  %v10760_v39 = vld [vmem:[#allocation3 + $0x170] sm:$0xff] }
 0xacb   : > { %4778 = vperm.xlu0 %7233, %v4696_v9   ;;  %v7292_v17 = vpop.eup %7291  ;;  %v4884_v41 = vsub.f32 2.0, %v4868_v22  ;;  %v4870_v56 = vmul.f32 %v7290_v37, %v10720_v0  ;;  %7317 = vrcp.f32 %v10748_v53 }
 0xacc   : > { %v7294_v36 = vpop.eup %7293  ;;  %v4901_v10 = vmul.f32 %v7284_v23, %v4885_v40  ;;  %v4887_v28 = vsub.f32 2.0, %v4871_v38  ;;  %v4873_v61 = vmul.f32 %v7292_v17, %v4841_v12  ;;  %7319 = vrcp.f32 %v5112_v51  ;;  %v5114_v23 = vld [vmem:[#allocation3 + $0x168] sm:$0xff] }
 0xacd   : > { %v7296_v29 = vpop.eup %7295  ;;  %v4900_v4 = vmul.f32 %v7286_v15, %v4884_v41  ;;  %v4886_v60 = vsub.f32 2.0, %v4870_v56  ;;  %v4872_v26 = vmul.f32 %v7294_v36, %v10724_v30  ;;  %7321 = vrcp.f32 %v10752_v42  ;;  %v5375_v41 = vld [vmem:[#allocation3 + $0x188] sm:$0xff] }
 0xace   : > { %4793 = vperm.xlu1 %7234, %v4699_v49   ;;  %v7298_v9 = vpop.eup %7297  ;;  %v4903_v62 = vmul.f32 %v7288_v16, %v4887_v28  ;;  %v4889_v48 = vsub.f32 2.0, %v4873_v61  ;;  %v4875_v21 = vmul.f32 %v7296_v29, %v4843_v32  ;;  %7323 = vrcp.f32 %v5114_v23  ;;  %v5116_v16 = vld [vmem:[#allocation3 + $0x178] sm:$0xff] }
 0xacf   : > { %4788 = vperm.xlu0 %7233, %v4698_v19   ;;  %v7300_v0 = vpop.eup %7299  ;;  %v4902_v49 = vmul.f32 %v7290_v37, %v4886_v60  ;;  %v4888_v5 = vsub.f32 2.0, %v4872_v26  ;;  %v4874_v31 = vmul.f32 %v7298_v9, %v10728_v27  ;;  %7325 = vrcp.f32 %v10756_v13  ;;  %v5377_v60 = vld [vmem:[#allocation3 + $0x198] sm:$0xff] }
 0xad0   : > { %v7302_v19 = vpop.eup %7301  ;;  %v4905_v11 = vmul.f32 %v7292_v17, %v4889_v48  ;;  %v4891_v12 = vsub.f32 2.0, %v4875_v21  ;;  %v5134_v57 = vmul.f32 %v7300_v0, %v5102_v46  ;;  %7327 = vrcp.f32 %v5116_v16  ;;  %v5374_v17 = vld [vmem:[#allocation3 + $0x180] sm:$0xff] }
 0xad1   : > { %v7304_v30 = vpop.eup %7303  ;;  %v4890_v43 = vsub.f32 2.0, %v4874_v31  ;;  %v5133_v35 = vmul.f32 %v7302_v19, %v10732_v54  ;;  %7329 = vrcp.f32 %v10760_v39 }
 0xad2   : > { %4931 = vperm.xlu1 %7234, %v4893_v44   ;;  %v4904_v44 = vmul.f32 %v7294_v36, %v4888_v5  ;;  %v4907_v8 = vmul.f32 %v7296_v29, %v4891_v12  ;;  %v5150_v32 = vsub.f32 2.0, %v5134_v57  ;;  %v5136_v45 = vmul.f32 %v7304_v30, %v5104_v1  ;;  %v5376_v29 = vld [vmem:[#allocation3 + $0x190] sm:$0xff]  ;;  %v5379_v5 = vld [vmem:[#allocation3 + $0x1a8] sm:$0xff] }
 0xad3   : > { %4926 = vperm.xlu0 %7233, %v4892_v24   ;;  %v7306_v24 = vpop.eup %7305  ;;  %v5149_v50 = vsub.f32 2.0, %v5133_v35  ;;  %7331 = vrcp.f32 %v5374_v17 }
 0xad4   : > { %v7308_v27 = vpop.eup %7307  ;;  %v5135_v34 = vmul.f32 %v7306_v24, %v10736_v25  ;;  %v5166_v58 = vmul.f32 %v7300_v0, %v5150_v32  ;;  %v5152_v46 = vsub.f32 2.0, %v5136_v45  ;;  %7333 = vrcp.f32 %v5375_v41  ;;  %v5378_v0 = vld [vmem:[#allocation3 + $0x1a0] sm:$0xff] }
 0xad5   : > { %v5138_v15 = vmul.f32 %v7308_v27, %v5106_v20  ;;  %7335 = vrcp.f32 %v5376_v29 }
 0xad6   : > { %4941 = vperm.xlu1 %7234, %v4895_v14   ;;  %v4906_v14 = vmul.f32 %v7298_v9, %v4890_v43  ;;  %v5151_v2 = vsub.f32 2.0, %v5135_v34  ;;  %v5168_v22 = vmul.f32 %v7304_v30, %v5152_v46  ;;  %7337 = vrcp.f32 %v5377_v60  ;;  %v5380_v30 = vld [vmem:[#allocation3 + $0x1b0] sm:$0xff] }
 0xad7   : > { %4936 = vperm.xlu0 %7233, %v4894_v55   ;;  %v7310_v55 = vpop.eup %7309  ;;  %v5154_v1 = vsub.f32 2.0, %v5138_v15  ;;  %7339 = vrcp.f32 %v5378_v0 }
 0xad8   : > { %v7312_v54 = vpop.eup %7311  ;;  %v5137_v47 = vmul.f32 %v7310_v55, %v10740_v6  ;;  %7341 = vrcp.f32 %v5379_v5 }
 0xad9   : > { %v5140_v37 = vmul.f32 %v7312_v54, %v5108_v33  ;;  %v5170_v56 = vmul.f32 %v7308_v27, %v5154_v1  ;;  %7343 = vrcp.f32 %v5380_v30 }
 0xada   : > { %4951 = vperm.xlu1 %7234, %v4897_v18   ;;  %v5165_v18 = vmul.f32 %v7302_v19, %v5149_v50  ;;  %v5153_v40 = vsub.f32 2.0, %v5137_v47 }
 0xadb   : > { %4946 = vperm.xlu0 %7233, %v4896_v3   ;;  %v7314_v3 = vpop.eup %7313  ;;  %v5156_v20 = vsub.f32 2.0, %v5140_v37 }
 0xadc   : > { %v7316_v25 = vpop.eup %7315  ;;  %v5139_v38 = vmul.f32 %v7314_v3, %v10744_v63 }
 0xadd   : > { %v5142_v36 = vmul.f32 %v7316_v25, %v5110_v59  ;;  %v5172_v26 = vmul.f32 %v7312_v54, %v5156_v20 }
 0xade   : > { %4961 = vperm.xlu1 %7234, %v4899_v7   ;;  %v5167_v7 = vmul.f32 %v7306_v24, %v5151_v2  ;;  %v5155_v28 = vsub.f32 2.0, %v5139_v38 }
 0xadf   : > { %4956 = vperm.xlu0 %7233, %v4898_v52   ;;  %v7318_v52 = vpop.eup %7317  ;;  %v5158_v33 = vsub.f32 2.0, %v5142_v36 }
 0xae0   : > { %v7320_v6 = vpop.eup %7319  ;;  %v5141_v61 = vmul.f32 %v7318_v52, %v10748_v53 }
 0xae1   : > { %v5144_v9 = vmul.f32 %v7320_v6, %v5112_v51  ;;  %v5174_v31 = vmul.f32 %v7316_v25, %v5158_v33  ;;  %v4703_v33 = vld [vmem:[#allocation4 + $0x18] sm:$0xff] }
 0xae2   : > { %4971 = vperm.xlu1 %7234, %v4901_v10   ;;  %v5169_v10 = vmul.f32 %v7310_v55, %v5153_v40  ;;  %v5157_v48 = vsub.f32 2.0, %v5141_v61  ;;  %v4700_v61 = vld [vmem:[#allocation4] sm:$0xff] }
 0xae3   : > { %4966 = vperm.xlu0 %7233, %v4900_v4   ;;  %v7322_v4 = vpop.eup %7321  ;;  %v5160_v59 = vsub.f32 2.0, %v5144_v9  ;;  %v4701_v9 = vld [vmem:[#allocation4 + $0x8] sm:$0xff] }
 0xae4   : > { %v7324_v63 = vpop.eup %7323  ;;  %v5143_v21 = vmul.f32 %v7322_v4, %v10752_v42 }
 0xae5   : > { %v5146_v19 = vmul.f32 %v7324_v63, %v5114_v23  ;;  %v5176_v43 = vmul.f32 %v7320_v6, %v5160_v59 }
 0xae6   : > { %4981 = vperm.xlu1 %7234, %v4903_v62   ;;  %v5171_v62 = vmul.f32 %v7314_v3, %v5155_v28  ;;  %v5159_v12 = vsub.f32 2.0, %v5143_v21  ;;  %v4702_v28 = vld [vmem:[#allocation4 + $0x10] sm:$0xff] }
 0xae7   : > { %4976 = vperm.xlu0 %7233, %v4902_v49   ;;  %v7326_v49 = vpop.eup %7325  ;;  %v5162_v35 = vsub.f32 2.0, %v5146_v19 }
 0xae8   : > { %v7328_v53 = vpop.eup %7327  ;;  %v5145_v57 = vmul.f32 %v7326_v49, %v10756_v13  ;;  %v5175_v42 = vmul.f32 %v7322_v4, %v5159_v12 }
 0xae9   : > { %v5148_v51 = vmul.f32 %v7328_v53, %v5116_v16  ;;  %v5178_v27 = vmul.f32 %v7324_v63, %v5162_v35  ;;  %v4708_v35 = vld [vmem:[#allocation4 + $0x40] sm:$0xff] }
 0xaea   : > { %4991 = vperm.xlu1 %7234, %v4905_v11   ;;  %v5173_v11 = vmul.f32 %v7318_v52, %v5157_v48 }
 0xaeb   : > { %4986 = vperm.xlu0 %7233, %v4904_v44   ;;  %v7330_v44 = vpop.eup %7329 }
 0xaec   : > { %v7332_v24 = vpop.eup %7331  ;;  %v5147_v32 = vmul.f32 %v7330_v44, %v10760_v39 }
 0xaed   : > { %v7334_v45 = vpop.eup %7333  ;;  %v5406_v50 = vmul.f32 %v7332_v24, %v5374_v17 }
 0xaee   : > { %5001 = vperm.xlu1 %7234, %v4907_v8   ;;  %v5161_v8 = vsub.f32 2.0, %v5145_v57  ;;  %v7336_v34 = vpop.eup %7335  ;;  %v5163_v55 = vsub.f32 2.0, %v5147_v32  ;;  %v5407_v13 = vmul.f32 %v7334_v45, %v5375_v41  ;;  %v4711_v32 = vld [vmem:[#allocation4 + $0x58] sm:$0xff] }
 0xaef   : > { %4996 = vperm.xlu0 %7233, %v4906_v14   ;;  %v5164_v14 = vsub.f32 2.0, %v5148_v51  ;;  %v5422_v15 = vsub.f32 2.0, %v5406_v50  ;;  %v5408_v54 = vmul.f32 %v7336_v34, %v5376_v29 }
 0xaf0   : > { %v5177_v23 = vmul.f32 %v7326_v49, %v5161_v8  ;;  %v5179_v2 = vmul.f32 %v7330_v44, %v5163_v55  ;;  %v5423_v47 = vsub.f32 2.0, %v5407_v13  ;;  %v4704_v49 = vld [vmem:[#allocation4 + $0x20] sm:$0xff] }
 0xaf1   : > { %v5180_v46 = vmul.f32 %v7328_v53, %v5164_v14  ;;  %v5438_v39 = vmul.f32 %v7332_v24, %v5422_v15  ;;  %v4707_v53 = vld [vmem:[#allocation4 + $0x38] sm:$0xff]  ;;  %v4712_v55 = vld [vmem:[#allocation4 + $0x60] sm:$0xff] }
 0xaf2   : > { %5204 = vperm.xlu1 %7234, %v5166_v58   ;;  %v7338_v58 = vpop.eup %7337  ;;  %v5439_v25 = vmul.f32 %v7334_v45, %v5423_v47  ;;  %v4710_v45 = vld [vmem:[#allocation4 + $0x50] sm:$0xff] }
 0xaf3   : > { %5199 = vperm.xlu0 %7233, %v5165_v18   ;;  %v7340_v18 = vpop.eup %7339  ;;  %v5409_v16 = vmul.f32 %v7338_v58, %v5377_v60 }
 0xaf4   : > { %v7342_v3 = vpop.eup %7341  ;;  %v5410_v1 = vmul.f32 %v7340_v18, %v5378_v0  ;;  %v4705_v0 = vld [vmem:[#allocation4 + $0x28] sm:$0xff] }
 0xaf5   : > { %v7344_v37 = vpop.eup %7343  ;;  %v5411_v40 = vmul.f32 %v7342_v3, %v5379_v5 }
 0xaf6   : > { %5214 = vperm.xlu1 %7234, %v5168_v22   ;;  %v5424_v22 = vsub.f32 2.0, %v5408_v54  ;;  %v5426_v17 = vsub.f32 2.0, %v5410_v1  ;;  %v5412_v52 = vmul.f32 %v7344_v37, %v5380_v30  ;;  %v4715_v54 = vld [vmem:[#allocation4 + $0x78] sm:$0xff] }
 0xaf7   : > { %5209 = vperm.xlu0 %7233, %v5167_v7   ;;  %v5425_v7 = vsub.f32 2.0, %v5409_v16 }
 0xaf8   : > { %v5440_v38 = vmul.f32 %v7336_v34, %v5424_v22  ;;  %v5442_v20 = vmul.f32 %v7340_v18, %v5426_v17  ;;  %v5428_v36 = vsub.f32 2.0, %v5412_v52  ;;  %v4714_v18 = vld [vmem:[#allocation4 + $0x70] sm:$0xff]  ;;  %v4908_v22 = vld [vmem:[#allocation4 + $0x80] sm:$0xff] }
 0xaf9   : > { %v5441_v41 = vmul.f32 %v7338_v58, %v5425_v7 }
 0xafa   : > { %5224 = vperm.xlu1 %7234, %v5170_v56   ;;  %v5427_v56 = vsub.f32 2.0, %v5411_v40  ;;  %v4911_v40 = vld [vmem:[#allocation4 + $0x98] sm:$0xff] }
 0xafb   : > { %5219 = vperm.xlu0 %7233, %v5169_v10   ;;  %v5444_v10 = vmul.f32 %v7344_v37, %v5428_v36  ;;  %v4912_v36 = vld [vmem:[#allocation4 + $0xa0] sm:$0xff] }
 0xafc   : > { %v5443_v6 = vmul.f32 %v7342_v3, %v5427_v56 }
 0xafe   : > { %5234 = vperm.xlu1 %7234, %v5172_v26  }
 0xaff   : > { %5229 = vperm.xlu0 %7233, %v5171_v62  }
 0xb02   : > { %5244 = vperm.xlu1 %7234, %v5174_v31  }
 0xb03   : > { %5239 = vperm.xlu0 %7233, %v5173_v11   ;;  %v4706_v11 = vld [vmem:[#allocation4 + $0x30] sm:$0xff] }
 0xb06   : > { %5254 = vperm.xlu1 %7234, %v5176_v43   ;;  %v4709_v43 = vld [vmem:[#allocation4 + $0x48] sm:$0xff] }
 0xb07   : > { %5249 = vperm.xlu0 %7233, %v5175_v42  }
 0xb0a   : > { %5264 = vperm.xlu1 %7234, %v5178_v27  }
 0xb0b   : > { %5259 = vperm.xlu0 %7233, %v5177_v23   ;;  %v4713_v23 = vld [vmem:[#allocation4 + $0x68] sm:$0xff] }
 0xb0e   : > { %5274 = vperm.xlu1 %7234, %v5180_v46  }
 0xb0f   : > { %5269 = vperm.xlu0 %7233, %v5179_v2  }
 0xb12   : > { %5472 = vperm.xlu1 %7234, %v5438_v39   ;;  %v4909_v39 = vld [vmem:[#allocation4 + $0x88] sm:$0xff] }
 0xb13   : > { %5477 = vperm.xlu0 %7233, %v5439_v25  }
 0xb16   : > { %5482 = vperm.xlu1 %7234, %v5440_v38   ;;  %v4910_v38 = vld [vmem:[#allocation4 + $0x90] sm:$0xff] }
 0xb17   : > { %5487 = vperm.xlu0 %7233, %v5441_v41  }
 0xb1a   : > { %5492 = vperm.xlu1 %7234, %v5442_v20   ;;  %v4913_v20 = vld [vmem:[#allocation4 + $0xa8] sm:$0xff] }
 0xb1b   : > { %5497 = vperm.xlu0 %7233, %v5443_v6  }
 0xb1e   : > { %5502 = vperm.xlu1 %7234, %v5444_v10   ;;  %v5382_v10 = vld [vmem:[#allocation3 + $0x1c0] sm:$0xff] }
 0xb1f   : > { %7345 = vrcp.f32 %v5382_v10 }
 0xb2d   : > { %v4729_v29 = vpop.permute.xlu1 %4728 }
 0xb2e   : > { %v4798_v4 = vmul.f32 %v4729_v29, %v4702_v28  ;;  %v4719_v60 = vpop.permute.xlu0 %4718 }
 0xb2f   : > { %v4796_v26 = vmul.f32 %v4719_v60, %v4700_v61  ;;  %v4914_v60 = vld [vmem:[#allocation4 + $0xb0] sm:$0xff] }
 0xb30   : > { %4814 = vst.msk [vmem:[%s7760_s1 + $0x10] sm:$0xff] %vm821_vm2, %v4798_v4  ;;  %v4915_v4 = vld [vmem:[#allocation4 + $0xb8] sm:$0xff] }
 0xb31   : > { %4812 = vst.msk [vmem:[%s7760_s1] sm:$0xff] %vm821_vm2, %v4796_v26  ;;  %v4734_v63 = vpop.permute.xlu1 %4733 }
 0xb32   : > { %v4799_v62 = vmul.f32 %v4734_v63, %v4703_v33  ;;  %v4724_v48 = vpop.permute.xlu0 %4723  ;;  %v5384_v33 = vld [vmem:[#allocation3 + $0x1d0] sm:$0xff] }
 0xb33   : > { %v4797_v21 = vmul.f32 %v4724_v48, %v4701_v9  ;;  %7347 = vrcp.f32 %v5384_v33 }
 0xb34   : > { %4815 = vst.msk [vmem:[%s7760_s1 + $0x18] sm:$0xff] %vm821_vm2, %v4799_v62  ;;  %v5381_v62 = vld [vmem:[#allocation3 + $0x1b8] sm:$0xff] }
 0xb35   : > { %4813 = vst.msk [vmem:[%s7760_s1 + $0x8] sm:$0xff] %vm821_vm2, %v4797_v21  ;;  %v4744_v5 = vpop.permute.xlu1 %4743  ;;  %v4917_v21 = vld [vmem:[#allocation4 + $0xc8] sm:$0xff]  ;;  %7349 = vrcp.f32 %v5381_v62 }
 0xb36   : > { %v4801_v31 = vmul.f32 %v4744_v5, %v4705_v0  ;;  %v4739_v59 = vpop.permute.xlu0 %4738  ;;  %v4916_v0 = vld [vmem:[#allocation4 + $0xc0] sm:$0xff] }
 0xb37   : > { %v4800_v19 = vmul.f32 %v4739_v59, %v4704_v49  ;;  %v5386_v5 = vld [vmem:[#allocation3 + $0x1e0] sm:$0xff] }
 0xb38   : > { %4817 = vst.msk [vmem:[%s7760_s1 + $0x28] sm:$0xff] %vm821_vm2, %v4801_v31  ;;  %7351 = vrcp.f32 %v5386_v5 }
 0xb39   : > { %4816 = vst.msk [vmem:[%s7760_s1 + $0x20] sm:$0xff] %vm821_vm2, %v4800_v19  ;;  %v4754_v12 = vpop.permute.xlu1 %4753  ;;  %v10808_v19 = vld [vmem:[#allocation3 + $0x1c8] sm:$0xff] }
 0xb3a   : > { %v4803_v57 = vmul.f32 %v4754_v12, %v4707_v53  ;;  %v4749_v30 = vpop.permute.xlu0 %4748  ;;  %v4918_v12 = vld [vmem:[#allocation4 + $0xd0] sm:$0xff]  ;;  %7353 = vrcp.f32 %v10808_v19 }
 0xb3b   : > { %v4802_v44 = vmul.f32 %v4749_v30, %v4706_v11  ;;  %v4919_v11 = vld [vmem:[#allocation4 + $0xd8] sm:$0xff]  ;;  %v5388_v30 = vld [vmem:[#allocation3 + $0x1f0] sm:$0xff] }
 0xb3c   : > { %4819 = vst.msk [vmem:[%s7760_s1 + $0x38] sm:$0xff] %vm821_vm2, %v4803_v57  ;;  %7355 = vrcp.f32 %v5388_v30 }
 0xb3d   : > { %4818 = vst.msk [vmem:[%s7760_s1 + $0x30] sm:$0xff] %vm821_vm2, %v4802_v44  ;;  %v4764_v51 = vpop.permute.xlu1 %4763 }
 0xb3e   : > { %v4805_v24 = vmul.f32 %v4764_v51, %v4709_v43  ;;  %v4759_v42 = vpop.permute.xlu0 %4758 }
 0xb3f   : > { %v4804_v8 = vmul.f32 %v4759_v42, %v4708_v35  ;;  %v5385_v35 = vld [vmem:[#allocation3 + $0x1d8] sm:$0xff]  ;;  %v4920_v42 = vld [vmem:[#allocation4 + $0xe0] sm:$0xff] }
 0xb40   : > { %4821 = vst.msk [vmem:[%s7760_s1 + $0x48] sm:$0xff] %vm821_vm2, %v4805_v24  ;;  %v4921_v24 = vld [vmem:[#allocation4 + $0xe8] sm:$0xff]  ;;  %7357 = vrcp.f32 %v5385_v35 }
 0xb41   : > { %4820 = vst.msk [vmem:[%s7760_s1 + $0x40] sm:$0xff] %vm821_vm2, %v4804_v8  ;;  %v4774_v27 = vpop.permute.xlu1 %4773  ;;  %v7346_v8 = vpop.eup %7345 }
 0xb42   : > { %v4807_v14 = vmul.f32 %v4774_v27, %v4711_v32  ;;  %v4769_v50 = vpop.permute.xlu0 %4768 }
 0xb43   : > { %v4806_v34 = vmul.f32 %v4769_v50, %v4710_v45 }
 0xb44   : > { %4823 = vst.msk [vmem:[%s7760_s1 + $0x58] sm:$0xff] %vm821_vm2, %v4807_v14  ;;  %v5387_v14 = vld [vmem:[#allocation3 + $0x1e8] sm:$0xff] }
 0xb45   : > { %4822 = vst.msk [vmem:[%s7760_s1 + $0x50] sm:$0xff] %vm821_vm2, %v4806_v34  ;;  %v4784_v13 = vpop.permute.xlu1 %4783  ;;  %v4923_v34 = vld [vmem:[#allocation4 + $0xf8] sm:$0xff]  ;;  %7359 = vrcp.f32 %v5387_v14 }
 0xb46   : > { %v4809_v58 = vmul.f32 %v4784_v13, %v4713_v23  ;;  %v4779_v46 = vpop.permute.xlu0 %4778  ;;  %v4922_v23 = vld [vmem:[#allocation4 + $0xf0] sm:$0xff]  ;;  %v7348_v13 = vpop.eup %7347 }
 0xb47   : > { %v4808_v15 = vmul.f32 %v4779_v46, %v4712_v55  ;;  %v5414_v55 = vmul.f32 %v7346_v8, %v5382_v10  ;;  %v7350_v46 = vpop.eup %7349 }
 0xb48   : > { %4825 = vst.msk [vmem:[%s7760_s1 + $0x68] sm:$0xff] %vm821_vm2, %v4809_v58 }
 0xb49   : > { %4824 = vst.msk [vmem:[%s7760_s1 + $0x60] sm:$0xff] %vm821_vm2, %v4808_v15  ;;  %v4794_v2 = vpop.permute.xlu1 %4793 }
 0xb4a   : > { %v4811_v47 = vmul.f32 %v4794_v2, %v4715_v54  ;;  %v4789_v16 = vpop.permute.xlu0 %4788 }
 0xb4b   : > { %v4810_v3 = vmul.f32 %v4789_v16, %v4714_v18  ;;  %v5389_v18 = vld [vmem:[#allocation3 + $0x1f8] sm:$0xff]  ;;  %v5181_v16 = vld [vmem:[#allocation4 + $0x100] sm:$0xff] }
 0xb4c   : > { %4827 = vst.msk [vmem:[%s7760_s1 + $0x78] sm:$0xff] %vm821_vm2, %v4811_v47  ;;  %v5182_v47 = vld [vmem:[#allocation4 + $0x108] sm:$0xff]  ;;  %7361 = vrcp.f32 %v5389_v18 }
 0xb4d   : > { %4826 = vst.msk [vmem:[%s7760_s1 + $0x70] sm:$0xff] %vm821_vm2, %v4810_v3  ;;  %v4932_v1 = vpop.permute.xlu1 %4931  ;;  %v5430_v3 = vsub.f32 2.0, %v5414_v55 }
 0xb4e   : > { %v5005_v37 = vmul.f32 %v4932_v1, %v4909_v39  ;;  %v4927_v25 = vpop.permute.xlu0 %4926  ;;  %v5416_v39 = vmul.f32 %v7348_v13, %v5384_v33 }
 0xb4f   : > { %v5004_v7 = vmul.f32 %v4927_v25, %v4908_v22  ;;  %v7352_v22 = vpop.eup %7351 }
 0xb50   : > { %5038 = vrot.lane.b32.xlu1 %v5005_v37, %s7490_s20  ;;  %v5413_v37 = vmul.f32 %v7350_v46, %v5381_v62  ;;  %v7354_v25 = vpop.eup %7353 }
 0xb51   : > { %5036 = vrot.lane.b32.xlu0 %v5004_v7, %s7490_s20  ;;  %v4942_v17 = vpop.permute.xlu1 %4941  ;;  %v5415_v10 = vmul.f32 %v7354_v25, %v10808_v19 }
 0xb52   : > { %v5007_v52 = vmul.f32 %v4942_v17, %v4911_v40  ;;  %v4937_v41 = vpop.permute.xlu0 %4936  ;;  %v5183_v17 = vld [vmem:[#allocation4 + $0x110] sm:$0xff] }
 0xb53   : > { %v5006_v56 = vmul.f32 %v4937_v41, %v4910_v38  ;;  %v5432_v41 = vsub.f32 2.0, %v5416_v39 }
 0xb54   : > { %5042 = vrot.lane.b32.xlu1 %v5007_v52, %s7490_s20  ;;  %v5446_v52 = vmul.f32 %v7346_v8, %v5430_v3 }
 0xb55   : > { %5040 = vrot.lane.b32.xlu0 %v5006_v56, %s7490_s20  ;;  %v4952_v6 = vpop.permute.xlu1 %4951  ;;  %v5418_v56 = vmul.f32 %v7352_v22, %v5386_v5 }
 0xb56   : > { %v5009_v28 = vmul.f32 %v4952_v6, %v4913_v20  ;;  %v4947_v61 = vpop.permute.xlu0 %4946  ;;  %v7356_v20 = vpop.eup %7355  ;;  %v5429_v6 = vsub.f32 2.0, %v5413_v37  ;;  %v5191_v37 = vld [vmem:[#allocation4 + $0x150] sm:$0xff] }
 0xb57   : > { %v5008_v29 = vmul.f32 %v4947_v61, %v4912_v36 }
 0xb58   : > { %5046 = vrot.lane.b32.xlu1 %v5009_v28, %s7490_s20  ;;  %v7358_v28 = vpop.eup %7357  ;;  %v5445_v33 = vmul.f32 %v7350_v46, %v5429_v6  ;;  %v5195_v6 = vld [vmem:[#allocation4 + $0x170] sm:$0xff] }
 0xb59   : > { %5044 = vrot.lane.b32.xlu0 %v5008_v29, %s7490_s20  ;;  %v4962_v26 = vpop.permute.xlu1 %4961  ;;  %v7360_v62 = vpop.eup %7359 }
 0xb5a   : > { %v5011_v9 = vmul.f32 %v4962_v26, %v4915_v4  ;;  %v4957_v63 = vpop.permute.xlu0 %4956  ;;  %v5448_v4 = vmul.f32 %v7348_v13, %v5432_v41  ;;  %v5420_v26 = vmul.f32 %v7356_v20, %v5388_v30  ;;  %v7362_v19 = vpop.eup %7361 }
 0xb5b   : > { %v5010_v48 = vmul.f32 %v4957_v63, %v4914_v60  ;;  %v5434_v60 = vsub.f32 2.0, %v5418_v56  ;;  %v5417_v63 = vmul.f32 %v7358_v28, %v5385_v35 }
 0xb5c   : > { %5050 = vrot.lane.b32.xlu1 %v5011_v9, %s7490_s20  ;;  %v5431_v9 = vsub.f32 2.0, %v5415_v10 }
 0xb5d   : > { %5048 = vrot.lane.b32.xlu0 %v5010_v48, %s7490_s20  ;;  %v4972_v49 = vpop.permute.xlu1 %4971 }
 0xb5e   : > { %v5013_v31 = vmul.f32 %v4972_v49, %v4917_v21  ;;  %v4967_v59 = vpop.permute.xlu0 %4966  ;;  %v5436_v49 = vsub.f32 2.0, %v5420_v26  ;;  %v5447_v5 = vmul.f32 %v7354_v25, %v5431_v9  ;;  %v5459_v9 = vld [vmem:[#allocation4 + $0x1a8] sm:$0xff] }
 0xb5f   : > { %v5012_v53 = vmul.f32 %v4967_v59, %v4916_v0  ;;  %v5450_v0 = vmul.f32 %v7352_v22, %v5434_v60  ;;  %v5419_v59 = vmul.f32 %v7360_v62, %v5387_v14 }
 0xb60   : > { %5054 = vrot.lane.b32.xlu1 %v5013_v31, %s7490_s20  ;;  %v5433_v31 = vsub.f32 2.0, %v5417_v63 }
 0xb61   : > { %5052 = vrot.lane.b32.xlu0 %v5012_v53, %s7490_s20  ;;  %v4982_v57 = vpop.permute.xlu1 %4981  ;;  %v5435_v30 = vsub.f32 2.0, %v5419_v59 }
 0xb62   : > { %v5015_v44 = vmul.f32 %v4982_v57, %v4919_v11  ;;  %v4977_v43 = vpop.permute.xlu0 %4976  ;;  %v5449_v57 = vmul.f32 %v7358_v28, %v5433_v31  ;;  %v5460_v31 = vld [vmem:[#allocation4 + $0x1b0] sm:$0xff] }
 0xb63   : > { %v5014_v51 = vmul.f32 %v4977_v43, %v4918_v12  ;;  %v5452_v12 = vmul.f32 %v7356_v20, %v5436_v49  ;;  %v5184_v43 = vld [vmem:[#allocation4 + $0x118] sm:$0xff]  ;;  %v5458_v49 = vld [vmem:[#allocation4 + $0x1a0] sm:$0xff] }
 0xb64   : > { %5058 = vrot.lane.b32.xlu1 %v5015_v44, %s7490_s20  ;;  %v5421_v44 = vmul.f32 %v7362_v19, %v5389_v18 }
 0xb65   : > { %5056 = vrot.lane.b32.xlu0 %v5014_v51, %s7490_s20  ;;  %v4992_v32 = vpop.permute.xlu1 %4991  ;;  %v5451_v51 = vmul.f32 %v7360_v62, %v5435_v30  ;;  %v5456_v62 = vld [vmem:[#allocation4 + $0x190] sm:$0xff] }
 0xb66   : > { %v5017_v45 = vmul.f32 %v4992_v32, %v4921_v24  ;;  %v4987_v27 = vpop.permute.xlu0 %4986  ;;  %v5437_v24 = vsub.f32 2.0, %v5421_v44  ;;  %v5186_v32 = vld [vmem:[#allocation4 + $0x128] sm:$0xff] }
 0xb67   : > { %v5016_v50 = vmul.f32 %v4987_v27, %v4920_v42 }
 0xb68   : > { %5062 = vrot.lane.b32.xlu1 %v5017_v45, %s7490_s20  ;;  %v5453_v27 = vmul.f32 %v7362_v19, %v5437_v24 }
 0xb69   : > { %5060 = vrot.lane.b32.xlu0 %v5016_v50, %s7490_s20  ;;  %v5002_v58 = vpop.permute.xlu1 %5001  ;;  %v5188_v50 = vld [vmem:[#allocation4 + $0x138] sm:$0xff] }
 0xb6a   : > { %v5019_v15 = vmul.f32 %v5002_v58, %v4923_v34  ;;  %v4997_v54 = vpop.permute.xlu0 %4996  ;;  %v5185_v34 = vld [vmem:[#allocation4 + $0x120] sm:$0xff]  ;;  %v5190_v58 = vld [vmem:[#allocation4 + $0x148] sm:$0xff] }
 0xb6b   : > { %v5018_v2 = vmul.f32 %v4997_v54, %v4922_v23 }
 0xb6c   : > { %5066 = vrot.lane.b32.xlu1 %v5019_v15, %s7490_s20  ;;  %v5187_v15 = vld [vmem:[#allocation4 + $0x130] sm:$0xff] }
 0xb6d   : > { %5064 = vrot.lane.b32.xlu0 %v5018_v2, %s7490_s20  ;;  %v5205_v1 = vpop.permute.xlu1 %5204 }
 0xb6e   : > { %v5278_v7 = vmul.f32 %v5205_v1, %v5182_v47  ;;  %v5200_v40 = vpop.permute.xlu0 %5199  ;;  %v5192_v47 = vld [vmem:[#allocation4 + $0x158] sm:$0xff]  ;;  %v5194_v1 = vld [vmem:[#allocation4 + $0x168] sm:$0xff] }
 0xb6f   : > { %v5277_v38 = vmul.f32 %v5200_v40, %v5181_v16  ;;  %v5189_v16 = vld [vmem:[#allocation4 + $0x140] sm:$0xff] }
 0xb70   : > { %5311 = vrot.lane.b32.xlu1 %v5278_v7, %s7491_s30 }
 0xb71   : > { %5309 = vrot.lane.b32.xlu0 %v5277_v38, %s7491_s30  ;;  %v5215_v36 = vpop.permute.xlu1 %5214  ;;  %v5196_v38 = vld [vmem:[#allocation4 + $0x178] sm:$0xff] }
 0xb72   : > { %v5210_v61 = vpop.permute.xlu0 %5209  ;;  %v5280_v42 = vmul.f32 %v5215_v36, %v5184_v43  ;;  %v5455_v36 = vld [vmem:[#allocation4 + $0x188] sm:$0xff] }
 0xb73   : > { %v5279_v29 = vmul.f32 %v5210_v61, %v5183_v17 }
 0xb74   : > { %5512 = vperm.xlu1 %7234, %v5446_v52   ;;  %v5193_v52 = vld [vmem:[#allocation4 + $0x160] sm:$0xff] }
 0xb75   : > { %5313 = vrot.lane.b32.xlu0 %v5279_v29, %s7491_s30  ;;  %v5225_v48 = vpop.permute.xlu1 %5224  ;;  %v5457_v29 = vld [vmem:[#allocation4 + $0x198] sm:$0xff] }
 0xb76   : > { %v5220_v21 = vpop.permute.xlu0 %5219  ;;  %v5282_v14 = vmul.f32 %v5225_v48, %v5186_v32 }
 0xb77   : > { %v5281_v13 = vmul.f32 %v5220_v21, %v5185_v34 }
 0xb78   : > { %5522 = vperm.xlu1 %7234, %v5448_v4   ;;  %v5454_v4 = vld [vmem:[#allocation4 + $0x180] sm:$0xff] }
 0xb79   : > { %5507 = vperm.xlu0 %7233, %v5445_v33   ;;  %v5235_v11 = vpop.permute.xlu1 %5234 }
 0xb7a   : > { %v5230_v53 = vpop.permute.xlu0 %5229  ;;  %v5284_v55 = vmul.f32 %v5235_v11, %v5188_v50 }
 0xb7b   : > { %v5283_v2 = vmul.f32 %v5230_v53, %v5187_v15  ;;  %v5461_v15 = vld [vmem:[#allocation4 + $0x1b8] sm:$0xff] }
 0xb7c   : > { %5532 = vperm.xlu1 %7234, %v5450_v0  }
 0xb7d   : > { %5517 = vperm.xlu0 %7233, %v5447_v5   ;;  %v5245_v8 = vpop.permute.xlu1 %5244 }
 0xb7e   : > { %v5240_v35 = vpop.permute.xlu0 %5239  ;;  %v5286_v54 = vmul.f32 %v5245_v8, %v5190_v58 }
 0xb7f   : > { %v5285_v22 = vmul.f32 %v5240_v35, %v5189_v16  ;;  %v5466_v16 = vld [vmem:[#allocation4 + $0x1e0] sm:$0xff] }
 0xb80   : > { %5542 = vperm.xlu1 %7234, %v5452_v12  }
 0xb81   : > { %5527 = vperm.xlu0 %7233, %v5449_v57   ;;  %v5255_v23 = vpop.permute.xlu1 %5254 }
 0xb82   : > { %v5250_v45 = vpop.permute.xlu0 %5249  ;;  %v5288_v39 = vmul.f32 %v5255_v23, %v5192_v47 }
 0xb83   : > { %v5287_v40 = vmul.f32 %v5250_v45, %v5191_v37 }
 0xb84   : > { %5315 = vrot.lane.b32.xlu1 %v5280_v42, %s7491_s30 }
 0xb85   : > { %5537 = vperm.xlu0 %7233, %v5451_v51   ;;  %v5265_v18 = vpop.permute.xlu1 %5264 }
 0xb86   : > { %v5260_v46 = vpop.permute.xlu0 %5259  ;;  %v5290_v7 = vmul.f32 %v5265_v18, %v5194_v1 }
 0xb87   : > { %v5289_v20 = vmul.f32 %v5260_v46, %v5193_v52  ;;  %v5464_v46 = vld [vmem:[#allocation4 + $0x1d0] sm:$0xff] }
 0xb88   : > { %5319 = vrot.lane.b32.xlu1 %v5282_v14, %s7491_s30 }
 0xb89   : > { %5547 = vperm.xlu0 %7233, %v5453_v27   ;;  %v5275_v25 = vpop.permute.xlu1 %5274 }
 0xb8a   : > { %v5270_v3 = vpop.permute.xlu0 %5269  ;;  %v5292_v41 = vmul.f32 %v5275_v25, %v5196_v38  ;;  %v5468_v25 = vld [vmem:[#allocation4 + $0x1f0] sm:$0xff] }
 0xb8b   : > { %v5291_v61 = vmul.f32 %v5270_v3, %v5195_v6  ;;  %v5463_v3 = vld [vmem:[#allocation4 + $0x1c8] sm:$0xff]  ;;  %v5469_v6 = vld [vmem:[#allocation4 + $0x1f8] sm:$0xff] }
 0xb8c   : > { %5323 = vrot.lane.b32.xlu1 %v5284_v55, %s7491_s30  ;;  %v5462_v55 = vld [vmem:[#allocation4 + $0x1c0] sm:$0xff] }
 0xb8d   : > { %5317 = vrot.lane.b32.xlu0 %v5281_v13, %s7491_s30  ;;  %v5473_v56 = vpop.permute.xlu1 %5472 }
 0xb8e   : > { %v5478_v17 = vpop.permute.xlu0 %5477  ;;  %v5550_v33 = vmul.f32 %v5473_v56, %v5454_v4 }
 0xb8f   : > { %v5551_v28 = vmul.f32 %v5478_v17, %v5455_v36 }
 0xb90   : > { %5327 = vrot.lane.b32.xlu1 %v5286_v54, %s7491_s30 }
 0xb91   : > { %5321 = vrot.lane.b32.xlu0 %v5283_v2, %s7491_s30  ;;  %v5483_v60 = vpop.permute.xlu1 %5482 }
 0xb92   : > { %v5488_v10 = vpop.permute.xlu0 %5487  ;;  %v5552_v0 = vmul.f32 %v5483_v60, %v5456_v62 }
 0xb93   : > { %v5553_v26 = vmul.f32 %v5488_v10, %v5457_v29 }
 0xb94   : > { %5331 = vrot.lane.b32.xlu1 %v5288_v39, %s7491_s30 }
 0xb95   : > { %5325 = vrot.lane.b32.xlu0 %v5285_v22, %s7491_s30  ;;  %v5493_v48 = vpop.permute.xlu1 %5492 }
 0xb96   : > { %v5498_v63 = vpop.permute.xlu0 %5497  ;;  %v5554_v5 = vmul.f32 %v5493_v48, %v5458_v49 }
 0xb97   : > { %v5555_v21 = vmul.f32 %v5498_v63, %v5459_v9 }
 0xb98   : > { %5335 = vrot.lane.b32.xlu1 %v5290_v7, %s7491_s30  ;;  %v5465_v7 = vld [vmem:[#allocation4 + $0x1d8] sm:$0xff] }
 0xb99   : > { %5329 = vrot.lane.b32.xlu0 %v5287_v40, %s7491_s30  ;;  %v5503_v59 = vpop.permute.xlu1 %5502 }
 0xb9a   : > { %v5556_v19 = vmul.f32 %v5503_v59, %v5460_v31 }
 0xb9c   : > { %5339 = vrot.lane.b32.xlu1 %v5292_v41, %s7491_s30  ;;  %v5467_v41 = vld [vmem:[#allocation4 + $0x1e8] sm:$0xff] }
 0xb9d   : > { %5333 = vrot.lane.b32.xlu0 %v5289_v20, %s7491_s30 }
 0xba0   : > { %5584 = vrot.lane.b32.xlu1 %v5551_v28, %s7492_s21 }
 0xba1   : > { %5337 = vrot.lane.b32.xlu0 %v5291_v61, %s7491_s30 }
 0xba4   : > { %5588 = vrot.lane.b32.xlu1 %v5553_v26, %s7492_s21 }
 0xba5   : > { %5582 = vrot.lane.b32.xlu0 %v5550_v33, %s7492_s21 }
 0xba8   : > { %5592 = vrot.lane.b32.xlu1 %v5555_v21, %s7492_s21 }
 0xba9   : > { %5586 = vrot.lane.b32.xlu0 %v5552_v0, %s7492_s21 }
 0xbad   : > { %5590 = vrot.lane.b32.xlu0 %v5554_v5, %s7492_s21 }
 0xbb1   : > { %5594 = vrot.lane.b32.xlu0 %v5556_v19, %s7492_s21 }
 0xbc2   : > { %v5039_v53 = vpop.permute.xlu1 %5038 }
 0xbc3   : > { %5086 = vst.msk [vmem:[%s7760_s1 + $0x8] sm:$0xff] %vm5084_vm4, %v5039_v53  ;;  %v5037_v11 = vpop.permute.xlu0 %5036 }
 0xbc4   : > { %5085 = vst.msk [vmem:[%s7760_s1] sm:$0xff] %vm5084_vm4, %v5037_v11 }
 0xbc6   : > { %v5043_v12 = vpop.permute.xlu1 %5042 }
 0xbc7   : > { %5088 = vst.msk [vmem:[%s7760_s1 + $0x18] sm:$0xff] %vm5084_vm4, %v5043_v12  ;;  %v5041_v57 = vpop.permute.xlu0 %5040 }
 0xbc8   : > { %5087 = vst.msk [vmem:[%s7760_s1 + $0x10] sm:$0xff] %vm5084_vm4, %v5041_v57 }
 0xbca   : > { %v5047_v30 = vpop.permute.xlu1 %5046 }
 0xbcb   : > { %5090 = vst.msk [vmem:[%s7760_s1 + $0x28] sm:$0xff] %vm5084_vm4, %v5047_v30  ;;  %v5045_v44 = vpop.permute.xlu0 %5044 }
 0xbcc   : > { %5089 = vst.msk [vmem:[%s7760_s1 + $0x20] sm:$0xff] %vm5084_vm4, %v5045_v44 }
 0xbce   : > { %v5051_v43 = vpop.permute.xlu1 %5050 }
 0xbcf   : > { %5092 = vst.msk [vmem:[%s7760_s1 + $0x38] sm:$0xff] %vm5084_vm4, %v5051_v43  ;;  %v5049_v35 = vpop.permute.xlu0 %5048 }
 0xbd0   : > { %5091 = vst.msk [vmem:[%s7760_s1 + $0x30] sm:$0xff] %vm5084_vm4, %v5049_v35 }
 0xbd2   : > { %v5055_v51 = vpop.permute.xlu1 %5054 }
 0xbd3   : > { %5094 = vst.msk [vmem:[%s7760_s1 + $0x48] sm:$0xff] %vm5084_vm4, %v5055_v51  ;;  %v5053_v24 = vpop.permute.xlu0 %5052 }
 0xbd4   : > { %5093 = vst.msk [vmem:[%s7760_s1 + $0x40] sm:$0xff] %vm5084_vm4, %v5053_v24 }
 0xbd6   : > { %v5059_v42 = vpop.permute.xlu1 %5058 }
 0xbd7   : > { %5096 = vst.msk [vmem:[%s7760_s1 + $0x58] sm:$0xff] %vm5084_vm4, %v5059_v42  ;;  %v5057_v8 = vpop.permute.xlu0 %5056 }
 0xbd8   : > { %5095 = vst.msk [vmem:[%s7760_s1 + $0x50] sm:$0xff] %vm5084_vm4, %v5057_v8 }
 0xbda   : > { %v5063_v32 = vpop.permute.xlu1 %5062 }
 0xbdb   : > { %5098 = vst.msk [vmem:[%s7760_s1 + $0x68] sm:$0xff] %vm5084_vm4, %v5063_v32  ;;  %v5061_v45 = vpop.permute.xlu0 %5060 }
 0xbdc   : > { %5097 = vst.msk [vmem:[%s7760_s1 + $0x60] sm:$0xff] %vm5084_vm4, %v5061_v45 }
 0xbde   : > { %v5067_v27 = vpop.permute.xlu1 %5066 }
 0xbdf   : > { %5100 = vst.msk [vmem:[%s7760_s1 + $0x78] sm:$0xff] %vm5084_vm4, %v5067_v27  ;;  %v5065_v14 = vpop.permute.xlu0 %5064 }
 0xbe0   : > { %5099 = vst.msk [vmem:[%s7760_s1 + $0x70] sm:$0xff] %vm5084_vm4, %v5065_v14 }
 0xbe2   : > { %v5312_v50 = vpop.permute.xlu1 %5311 }
 0xbe3   : > { %5359 = vst.msk [vmem:[%s7760_s1 + $0x8] sm:$0xff] %vm5357_vm5, %v5312_v50  ;;  %v5310_v34 = vpop.permute.xlu0 %5309 }
 0xbe4   : > { %5358 = vst.msk [vmem:[%s7760_s1] sm:$0xff] %vm5357_vm5, %v5310_v34 }
 0xbe7   : > { %v5314_v23 = vpop.permute.xlu0 %5313 }
 0xbe8   : > { %5360 = vst.msk [vmem:[%s7760_s1 + $0x10] sm:$0xff] %vm5357_vm5, %v5314_v23 }
 0xbef   : > { %v5513_v13 = vpop.permute.xlu1 %5512 }
 0xbf0   : > { %v5558_v58 = vmul.f32 %v5513_v13, %v5462_v55 }
 0xbf2   : > { %5598 = vrot.lane.b32.xlu0 %v5558_v58, %s7492_s21 }
 0xbf3   : > { %v5523_v54 = vpop.permute.xlu1 %5522 }
 0xbf4   : > { %v5560_v18 = vmul.f32 %v5523_v54, %v5464_v46  ;;  %v5508_v2 = vpop.permute.xlu0 %5507 }
 0xbf5   : > { %v5557_v47 = vmul.f32 %v5508_v2, %v5461_v15 }
 0xbf6   : > { %5602 = vrot.lane.b32.xlu0 %v5560_v18, %s7492_s21 }
 0xbf7   : > { %5596 = vrot.lane.b32.xlu1 %v5557_v47, %s7492_s21  ;;  %v5533_v39 = vpop.permute.xlu1 %5532 }
 0xbf8   : > { %v5562_v22 = vmul.f32 %v5533_v39, %v5466_v16  ;;  %v5518_v1 = vpop.permute.xlu0 %5517 }
 0xbf9   : > { %v5559_v37 = vmul.f32 %v5518_v1, %v5463_v3 }
 0xbfa   : > { %5606 = vrot.lane.b32.xlu0 %v5562_v22, %s7492_s21 }
 0xbfb   : > { %5600 = vrot.lane.b32.xlu1 %v5559_v37, %s7492_s21  ;;  %v5543_v40 = vpop.permute.xlu1 %5542 }
 0xbfc   : > { %v5564_v38 = vmul.f32 %v5543_v40, %v5468_v25  ;;  %v5528_v17 = vpop.permute.xlu0 %5527 }
 0xbfd   : > { %v5561_v52 = vmul.f32 %v5528_v17, %v5465_v7 }
 0xbfe   : > { %5610 = vrot.lane.b32.xlu0 %v5564_v38, %s7492_s21 }
 0xbff   : > { %5604 = vrot.lane.b32.xlu1 %v5561_v52, %s7492_s21  ;;  %v5316_v56 = vpop.permute.xlu1 %5315 }
 0xc00   : > { %5361 = vst.msk [vmem:[%s7760_s1 + $0x18] sm:$0xff] %vm5357_vm5, %v5316_v56  ;;  %v5538_v20 = vpop.permute.xlu0 %5537 }
 0xc01   : > { %v5563_v36 = vmul.f32 %v5538_v20, %v5467_v41 }
 0xc03   : > { %5608 = vrot.lane.b32.xlu1 %v5563_v36, %s7492_s21  ;;  %v5320_v10 = vpop.permute.xlu1 %5319 }
 0xc04   : > { %5363 = vst.msk [vmem:[%s7760_s1 + $0x28] sm:$0xff] %vm5357_vm5, %v5320_v10  ;;  %v5548_v28 = vpop.permute.xlu0 %5547 }
 0xc05   : > { %v5565_v61 = vmul.f32 %v5548_v28, %v5469_v6 }
 0xc07   : > { %5612 = vrot.lane.b32.xlu1 %v5565_v61, %s7492_s21  ;;  %v5324_v29 = vpop.permute.xlu1 %5323 }
 0xc08   : > { %5365 = vst.msk [vmem:[%s7760_s1 + $0x38] sm:$0xff] %vm5357_vm5, %v5324_v29  ;;  %v5318_v4 = vpop.permute.xlu0 %5317 }
 0xc09   : > { %5362 = vst.msk [vmem:[%s7760_s1 + $0x20] sm:$0xff] %vm5357_vm5, %v5318_v4 }
 0xc0b   : > { %v5328_v60 = vpop.permute.xlu1 %5327 }
 0xc0c   : > { %5367 = vst.msk [vmem:[%s7760_s1 + $0x48] sm:$0xff] %vm5357_vm5, %v5328_v60  ;;  %v5322_v26 = vpop.permute.xlu0 %5321 }
 0xc0d   : > { %5364 = vst.msk [vmem:[%s7760_s1 + $0x30] sm:$0xff] %vm5357_vm5, %v5322_v26 }
 0xc0f   : > { %v5332_v33 = vpop.permute.xlu1 %5331 }
 0xc10   : > { %5369 = vst.msk [vmem:[%s7760_s1 + $0x58] sm:$0xff] %vm5357_vm5, %v5332_v33  ;;  %v5326_v9 = vpop.permute.xlu0 %5325 }
 0xc11   : > { %5366 = vst.msk [vmem:[%s7760_s1 + $0x40] sm:$0xff] %vm5357_vm5, %v5326_v9 }
 0xc13   : > { %v5336_v63 = vpop.permute.xlu1 %5335 }
 0xc14   : > { %5371 = vst.msk [vmem:[%s7760_s1 + $0x68] sm:$0xff] %vm5357_vm5, %v5336_v63  ;;  %v5330_v62 = vpop.permute.xlu0 %5329 }
 0xc15   : > { %5368 = vst.msk [vmem:[%s7760_s1 + $0x50] sm:$0xff] %vm5357_vm5, %v5330_v62 }
 0xc17   : > { %v5340_v48 = vpop.permute.xlu1 %5339 }
 0xc18   : > { %5373 = vst.msk [vmem:[%s7760_s1 + $0x78] sm:$0xff] %vm5357_vm5, %v5340_v48  ;;  %v5334_v21 = vpop.permute.xlu0 %5333 }
 0xc19   : > { %5370 = vst.msk [vmem:[%s7760_s1 + $0x60] sm:$0xff] %vm5357_vm5, %v5334_v21 }
 0xc1b   : > { %v5585_v0 = vpop.permute.xlu1 %5584 }
 0xc1c   : > { %5632 = vst.msk [vmem:[%s7760_s1 + $0x8] sm:$0xff] %vm5630_vm6, %v5585_v0  ;;  %v5338_v49 = vpop.permute.xlu0 %5337 }
 0xc1d   : > { %5372 = vst.msk [vmem:[%s7760_s1 + $0x70] sm:$0xff] %vm5357_vm5, %v5338_v49 }
 0xc1f   : > { %v5589_v5 = vpop.permute.xlu1 %5588 }
 0xc20   : > { %5634 = vst.msk [vmem:[%s7760_s1 + $0x18] sm:$0xff] %vm5630_vm6, %v5589_v5  ;;  %v5583_v31 = vpop.permute.xlu0 %5582 }
 0xc21   : > { %5631 = vst.msk [vmem:[%s7760_s1] sm:$0xff] %vm5630_vm6, %v5583_v31 }
 0xc23   : > { %v5593_v59 = vpop.permute.xlu1 %5592 }
 0xc24   : > { %5636 = vst.msk [vmem:[%s7760_s1 + $0x28] sm:$0xff] %vm5630_vm6, %v5593_v59  ;;  %v5587_v19 = vpop.permute.xlu0 %5586 }
 0xc25   : > { %5633 = vst.msk [vmem:[%s7760_s1 + $0x10] sm:$0xff] %vm5630_vm6, %v5587_v19 }
 0xc28   : > { %v5591_v53 = vpop.permute.xlu0 %5590 }
 0xc29   : > { %5635 = vst.msk [vmem:[%s7760_s1 + $0x20] sm:$0xff] %vm5630_vm6, %v5591_v53 }
 0xc2c   : > { %v5595_v11 = vpop.permute.xlu0 %5594 }
 0xc2d   : > { %5637 = vst.msk [vmem:[%s7760_s1 + $0x30] sm:$0xff] %vm5630_vm6, %v5595_v11 }
 0xc64   : > { %v5599_v12 = vpop.permute.xlu0 %5598 }
 0xc65   : > { %5639 = vst.msk [vmem:[%s7760_s1 + $0x40] sm:$0xff] %vm5630_vm6, %v5599_v12 }
 0xc68   : > { %v5603_v57 = vpop.permute.xlu0 %5602 }
 0xc69   : > { %v5597_v30 = vpop.permute.xlu1 %5596  ;;  %5641 = vst.msk [vmem:[%s7760_s1 + $0x50] sm:$0xff] %vm5630_vm6, %v5603_v57 }
 0xc6a   : > { %5638 = vst.msk [vmem:[%s7760_s1 + $0x38] sm:$0xff] %vm5630_vm6, %v5597_v30 }
 0xc6c   : > { %v5607_v44 = vpop.permute.xlu0 %5606 }
 0xc6d   : > { %v5601_v43 = vpop.permute.xlu1 %5600  ;;  %5643 = vst.msk [vmem:[%s7760_s1 + $0x60] sm:$0xff] %vm5630_vm6, %v5607_v44 }
 0xc6e   : > { %5640 = vst.msk [vmem:[%s7760_s1 + $0x48] sm:$0xff] %vm5630_vm6, %v5601_v43 }
 0xc70   : > { %v5611_v35 = vpop.permute.xlu0 %5610 }
 0xc71   : > { %v5605_v51 = vpop.permute.xlu1 %5604  ;;  %5645 = vst.msk [vmem:[%s7760_s1 + $0x70] sm:$0xff] %vm5630_vm6, %v5611_v35 }
 0xc72   : > { %5642 = vst.msk [vmem:[%s7760_s1 + $0x58] sm:$0xff] %vm5630_vm6, %v5605_v51 }
 0xc75   : > { %v5609_v24 = vpop.permute.xlu1 %5608 }
 0xc76   : > { %5644 = vst.msk [vmem:[%s7760_s1 + $0x68] sm:$0xff] %vm5630_vm6, %v5609_v24 }
 0xc79   : > { %v5613_v42 = vpop.permute.xlu1 %5612 }
 0xc7a   : > { %5646 = vst.msk [vmem:[%s7760_s1 + $0x78] sm:$0xff] %vm5630_vm6, %v5613_v42 }
 0xc7b PF: > { %5653 = sbr.rel (!%p7663_p2) target bundleno = 3215 (0xc8f), region = 158  ;;  %s11512_s27 = sld [smem:[#allocation11_spill]] (%p7663_p2)  ;;  %v5719_v8 = vld [vmem:[%s7760_s1] sm:$0xff] (%p7663_p2)  ;;  %v5721_v32 = vld [vmem:[%s7760_s1 + $0x8] sm:$0xff] (%p7663_p2)  ;;  %v5723_v45 = vld [vmem:[%s7760_s1 + $0x10] sm:$0xff] (%p7663_p2) }
 0xc7c   : > { %s11513_s29 = sld [smem:[#allocation13_spill]] (%p7663_p2)  ;;  %v5725_v27 = vld [vmem:[%s7760_s1 + $0x18] sm:$0xff] (%p7663_p2)  ;;  %v5727_v14 = vld [vmem:[%s7760_s1 + $0x20] sm:$0xff] (%p7663_p2)  ;;  %v5729_v50 = vld [vmem:[%s7760_s1 + $0x28] sm:$0xff] (%p7663_p2) }
 0xc7d   : > { %s11514_s28 = sld [smem:[#allocation12_spill]] (%p7663_p2)  ;;  %v5731_v34 = vld [vmem:[%s7760_s1 + $0x30] sm:$0xff] (%p7663_p2)  ;;  %v5733_v23 = vld [vmem:[%s7760_s1 + $0x38] sm:$0xff] (%p7663_p2)  ;;  %v5735_v55 = vld [vmem:[%s7760_s1 + $0x40] sm:$0xff] (%p7663_p2) }
 0xc7e   : > { %v5737_v13 = vld [vmem:[%s7760_s1 + $0x48] sm:$0xff] (%p7663_p2)  ;;  %v5739_v58 = vld [vmem:[%s7760_s1 + $0x50] sm:$0xff] (%p7663_p2)  ;;  %v5741_v46 = vld [vmem:[%s7760_s1 + $0x58] sm:$0xff] (%p7663_p2)  ;;  %s11515_s2 = sld [smem:[#allocation95_spill]] (%p7663_p2) }
 0xc7f   : > { %v5743_v15 = vld [vmem:[%s7760_s1 + $0x60] sm:$0xff] (%p7663_p2)  ;;  %v5745_v54 = vld [vmem:[%s7760_s1 + $0x68] sm:$0xff] (%p7663_p2)  ;;  %v5747_v18 = vld [vmem:[%s7760_s1 + $0x70] sm:$0xff] (%p7663_p2) }
 0xc81   : > { %s6074_s4 = sshll.u32 %s11512_s27, 5  ;;  %v5749_v2 = vld [vmem:[%s7760_s1 + $0x78] sm:$0xff] }
 0xc82   : > { %s6070_s7 = sshll.u32 %s11513_s29, 6 }
 0xc83   : > { %s5656_s18 = sadd.s32 %s11514_s28, %s6074_s4 }
 0xc84   : > { %s5658_s9 = sadd.s32 %s6070_s7, %s5656_s18 }
 0xc85   : > { %s6071_s10 = sshll.u32 %s5658_s9, 3 }
 0xc86   : > { %s5660_s12 = scalar_lea.vmem %s11515_s2, %s6071_s10 }
 0xc87   : > { %5720 = vst [vmem:[%s5660_s12] sm:$0xff] %v5719_v8  ;;  %5722 = vst [vmem:[%s5660_s12 + $0x10] sm:$0xff] %v5721_v32 }
 0xc88   : > { %5724 = vst [vmem:[%s5660_s12 + $0x20] sm:$0xff] %v5723_v45  ;;  %5726 = vst [vmem:[%s5660_s12 + $0x30] sm:$0xff] %v5725_v27 }
 0xc89   : > { %5728 = vst [vmem:[%s5660_s12 + $0x40] sm:$0xff] %v5727_v14  ;;  %5730 = vst [vmem:[%s5660_s12 + $0x50] sm:$0xff] %v5729_v50 }
 0xc8a   : > { %5732 = vst [vmem:[%s5660_s12 + $0x60] sm:$0xff] %v5731_v34  ;;  %5734 = vst [vmem:[%s5660_s12 + $0x70] sm:$0xff] %v5733_v23 }
 0xc8b   : > { %5736 = vst [vmem:[%s5660_s12 + $0x80] sm:$0xff] %v5735_v55  ;;  %5738 = vst [vmem:[%s5660_s12 + $0x90] sm:$0xff] %v5737_v13 }
 0xc8c   : > { %5740 = vst [vmem:[%s5660_s12 + $0xa0] sm:$0xff] %v5739_v58  ;;  %5742 = vst [vmem:[%s5660_s12 + $0xb0] sm:$0xff] %v5741_v46 }
 0xc8d   : > { %5744 = vst [vmem:[%s5660_s12 + $0xc0] sm:$0xff] %v5743_v15  ;;  %5746 = vst [vmem:[%s5660_s12 + $0xd0] sm:$0xff] %v5745_v54 }
 0xc8e   : > { %5748 = vst [vmem:[%s5660_s12 + $0xe0] sm:$0xff] %v5747_v18  ;;  %5750 = vst [vmem:[%s5660_s12 + $0xf0] sm:$0xff] %v5749_v2 }
 0xc8f PF: > { %s13_s26 = sadd.s32 1, %s7481_s26   ;;  %s11517_s1 = sld [smem:[#allocation14_spill]] }
 0xc90   : > { %p10973_p8 = scmp.ge.s32.totalorder %s13_s26, 18   ;;  %s11518_s30 = sld [smem:[#allocation15_spill]] }
 0xc91   : > { %s11519_s27 = sld [smem:[#allocation16_spill]]  ;;  %s11522_s12 = smov %s7429_s13 }
 0xc92   : > { %s11520_s29 = sld [smem:[#allocation17_spill]]  ;;  %s11523_s13 = smov %s7658_s8 }
 0xc93   : > { %s11524_s14 = smov %s7437_s15  ;;  %s11525_s15 = smov %s7653_s11 }
 0xc94   : > { %s11526_s16 = smov %s7445_s17  ;;  %s11527_s17 = smov %s7650_s3 }
 0xc95   : > { %s11528_s18 = smov %s7465_s22  ;;  %s11529_s19 = smov %s7469_s23 }
 0xc96   : > { %s11530_s20 = smov %s7473_s24  ;;  %s11531_s21 = smov %s7477_s25 }
 0xc97   : > { %s11532_s22 = smov %s11517_s1  ;;  %s11533_s23 = smov %s11518_s30 }
 0xc98   : > { %s11534_s24 = smov %s11519_s27  ;;  %s11535_s25 = smov %s11520_s29 }
 0xc99   :  { %12 = sbr.rel (!%p10973_p8) target bundleno = 12 (0xc), region = 252 }

</bundles_post_ra>
